<compile_context>
chip_gen: v7x
topology: tpu7x:2x2x1
jax: 0.10.0
libtpu: 0.0.40
codegen_flags: <defaults>
</compile_context>

<pallas_src>
import functools

import jax
import jax.numpy as jnp
from jax import lax
from jax.experimental import pallas as pl
from jax.experimental.pallas import tpu as pltpu


# ---------------------------- tiling helper ----------------------------

def _pick_h_tile(H, W, C, budget_bytes=20 << 20):
    """H-tile rows per grid step; must divide H.

    Rough VMEM per H row (f32): double-buffered x block (2*W*C*4) + double-buffered
    output block (2*2*W*C*4) + ~10 tile-sized temporaries (~36*W*C) ~= 64*W*C bytes.
    """
    per_row = 64 * W * C
    th = max(1, min(H, budget_bytes // max(per_row, 1)))
    while H % th:          # keep the grid exact so halo clamping stays per-image
        th -= 1
    return th


_COMPILER_PARAMS = pltpu.CompilerParams(
    dimension_semantics=("parallel", "parallel"),   # (batch, H-tile): both independent
    vmem_limit_bytes=48 * 1024 * 1024,              # safe under v7x's 64 MiB physical VMEM
)


# ---------------------------- fused kernel ----------------------------

def _upsample_fused_kernel(xc_ref, xu_ref, xd_ref, wp1_ref, w1_ref, wb1_ref,
                           bb1_ref, w2_ref, alpha_ref, out_ref):
    # xc_ref : (1, th, W, C)   x rows of this tile
    # xu_ref : (1, 1,  W, C)   x row just above the tile (edge clamped)
    # xd_ref : (1, 1,  W, C)   x row just below the tile (edge clamped)
    # out_ref: (1, th, 2, 2*W*Ch)  ==  row-major (1, 2*th, 2*W, Ch)
    _, th, W, C = xc_ref.shape
    ch = w2_ref.shape[1]

    a_p = alpha_ref[0]                      # PReLU slopes live in SMEM
    a_b = alpha_ref[1]
    wb1 = wb1_ref[...]
    bb1 = bb1_ref[...]
    w2 = w2_ref[...]

    def b_head(x2d):                        # conv(C->C,bias) -> PReLU -> folded W2
        h = jnp.dot(x2d, wb1, preferred_element_type=jnp.float32) + bb1
        h = jnp.where(h > 0.0, h, a_b * h)
        return jnp.dot(h, w2, preferred_element_type=jnp.float32)

    x_c = xc_ref[0].reshape(th * W, C)
    yb = b_head(x_c).reshape(th, W, ch)     # b-branch activations for the tile
    yb_u = b_head(xu_ref[0, 0])             # (W, ch) halo row above (clamped)
    yb_d = b_head(xd_ref[0, 0])             # (W, ch) halo row below (clamped)

    # p branch head: PReLU(x @ w_p1_perm); sub-pixel slab s (= 2*i + j) is columns
    # [s*ch, (s+1)*ch), then one small (N,ch)x(ch,ch) dot per slab (no zero padding).
    hp = jnp.dot(x_c, wp1_ref[...], preferred_element_type=jnp.float32)
    hp = jnp.where(hp > 0.0, hp, a_p * hp)
    w1 = w1_ref[...]
    yp = [jnp.dot(hp[:, s * ch:(s + 1) * ch], w1,
                  preferred_element_type=jnp.float32).reshape(th, W, ch)
          for s in range(4)]

    # vertically clamped +-1 rows (halo rows supply the cross-tile / image-edge clamp)
    if th > 1:
        r_up = jnp.concatenate([yb_u[None], yb[:-1]], axis=0)
        r_dn = jnp.concatenate([yb[1:], yb_d[None]], axis=0)
    else:
        r_up, r_dn = yb_u[None], yb_d[None]

    # horizontally clamped +-1 columns
    # TODO(synk): pltpu.roll along W (+ edge fix-up) would shave a few VMEM temporaries.
    def sh_l(t):   # value at column w-1, edge clamped
        return jnp.concatenate([t[:, :1], t[:, :-1]], axis=1)

    def sh_r(t):   # value at column w+1, edge clamped
        return jnp.concatenate([t[:, 1:], t[:, -1:]], axis=1)

    c_lr = (sh_l(yb), sh_r(yb))

    for i, r_i in enumerate((r_up, r_dn)):          # output rows 2h + i
        base = 0.5625 * yb + 0.1875 * r_i           # bilinear x2, align_corners=False
        vals = []
        for j, sh in enumerate((sh_l, sh_r)):       # output cols 2w + j
            v = base + 0.1875 * c_lr[j] + 0.0625 * sh(r_i) + yp[2 * i + j]
            vals.append(v)
        # interleave to (w, j, c) order and flatten -> lane-dense row of width 2*W*ch
        row = jnp.concatenate(vals, axis=-1).reshape(th, 2 * W * ch)
        out_ref[0, :, i, :] = row.astype(out_ref.dtype)


# ---------------------------- weight folding (host/XLA side, tiny) ----------------------------

def fold_weights(params, C):
    ch = C // 2
    hi = lax.Precision.HIGHEST
    w1 = jnp.matmul(params["w_p2"], params["w_out"][:ch], precision=hi)   # (ch, ch)
    w2 = jnp.matmul(params["w_b2"], params["w_out"][ch:], precision=hi)   # (C, ch)
    # PixelShuffle channel order: shuffled channel c at sub-pixel (i, j) reads p-branch
    # channel 4*c + 2*i + j, so slab s = 2*i + j gathers every 4th column starting at s.
    wp1_perm = jnp.concatenate([params["w_p1"][:, s::4] for s in range(4)], axis=1)
    alphas = jnp.stack([params["a_p"].reshape(()), params["a_b"].reshape(())])
    return wp1_perm, w1, w2, alphas


# ---------------------------- module forward ----------------------------

def upsample_forward(params, x, H, W):
    """UpSample.forward for scale_factor == 2.  x: (B, L=H*W, C) -> (B, 4L, C//2)."""
    B, L, C = x.shape
    assert L == H * W and C % 2 == 0
    ch = C // 2
    wp1_perm, w1, w2, alphas = fold_weights(params, C)

    x_img = x.reshape(B, H, W, C)
    th = _pick_h_tile(H, W, C)
    grid = (B, H // th)

    N = B * H * W
    flops = N * (4 * C * C + 2 * C * C + 2 * C * ch + 8 * ch * ch + 40 * ch)
    bytes_accessed = 4 * (N * C + 2 * B * (H // th) * W * C + 2 * N * C
                          + 2 * C * C + C * C + C * ch + ch * ch + C)

    out = pl.pallas_call(
        _upsample_fused_kernel,
        out_shape=jax.ShapeDtypeStruct((B, H, 2, 2 * W * ch), x.dtype),
        grid=grid,
        in_specs=[
            # x tile + 1-row halo above/below (block size 1 along H => index == row)
            pl.BlockSpec((1, th, W, C), lambda b, t: (b, t, 0, 0)),
            pl.BlockSpec((1, 1, W, C),
                         lambda b, t: (b, jnp.maximum(t * th - 1, 0), 0, 0)),
            pl.BlockSpec((1, 1, W, C),
                         lambda b, t: (b, jnp.minimum((t + 1) * th, H - 1), 0, 0)),
            # small weights, resident in VMEM
            pl.BlockSpec((C, 2 * C), lambda b, t: (0, 0)),
            pl.BlockSpec((ch, ch), lambda b, t: (0, 0)),
            pl.BlockSpec((C, C), lambda b, t: (0, 0)),
            pl.BlockSpec((1, C), lambda b, t: (0, 0)),
            pl.BlockSpec((C, ch), lambda b, t: (0, 0)),
            # PReLU slopes as scalars in SMEM
            pl.BlockSpec(memory_space=pltpu.MemorySpace.SMEM),
        ],
        out_specs=pl.BlockSpec((1, th, 2, 2 * W * ch), lambda b, t: (b, t, 0, 0)),
        compiler_params=_COMPILER_PARAMS,
        cost_estimate=pl.CostEstimate(flops=flops, transcendentals=0,
                                      bytes_accessed=bytes_accessed),
    )(x_img, x_img, x_img, wp1_perm, w1, params["w_b1"], params["b_b1"], w2, alphas)

    # (B, H, 2, 2*W*ch) is already the row-major (B, 2H, 2W, ch) layout.
    return out.reshape(B, 4 * L, ch)


# ---------------------------- params + pure-JAX reference ----------------------------

def init_params(key, c):
    # conv weights stored as (Cin, Cout) == torch W[:, :, 0, 0].T
    ks = jax.random.split(key, 6)
    s = 0.1
    return dict(
        w_p1=jax.random.normal(ks[0], (c, 2 * c), jnp.float32) * s,        # Conv2d(C, 2C, 1, bias=False)
        a_p=jnp.full((), 0.25, jnp.float32),                               # nn.PReLU() default
        w_p2=jax.random.normal(ks[1], (c // 2, c // 2), jnp.float32) * s,  # Conv2d(C/2, C/2, 1, bias=False)
        w_b1=jax.random.normal(ks[2], (c, c), jnp.float32) * s,            # Conv2d(C, C, 1) (has bias)
        b_b1=jax.random.normal(ks[3], (1, c), jnp.float32) * s,
        a_b=jnp.full((), 0.25, jnp.float32),                               # nn.PReLU() default
        w_b2=jax.random.normal(ks[4], (c, c // 2), jnp.float32) * s,       # Conv2d(C, C/2, 1, bias=False)
        w_out=jax.random.normal(ks[5], (c, c // 2), jnp.float32) * s,      # Conv2d(C, C/2, 1, bias=False)
    )


def _bilinear_up2_ref(x):
    def up_axis(t, axis):
        n = t.shape[axis]
        first = lax.slice_in_dim(t, 0, 1, axis=axis)
        last = lax.slice_in_dim(t, n - 1, n, axis=axis)
        tm = jnp.concatenate([first, lax.slice_in_dim(t, 0, n - 1, axis=axis)], axis=axis)
        tp = jnp.concatenate([lax.slice_in_dim(t, 1, n, axis=axis), last], axis=axis)
        even = 0.75 * t + 0.25 * tm
        odd = 0.75 * t + 0.25 * tp
        st = jnp.stack([even, odd], axis=axis + 1)
        shape = list(t.shape)
        shape[axis] = 2 * n
        return st.reshape(shape)
    return up_axis(up_axis(x, 1), 2)


def upsample_reference(params, x, H, W):
    """Unfused pure-JAX mirror of the PyTorch module (factor == 2), NHWC."""
    B, L, C = x.shape
    ch = C // 2
    mm = functools.partial(jnp.matmul, precision=lax.Precision.HIGHEST)
    prelu = lambda t, a: jnp.where(t > 0, t, a * t)
    xi = x.reshape(B, H, W, C)
    # up_p
    p = prelu(mm(xi, params["w_p1"]), params["a_p"])
    p = p.reshape(B, H, W, ch, 2, 2).transpose(0, 1, 4, 2, 5, 3).reshape(B, 2 * H, 2 * W, ch)
    p = mm(p, params["w_p2"])
    # up_b
    b = prelu(mm(xi, params["w_b1"]) + params["b_b1"], params["a_b"])
    b = mm(_bilinear_up2_ref(b), params["w_b2"])
    out = mm(jnp.concatenate([p, b], axis=-1), params["w_out"])
    return out.reshape(B, 4 * L, ch)


# ---------------------------- demo ----------------------------

if __name__ == "__main__":
    B, C, H, W = 2, 4, 16, 16     # in_channels=4, input_resolution=16, scale_factor=2
    L = H * W
    key = jax.random.PRNGKey(0)
    kx, kp = jax.random.split(key)
    x = jax.random.normal(kx, (B, L, C), jnp.float32)
    params = init_params(kp, C)

    fwd = jax.jit(functools.partial(upsample_forward, H=H, W=W))
    out = fwd(params, x)
    jax.block_until_ready(out)
    assert out.shape == (B, 4 * L, C // 2), out.shape
    assert bool(jnp.all(jnp.isfinite(out)))

    ref = jax.jit(functools.partial(upsample_reference, H=H, W=W))(params, x)
    denom = jnp.maximum(jnp.max(jnp.abs(ref)), 1e-6)
    rel_err = float(jnp.max(jnp.abs(out - ref)) / denom)
    assert rel_err < 3e-5, f"mismatch vs reference, rel_err={rel_err}"

    print("KERNEL_OK")
</pallas_src>

<mosaic_0001>
module attributes {stable_mosaic.version = 11 : i64} {
  func.func @_upsample_fused_kernel(%arg0: i32, %arg1: i32, %arg2: memref<1x16x16x4xf32, #tpu.memory_space<vmem>>, %arg3: memref<1x1x16x4xf32, #tpu.memory_space<vmem>>, %arg4: memref<1x1x16x4xf32, #tpu.memory_space<vmem>>, %arg5: memref<4x8xf32, #tpu.memory_space<vmem>>, %arg6: memref<2x2xf32, #tpu.memory_space<vmem>>, %arg7: memref<4x4xf32, #tpu.memory_space<vmem>>, %arg8: memref<1x4xf32, #tpu.memory_space<vmem>>, %arg9: memref<4x2xf32, #tpu.memory_space<vmem>>, %arg10: memref<2xf32, #tpu.memory_space<smem>>, %arg11: memref<1x16x2x64xf32, #tpu.memory_space<vmem>>) attributes {dimension_semantics = [#tpu.dimension_semantics<parallel>, #tpu.dimension_semantics<parallel>], iteration_bounds = array<i64: 2, 1>, scalar_prefetch = 0 : i64, scratch_operands = 0 : i64, tpu.core_type = #tpu.core_type<tc>, window_params = [{transform_indices = @transform_0, window_bounds = array<i64: 1, 16, 16, 4>}, {transform_indices = @transform_1, window_bounds = array<i64: 1, 1, 16, 4>}, {transform_indices = @transform_2, window_bounds = array<i64: 1, 1, 16, 4>}, {pipeline_mode = #tpu.pipeline_mode<synchronous>, transform_indices = @transform_3, window_bounds = array<i64: 4, 8>}, {pipeline_mode = #tpu.pipeline_mode<synchronous>, transform_indices = @transform_4, window_bounds = array<i64: 2, 2>}, {pipeline_mode = #tpu.pipeline_mode<synchronous>, transform_indices = @transform_5, window_bounds = array<i64: 4, 4>}, {pipeline_mode = #tpu.pipeline_mode<synchronous>, transform_indices = @transform_6, window_bounds = array<i64: 1, 4>}, {pipeline_mode = #tpu.pipeline_mode<synchronous>, transform_indices = @transform_7, window_bounds = array<i64: 4, 2>}, {transform_indices = @transform_8, window_bounds = array<i64: 2>}, {transform_indices = @transform_9, window_bounds = array<i64: 1, 16, 2, 64>}]} {
    %c0 = arith.constant 0 : index
    %0 = memref.load %arg10[%c0] : memref<2xf32, #tpu.memory_space<smem>>
    %c1 = arith.constant 1 : index
    %1 = memref.load %arg10[%c1] : memref<2xf32, #tpu.memory_space<smem>>
    %c0_0 = arith.constant 0 : index
    %c0_1 = arith.constant 0 : index
    %2 = vector.load %arg7[%c0_0, %c0_1] : memref<4x4xf32, #tpu.memory_space<vmem>>, vector<4x4xf32>
    %c0_2 = arith.constant 0 : index
    %c0_3 = arith.constant 0 : index
    %3 = vector.load %arg8[%c0_2, %c0_3] : memref<1x4xf32, #tpu.memory_space<vmem>>, vector<1x4xf32>
    %c0_4 = arith.constant 0 : index
    %c0_5 = arith.constant 0 : index
    %4 = vector.load %arg9[%c0_4, %c0_5] : memref<4x2xf32, #tpu.memory_space<vmem>>, vector<4x2xf32>
    %c0_6 = arith.constant 0 : index
    %c0_7 = arith.constant 0 : index
    %c0_8 = arith.constant 0 : index
    %c0_9 = arith.constant 0 : index
    %5 = vector.load %arg2[%c0_6, %c0_7, %c0_8, %c0_9] : memref<1x16x16x4xf32, #tpu.memory_space<vmem>>, vector<1x16x16x4xf32>
    %6 = vector.shape_cast %5 : vector<1x16x16x4xf32> to vector<16x16x4xf32>
    %7 = vector.shape_cast %6 : vector<16x16x4xf32> to vector<256x4xf32>
    %cst = arith.constant dense<0.000000e+00> : vector<256x4xf32>
    %8 = tpu.matmul %7, %2, %cst {dimension_numbers = #tpu.dot_dimension_numbers<[1], [0], [0], [1], [0, 0, 1, 1], [], []>} : vector<256x4xf32>, vector<4x4xf32>, vector<256x4xf32> -> vector<256x4xf32>
    %9 = vector.broadcast %3 : vector<1x4xf32> to vector<256x4xf32>
    %10 = arith.addf %8, %9 : vector<256x4xf32>
    %cst_10 = arith.constant 0.000000e+00 : f32
    %11 = vector.broadcast %cst_10 : f32 to vector<256x4xf32>
    %12 = arith.cmpf ogt, %10, %11 : vector<256x4xf32>
    %13 = vector.broadcast %1 : f32 to vector<256x4xf32>
    %14 = arith.mulf %13, %10 : vector<256x4xf32>
    %15 = arith.select %12, %10, %14 : vector<256x4xi1>, vector<256x4xf32>
    %cst_11 = arith.constant dense<0.000000e+00> : vector<256x2xf32>
    %16 = tpu.matmul %15, %4, %cst_11 {dimension_numbers = #tpu.dot_dimension_numbers<[1], [0], [0], [1], [0, 0, 1, 1], [], []>} : vector<256x4xf32>, vector<4x2xf32>, vector<256x2xf32> -> vector<256x2xf32>
    %17 = vector.shape_cast %16 : vector<256x2xf32> to vector<16x16x2xf32>
    %c0_12 = arith.constant 0 : index
    %c0_13 = arith.constant 0 : index
    %c0_14 = arith.constant 0 : index
    %c0_15 = arith.constant 0 : index
    %18 = vector.load %arg3[%c0_12, %c0_13, %c0_14, %c0_15] : memref<1x1x16x4xf32, #tpu.memory_space<vmem>>, vector<1x1x16x4xf32>
    %19 = vector.shape_cast %18 : vector<1x1x16x4xf32> to vector<16x4xf32>
    %cst_16 = arith.constant dense<0.000000e+00> : vector<16x4xf32>
    %20 = tpu.matmul %19, %2, %cst_16 {dimension_numbers = #tpu.dot_dimension_numbers<[1], [0], [0], [1], [0, 0, 1, 1], [], []>} : vector<16x4xf32>, vector<4x4xf32>, vector<16x4xf32> -> vector<16x4xf32>
    %21 = vector.broadcast %3 : vector<1x4xf32> to vector<16x4xf32>
    %22 = arith.addf %20, %21 : vector<16x4xf32>
    %cst_17 = arith.constant 0.000000e+00 : f32
    %23 = vector.broadcast %cst_17 : f32 to vector<16x4xf32>
    %24 = arith.cmpf ogt, %22, %23 : vector<16x4xf32>
    %25 = vector.broadcast %1 : f32 to vector<16x4xf32>
    %26 = arith.mulf %25, %22 : vector<16x4xf32>
    %27 = arith.select %24, %22, %26 : vector<16x4xi1>, vector<16x4xf32>
    %cst_18 = arith.constant dense<0.000000e+00> : vector<16x2xf32>
    %28 = tpu.matmul %27, %4, %cst_18 {dimension_numbers = #tpu.dot_dimension_numbers<[1], [0], [0], [1], [0, 0, 1, 1], [], []>} : vector<16x4xf32>, vector<4x2xf32>, vector<16x2xf32> -> vector<16x2xf32>
    %c0_19 = arith.constant 0 : index
    %c0_20 = arith.constant 0 : index
    %c0_21 = arith.constant 0 : index
    %c0_22 = arith.constant 0 : index
    %29 = vector.load %arg4[%c0_19, %c0_20, %c0_21, %c0_22] : memref<1x1x16x4xf32, #tpu.memory_space<vmem>>, vector<1x1x16x4xf32>
    %30 = vector.shape_cast %29 : vector<1x1x16x4xf32> to vector<16x4xf32>
    %cst_23 = arith.constant dense<0.000000e+00> : vector<16x4xf32>
    %31 = tpu.matmul %30, %2, %cst_23 {dimension_numbers = #tpu.dot_dimension_numbers<[1], [0], [0], [1], [0, 0, 1, 1], [], []>} : vector<16x4xf32>, vector<4x4xf32>, vector<16x4xf32> -> vector<16x4xf32>
    %32 = vector.broadcast %3 : vector<1x4xf32> to vector<16x4xf32>
    %33 = arith.addf %31, %32 : vector<16x4xf32>
    %cst_24 = arith.constant 0.000000e+00 : f32
    %34 = vector.broadcast %cst_24 : f32 to vector<16x4xf32>
    %35 = arith.cmpf ogt, %33, %34 : vector<16x4xf32>
    %36 = vector.broadcast %1 : f32 to vector<16x4xf32>
    %37 = arith.mulf %36, %33 : vector<16x4xf32>
    %38 = arith.select %35, %33, %37 : vector<16x4xi1>, vector<16x4xf32>
    %cst_25 = arith.constant dense<0.000000e+00> : vector<16x2xf32>
    %39 = tpu.matmul %38, %4, %cst_25 {dimension_numbers = #tpu.dot_dimension_numbers<[1], [0], [0], [1], [0, 0, 1, 1], [], []>} : vector<16x4xf32>, vector<4x2xf32>, vector<16x2xf32> -> vector<16x2xf32>
    %c0_26 = arith.constant 0 : index
    %c0_27 = arith.constant 0 : index
    %40 = vector.load %arg5[%c0_26, %c0_27] : memref<4x8xf32, #tpu.memory_space<vmem>>, vector<4x8xf32>
    %cst_28 = arith.constant dense<0.000000e+00> : vector<256x8xf32>
    %41 = tpu.matmul %7, %40, %cst_28 {dimension_numbers = #tpu.dot_dimension_numbers<[1], [0], [0], [1], [0, 0, 1, 1], [], []>} : vector<256x4xf32>, vector<4x8xf32>, vector<256x8xf32> -> vector<256x8xf32>
    %cst_29 = arith.constant 0.000000e+00 : f32
    %42 = vector.broadcast %cst_29 : f32 to vector<256x8xf32>
    %43 = arith.cmpf ogt, %41, %42 : vector<256x8xf32>
    %44 = vector.broadcast %0 : f32 to vector<256x8xf32>
    %45 = arith.mulf %44, %41 : vector<256x8xf32>
    %46 = arith.select %43, %41, %45 : vector<256x8xi1>, vector<256x8xf32>
    %c0_30 = arith.constant 0 : index
    %c0_31 = arith.constant 0 : index
    %47 = vector.load %arg6[%c0_30, %c0_31] : memref<2x2xf32, #tpu.memory_space<vmem>>, vector<2x2xf32>
    %48 = vector.extract_strided_slice %46 {offsets = [0, 0], sizes = [256, 2], strides = [1, 1]} : vector<256x8xf32> to vector<256x2xf32>
    %cst_32 = arith.constant dense<0.000000e+00> : vector<256x2xf32>
    %49 = tpu.matmul %48, %47, %cst_32 {dimension_numbers = #tpu.dot_dimension_numbers<[1], [0], [0], [1], [0, 0, 1, 1], [], []>} : vector<256x2xf32>, vector<2x2xf32>, vector<256x2xf32> -> vector<256x2xf32>
    %50 = vector.shape_cast %49 : vector<256x2xf32> to vector<16x16x2xf32>
    %51 = vector.extract_strided_slice %46 {offsets = [0, 2], sizes = [256, 2], strides = [1, 1]} : vector<256x8xf32> to vector<256x2xf32>
    %cst_33 = arith.constant dense<0.000000e+00> : vector<256x2xf32>
    %52 = tpu.matmul %51, %47, %cst_33 {dimension_numbers = #tpu.dot_dimension_numbers<[1], [0], [0], [1], [0, 0, 1, 1], [], []>} : vector<256x2xf32>, vector<2x2xf32>, vector<256x2xf32> -> vector<256x2xf32>
    %53 = vector.shape_cast %52 : vector<256x2xf32> to vector<16x16x2xf32>
    %54 = vector.extract_strided_slice %46 {offsets = [0, 4], sizes = [256, 2], strides = [1, 1]} : vector<256x8xf32> to vector<256x2xf32>
    %cst_34 = arith.constant dense<0.000000e+00> : vector<256x2xf32>
    %55 = tpu.matmul %54, %47, %cst_34 {dimension_numbers = #tpu.dot_dimension_numbers<[1], [0], [0], [1], [0, 0, 1, 1], [], []>} : vector<256x2xf32>, vector<2x2xf32>, vector<256x2xf32> -> vector<256x2xf32>
    %56 = vector.shape_cast %55 : vector<256x2xf32> to vector<16x16x2xf32>
    %57 = vector.extract_strided_slice %46 {offsets = [0, 6], sizes = [256, 2], strides = [1, 1]} : vector<256x8xf32> to vector<256x2xf32>
    %cst_35 = arith.constant dense<0.000000e+00> : vector<256x2xf32>
    %58 = tpu.matmul %57, %47, %cst_35 {dimension_numbers = #tpu.dot_dimension_numbers<[1], [0], [0], [1], [0, 0, 1, 1], [], []>} : vector<256x2xf32>, vector<2x2xf32>, vector<256x2xf32> -> vector<256x2xf32>
    %59 = vector.shape_cast %58 : vector<256x2xf32> to vector<16x16x2xf32>
    %60 = vector.shape_cast %28 : vector<16x2xf32> to vector<1x16x2xf32>
    %61 = vector.extract_strided_slice %17 {offsets = [0, 0, 0], sizes = [15, 16, 2], strides = [1, 1, 1]} : vector<16x16x2xf32> to vector<15x16x2xf32>
    %62 = tpu.concatenate %60, %61 in 0 : vector<1x16x2xf32>, vector<15x16x2xf32> -> vector<16x16x2xf32>
    %63 = vector.extract_strided_slice %17 {offsets = [1, 0, 0], sizes = [15, 16, 2], strides = [1, 1, 1]} : vector<16x16x2xf32> to vector<15x16x2xf32>
    %64 = vector.shape_cast %39 : vector<16x2xf32> to vector<1x16x2xf32>
    %65 = tpu.concatenate %63, %64 in 0 : vector<15x16x2xf32>, vector<1x16x2xf32> -> vector<16x16x2xf32>
    %66 = vector.extract_strided_slice %17 {offsets = [0, 0, 0], sizes = [16, 1, 2], strides = [1, 1, 1]} : vector<16x16x2xf32> to vector<16x1x2xf32>
    %67 = vector.extract_strided_slice %17 {offsets = [0, 0, 0], sizes = [16, 15, 2], strides = [1, 1, 1]} : vector<16x16x2xf32> to vector<16x15x2xf32>
    %68 = tpu.concatenate %66, %67 in 1 : vector<16x1x2xf32>, vector<16x15x2xf32> -> vector<16x16x2xf32>
    %69 = vector.extract_strided_slice %17 {offsets = [0, 1, 0], sizes = [16, 15, 2], strides = [1, 1, 1]} : vector<16x16x2xf32> to vector<16x15x2xf32>
    %70 = vector.extract_strided_slice %17 {offsets = [0, 15, 0], sizes = [16, 1, 2], strides = [1, 1, 1]} : vector<16x16x2xf32> to vector<16x1x2xf32>
    %71 = tpu.concatenate %69, %70 in 1 : vector<16x15x2xf32>, vector<16x1x2xf32> -> vector<16x16x2xf32>
    %cst_36 = arith.constant 5.625000e-01 : f32
    %72 = vector.broadcast %cst_36 : f32 to vector<16x16x2xf32>
    %73 = arith.mulf %72, %17 : vector<16x16x2xf32>
    %cst_37 = arith.constant 1.875000e-01 : f32
    %74 = vector.broadcast %cst_37 : f32 to vector<16x16x2xf32>
    %75 = arith.mulf %74, %62 : vector<16x16x2xf32>
    %76 = arith.addf %73, %75 : vector<16x16x2xf32>
    %cst_38 = arith.constant 1.875000e-01 : f32
    %77 = vector.broadcast %cst_38 : f32 to vector<16x16x2xf32>
    %78 = arith.mulf %77, %68 : vector<16x16x2xf32>
    %79 = arith.addf %76, %78 : vector<16x16x2xf32>
    %80 = vector.extract_strided_slice %62 {offsets = [0, 0, 0], sizes = [16, 1, 2], strides = [1, 1, 1]} : vector<16x16x2xf32> to vector<16x1x2xf32>
    %81 = vector.extract_strided_slice %62 {offsets = [0, 0, 0], sizes = [16, 15, 2], strides = [1, 1, 1]} : vector<16x16x2xf32> to vector<16x15x2xf32>
    %82 = tpu.concatenate %80, %81 in 1 : vector<16x1x2xf32>, vector<16x15x2xf32> -> vector<16x16x2xf32>
    %cst_39 = arith.constant 6.250000e-02 : f32
    %83 = vector.broadcast %cst_39 : f32 to vector<16x16x2xf32>
    %84 = arith.mulf %83, %82 : vector<16x16x2xf32>
    %85 = arith.addf %79, %84 : vector<16x16x2xf32>
    %86 = arith.addf %85, %50 : vector<16x16x2xf32>
    %cst_40 = arith.constant 1.875000e-01 : f32
    %87 = vector.broadcast %cst_40 : f32 to vector<16x16x2xf32>
    %88 = arith.mulf %87, %71 : vector<16x16x2xf32>
    %89 = arith.addf %76, %88 : vector<16x16x2xf32>
    %90 = vector.extract_strided_slice %62 {offsets = [0, 1, 0], sizes = [16, 15, 2], strides = [1, 1, 1]} : vector<16x16x2xf32> to vector<16x15x2xf32>
    %91 = vector.extract_strided_slice %62 {offsets = [0, 15, 0], sizes = [16, 1, 2], strides = [1, 1, 1]} : vector<16x16x2xf32> to vector<16x1x2xf32>
    %92 = tpu.concatenate %90, %91 in 1 : vector<16x15x2xf32>, vector<16x1x2xf32> -> vector<16x16x2xf32>
    %cst_41 = arith.constant 6.250000e-02 : f32
    %93 = vector.broadcast %cst_41 : f32 to vector<16x16x2xf32>
    %94 = arith.mulf %93, %92 : vector<16x16x2xf32>
    %95 = arith.addf %89, %94 : vector<16x16x2xf32>
    %96 = arith.addf %95, %53 : vector<16x16x2xf32>
    %97 = tpu.concatenate %86, %96 in 2 : vector<16x16x2xf32>, vector<16x16x2xf32> -> vector<16x16x4xf32>
    %98 = vector.shape_cast %97 : vector<16x16x4xf32> to vector<16x64xf32>
    %c0_42 = arith.constant 0 : index
    %c0_43 = arith.constant 0 : index
    %c0_44 = arith.constant 0 : index
    %c0_45 = arith.constant 0 : index
    %99 = vector.load %arg11[%c0_42, %c0_43, %c0_44, %c0_45] : memref<1x16x2x64xf32, #tpu.memory_space<vmem>>, vector<1x16x1x64xf32>
    %100 = vector.shape_cast %99 : vector<1x16x1x64xf32> to vector<16x64xf32>
    %101 = vector.shape_cast %98 : vector<16x64xf32> to vector<1x16x1x64xf32>
    tpu.vector_store %arg11[%c0_42, %c0_43, %c0_44, %c0_45], %101 {strides = array<i32>} : memref<1x16x2x64xf32, #tpu.memory_space<vmem>>, vector<1x16x1x64xf32>,
    %cst_46 = arith.constant 5.625000e-01 : f32
    %102 = vector.broadcast %cst_46 : f32 to vector<16x16x2xf32>
    %103 = arith.mulf %102, %17 : vector<16x16x2xf32>
    %cst_47 = arith.constant 1.875000e-01 : f32
    %104 = vector.broadcast %cst_47 : f32 to vector<16x16x2xf32>
    %105 = arith.mulf %104, %65 : vector<16x16x2xf32>
    %106 = arith.addf %103, %105 : vector<16x16x2xf32>
    %cst_48 = arith.constant 1.875000e-01 : f32
    %107 = vector.broadcast %cst_48 : f32 to vector<16x16x2xf32>
    %108 = arith.mulf %107, %68 : vector<16x16x2xf32>
    %109 = arith.addf %106, %108 : vector<16x16x2xf32>
    %110 = vector.extract_strided_slice %65 {offsets = [0, 0, 0], sizes = [16, 1, 2], strides = [1, 1, 1]} : vector<16x16x2xf32> to vector<16x1x2xf32>
    %111 = vector.extract_strided_slice %65 {offsets = [0, 0, 0], sizes = [16, 15, 2], strides = [1, 1, 1]} : vector<16x16x2xf32> to vector<16x15x2xf32>
    %112 = tpu.concatenate %110, %111 in 1 : vector<16x1x2xf32>, vector<16x15x2xf32> -> vector<16x16x2xf32>
    %cst_49 = arith.constant 6.250000e-02 : f32
    %113 = vector.broadcast %cst_49 : f32 to vector<16x16x2xf32>
    %114 = arith.mulf %113, %112 : vector<16x16x2xf32>
    %115 = arith.addf %109, %114 : vector<16x16x2xf32>
    %116 = arith.addf %115, %56 : vector<16x16x2xf32>
    %cst_50 = arith.constant 1.875000e-01 : f32
    %117 = vector.broadcast %cst_50 : f32 to vector<16x16x2xf32>
    %118 = arith.mulf %117, %71 : vector<16x16x2xf32>
    %119 = arith.addf %106, %118 : vector<16x16x2xf32>
    %120 = vector.extract_strided_slice %65 {offsets = [0, 1, 0], sizes = [16, 15, 2], strides = [1, 1, 1]} : vector<16x16x2xf32> to vector<16x15x2xf32>
    %121 = vector.extract_strided_slice %65 {offsets = [0, 15, 0], sizes = [16, 1, 2], strides = [1, 1, 1]} : vector<16x16x2xf32> to vector<16x1x2xf32>
    %122 = tpu.concatenate %120, %121 in 1 : vector<16x15x2xf32>, vector<16x1x2xf32> -> vector<16x16x2xf32>
    %cst_51 = arith.constant 6.250000e-02 : f32
    %123 = vector.broadcast %cst_51 : f32 to vector<16x16x2xf32>
    %124 = arith.mulf %123, %122 : vector<16x16x2xf32>
    %125 = arith.addf %119, %124 : vector<16x16x2xf32>
    %126 = arith.addf %125, %59 : vector<16x16x2xf32>
    %127 = tpu.concatenate %116, %126 in 2 : vector<16x16x2xf32>, vector<16x16x2xf32> -> vector<16x16x4xf32>
    %128 = vector.shape_cast %127 : vector<16x16x4xf32> to vector<16x64xf32>
    %c0_52 = arith.constant 0 : index
    %c0_53 = arith.constant 0 : index
    %c1_54 = arith.constant 1 : index
    %c0_55 = arith.constant 0 : index
    %129 = vector.load %arg11[%c0_52, %c0_53, %c1_54, %c0_55] : memref<1x16x2x64xf32, #tpu.memory_space<vmem>>, vector<1x16x1x64xf32>
    %130 = vector.shape_cast %129 : vector<1x16x1x64xf32> to vector<16x64xf32>
    %131 = vector.shape_cast %128 : vector<16x64xf32> to vector<1x16x1x64xf32>
    tpu.vector_store %arg11[%c0_52, %c0_53, %c1_54, %c0_55], %131 {strides = array<i32>} : memref<1x16x2x64xf32, #tpu.memory_space<vmem>>, vector<1x16x1x64xf32>,
    return
  }
  func.func @transform_0(%arg0: i32, %arg1: i32) -> (i32, i32, i32, i32) {
    %c0_i32 = arith.constant 0 : i32
    %c0_i32_0 = arith.constant 0 : i32
    %c0_i32_1 = arith.constant 0 : i32
    return %arg0, %arg1, %c0_i32, %c0_i32_0 : i32, i32, i32, i32
  }
  func.func @transform_1(%arg0: i32, %arg1: i32) -> (i32, i32, i32, i32) {
    %c16_i32 = arith.constant 16 : i32
    %0 = arith.muli %arg1, %c16_i32 : i32
    %c1_i32 = arith.constant 1 : i32
    %1 = arith.subi %0, %c1_i32 : i32
    %c0_i32 = arith.constant 0 : i32
    %2 = arith.maxsi %1, %c0_i32 : i32
    %c0_i32_0 = arith.constant 0 : i32
    %c0_i32_1 = arith.constant 0 : i32
    %c0_i32_2 = arith.constant 0 : i32
    return %arg0, %2, %c0_i32_0, %c0_i32_1 : i32, i32, i32, i32
  }
  func.func @transform_2(%arg0: i32, %arg1: i32) -> (i32, i32, i32, i32) {
    %c1_i32 = arith.constant 1 : i32
    %0 = arith.addi %arg1, %c1_i32 : i32
    %c16_i32 = arith.constant 16 : i32
    %1 = arith.muli %0, %c16_i32 : i32
    %c15_i32 = arith.constant 15 : i32
    %2 = arith.minsi %1, %c15_i32 : i32
    %c0_i32 = arith.constant 0 : i32
    %c0_i32_0 = arith.constant 0 : i32
    %c0_i32_1 = arith.constant 0 : i32
    return %arg0, %2, %c0_i32, %c0_i32_0 : i32, i32, i32, i32
  }
  func.func @transform_3(%arg0: i32, %arg1: i32) -> (i32, i32) {
    %c0_i32 = arith.constant 0 : i32
    %c0_i32_0 = arith.constant 0 : i32
    %c0_i32_1 = arith.constant 0 : i32
    return %c0_i32, %c0_i32_0 : i32, i32
  }
  func.func @transform_4(%arg0: i32, %arg1: i32) -> (i32, i32) {
    %c0_i32 = arith.constant 0 : i32
    %c0_i32_0 = arith.constant 0 : i32
    %c0_i32_1 = arith.constant 0 : i32
    return %c0_i32, %c0_i32_0 : i32, i32
  }
  func.func @transform_5(%arg0: i32, %arg1: i32) -> (i32, i32) {
    %c0_i32 = arith.constant 0 : i32
    %c0_i32_0 = arith.constant 0 : i32
    %c0_i32_1 = arith.constant 0 : i32
    return %c0_i32, %c0_i32_0 : i32, i32
  }
  func.func @transform_6(%arg0: i32, %arg1: i32) -> (i32, i32) {
    %c0_i32 = arith.constant 0 : i32
    %c0_i32_0 = arith.constant 0 : i32
    %c0_i32_1 = arith.constant 0 : i32
    return %c0_i32, %c0_i32_0 : i32, i32
  }
  func.func @transform_7(%arg0: i32, %arg1: i32) -> (i32, i32) {
    %c0_i32 = arith.constant 0 : i32
    %c0_i32_0 = arith.constant 0 : i32
    %c0_i32_1 = arith.constant 0 : i32
    return %c0_i32, %c0_i32_0 : i32, i32
  }
  func.func @transform_8(%arg0: i32, %arg1: i32) -> i32 {
    %c0_i32 = arith.constant 0 : i32
    %c0_i32_0 = arith.constant 0 : i32
    return %c0_i32 : i32
  }
  func.func @transform_9(%arg0: i32, %arg1: i32) -> (i32, i32, i32, i32) {
    %c0_i32 = arith.constant 0 : i32
    %c0_i32_0 = arith.constant 0 : i32
    %c0_i32_1 = arith.constant 0 : i32
    return %arg0, %arg1, %c0_i32, %c0_i32_0 : i32, i32, i32, i32
  }
}

</mosaic_0001>

<bundles_post_ra>
// kernel: upsample_forward.1
= control target key start
LH: loop header
LB: loop body
LE: loop exit
PB: predicated region body
PF: predicated region fallthrough
CT: control target
= control target key end

     0   :  { %14 = vsyncpa [#allocation3], 0  ;;  %s11364_s30 = smov 0   ;;  %s11366_s10 = smov 0   ;;  %s18091_s0 = inlined_call_operand.vmem [shape: f32[2,16,16,4], index: 0, kind: input, shape index: {}, may-alias: {0,1,2}]   ;;  %s18092_s1 = inlined_call_operand.vmem [shape: f32[2,16,16,4], index: 1, kind: input, shape index: {}, may-alias: {0,1,2}]   ;;  %s18093_s2 = inlined_call_operand.vmem [shape: f32[2,16,16,4], index: 2, kind: input, shape index: {}, may-alias: {0,1,2}]   ;;  %s18094_s3 = inlined_call_operand.vmem [shape: f32[4,8], index: 3, kind: input, shape index: {}]   ;;  %s18095_s4 = inlined_call_operand.vmem [shape: f32[2,2], index: 4, kind: input, shape index: {}]   ;;  %s18096_s5 = inlined_call_operand.vmem [shape: f32[4,4], index: 5, kind: input, shape index: {}]   ;;  %s18097_s6 = inlined_call_operand.vmem [shape: f32[1,4], index: 6, kind: input, shape index: {}]   ;;  %s18098_s7 = inlined_call_operand.vmem [shape: f32[4,2], index: 7, kind: input, shape index: {}]   ;;  %s18099_s8 = inlined_call_operand.vmem [shape: f32[2], index: 8, kind: input, shape index: {}]   ;;  %s18100_s9 = inlined_call_operand.vmem [shape: f32[2,16,2,64], index: 9, kind: output, shape index: {}]  }
   0x1   :  { %s11368_s11 = smov 0  }
   0x2 LB: > { %s10308_s12 = sadd.s32 4294967295, %s11289_s11   ;;  %s32_s13 = sadd.s32 1, %s11285_s10  ;;  %s11289_s11 = sphi %s11368_s11, %s20_s11   ;;  %s11285_s10 = sphi %s11366_s10, %s19471_s10   ;;  %s11281_s30 = sphi %s11364_s30, %s19470_s30  }
   0x3   : > { %p34_p0 = scmp.ge.s32.totalorder %s32_s13, 2  ;;  %p10310_p1 = scmp.ge.s32.totalorder %s11289_s11, 1 }
   0x4   : > { %p291_p2 = scmp.lt.s32.totalorder %s11289_s11, 3  ;;  %p11389_p4 = scmp.eq.s32.totalorder %s10308_s12, 0 }
   0x5   : > { %s19473_s13 = smov (%p34_p0, %s32_s13), 0  ;;  %s319_s18 = sshll.u32 %s18099_s8, 4  ;;  %s320_s18 = int_to_ptr.vmem [resolvable:$true] %s319_s18 }
   0x6   : > { %p11385_p3 = pnand %p10310_p1, %p291_p2  ;;  %s11248_s19 = scalar_lea.vmem %s320_s18, 16 }
   0x7   : > { %p11249_p7 = scmp.ne.s32.totalorder %s320_s18, %s11248_s19  ;;  %p11256_p11 = scmp.lt.s32.totalorder %s320_s18, %s320_s18 }
   0x8   : > { %p11195_p5 = pneg %p11385_p3  ;;  %p11257_p12 = scmp.lt.s32.totalorder %s11248_s19, %s11248_s19 }
   0xa   : > { %p11196_p6 = pnand %p11389_p4, %p11195_p5  ;;  %p11258_p13 = por %p11257_p12, %p11256_p11 }
   0xc   : > { %p11250_p8 = pneg %p11196_p6 }
   0xe   : > { %p11251_p9 = pnand %p11250_p8, %p11249_p7 }
  0x10   : > { %p11252_p10 = pneg %p11251_p9 }
  0x12   : > { %p11259_p0 = pnand %p11258_p13, %p11252_p10 }
  0x14   : > { %11262 = shalt.err (!%p11259_p0)
}
  0x15   : > { %s11291_s20 = smov [#allocation2]   ;;  %386 = sbr.rel (%p11385_p3) target bundleno = 2052 (0x804), region = 56 }
  0x16   : > { %11198 = dma.vmem_to_smem (!%p11196_p6), %s320_s18, 16, %s11291_s20, [#allocation3]  }
  0x1c   : > { %11276 = dma.done.wait (%p11389_p4), [#allocation3], 16  }
  0x1d   : > { %11278 = vsyncadd (%p11389_p4), [#allocation3], 4294967280 }
  0x1e   : > { %392 = sfence }
  0x1f   : > { %v11409_v0 = vld [vmem:[%s18096_s5] sm:$0xf]  ;;  %vm653_vm0 = vcmask 1043456   ;;  %p459_p1 = scmp.lt.s32.totalorder %s11281_s30, 1  ;;  %vm556_vm1 = vcmask 31744   ;;  %vm2067_vm2 = vcmask 1041408  }
  0x20   : > { %10819 = vmatprep.subr.msk.mxu0 %vm653_vm0, %v11409_v0  ;;  %11189 = vmatprep.subr.msk.mxu1 %vm653_vm0, %v11409_v0  ;;  %v1643_v35 = vld [vmem:[%s18094_s3] sm:$0xf]  ;;  %s11292_s27 = smov 124   ;;  %s11293_s28 = smov 126  }
  0x21   : > { %10820 = vmatpush3.msk.msra.mxu0 %vm653_vm0, %v11409_v0  ;;  %s19475_s30 = smov (!%p459_p1, %s11281_s30), 1  ;;  %11190 = vmatpush3.msk.msra.mxu1 %vm653_vm0, %v11409_v0  ;;  %v11625_v38 = vld [vmem:[%s18098_s7] sm:$0xf]  ;;  %s11298_s14 = smov 32  }
  0x22   : > { %10919 = vmatprep.subr.msk.mxu0 %vm653_vm0, %v11409_v0  ;;  %s11426_s23 = sshll.u32 %s19475_s30, 8  ;;  %10869 = vmatprep.subr.msk.mxu1 %vm653_vm0, %v11625_v38  ;;  %v11643_v39 = vld [vmem:[%s18095_s4] sm:$0x3]  ;;  %s11300_s15 = smov 36  }
  0x23   : > { %s11432_s26 = scalar_lea.vmem %s18091_s0, %s11426_s23  ;;  %s481_s29 = scalar_lea.vmem %s18092_s1, %s11426_s23  ;;  %v11654_v40 = vld [vmem:[%s18097_s6] ss:$0 sm:$0xff] }
  0x24   : > { %v11435_v1 = vld [vmem:[%s11432_s26] sm:$0xff]  ;;  %v11438_v2 = vld [vmem:[%s11432_s26 + $0x8] sm:$0xff]  ;;  %v11441_v3 = vld [vmem:[%s11432_s26 + $0x10] sm:$0xff]  ;;  %s10573_s12 = sadd.s32 240, %s11426_s23  ;;  %s10323_s23 = sld [smem:[#allocation2 + $0x1]] }
  0x25   : > { %10821 = vmatprep.mubr.msk.f32.mxu0 %vm556_vm1, %v11435_v1  ;;  %v11452_v4 = vld [vmem:[%s11432_s26 + $0x18] sm:$0xff]  ;;  %v11455_v5 = vld [vmem:[%s11432_s26 + $0x20] sm:$0xff]  ;;  %v11467_v7 = vld [vmem:[%s11432_s26 + $0x88] sm:$0xff]  ;;  %s498_s16 = scalar_lea.vmem %s18093_s2, %s10573_s12  ;;  %s18291_s12 = smov 2  }
  0x26   : > { %10822 = vmatmul.mubr.msk.f32.vlgmr.msra.gmra.mrb[0].mxu0 %vm556_vm1, %v11438_v2  ;;  %v11460_v6 = vld [vmem:[%s11432_s26 + $0x80] sm:$0xff]  ;;  %v11470_v8 = vld [vmem:[%s11432_s26 + $0x90] sm:$0xff]  ;;  %v11475_v9 = vld [vmem:[%s11432_s26 + $0x28] sm:$0xff]  ;;  %s11302_s17 = smov 48   ;;  %s11303_s18 = smov 4  }
  0x27   : > { %10920 = vmatpush3.msk.msra.mxu0 %vm653_vm0, %v11409_v0  ;;  %10824 = vmatprep.mubr.msk.f32.mxu0 %vm556_vm1, %v11441_v3  ;;  %v11480_v10 = vld [vmem:[%s11432_s26 + $0x30] sm:$0xff]  ;;  %v11485_v11 = vld [vmem:[%s11432_s26 + $0x98] sm:$0xff]  ;;  %v11488_v12 = vld [vmem:[%s11432_s26 + $0xa0] sm:$0xff]  ;;  %s11304_s19 = smov 8   ;;  %s11305_s20 = smov 16  }
  0x28   : > { %10929 = vmatprep.subr.msk.mxu0 %vm653_vm0, %v11409_v0  ;;  %10845 = vmatprep.mubr.msk.f32.mxu1 %vm556_vm1, %v11460_v6  ;;  %v11495_v13 = vld [vmem:[%s11432_s26 + $0x38] sm:$0xff]  ;;  %v11500_v14 = vld [vmem:[%s11432_s26 + $0x40] sm:$0xff]  ;;  %v11505_v15 = vld [vmem:[%s11432_s26 + $0xa8] sm:$0xff]  ;;  %s11306_s21 = smov 44   ;;  %s11307_s22 = smov 52  }
  0x29   : > { %10846 = vmatmul.mubr.msk.f32.vlgmr.msra.gmra.mrb[0].mxu1 %vm556_vm1, %v11467_v7  ;;  %v11508_v16 = vld [vmem:[%s11432_s26 + $0xb0] sm:$0xff]  ;;  %v527_v17 = vld [vmem:[%s11432_s26 + $0x48] sm:$0xff]  ;;  %v11521_v19 = vld [vmem:[%s11432_s26 + $0xb8] sm:$0xff]  ;;  %s11309_s24 = smov 12   ;;  %s11310_s25 = smov 20  }
  0x2a   : > { %10825 = vmatmul.mubr.msk.f32.gmra.mrb[2].mxu0 %vm556_vm1, %v11452_v4  ;;  %10848 = vmatprep.mubr.msk.f32.mxu1 %vm556_vm1, %v11470_v8  ;;  %v528_v18 = vld [vmem:[%s11432_s26 + $0x50] sm:$0xff]  ;;  %v11524_v20 = vld [vmem:[%s11432_s26 + $0xc0] sm:$0xff]  ;;  %v529_v21 = vld [vmem:[%s11432_s26 + $0x58] sm:$0xff]  ;;  %v11656_v42 = vstv %s10323_s23  ;;  %s11308_s23 = smov 56  }
  0x2b   : > { %10827 = vmatprep.mubr.msk.f32.mxu0 %vm556_vm1, %v11455_v5  ;;  %v530_v22 = vld [vmem:[%s11432_s26 + $0x60] sm:$0xff]  ;;  %v543_v23 = vld [vmem:[%s11432_s26 + $0xc8] sm:$0xff]  ;;  %v11536_v24 = vld [vmem:[%s11432_s26 + $0xd0] sm:$0xff]  ;;  %10870 = vmatpush3.msk.msra.mxu1 %vm653_vm0, %v11625_v38 }
  0x2c   : > { %v531_v25 = vld [vmem:[%s11432_s26 + $0x68] sm:$0xff]  ;;  %v532_v26 = vld [vmem:[%s11432_s26 + $0x70] sm:$0xff]  ;;  %v545_v27 = vld [vmem:[%s11432_s26 + $0xd8] sm:$0xff]  ;;  %10924 = vmatprep.subr.msk.mxu1 %vm653_vm0, %v11625_v38 }
  0x2d   : > { %10849 = vmatmul.mubr.msk.f32.gmra.mrb[2].mxu1 %vm556_vm1, %v11485_v11  ;;  %v546_v28 = vld [vmem:[%s11432_s26 + $0xe0] sm:$0xff]  ;;  %v533_v29 = vld [vmem:[%s11432_s26 + $0x78] sm:$0xff]  ;;  %v547_v31 = vld [vmem:[%s11432_s26 + $0xe8] sm:$0xff] }
  0x2e   : > { %10828 = vmatmul.mubr.msk.f32.gmra.mrb[4].mxu0 %vm556_vm1, %v11475_v9  ;;  %10851 = vmatprep.mubr.msk.f32.mxu1 %vm556_vm1, %v11488_v12  ;;  %v1303_v30 = vld [vmem:[%s481_s29] sm:$0xff]  ;;  %v548_v32 = vld [vmem:[%s11432_s26 + $0xf0] sm:$0xff]  ;;  %v1304_v33 = vld [vmem:[%s481_s29 + $0x8] sm:$0xff]  ;;  %s11294_s29 = smov 122  }
  0x2f   : > { %10830 = vmatprep.mubr.msk.f32.mxu0 %vm556_vm1, %v11480_v10  ;;  %v1473_v34 = vld [vmem:[%s498_s16] sm:$0xff]  ;;  %v549_v36 = vld [vmem:[%s11432_s26 + $0xf8] sm:$0xff]  ;;  %v1474_v37 = vld [vmem:[%s498_s16 + $0x8] sm:$0xff]  ;;  %s11737_s26 = sld [smem:[#allocation2]]  ;;  %s11301_s16 = smov 40  }
  0x31   : > { %10852 = vmatmul.mubr.msk.f32.gmra.mrb[4].mxu1 %vm556_vm1, %v11505_v15 }
  0x32   : > { %10831 = vmatmul.mubr.msk.f32.gmra.mrb[6].mxu0 %vm556_vm1, %v11495_v13  ;;  %10854 = vmatprep.mubr.msk.f32.mxu1 %vm556_vm1, %v11508_v16 }
  0x33   : > { %10833 = vmatprep.mubr.msk.f32.mxu0 %vm556_vm1, %v11500_v14 }
  0x35   : > { %10855 = vmatmul.mubr.msk.f32.gmra.mrb[6].mxu1 %vm556_vm1, %v11521_v19 }
  0x36   : > { %10834 = vmatmul.mubr.msk.f32.gmra.mrb[8].mxu0 %vm556_vm1, %v527_v17  ;;  %10857 = vmatprep.mubr.msk.f32.mxu1 %vm556_vm1, %v11524_v20 }
  0x37   : > { %10836 = vmatprep.mubr.msk.f32.mxu0 %vm556_vm1, %v528_v18 }
  0x39   : > { %10858 = vmatmul.mubr.msk.f32.gmra.mrb[8].mxu1 %vm556_vm1, %v543_v23 }
  0x3a   : > { %10837 = vmatmul.mubr.msk.f32.gmra.mrb[10].mxu0 %vm556_vm1, %v529_v21  ;;  %10860 = vmatprep.mubr.msk.f32.mxu1 %vm556_vm1, %v11536_v24 }
  0x3b   : > { %10839 = vmatprep.mubr.msk.f32.mxu0 %vm556_vm1, %v530_v22 }
  0x3d   : > { %10861 = vmatmul.mubr.msk.f32.gmra.mrb[10].mxu1 %vm556_vm1, %v545_v27 }
  0x3e   : > { %10840 = vmatmul.mubr.msk.f32.gmra.mrb[12].mxu0 %vm556_vm1, %v531_v25  ;;  %10863 = vmatprep.mubr.msk.f32.mxu1 %vm556_vm1, %v546_v28 }
  0x3f   : > { %10842 = vmatprep.mubr.msk.f32.mxu0 %vm556_vm1, %v532_v26 }
  0x41   : > { %10864 = vmatmul.mubr.msk.f32.gmra.mrb[12].mxu1 %vm556_vm1, %v547_v31 }
  0x42   : > { %10843 = vmatmul.mubr.msk.f32.gmra.mrb[14].mxu0 %vm556_vm1, %v533_v29  ;;  %10866 = vmatprep.mubr.msk.f32.mxu1 %vm556_vm1, %v548_v32 }
  0x43   : > { %10921 = vmatprep.mubr.msk.f32.mxu0 %vm556_vm1, %v1303_v30 }
  0x45   : > { %10867 = vmatmul.mubr.msk.f32.gmra.mrb[14].mxu1 %vm556_vm1, %v549_v36 }
  0x46   : > { %10922 = vmatmul.mubr.msk.f32.vlgmr.msra.gmra.mrb[16].mxu0 %vm556_vm1, %v1304_v33 }
  0x47   : > { %10930 = vmatpush3.msk.msra.mxu0 %vm653_vm0, %v11409_v0  ;;  %10931 = vmatprep.mubr.msk.f32.mxu0 %vm556_vm1, %v1473_v34 }
  0x48   : > { %10939 = vmatprep.subr.msk.mxu0 %vm653_vm0, %v1643_v35 }
  0x4a   : > { %10932 = vmatmul.mubr.msk.f32.vlgmr.msra.gmra.mrb[18].mxu0 %vm556_vm1, %v1474_v37 }
  0x4b   : > { %10940 = vmatpush3.msk.msra.mxu0 %vm653_vm0, %v1643_v35  ;;  %10941 = vmatprep.mubr.msk.f32.mxu0 %vm556_vm1, %v11435_v1 }
  0x4c   : > { %11039 = vmatprep.subr.msk.mxu0 %vm2067_vm2, %v11643_v39 }
  0x4e   : > { %10942 = vmatmul.mubr.msk.f32.vlgmr.msra.gmra.mrb[20].mxu0 %vm556_vm1, %v11438_v2 }
  0x4f   : > { %10944 = vmatprep.mubr.msk.f32.mxu0 %vm556_vm1, %v11441_v3  ;;  %11040 = vmatpush3.msk.msra.mxu0 %vm2067_vm2, %v11643_v39 }
  0x50   : > { %11139 = vmatprep.subr.msk.mxu0 %vm2067_vm2, %v11643_v39 }
  0x52   : > { %10945 = vmatmul.mubr.msk.f32.gmra.mrb[22].mxu0 %vm556_vm1, %v11452_v4 }
  0x53   : > { %10947 = vmatprep.mubr.msk.f32.mxu0 %vm556_vm1, %v11455_v5 }
  0x56   : > { %10948 = vmatmul.mubr.msk.f32.gmra.mrb[24].mxu0 %vm556_vm1, %v11475_v9 }
  0x57   : > { %10950 = vmatprep.mubr.msk.f32.mxu0 %vm556_vm1, %v11480_v10 }
  0x5a   : > { %10951 = vmatmul.mubr.msk.f32.gmra.mrb[26].mxu0 %vm556_vm1, %v11495_v13 }
  0x5b   : > { %10953 = vmatprep.mubr.msk.f32.mxu0 %vm556_vm1, %v11500_v14 }
  0x5e   : > { %10954 = vmatmul.mubr.msk.f32.gmra.mrb[28].mxu0 %vm556_vm1, %v527_v17 }
  0x5f   : > { %10956 = vmatprep.mubr.msk.f32.mxu0 %vm556_vm1, %v528_v18 }
  0x62   : > { %10957 = vmatmul.mubr.msk.f32.gmra.mrb[30].mxu0 %vm556_vm1, %v529_v21 }
  0x63   : > { %10959 = vmatprep.mubr.msk.f32.mxu0 %vm556_vm1, %v530_v22 }
  0x66   : > { %10960 = vmatmul.mubr.msk.f32.gmra.mrb[32].mxu0 %vm556_vm1, %v531_v25 }
  0x67   : > { %10962 = vmatprep.mubr.msk.f32.mxu0 %vm556_vm1, %v532_v26 }
  0x6a   : > { %10963 = vmatmul.mubr.msk.f32.gmra.mrb[34].mxu0 %vm556_vm1, %v533_v29 }
  0x6b   : > { %10965 = vmatprep.mubr.msk.f32.mxu0 %vm556_vm1, %v11460_v6 }
  0x6e   : > { %10966 = vmatmul.mubr.msk.f32.gmra.mrb[36].mxu0 %vm556_vm1, %v11467_v7 }
  0x6f   : > { %10968 = vmatprep.mubr.msk.f32.mxu0 %vm556_vm1, %v11470_v8 }
  0x72   : > { %10969 = vmatmul.mubr.msk.f32.gmra.mrb[38].mxu0 %vm556_vm1, %v11485_v11 }
  0x73   : > { %10971 = vmatprep.mubr.msk.f32.mxu0 %vm556_vm1, %v11488_v12 }
  0x76   : > { %10972 = vmatmul.mubr.msk.f32.gmra.mrb[40].mxu0 %vm556_vm1, %v11505_v15 }
  0x77   : > { %10974 = vmatprep.mubr.msk.f32.mxu0 %vm556_vm1, %v11508_v16 }
  0x7a   : > { %10975 = vmatmul.mubr.msk.f32.gmra.mrb[42].mxu0 %vm556_vm1, %v11521_v19 }
  0x7b   : > { %10977 = vmatprep.mubr.msk.f32.mxu0 %vm556_vm1, %v11524_v20 }
  0x7e   : > { %10978 = vmatmul.mubr.msk.f32.gmra.mrb[44].mxu0 %vm556_vm1, %v543_v23 }
  0x7f   : > { %10980 = vmatprep.mubr.msk.f32.mxu0 %vm556_vm1, %v11536_v24 }
  0x82   : > { %10981 = vmatmul.mubr.msk.f32.gmra.mrb[46].mxu0 %vm556_vm1, %v545_v27 }
  0x83   : > { %10983 = vmatprep.mubr.msk.f32.mxu0 %vm556_vm1, %v546_v28 }
  0x86   : > { %10984 = vmatmul.mubr.msk.f32.gmra.mrb[48].mxu0 %vm556_vm1, %v547_v31 }
  0x87   : > { %10986 = vmatprep.mubr.msk.f32.mxu0 %vm556_vm1, %v548_v32 }
  0x8a   : > { %10987 = vmatmul.mubr.msk.f32.gmra.mrb[50].mxu0 %vm556_vm1, %v549_v36 }
  0xf9   : > { %v10823_v41 = vpop.f32.mrb[0].mxu0 }
  0xfa   : > { %v729_v43 = vadd.f32 %v10823_v41, %v11654_v40  ;;  %v723_v44 = vpop.f32.mrb[1].mxu0 }
  0xfb   : > { %v724_v45 = vadd.f32 %v11654_v40, %v723_v44 }
  0xfc   : > { %v916_v46 = vmul.f32 %v11656_v42, %v729_v43  ;;  %vm883_vm3 = vcmp.gt.f32.partialorder %v729_v43, 0.0  ;;  %v11663_v51 = vpop.f32.mrb[0].mxu1 }
  0xfd   : > { %vm882_vm4 = vcmp.gt.f32.partialorder %v724_v45, 0.0  ;;  %v915_v47 = vmul.f32 %v11656_v42, %v724_v45  ;;  %v10826_v48 = vpop.f32.mrb[2].mxu0  ;;  %v11666_v54 = vpop.f32.mrb[1].mxu1 }
  0xfe   : > { %v739_v49 = vadd.f32 %v10826_v48, %v11654_v40  ;;  %v733_v50 = vpop.f32.mrb[3].mxu0  ;;  %v948_v55 = vsel %vm883_vm3, %v729_v43, %v916_v46  ;;  %v804_v44 = vadd.f32 %v11654_v40, %v11666_v54  ;;  %v809_v48 = vadd.f32 %v11663_v51, %v11654_v40 }
  0xff   : > { %v734_v52 = vadd.f32 %v11654_v40, %v733_v50  ;;  %v947_v53 = vsel %vm882_vm4, %v724_v45, %v915_v47 }
 0x100   : > { %v918_v56 = vmul.f32 %v11656_v42, %v739_v49  ;;  %10871 = vmatprep.mubr.msk.f32.mxu1 %vm556_vm1, %v947_v53  ;;  %vm885_vm5 = vcmp.gt.f32.partialorder %v739_v49, 0.0  ;;  %v11673_v61 = vpop.f32.mrb[2].mxu1  ;;  %vm898_vm4 = vcmp.gt.f32.partialorder %v804_v44, 0.0 }
 0x101   : > { %vm884_vm6 = vcmp.gt.f32.partialorder %v734_v52, 0.0  ;;  %v917_v57 = vmul.f32 %v11656_v42, %v734_v52  ;;  %v10829_v58 = vpop.f32.mrb[4].mxu0  ;;  %10872 = vmatmul.mubr.msk.f32.vlgmr.msra.gmra.mrb[16].mxu1 %vm556_vm1, %v948_v55  ;;  %v11678_v0 = vpop.f32.mrb[3].mxu1 }
 0x102   : > { %v749_v59 = vadd.f32 %v10829_v58, %v11654_v40  ;;  %v743_v60 = vpop.f32.mrb[5].mxu0  ;;  %10925 = vmatpush3.msk.msra.mxu1 %vm653_vm0, %v11625_v38  ;;  %v950_v2 = vsel %vm885_vm5, %v739_v49, %v918_v56  ;;  %v814_v51 = vadd.f32 %v11654_v40, %v11678_v0 }
 0x103   : > { %v744_v62 = vadd.f32 %v11654_v40, %v743_v60  ;;  %v949_v63 = vsel %vm884_vm6, %v734_v52, %v917_v57  ;;  %10934 = vmatprep.subr.msk.mxu1 %vm653_vm0, %v11625_v38  ;;  %v931_v57 = vmul.f32 %v11656_v42, %v804_v44  ;;  %v932_v60 = vmul.f32 %v11656_v42, %v809_v48 }
 0x104   : > { %v920_v1 = vmul.f32 %v11656_v42, %v749_v59  ;;  %10874 = vmatprep.mubr.msk.f32.mxu1 %vm556_vm1, %v949_v63  ;;  %vm887_vm7 = vcmp.gt.f32.partialorder %v749_v59, 0.0  ;;  %v11687_v7 = vpop.f32.mrb[4].mxu1 }
 0x105   : > { %vm886_vm8 = vcmp.gt.f32.partialorder %v744_v62, 0.0  ;;  %v919_v3 = vmul.f32 %v11656_v42, %v744_v62  ;;  %v10832_v4 = vpop.f32.mrb[6].mxu0  ;;  %10875 = vmatmul.mubr.msk.f32.gmra.mrb[18].mxu1 %vm556_vm1, %v950_v2  ;;  %v11690_v10 = vpop.f32.mrb[5].mxu1 }
 0x106   : > { %v759_v5 = vadd.f32 %v10832_v4, %v11654_v40  ;;  %v753_v6 = vpop.f32.mrb[7].mxu0  ;;  %v952_v12 = vsel %vm887_vm7, %v749_v59, %v920_v1  ;;  %v819_v1 = vadd.f32 %v11673_v61, %v11654_v40  ;;  %vm899_vm7 = vcmp.gt.f32.partialorder %v809_v48, 0.0 }
 0x107   : > { %v754_v8 = vadd.f32 %v11654_v40, %v753_v6  ;;  %v951_v9 = vsel %vm886_vm8, %v744_v62, %v919_v3  ;;  %v963_v6 = vsel %vm898_vm4, %v804_v44, %v931_v57 }
 0x108   : > { %v922_v11 = vmul.f32 %v11656_v42, %v759_v5  ;;  %10877 = vmatprep.mubr.msk.f32.mxu1 %vm556_vm1, %v951_v9  ;;  %vm889_vm9 = vcmp.gt.f32.partialorder %v759_v5, 0.0  ;;  %v11697_v17 = vpop.f32.mrb[6].mxu1 }
 0x109   : > { %vm888_vm10 = vcmp.gt.f32.partialorder %v754_v8, 0.0  ;;  %v921_v13 = vmul.f32 %v11656_v42, %v754_v8  ;;  %v10835_v14 = vpop.f32.mrb[8].mxu0  ;;  %10878 = vmatmul.mubr.msk.f32.gmra.mrb[20].mxu1 %vm556_vm1, %v952_v12  ;;  %v11700_v20 = vpop.f32.mrb[7].mxu1 }
 0x10a   : > { %v769_v15 = vadd.f32 %v10835_v14, %v11654_v40  ;;  %v763_v16 = vpop.f32.mrb[9].mxu0  ;;  %v954_v22 = vsel %vm889_vm9, %v759_v5, %v922_v11  ;;  %v933_v5 = vmul.f32 %v11656_v42, %v814_v51  ;;  %vm900_vm9 = vcmp.gt.f32.partialorder %v814_v51, 0.0 }
 0x10b   : > { %v764_v18 = vadd.f32 %v11654_v40, %v763_v16  ;;  %v953_v19 = vsel %vm888_vm10, %v754_v8, %v921_v13  ;;  %v824_v8 = vadd.f32 %v11654_v40, %v11690_v10  ;;  %v934_v13 = vmul.f32 %v11656_v42, %v819_v1 }
 0x10c   : > { %v924_v21 = vmul.f32 %v11656_v42, %v769_v15  ;;  %10880 = vmatprep.mubr.msk.f32.mxu1 %vm556_vm1, %v953_v19  ;;  %vm891_vm11 = vcmp.gt.f32.partialorder %v769_v15, 0.0  ;;  %v11707_v27 = vpop.f32.mrb[8].mxu1  ;;  %v964_v10 = vsel %vm899_vm7, %v809_v48, %v932_v60  ;;  %vm901_vm10 = vcmp.gt.f32.partialorder %v819_v1, 0.0 }
 0x10d   : > { %vm890_vm12 = vcmp.gt.f32.partialorder %v764_v18, 0.0  ;;  %v923_v23 = vmul.f32 %v11656_v42, %v764_v18  ;;  %v10838_v24 = vpop.f32.mrb[10].mxu0  ;;  %10881 = vmatmul.mubr.msk.f32.gmra.mrb[22].mxu1 %vm556_vm1, %v954_v22  ;;  %v11710_v30 = vpop.f32.mrb[9].mxu1  ;;  %v829_v19 = vadd.f32 %v11687_v7, %v11654_v40  ;;  %v11773_v22 = vstv %s11737_s26  ;;  %s18293_s26 = smov 24  }
 0x10e   : > { %v779_v25 = vadd.f32 %v10838_v24, %v11654_v40  ;;  %v773_v26 = vpop.f32.mrb[11].mxu0  ;;  %v956_v32 = vsel %vm891_vm11, %v769_v15, %v924_v21  ;;  %v965_v24 = vsel %vm900_vm9, %v814_v51, %v933_v5 }
 0x10f   : > { %v774_v28 = vadd.f32 %v11654_v40, %v773_v26  ;;  %v955_v29 = vsel %vm890_vm12, %v764_v18, %v923_v23  ;;  %v935_v23 = vmul.f32 %v11656_v42, %v824_v8  ;;  %vm902_vm12 = vcmp.gt.f32.partialorder %v824_v8, 0.0 }
 0x110   : > { %v926_v31 = vmul.f32 %v11656_v42, %v779_v25  ;;  %10883 = vmatprep.mubr.msk.f32.mxu1 %vm556_vm1, %v955_v29  ;;  %vm893_vm13 = vcmp.gt.f32.partialorder %v779_v25, 0.0  ;;  %v11717_v37 = vpop.f32.mrb[10].mxu1  ;;  %v834_v26 = vadd.f32 %v11654_v40, %v11700_v20  ;;  %v966_v29 = vsel %vm901_vm10, %v819_v1, %v934_v13 }
 0x111   : > { %vm892_vm14 = vcmp.gt.f32.partialorder %v774_v28, 0.0  ;;  %v925_v33 = vmul.f32 %v11656_v42, %v774_v28  ;;  %v10841_v34 = vpop.f32.mrb[12].mxu0  ;;  %10884 = vmatmul.mubr.msk.f32.gmra.mrb[24].mxu1 %vm556_vm1, %v956_v32  ;;  %v11722_v45 = vpop.f32.mrb[11].mxu1  ;;  %v936_v32 = vmul.f32 %v11656_v42, %v829_v19  ;;  %v839_v20 = vadd.f32 %v11697_v17, %v11654_v40 }
 0x112   : > { %v789_v35 = vadd.f32 %v10841_v34, %v11654_v40  ;;  %v783_v36 = vpop.f32.mrb[13].mxu0  ;;  %v958_v47 = vsel %vm893_vm13, %v779_v25, %v926_v31  ;;  %v937_v44 = vmul.f32 %v11656_v42, %v834_v26  ;;  %vm904_vm4 = vcmp.gt.f32.partialorder %v834_v26, 0.0 }
 0x113   : > { %v784_v41 = vadd.f32 %v11654_v40, %v783_v36  ;;  %v957_v43 = vsel %vm892_vm14, %v774_v28, %v925_v33 }
 0x114   : > { %v928_v46 = vmul.f32 %v11656_v42, %v789_v35  ;;  %10886 = vmatprep.mubr.msk.f32.mxu1 %vm556_vm1, %v957_v43  ;;  %vm895_vm15 = vcmp.gt.f32.partialorder %v789_v35, 0.0  ;;  %v11731_v54 = vpop.f32.mrb[12].mxu1 }
 0x115   : > { %vm894_vm3 = vcmp.gt.f32.partialorder %v784_v41, 0.0  ;;  %v927_v49 = vmul.f32 %v11656_v42, %v784_v41  ;;  %v10844_v50 = vpop.f32.mrb[14].mxu0  ;;  %10887 = vmatmul.mubr.msk.f32.gmra.mrb[26].mxu1 %vm556_vm1, %v958_v47  ;;  %v11739_v58 = vpop.f32.mrb[13].mxu1 }
 0x116   : > { %v799_v52 = vadd.f32 %v10844_v50, %v11654_v40  ;;  %v793_v53 = vpop.f32.mrb[15].mxu0  ;;  %v960_v62 = vsel %vm895_vm15, %v789_v35, %v928_v46  ;;  %vm903_vm15 = vcmp.gt.f32.partialorder %v829_v19, 0.0  ;;  %v967_v35 = vsel %vm902_vm12, %v824_v8, %v935_v23 }
 0x117   : > { %v794_v55 = vadd.f32 %v11654_v40, %v793_v53  ;;  %v959_v56 = vsel %vm894_vm3, %v784_v41, %v927_v49  ;;  %v844_v46 = vadd.f32 %v11654_v40, %v11710_v30  ;;  %v968_v49 = vsel %vm903_vm15, %v829_v19, %v936_v32 }
 0x118   : > { %v930_v59 = vmul.f32 %v11656_v42, %v799_v52  ;;  %10889 = vmatprep.mubr.msk.f32.mxu1 %vm556_vm1, %v959_v56  ;;  %vm897_vm5 = vcmp.gt.f32.partialorder %v799_v52, 0.0  ;;  %v11755_v9 = vpop.f32.mrb[14].mxu1  ;;  %v938_v30 = vmul.f32 %v11656_v42, %v839_v20  ;;  %v849_v50 = vadd.f32 %v11707_v27, %v11654_v40 }
 0x119   : > { %vm896_vm6 = vcmp.gt.f32.partialorder %v794_v55, 0.0  ;;  %v929_v63 = vmul.f32 %v11656_v42, %v794_v55  ;;  %10890 = vmatmul.mubr.msk.f32.gmra.mrb[28].mxu1 %vm556_vm1, %v960_v62  ;;  %v10923_v0 = vpop.f32.mrb[16].mxu0  ;;  %v11760_v12 = vpop.f32.mrb[15].mxu1  ;;  %v939_v53 = vmul.f32 %v11656_v42, %v844_v46  ;;  %v854_v56 = vadd.f32 %v11654_v40, %v11722_v45 }
 0x11a   : > { %v1383_v2 = vadd.f32 %v10923_v0, %v11654_v40  ;;  %v11750_v3 = vpop.f32.mrb[17].mxu0  ;;  %v962_v61 = vsel %vm897_vm5, %v799_v52, %v930_v59  ;;  %vm905_vm5 = vcmp.gt.f32.partialorder %v839_v20, 0.0  ;;  %vm906_vm7 = vcmp.gt.f32.partialorder %v844_v46, 0.0 }
 0x11b   : > { %v961_v4 = vsel %vm896_vm6, %v794_v55, %v929_v63  ;;  %v969_v55 = vsel %vm904_vm4, %v834_v26, %v937_v44  ;;  %v940_v59 = vmul.f32 %v11656_v42, %v849_v50  ;;  %v859_v45 = vadd.f32 %v11717_v37, %v11654_v40 }
 0x11c   : > { %vm1387_vm8 = vcmp.gt.f32.partialorder %v1383_v2, 0.0  ;;  %v1389_v11 = vmul.f32 %v1383_v2, %v11656_v42  ;;  %10892 = vmatprep.mubr.msk.f32.mxu1 %vm556_vm1, %v961_v4  ;;  %v970_v60 = vsel %vm905_vm5, %v839_v20, %v938_v30  ;;  %v941_v62 = vmul.f32 %v11656_v42, %v854_v56 }
 0x11d   : > { %10893 = vmatmul.mubr.msk.f32.gmra.mrb[30].mxu1 %vm556_vm1, %v962_v61  ;;  %v10933_v14 = vpop.f32.mrb[18].mxu0  ;;  %v971_v63 = vsel %vm906_vm7, %v844_v46, %v939_v53  ;;  %v864_v0 = vadd.f32 %v11654_v40, %v11739_v58  ;;  %vm908_vm9 = vcmp.gt.f32.partialorder %v854_v56, 0.0  ;;  %vm909_vm10 = vcmp.gt.f32.partialorder %v859_v45, 0.0 }
 0x11e   : > { %v11765_v15 = vsel %vm1387_vm8, %v1383_v2, %v1389_v11  ;;  %v1553_v16 = vadd.f32 %v10933_v14, %v11654_v40  ;;  %v1547_v18 = vpop.f32.mrb[19].mxu0  ;;  %10895 = vmatprep.mubr.msk.f32.mxu1 %vm556_vm1, %v963_v6  ;;  %vm907_vm8 = vcmp.gt.f32.partialorder %v849_v50, 0.0  ;;  %v942_v2 = vmul.f32 %v11656_v42, %v859_v45 }
 0x11f   : > { %v1548_v21 = vadd.f32 %v11654_v40, %v1547_v18  ;;  %v869_v58 = vadd.f32 %v11731_v54, %v11654_v40  ;;  %v972_v4 = vsel %vm907_vm8, %v849_v50, %v940_v59  ;;  %v943_v6 = vmul.f32 %v11656_v42, %v864_v0 }
 0x120   : > { %vm1557_vm11 = vcmp.gt.f32.partialorder %v1553_v16, 0.0  ;;  %v1559_v25 = vmul.f32 %v1553_v16, %v11656_v42  ;;  %v973_v8 = vsel %vm908_vm9, %v854_v56, %v941_v62  ;;  %v874_v11 = vadd.f32 %v11654_v40, %v11760_v12 }
 0x121   : > { %vm1556_vm13 = vcmp.gt.f32.partialorder %v1548_v21, 0.0  ;;  %v1558_v28 = vmul.f32 %v1548_v21, %v11656_v42  ;;  %10896 = vmatmul.mubr.msk.f32.gmra.mrb[32].mxu1 %vm556_vm1, %v964_v10  ;;  %v10943_v7 = vpop.f32.mrb[20].mxu0  ;;  %vm910_vm12 = vcmp.gt.f32.partialorder %v864_v0, 0.0  ;;  %v944_v13 = vmul.f32 %v11656_v42, %v869_v58 }
 0x122   : > { %v11782_v31 = vsel %vm1557_vm11, %v1553_v16, %v1559_v25  ;;  %vm1873_vm14 = vcmp.gt.f32.partialorder %v10943_v7, 0.0  ;;  %v1906_v33 = vmul.f32 %v10943_v7, %v11773_v22  ;;  %v1713_v34 = vpop.f32.mrb[21].mxu0  ;;  %10898 = vmatprep.mubr.msk.f32.mxu1 %vm556_vm1, %v965_v24  ;;  %v879_v12 = vadd.f32 %v11755_v9, %v11654_v40 }
 0x123   : > { %v11789_v36 = vsel %vm1556_vm13, %v1548_v21, %v1558_v28  ;;  %v1905_v41 = vmul.f32 %v11773_v22, %v1713_v34  ;;  %vm1872_vm3 = vcmp.gt.f32.partialorder %v1713_v34, 0.0  ;;  %v974_v14 = vsel %vm909_vm10, %v859_v45, %v942_v2 }
 0x124   : > { %v11792_v43 = vsel %vm1873_vm14, %v10943_v7, %v1906_v33  ;;  %vm911_vm13 = vcmp.gt.f32.partialorder %v869_v58, 0.0  ;;  %v945_v16 = vmul.f32 %v11656_v42, %v874_v11  ;;  %v975_v18 = vsel %vm910_vm12, %v864_v0, %v943_v6 }
 0x125   : > { %2651 = vrot.lane.b32.xlu1 %v11792_v43, %s11292_s27  ;;  %2298 = vrot.lane.b32.xlu0 %v11792_v43, %s11293_s28  ;;  %v10946_v17 = vpop.f32.mrb[22].mxu0  ;;  %v11809_v52 = vsel %vm1872_vm3, %v1713_v34, %v1905_v41  ;;  %vm912_vm14 = vcmp.gt.f32.partialorder %v874_v11, 0.0  ;;  %v1378_v9 = vadd.f32 %v11654_v40, %v11750_v3  ;;  %v946_v23 = vmul.f32 %v11656_v42, %v879_v12 }
 0x126   : > { %10899 = vmatmul.mubr.msk.f32.gmra.mrb[34].mxu1 %vm556_vm1, %v966_v29  ;;  %v1908_v47 = vmul.f32 %v10946_v17, %v11773_v22  ;;  %v1723_v48 = vpop.f32.mrb[23].mxu0  ;;  %vm1875_vm6 = vcmp.gt.f32.partialorder %v10946_v17, 0.0  ;;  %v976_v24 = vsel %vm911_vm13, %v869_v58, %v944_v13  ;;  %vm913_vm15 = vcmp.gt.f32.partialorder %v879_v12, 0.0 }
 0x127   : > { %10901 = vmatprep.mubr.msk.f32.mxu1 %vm556_vm1, %v967_v35  ;;  %v1907_v5 = vmul.f32 %v11773_v22, %v1723_v48  ;;  %vm1874_vm11 = vcmp.gt.f32.partialorder %v1723_v48, 0.0  ;;  %v977_v28 = vsel %vm912_vm14, %v874_v11, %v945_v16  ;;  %v1388_v3 = vmul.f32 %v1378_v9, %v11656_v42 }
 0x128   : > { %v11821_v27 = vsel %vm1875_vm6, %v10946_v17, %v1908_v47  ;;  %vm1386_vm5 = vcmp.gt.f32.partialorder %v1378_v9, 0.0  ;;  %v978_v29 = vsel %vm913_vm15, %v879_v12, %v946_v23  ;;  %vm18315_vm9 = vcmask 15360  }
 0x129   : > { %3004 = vrot.lane.b32.xlu1 %v11792_v43, %s11294_s29  ;;  %2296 = vrot.lane.b32.xlu0 %v11809_v52, %s11293_s28  ;;  %v11818_v57 = vpop.f32.mrb[24].mxu0  ;;  %v11864_v10 = vsel %vm1874_vm11, %v1723_v48, %v1907_v5  ;;  %v1390_v34 = vsel %vm1386_vm5, %v1378_v9, %v1388_v3 }
 0x12a   : > { %10902 = vmatmul.mubr.msk.f32.gmra.mrb[36].mxu1 %vm556_vm1, %v968_v49  ;;  %v11823_v51 = vpop.f32.mrb[25].mxu0  ;;  %v1910_v25 = vmul.f32 %v11818_v57, %v11773_v22  ;;  %vm1877_vm3 = vcmp.gt.f32.partialorder %v11818_v57, 0.0 }
 0x12b   : > { %10904 = vmatprep.mubr.msk.f32.mxu1 %vm556_vm1, %v969_v55  ;;  %v1909_v26 = vmul.f32 %v11773_v22, %v11823_v51  ;;  %vm1876_vm4 = vcmp.gt.f32.partialorder %v11823_v51, 0.0 }
 0x12c   : > { %v11898_v32 = vsel %vm1877_vm3, %v11818_v57, %v1910_v25 }
 0x12d   : > { %2649 = vrot.lane.b32.xlu0 %v11809_v52, %s11292_s27  ;;  %2302 = vrot.lane.b32.xlu1 %v11821_v27, %s11293_s28  ;;  %v11837_v1 = vpop.f32.mrb[26].mxu0  ;;  %v11901_v33 = vsel %vm1876_vm4, %v11823_v51, %v1909_v26 }
 0x12e   : > { %10905 = vmatmul.mubr.msk.f32.gmra.mrb[38].mxu1 %vm556_vm1, %v970_v60  ;;  %v11840_v37 = vpop.f32.mrb[27].mxu0  ;;  %v1912_v48 = vmul.f32 %v11837_v1, %v11773_v22  ;;  %vm1879_vm10 = vcmp.gt.f32.partialorder %v11837_v1, 0.0 }
 0x12f   : > { %10907 = vmatprep.mubr.msk.f32.mxu1 %vm556_vm1, %v971_v63  ;;  %v1911_v49 = vmul.f32 %v11773_v22, %v11840_v37  ;;  %vm1878_vm11 = vcmp.gt.f32.partialorder %v11840_v37, 0.0 }
 0x130   : > { %v1944_v55 = vsel %vm1879_vm10, %v11837_v1, %v1912_v48 }
 0x131   : > { %3002 = vrot.lane.b32.xlu0 %v11809_v52, %s11294_s29  ;;  %2655 = vrot.lane.b32.xlu1 %v11821_v27, %s11292_s27  ;;  %v11854_v61 = vpop.f32.mrb[28].mxu0  ;;  %v1943_v56 = vsel %vm1878_vm11, %v11840_v37, %v1911_v49 }
 0x132   : > { %10908 = vmatmul.mubr.msk.f32.gmra.mrb[40].mxu1 %vm556_vm1, %v972_v4  ;;  %v11857_v54 = vpop.f32.mrb[29].mxu0  ;;  %v1914_v37 = vmul.f32 %v11854_v61, %v11773_v22  ;;  %vm1881_vm4 = vcmp.gt.f32.partialorder %v11854_v61, 0.0 }
 0x133   : > { %10910 = vmatprep.mubr.msk.f32.mxu1 %vm556_vm1, %v973_v8  ;;  %v1913_v2 = vmul.f32 %v11773_v22, %v11857_v54  ;;  %vm1880_vm5 = vcmp.gt.f32.partialorder %v11857_v54, 0.0 }
 0x134   : > { %v1946_v11 = vsel %vm1881_vm4, %v11854_v61, %v1914_v37 }
 0x135   : > { %3008 = vrot.lane.b32.xlu1 %v11821_v27, %s11294_s29  ;;  %2653 = vrot.lane.b32.xlu0 %v11864_v10, %s11292_s27  ;;  %v11871_v19 = vpop.f32.mrb[30].mxu0  ;;  %v1945_v13 = vsel %vm1880_vm5, %v11857_v54, %v1913_v2 }
 0x136   : > { %10911 = vmatmul.mubr.msk.f32.gmra.mrb[42].mxu1 %vm556_vm1, %v974_v14  ;;  %v11876_v21 = vpop.f32.mrb[31].mxu0 }
 0x137   : > { %10913 = vmatprep.mubr.msk.f32.mxu1 %vm556_vm1, %v975_v18  ;;  %v1915_v12 = vmul.f32 %v11773_v22, %v11876_v21  ;;  %v1916_v18 = vmul.f32 %v11871_v19, %v11773_v22 }
 0x139   : > { %3006 = vrot.lane.b32.xlu0 %v11864_v10, %s11294_s29  ;;  %2300 = vrot.lane.b32.xlu1 %v11864_v10, %s11293_s28  ;;  %v11890_v40 = vpop.f32.mrb[32].mxu0 }
 0x13a   : > { %10914 = vmatmul.mubr.msk.f32.gmra.mrb[44].mxu1 %vm556_vm1, %v976_v24  ;;  %v11894_v7 = vpop.f32.mrb[33].mxu0 }
 0x13b   : > { %10916 = vmatprep.mubr.msk.f32.mxu1 %vm556_vm1, %v977_v28  ;;  %v1917_v23 = vmul.f32 %v11773_v22, %v11894_v7 }
 0x13d   : > { %2306 = vrot.lane.b32.xlu1 %v11898_v32, %s11293_s28  ;;  %2304 = vrot.lane.b32.xlu0 %v11901_v33, %s11293_s28  ;;  %v10964_v42 = vpop.f32.mrb[34].mxu0 }
 0x13e   : > { %10917 = vmatmul.mubr.msk.f32.gmra.mrb[46].mxu1 %vm556_vm1, %v978_v29  ;;  %vm1887_vm6 = vcmp.gt.f32.partialorder %v10964_v42, 0.0  ;;  %v1920_v20 = vmul.f32 %v10964_v42, %v11773_v22  ;;  %v11909_v35 = vpop.f32.mrb[35].mxu0 }
 0x13f   : > { %10926 = vmatprep.mubr.msk.f32.mxu1 %vm556_vm1, %v1390_v34 }
 0x140   : > { %v11912_v41 = vsel %vm1887_vm6, %v10964_v42, %v1920_v20  ;;  %v1919_v42 = vmul.f32 %v11773_v22, %v11909_v35 }
 0x141   : > { %2659 = vrot.lane.b32.xlu1 %v11898_v32, %s11292_s27  ;;  %2657 = vrot.lane.b32.xlu0 %v11901_v33, %s11292_s27  ;;  %v10967_v44 = vpop.f32.mrb[36].mxu0 }
 0x142   : > { %10927 = vmatmul.mubr.msk.f32.vlgmr.msra.gmra.mrb[48].mxu1 %vm556_vm1, %v11765_v15  ;;  %vm1889_vm7 = vcmp.gt.f32.partialorder %v10967_v44, 0.0  ;;  %v1922_v46 = vmul.f32 %v10967_v44, %v11773_v22  ;;  %v1793_v17 = vpop.f32.mrb[37].mxu0 }
 0x143   : > { %10936 = vmatprep.mubr.msk.f32.mxu1 %vm556_vm1, %v11789_v36  ;;  %10935 = vmatpush3.msk.msra.mxu1 %vm653_vm0, %v11625_v38  ;;  %vm1888_vm8 = vcmp.gt.f32.partialorder %v1793_v17, 0.0  ;;  %v1921_v47 = vmul.f32 %v11773_v22, %v1793_v17 }
 0x144   : > { %10989 = vmatprep.subr.msk.mxu1 %vm2067_vm2, %v11643_v39  ;;  %v11932_v15 = vsel %vm1889_vm7, %v10967_v44, %v1922_v46 }
 0x145   : > { %3012 = vrot.lane.b32.xlu1 %v11898_v32, %s11294_s29  ;;  %3010 = vrot.lane.b32.xlu0 %v11901_v33, %s11294_s29  ;;  %v11940_v38 = vsel %vm1888_vm8, %v1793_v17, %v1921_v47  ;;  %v10970_v36 = vpop.f32.mrb[38].mxu0  ;;  %vm1882_vm8 = vcmp.gt.f32.partialorder %v11876_v21, 0.0 }
 0x146   : > { %10937 = vmatmul.mubr.msk.f32.vlgmr.msra.gmra.mrb[50].mxu1 %vm556_vm1, %v11782_v31  ;;  %vm1891_vm0 = vcmp.gt.f32.partialorder %v10970_v36, 0.0  ;;  %v1924_v30 = vmul.f32 %v10970_v36, %v11773_v22  ;;  %v1803_v50 = vpop.f32.mrb[39].mxu0  ;;  %v1947_v24 = vsel %vm1882_vm8, %v11876_v21, %v1915_v12  ;;  %v1918_v21 = vmul.f32 %v11890_v40, %v11773_v22 }
 0x147   : > { %10991 = vmatprep.mubr.msk.f32.mxu1 %vm18315_vm9, %v11809_v52  ;;  %10990 = vmatpush3.msk.msra.mxu1 %vm2067_vm2, %v11643_v39  ;;  %vm1890_vm12 = vcmp.gt.f32.partialorder %v1803_v50, 0.0  ;;  %v1923_v53 = vmul.f32 %v11773_v22, %v1803_v50  ;;  %vm18297_vm8 = vcmask 97280  }
 0x148   : > { %v11952_v57 = vsel %vm1891_vm0, %v10970_v36, %v1924_v30  ;;  %11089 = vmatprep.subr.msk.mxu1 %vm2067_vm2, %v11643_v39  ;;  %vm1883_vm0 = vcmp.gt.f32.partialorder %v11871_v19, 0.0 }
 0x149   : > { %2310 = vrot.lane.b32.xlu1 %v1944_v55, %s11293_s28  ;;  %2308 = vrot.lane.b32.xlu0 %v1943_v56, %s11293_s28  ;;  %v10973_v31 = vpop.f32.mrb[40].mxu0  ;;  %v11958_v52 = vsel %vm1890_vm12, %v1803_v50, %v1923_v53  ;;  %vm1884_vm12 = vcmp.gt.f32.partialorder %v11894_v7, 0.0 }
 0x14a   : > { %10992 = vmatmul.mubr.msk.f32.vlgmr.msra.gmra.mrb[52].mxu1 %vm18315_vm9, %v11792_v43  ;;  %vm1893_vm13 = vcmp.gt.f32.partialorder %v10973_v31, 0.0  ;;  %v1926_v51 = vmul.f32 %v10973_v31, %v11773_v22  ;;  %v1813_v59 = vpop.f32.mrb[41].mxu0  ;;  %v1949_v34 = vsel %vm1884_vm12, %v11894_v7, %v1917_v23  ;;  %vm6800_vm12 = vcmask 228352  }
 0x14b   : > { %10994 = vmatprep.mubr.msk.f32.mxu1 %vm18315_vm9, %v11864_v10  ;;  %vm1892_vm14 = vcmp.gt.f32.partialorder %v1813_v59, 0.0  ;;  %v1925_v45 = vmul.f32 %v11773_v22, %v1813_v59  ;;  %11090 = vmatpush3.msk.msra.mxu1 %vm2067_vm2, %v11643_v39 }
 0x14c   : > { %v11968_v60 = vsel %vm1893_vm13, %v10973_v31, %v1926_v51 }
 0x14d   : > { %2663 = vrot.lane.b32.xlu1 %v1944_v55, %s11292_s27  ;;  %2661 = vrot.lane.b32.xlu0 %v1943_v56, %s11292_s27  ;;  %v10976_v43 = vpop.f32.mrb[42].mxu0  ;;  %v11972_v62 = vsel %vm1892_vm14, %v1813_v59, %v1925_v45 }
 0x14e   : > { %10995 = vmatmul.mubr.msk.f32.gmra.mrb[54].mxu1 %vm18315_vm9, %v11821_v27  ;;  %vm1895_vm15 = vcmp.gt.f32.partialorder %v10976_v43, 0.0  ;;  %v1928_v63 = vmul.f32 %v10976_v43, %v11773_v22  ;;  %v1823_v0 = vpop.f32.mrb[43].mxu0 }
 0x14f   : > { %10997 = vmatprep.mubr.msk.f32.mxu1 %vm18315_vm9, %v11901_v33  ;;  %vm1894_vm3 = vcmp.gt.f32.partialorder %v1823_v0, 0.0  ;;  %v1927_v1 = vmul.f32 %v11773_v22, %v1823_v0 }
 0x150   : > { %v11984_v58 = vsel %vm1895_vm15, %v10976_v43, %v1928_v63  ;;  %vm1885_vm15 = vcmp.gt.f32.partialorder %v11890_v40, 0.0 }
 0x151   : > { %3016 = vrot.lane.b32.xlu1 %v1944_v55, %s11294_s29  ;;  %3014 = vrot.lane.b32.xlu0 %v1943_v56, %s11294_s29  ;;  %v10979_v27 = vpop.f32.mrb[44].mxu0  ;;  %v11990_v4 = vsel %vm1894_vm3, %v1823_v0, %v1927_v1  ;;  %vm1886_vm3 = vcmp.gt.f32.partialorder %v11909_v35, 0.0  ;;  %v1950_v7 = vsel %vm1885_vm15, %v11890_v40, %v1918_v21  ;;  %vm6851_vm15 = vcmask 326656  }
 0x152   : > { %10998 = vmatmul.mubr.msk.f32.gmra.mrb[56].mxu1 %vm18315_vm9, %v11898_v32  ;;  %vm1897_vm6 = vcmp.gt.f32.partialorder %v10979_v27, 0.0  ;;  %v1930_v5 = vmul.f32 %v10979_v27, %v11773_v22  ;;  %v1833_v6 = vpop.f32.mrb[45].mxu0  ;;  %v1948_v32 = vsel %vm1883_vm0, %v11871_v19, %v1916_v18  ;;  %v1951_v48 = vsel %vm1886_vm3, %v11909_v35, %v1919_v42 }
 0x153   : > { %11000 = vmatprep.mubr.msk.f32.mxu1 %vm18315_vm9, %v1943_v56  ;;  %vm1896_vm7 = vcmp.gt.f32.partialorder %v1833_v6, 0.0  ;;  %v1929_v8 = vmul.f32 %v11773_v22, %v1833_v6  ;;  %vm18290_vm0 = vcmask 195584   ;;  %vm6868_vm3 = vcmask 359424  }
 0x154   : > { %v12001_v14 = vsel %vm1897_vm6, %v10979_v27, %v1930_v5  ;;  %vm3484_vm6 = vcmask 1046528  }
 0x155   : > { %2314 = vrot.lane.b32.xlu1 %v1946_v11, %s11293_s28  ;;  %2312 = vrot.lane.b32.xlu0 %v1945_v13, %s11293_s28  ;;  %v10982_v10 = vpop.f32.mrb[46].mxu0  ;;  %v12006_v16 = vsel %vm1896_vm7, %v1833_v6, %v1929_v8  ;;  %vm18299_vm7 = vcmask 64512  }
 0x156   : > { %11001 = vmatmul.mubr.msk.f32.gmra.mrb[58].mxu1 %vm18315_vm9, %v1944_v55  ;;  %vm1899_vm10 = vcmp.gt.f32.partialorder %v10982_v10, 0.0  ;;  %v1932_v61 = vmul.f32 %v10982_v10, %v11773_v22  ;;  %v1843_v54 = vpop.f32.mrb[47].mxu0 }
 0x157   : > { %11003 = vmatprep.mubr.msk.f32.mxu1 %vm18315_vm9, %v1945_v13  ;;  %vm1898_vm11 = vcmp.gt.f32.partialorder %v1843_v54, 0.0  ;;  %v1931_v9 = vmul.f32 %v11773_v22, %v1843_v54 }
 0x158   : > { %v12018_v25 = vsel %vm1899_vm10, %v10982_v10, %v1932_v61  ;;  %vm6749_vm10 = vcmask 130048  }
 0x159   : > { %2667 = vrot.lane.b32.xlu1 %v1946_v11, %s11292_s27  ;;  %2665 = vrot.lane.b32.xlu0 %v1945_v13, %s11292_s27  ;;  %v10985_v26 = vpop.f32.mrb[48].mxu0  ;;  %v12023_v28 = vsel %vm1898_vm11, %v1843_v54, %v1931_v9  ;;  %vm6766_vm11 = vcmask 162816  }
 0x15a   : > { %11004 = vmatmul.mubr.msk.f32.gmra.mrb[60].mxu1 %vm18315_vm9, %v1946_v11  ;;  %vm1901_vm13 = vcmp.gt.f32.partialorder %v10985_v26, 0.0  ;;  %v1934_v3 = vmul.f32 %v10985_v26, %v11773_v22  ;;  %v1853_v29 = vpop.f32.mrb[49].mxu0 }
 0x15b   : > { %11006 = vmatprep.mubr.msk.f32.mxu1 %vm18315_vm9, %v1947_v24  ;;  %vm1900_vm14 = vcmp.gt.f32.partialorder %v1853_v29, 0.0  ;;  %v1933_v33 = vmul.f32 %v11773_v22, %v1853_v29 }
 0x15c   : > { %v12036_v20 = vsel %vm1901_vm13, %v10985_v26, %v1934_v3  ;;  %vm18295_vm13 = vcmask 261120  }
 0x15d   : > { %3020 = vrot.lane.b32.xlu1 %v1946_v11, %s11294_s29  ;;  %3018 = vrot.lane.b32.xlu0 %v1945_v13, %s11294_s29  ;;  %v10988_v44 = vpop.f32.mrb[50].mxu0  ;;  %v12041_v19 = vsel %vm1900_vm14, %v1853_v29, %v1933_v33  ;;  %vm6834_vm14 = vcmask 293888  }
 0x15e   : > { %11007 = vmatmul.mubr.msk.f32.gmra.mrb[62].mxu1 %vm18315_vm9, %v1948_v32  ;;  %vm1903_vm4 = vcmp.gt.f32.partialorder %v10988_v44, 0.0  ;;  %v1936_v46 = vmul.f32 %v10988_v44, %v11773_v22  ;;  %v1863_v17 = vpop.f32.mrb[51].mxu0 }
 0x15f   : > { %11009 = vmatprep.mubr.msk.f32.mxu1 %vm18315_vm9, %v1949_v34  ;;  %vm1902_vm5 = vcmp.gt.f32.partialorder %v1863_v17, 0.0  ;;  %v1935_v47 = vmul.f32 %v11773_v22, %v1863_v17 }
 0x160   : > { %v12049_v49 = vsel %vm1903_vm4, %v10988_v44, %v1936_v46  ;;  %vm6885_vm4 = vcmask 392192  }
 0x161   : > { %2318 = vrot.lane.b32.xlu1 %v1948_v32, %s11293_s28  ;;  %2316 = vrot.lane.b32.xlu0 %v1947_v24, %s11293_s28  ;;  %v12053_v36 = vsel %vm1902_vm5, %v1863_v17, %v1935_v47  ;;  %vm6902_vm5 = vcmask 424960  }
 0x162   : > { %11010 = vmatmul.mubr.msk.f32.gmra.mrb[64].mxu1 %vm18315_vm9, %v1950_v7 }
 0x163   : > { %11012 = vmatprep.mubr.msk.f32.mxu1 %vm18315_vm9, %v1951_v48 }
 0x165   : > { %2671 = vrot.lane.b32.xlu1 %v1948_v32, %s11292_s27  ;;  %2669 = vrot.lane.b32.xlu0 %v1947_v24, %s11292_s27 }
 0x166   : > { %11013 = vmatmul.mubr.msk.f32.gmra.mrb[66].mxu1 %vm18315_vm9, %v11912_v41 }
 0x167   : > { %11015 = vmatprep.mubr.msk.f32.mxu1 %vm18315_vm9, %v11940_v38 }
 0x169   : > { %3024 = vrot.lane.b32.xlu1 %v1948_v32, %s11294_s29  ;;  %3022 = vrot.lane.b32.xlu0 %v1947_v24, %s11294_s29 }
 0x16a   : > { %11016 = vmatmul.mubr.msk.f32.gmra.mrb[68].mxu1 %vm18315_vm9, %v11932_v15 }
 0x16b   : > { %11018 = vmatprep.mubr.msk.f32.mxu1 %vm18315_vm9, %v11958_v52 }
 0x16d   : > { %2322 = vrot.lane.b32.xlu1 %v1950_v7, %s11293_s28  ;;  %2320 = vrot.lane.b32.xlu0 %v1949_v34, %s11293_s28 }
 0x16e   : > { %11019 = vmatmul.mubr.msk.f32.gmra.mrb[70].mxu1 %vm18315_vm9, %v11952_v57 }
 0x16f   : > { %11021 = vmatprep.mubr.msk.f32.mxu1 %vm18315_vm9, %v11972_v62 }
 0x171   : > { %2675 = vrot.lane.b32.xlu1 %v1950_v7, %s11292_s27  ;;  %2673 = vrot.lane.b32.xlu0 %v1949_v34, %s11292_s27 }
 0x172   : > { %11022 = vmatmul.mubr.msk.f32.gmra.mrb[72].mxu1 %vm18315_vm9, %v11968_v60 }
 0x173   : > { %11024 = vmatprep.mubr.msk.f32.mxu1 %vm18315_vm9, %v11990_v4 }
 0x175   : > { %3028 = vrot.lane.b32.xlu1 %v1950_v7, %s11294_s29  ;;  %3026 = vrot.lane.b32.xlu0 %v1949_v34, %s11294_s29 }
 0x176   : > { %11025 = vmatmul.mubr.msk.f32.gmra.mrb[74].mxu1 %vm18315_vm9, %v11984_v58 }
 0x177   : > { %11027 = vmatprep.mubr.msk.f32.mxu1 %vm18315_vm9, %v12006_v16 }
 0x179   : > { %2326 = vrot.lane.b32.xlu1 %v11912_v41, %s11293_s28  ;;  %2324 = vrot.lane.b32.xlu0 %v1951_v48, %s11293_s28 }
 0x17a   : > { %11028 = vmatmul.mubr.msk.f32.gmra.mrb[76].mxu1 %vm18315_vm9, %v12001_v14 }
 0x17b   : > { %11030 = vmatprep.mubr.msk.f32.mxu1 %vm18315_vm9, %v12023_v28 }
 0x17d   : > { %2679 = vrot.lane.b32.xlu1 %v11912_v41, %s11292_s27  ;;  %2677 = vrot.lane.b32.xlu0 %v1951_v48, %s11292_s27 }
 0x17e   : > { %11031 = vmatmul.mubr.msk.f32.gmra.mrb[78].mxu1 %vm18315_vm9, %v12018_v25 }
 0x17f   : > { %11033 = vmatprep.mubr.msk.f32.mxu1 %vm18315_vm9, %v12041_v19 }
 0x181   : > { %3032 = vrot.lane.b32.xlu1 %v11912_v41, %s11294_s29  ;;  %3030 = vrot.lane.b32.xlu0 %v1951_v48, %s11294_s29 }
 0x182   : > { %11034 = vmatmul.mubr.msk.f32.gmra.mrb[80].mxu1 %vm18315_vm9, %v12036_v20 }
 0x183   : > { %11036 = vmatprep.mubr.msk.f32.mxu1 %vm18315_vm9, %v12053_v36 }
 0x185   : > { %2330 = vrot.lane.b32.xlu1 %v11932_v15, %s11293_s28  ;;  %2328 = vrot.lane.b32.xlu0 %v11940_v38, %s11293_s28 }
 0x186   : > { %11037 = vmatmul.mubr.msk.f32.gmra.mrb[82].mxu1 %vm18315_vm9, %v12049_v49 }
 0x189   : > { %2683 = vrot.lane.b32.xlu1 %v11932_v15, %s11292_s27  ;;  %2681 = vrot.lane.b32.xlu0 %v11940_v38, %s11292_s27 }
 0x18d   : > { %3036 = vrot.lane.b32.xlu1 %v11932_v15, %s11294_s29  ;;  %3034 = vrot.lane.b32.xlu0 %v11940_v38, %s11294_s29 }
 0x191   : > { %2334 = vrot.lane.b32.xlu1 %v11952_v57, %s11293_s28  ;;  %2332 = vrot.lane.b32.xlu0 %v11958_v52, %s11293_s28 }
 0x195   : > { %2687 = vrot.lane.b32.xlu1 %v11952_v57, %s11292_s27  ;;  %2685 = vrot.lane.b32.xlu0 %v11958_v52, %s11292_s27 }
 0x197   : > { %v2652_v22 = vpop.permute.xlu1 %2651  ;;  %v2299_v40 = vpop.permute.xlu0 %2298 }
 0x199   : > { %3040 = vrot.lane.b32.xlu1 %v11952_v57, %s11294_s29  ;;  %3038 = vrot.lane.b32.xlu0 %v11958_v52, %s11294_s29 }
 0x19b   : > { %v12134_v35 = vpop.permute.xlu1 %3004  ;;  %v2297_v41 = vpop.permute.xlu0 %2296 }
 0x19c   : > { %11041 = vmatprep.mubr.msk.f32.mxu0 %vm18315_vm9, %v2297_v41 }
 0x19d   : > { %11042 = vmatmul.mubr.msk.f32.vlgmr.msra.gmra.mrb[52].mxu0 %vm18315_vm9, %v2299_v40  ;;  %2338 = vrot.lane.b32.xlu1 %v11968_v60, %s11293_s28 }
 0x19e   : > { %2336 = vrot.lane.b32.xlu0 %v11972_v62, %s11293_s28  ;;  %11140 = vmatpush3.msk.msra.mxu0 %vm2067_vm2, %v11643_v39  ;;  %vm18296_vm2 = vcmask 1040384  }
 0x19f   : > { %v2650_v15 = vpop.permute.xlu0 %2649  ;;  %v2303_v38 = vpop.permute.xlu1 %2302 }
 0x1a0   : > { %11091 = vmatprep.mubr.msk.f32.mxu1 %vm18315_vm9, %v2650_v15 }
 0x1a1   : > { %2691 = vrot.lane.b32.xlu1 %v11968_v60, %s11292_s27  ;;  %11092 = vmatmul.mubr.msk.f32.vlgmr.msra.gmra.mrb[84].mxu1 %vm18315_vm9, %v2652_v22 }
 0x1a2   : > { %2689 = vrot.lane.b32.xlu0 %v11972_v62, %s11292_s27 }
 0x1a3   : > { %v12150_v30 = vpop.permute.xlu0 %3002  ;;  %v2656_v50 = vpop.permute.xlu1 %2655 }
 0x1a5   : > { %3044 = vrot.lane.b32.xlu1 %v11968_v60, %s11294_s29 }
 0x1a6   : > { %3042 = vrot.lane.b32.xlu0 %v11972_v62, %s11294_s29 }
 0x1a7   : > { %v12156_v39 = vpop.permute.xlu1 %3008  ;;  %v2654_v53 = vpop.permute.xlu0 %2653 }
 0x1a8   : > { %18329 = vst [vmem:[#allocation5_spill] sm:$0xff] %v12156_v39  ;;  %11094 = vmatprep.mubr.msk.f32.mxu1 %vm18315_vm9, %v2654_v53 }
 0x1a9   : > { %2342 = vrot.lane.b32.xlu1 %v11984_v58, %s11293_s28  ;;  %11095 = vmatmul.mubr.msk.f32.gmra.mrb[86].mxu1 %vm18315_vm9, %v2656_v50 }
 0x1aa   : > { %2340 = vrot.lane.b32.xlu0 %v11990_v4, %s11293_s28 }
 0x1ab   : > { %v12164_v55 = vpop.permute.xlu0 %3006  ;;  %v2301_v56 = vpop.permute.xlu1 %2300 }
 0x1ac   : > { %11044 = vmatprep.mubr.msk.f32.mxu0 %vm18315_vm9, %v2301_v56 }
 0x1ad   : > { %11045 = vmatmul.mubr.msk.f32.gmra.mrb[54].mxu0 %vm18315_vm9, %v2303_v38  ;;  %2695 = vrot.lane.b32.xlu1 %v11984_v58, %s11292_s27 }
 0x1ae   : > { %2693 = vrot.lane.b32.xlu0 %v11990_v4, %s11292_s27 }
 0x1af   : > { %v2307_v57 = vpop.permute.xlu1 %2306  ;;  %v2305_v31 = vpop.permute.xlu0 %2304 }
 0x1b0   : > { %11047 = vmatprep.mubr.msk.f32.mxu0 %vm18315_vm9, %v2305_v31 }
 0x1b1   : > { %11048 = vmatmul.mubr.msk.f32.gmra.mrb[56].mxu0 %vm18315_vm9, %v2307_v57  ;;  %3048 = vrot.lane.b32.xlu1 %v11984_v58, %s11294_s29 }
 0x1b2   : > { %3046 = vrot.lane.b32.xlu0 %v11990_v4, %s11294_s29 }
 0x1b3   : > { %v2660_v52 = vpop.permute.xlu1 %2659  ;;  %v2658_v51 = vpop.permute.xlu0 %2657 }
 0x1b4   : > { %11097 = vmatprep.mubr.msk.f32.mxu1 %vm18315_vm9, %v2658_v51 }
 0x1b5   : > { %2346 = vrot.lane.b32.xlu1 %v12001_v14, %s11293_s28  ;;  %11098 = vmatmul.mubr.msk.f32.gmra.mrb[88].mxu1 %vm18315_vm9, %v2660_v52 }
 0x1b6   : > { %2344 = vrot.lane.b32.xlu0 %v12006_v16, %s11293_s28 }
 0x1b7   : > { %v12184_v59 = vpop.permute.xlu1 %3012  ;;  %v12186_v45 = vpop.permute.xlu0 %3010 }
 0x1b8   : > { %18330 = vst [vmem:[#allocation6_spill] sm:$0xff] %v12184_v59  ;;  %18331 = vst [vmem:[#allocation7_spill] sm:$0xff] %v12186_v45 }
 0x1b9   : > { %2699 = vrot.lane.b32.xlu1 %v12001_v14, %s11292_s27 }
 0x1ba   : > { %2697 = vrot.lane.b32.xlu0 %v12006_v16, %s11292_s27 }
 0x1bb   : > { %v2311_v60 = vpop.permute.xlu1 %2310  ;;  %v2309_v43 = vpop.permute.xlu0 %2308 }
 0x1bc   : > { %11050 = vmatprep.mubr.msk.f32.mxu0 %vm18315_vm9, %v2309_v43 }
 0x1bd   : > { %11051 = vmatmul.mubr.msk.f32.gmra.mrb[58].mxu0 %vm18315_vm9, %v2311_v60  ;;  %3052 = vrot.lane.b32.xlu1 %v12001_v14, %s11294_s29 }
 0x1be   : > { %3050 = vrot.lane.b32.xlu0 %v12006_v16, %s11294_s29 }
 0x1bf   : > { %v2664_v62 = vpop.permute.xlu1 %2663  ;;  %v2662_v63 = vpop.permute.xlu0 %2661 }
 0x1c0   : > { %11100 = vmatprep.mubr.msk.f32.mxu1 %vm18315_vm9, %v2662_v63 }
 0x1c1   : > { %2350 = vrot.lane.b32.xlu1 %v12018_v25, %s11293_s28  ;;  %11101 = vmatmul.mubr.msk.f32.gmra.mrb[90].mxu1 %vm18315_vm9, %v2664_v62 }
 0x1c2   : > { %2348 = vrot.lane.b32.xlu0 %v12023_v28, %s11293_s28 }
 0x1c3   : > { %v12204_v0 = vpop.permute.xlu1 %3016  ;;  %v12206_v1 = vpop.permute.xlu0 %3014 }
 0x1c4   : > { %18332 = vst [vmem:[#allocation8_spill] sm:$0xff] %v12204_v0  ;;  %18333 = vst [vmem:[#allocation9_spill] sm:$0xff] %v12206_v1 }
 0x1c5   : > { %2703 = vrot.lane.b32.xlu1 %v12018_v25, %s11292_s27 }
 0x1c6   : > { %2701 = vrot.lane.b32.xlu0 %v12023_v28, %s11292_s27 }
 0x1c7   : > { %v2315_v37 = vpop.permute.xlu1 %2314  ;;  %v2313_v2 = vpop.permute.xlu0 %2312 }
 0x1c8   : > { %11053 = vmatprep.mubr.msk.f32.mxu0 %vm18315_vm9, %v2313_v2 }
 0x1c9   : > { %11054 = vmatmul.mubr.msk.f32.gmra.mrb[60].mxu0 %vm18315_vm9, %v2315_v37  ;;  %3056 = vrot.lane.b32.xlu1 %v12018_v25, %s11294_s29 }
 0x1ca   : > { %3054 = vrot.lane.b32.xlu0 %v12023_v28, %s11294_s29 }
 0x1cb   : > { %v2668_v58 = vpop.permute.xlu1 %2667  ;;  %v2666_v27 = vpop.permute.xlu0 %2665 }
 0x1cc   : > { %11103 = vmatprep.mubr.msk.f32.mxu1 %vm18315_vm9, %v2666_v27 }
 0x1cd   : > { %2354 = vrot.lane.b32.xlu1 %v12036_v20, %s11293_s28  ;;  %11104 = vmatmul.mubr.msk.f32.gmra.mrb[92].mxu1 %vm18315_vm9, %v2668_v58 }
 0x1ce   : > { %2352 = vrot.lane.b32.xlu0 %v12041_v19, %s11293_s28 }
 0x1cf   : > { %v12224_v4 = vpop.permute.xlu1 %3020  ;;  %v12226_v5 = vpop.permute.xlu0 %3018 }
 0x1d0   : > { %18334 = vst [vmem:[#allocation10_spill] sm:$0xff] %v12224_v4  ;;  %18335 = vst [vmem:[#allocation11_spill] sm:$0xff] %v12226_v5 }
 0x1d1   : > { %2707 = vrot.lane.b32.xlu1 %v12036_v20, %s11292_s27 }
 0x1d2   : > { %2705 = vrot.lane.b32.xlu0 %v12041_v19, %s11292_s27 }
 0x1d3   : > { %v2319_v6 = vpop.permute.xlu1 %2318  ;;  %v2317_v8 = vpop.permute.xlu0 %2316 }
 0x1d4   : > { %v12232_v11 = vpop.f32.mrb[16].mxu1  ;;  %11056 = vmatprep.mubr.msk.f32.mxu0 %vm18315_vm9, %v2317_v8 }
 0x1d5   : > { %v3389_v13 = vrot.slane %v12232_v11, 7  ;;  %v18108_v12 = vrot.slane %v12232_v11, 1  ;;  %11057 = vmatmul.mubr.msk.f32.gmra.mrb[62].mxu0 %vm18315_vm9, %v2319_v6  ;;  %3060 = vrot.lane.b32.xlu1 %v12036_v20, %s11294_s29  ;;  %v12240_v14 = vpop.f32.mrb[17].mxu1 }
 0x1d6   : > { %3058 = vrot.lane.b32.xlu0 %v12041_v19, %s11294_s29  ;;  %v18109_v10 = vrot.slane %v12240_v14, 7  ;;  %v3485_v16 = vrot.slane %v12240_v14, 1 }
 0x1d7   : > { %v2672_v61 = vpop.permute.xlu1 %2671  ;;  %v2670_v54 = vpop.permute.xlu0 %2669 }
 0x1d8   : > { %v12246_v18 = vpop.f32.mrb[18].mxu1  ;;  %11106 = vmatprep.mubr.msk.f32.mxu1 %vm18315_vm9, %v2670_v54  ;;  %v12252_v9 = vsel %vm18296_vm2, %v18109_v10, %v3389_v13  ;;  %v12257_v23 = vsel %vm3484_vm6, %v3485_v16, %v18108_v12 }
 0x1d9   : > { %v3392_v24 = vrot.slane %v12246_v18, 7  ;;  %2358 = vrot.lane.b32.xlu1 %v12049_v49, %s11293_s28  ;;  %v12262_v25 = vpop.f32.mrb[19].mxu1  ;;  %11107 = vmatmul.mubr.msk.f32.gmra.mrb[94].mxu1 %vm18315_vm9, %v2672_v61 }
 0x1da   : > { %2356 = vrot.lane.b32.xlu0 %v12053_v36, %s11293_s28  ;;  %v18111_v26 = vrot.slane %v12262_v25, 7  ;;  %s11313_s28 = smov 28  }
 0x1db   : > { %v12268_v28 = vpop.permute.xlu1 %3024  ;;  %v12270_v3 = vpop.permute.xlu0 %3022 }
 0x1dc   : > { %18336 = vst [vmem:[#allocation12_spill] sm:$0xff] %v12268_v28  ;;  %18337 = vst [vmem:[#allocation13_spill] sm:$0xff] %v12270_v3  ;;  %v12272_v29 = vpop.f32.mrb[20].mxu1  ;;  %v12277_v21 = vsel %vm18296_vm2, %v18111_v26, %v3392_v24 }
 0x1dd   : > { %18338 = vst [vmem:[#allocation14_spill] sm:$0xff] %v12277_v21  ;;  %v3395_v32 = vrot.slane %v12272_v29, 7  ;;  %2711 = vrot.lane.b32.xlu1 %v12049_v49, %s11292_s27  ;;  %v12282_v33 = vpop.f32.mrb[21].mxu1 }
 0x1de   : > { %18339 = vst [vmem:[#allocation15_spill] sm:$0xff] %v12282_v33  ;;  %2709 = vrot.lane.b32.xlu0 %v12053_v36, %s11292_s27  ;;  %v18107_v42 = vrot.slane %v12282_v33, 7  ;;  %s11312_s27 = smov 60  }
 0x1df   : > { %v2323_v34 = vpop.permute.xlu1 %2322  ;;  %v2321_v20 = vpop.permute.xlu0 %2320 }
 0x1e0   : > { %v12287_v44 = vpop.f32.mrb[22].mxu1  ;;  %11059 = vmatprep.mubr.msk.f32.mxu0 %vm18315_vm9, %v2321_v20  ;;  %v12293_v19 = vsel %vm18296_vm2, %v18107_v42, %v3395_v32 }
 0x1e1   : > { %18340 = vst [vmem:[#allocation16_spill] sm:$0xff] %v12293_v19  ;;  %v3398_v46 = vrot.slane %v12287_v44, 7  ;;  %11060 = vmatmul.mubr.msk.f32.gmra.mrb[64].mxu0 %vm18315_vm9, %v2323_v34  ;;  %3064 = vrot.lane.b32.xlu1 %v12049_v49, %s11294_s29  ;;  %v12299_v17 = vpop.f32.mrb[23].mxu1 }
 0x1e2   : > { %18341 = vst [vmem:[#allocation17_spill] sm:$0xff] %v12299_v17  ;;  %3062 = vrot.lane.b32.xlu0 %v12053_v36, %s11294_s29  ;;  %v18106_v7 = vrot.slane %v12299_v17, 7  ;;  %s10574_s29 = sshll.u32 %s19475_s30, 5 }
 0x1e3   : > { %v2676_v47 = vpop.permute.xlu1 %2675  ;;  %v2674_v48 = vpop.permute.xlu0 %2673 }
 0x1e4   : > { %v12304_v22 = vpop.f32.mrb[24].mxu1  ;;  %11109 = vmatprep.mubr.msk.f32.mxu1 %vm18315_vm9, %v2674_v48  ;;  %v12310_v40 = vsel %vm18296_vm2, %v18106_v7, %v3398_v46 }
 0x1e5   : > { %18342 = vst [vmem:[#allocation18_spill] sm:$0xff] %v12310_v40  ;;  %v3401_v49 = vrot.slane %v12304_v22, 7  ;;  %v12313_v41 = vpop.f32.mrb[25].mxu1  ;;  %11110 = vmatmul.mubr.msk.f32.gmra.mrb[96].mxu1 %vm18315_vm9, %v2676_v47  ;;  %v12453_v40 = vmul.f32 0.5625, %v12232_v11 }
 0x1e6   : > { %18343 = vst [vmem:[#allocation19_spill] sm:$0xff] %v12313_v41  ;;  %v18105_v36 = vrot.slane %v12313_v41, 7 }
 0x1e7   : > { %v12317_v15 = vpop.permute.xlu1 %3028  ;;  %v12319_v38 = vpop.permute.xlu0 %3026 }
 0x1e8   : > { %18344 = vst [vmem:[#allocation20_spill] sm:$0xff] %v12317_v15  ;;  %18345 = vst [vmem:[#allocation21_spill] sm:$0xff] %v12319_v38  ;;  %v12321_v50 = vpop.f32.mrb[26].mxu1  ;;  %v12326_v53 = vsel %vm18296_vm2, %v18105_v36, %v3401_v49 }
 0x1e9   : > { %18346 = vst [vmem:[#allocation22_spill] sm:$0xff] %v12326_v53  ;;  %v3404_v56 = vrot.slane %v12321_v50, 7  ;;  %v12329_v57 = vpop.f32.mrb[27].mxu1 }
 0x1ea   : > { %18347 = vst [vmem:[#allocation23_spill] sm:$0xff] %v12329_v57  ;;  %v18104_v31 = vrot.slane %v12329_v57, 7 }
 0x1eb   : > { %v2327_v52 = vpop.permute.xlu1 %2326  ;;  %v2325_v51 = vpop.permute.xlu0 %2324 }
 0x1ec   : > { %v12332_v60 = vpop.f32.mrb[28].mxu1  ;;  %11062 = vmatprep.mubr.msk.f32.mxu0 %vm18315_vm9, %v2325_v51  ;;  %v12341_v62 = vsel %vm18296_vm2, %v18104_v31, %v3404_v56 }
 0x1ed   : > { %v12335_v43 = vpop.f32.mrb[29].mxu1  ;;  %11063 = vmatmul.mubr.msk.f32.gmra.mrb[66].mxu0 %vm18315_vm9, %v2327_v52  ;;  %18349 = vst [vmem:[#allocation25_spill] sm:$0xff] %v12341_v62  ;;  %v3407_v63 = vrot.slane %v12332_v60, 7 }
 0x1ee   : > { %18348 = vst [vmem:[#allocation24_spill] sm:$0xff] %v12335_v43  ;;  %v18102_v37 = vrot.slane %v12335_v43, 7 }
 0x1ef   : > { %v2680_v2 = vpop.permute.xlu1 %2679  ;;  %v2678_v58 = vpop.permute.xlu0 %2677 }
 0x1f0   : > { %v12345_v27 = vpop.f32.mrb[30].mxu1  ;;  %11112 = vmatprep.mubr.msk.f32.mxu1 %vm18315_vm9, %v2678_v58  ;;  %v12358_v16 = vsel %vm18296_vm2, %v18102_v37, %v3407_v63 }
 0x1f1   : > { %v12348_v6 = vpop.f32.mrb[31].mxu1  ;;  %11113 = vmatmul.mubr.msk.f32.gmra.mrb[98].mxu1 %vm18315_vm9, %v2680_v2  ;;  %18353 = vst [vmem:[#allocation29_spill] sm:$0xff] %v12358_v16  ;;  %v3410_v61 = vrot.slane %v12345_v27, 7 }
 0x1f2   : > { %18350 = vst [vmem:[#allocation26_spill] sm:$0xff] %v12348_v6  ;;  %v18101_v54 = vrot.slane %v12348_v6, 7 }
 0x1f3   : > { %v12351_v8 = vpop.permute.xlu1 %3032  ;;  %v12353_v13 = vpop.permute.xlu0 %3030 }
 0x1f4   : > { %18351 = vst [vmem:[#allocation27_spill] sm:$0xff] %v12351_v8  ;;  %18352 = vst [vmem:[#allocation28_spill] sm:$0xff] %v12353_v13  ;;  %v12362_v24 = vpop.f32.mrb[32].mxu1  ;;  %v12370_v46 = vsel %vm18296_vm2, %v18101_v54, %v3410_v61  ;;  %v12492_v13 = vmul.f32 0.1875, %v12277_v21 }
 0x1f5   : > { %v12364_v32 = vpop.f32.mrb[33].mxu1  ;;  %18355 = vst [vmem:[#allocation31_spill] sm:$0xff] %v12370_v46  ;;  %v3413_v47 = vrot.slane %v12362_v24, 7 }
 0x1f6   : > { %18354 = vst [vmem:[#allocation30_spill] sm:$0xff] %v12364_v32  ;;  %v18103_v48 = vrot.slane %v12364_v32, 7  ;;  %18381 = vst [vmem:[#allocation55_spill] sm:$0xff] %v12492_v13 }
 0x1f7   : > { %v2331_v34 = vpop.permute.xlu1 %2330  ;;  %v2329_v20 = vpop.permute.xlu0 %2328 }
 0x1f8   : > { %11065 = vmatprep.mubr.msk.f32.mxu0 %vm18315_vm9, %v2329_v20  ;;  %v12386_v2 = vsel %vm18296_vm2, %v18103_v48, %v3413_v47 }
 0x1f9   : > { %11066 = vmatmul.mubr.msk.f32.gmra.mrb[68].mxu0 %vm18315_vm9, %v2331_v34  ;;  %v12375_v49 = vpop.f32.mrb[34].mxu1  ;;  %18357 = vst [vmem:[#allocation33_spill] sm:$0xff] %v12386_v2 }
 0x1fa   : > { %v12377_v56 = vpop.f32.mrb[35].mxu1  ;;  %v3416_v58 = vrot.slane %v12375_v49, 7 }
 0x1fb   : > { %18356 = vst [vmem:[#allocation32_spill] sm:$0xff] %v12377_v56  ;;  %v2684_v52 = vpop.permute.xlu1 %2683  ;;  %v2682_v51 = vpop.permute.xlu0 %2681  ;;  %v18110_v61 = vrot.slane %v12377_v56, 7 }
 0x1fc   : > { %11115 = vmatprep.mubr.msk.f32.mxu1 %vm18315_vm9, %v2682_v51 }
 0x1fd   : > { %11116 = vmatmul.mubr.msk.f32.gmra.mrb[100].mxu1 %vm18315_vm9, %v2684_v52  ;;  %v12381_v63 = vpop.f32.mrb[36].mxu1  ;;  %v12403_v37 = vsel %vm18296_vm2, %v18110_v61, %v3416_v58 }
 0x1fe   : > { %v12390_v34 = vpop.f32.mrb[37].mxu1  ;;  %18363 = vst [vmem:[#allocation39_spill] sm:$0xff] %v12403_v37  ;;  %v3419_v31 = vrot.slane %v12381_v63, 7 }
 0x1ff   : > { %18358 = vst [vmem:[#allocation34_spill] sm:$0xff] %v12390_v34  ;;  %v12392_v20 = vpop.permute.xlu1 %3036  ;;  %v12394_v54 = vpop.permute.xlu0 %3034  ;;  %v18114_v36 = vrot.slane %v12390_v34, 7 }
 0x200   : > { %18359 = vst [vmem:[#allocation35_spill] sm:$0xff] %v12392_v20  ;;  %18360 = vst [vmem:[#allocation36_spill] sm:$0xff] %v12394_v54 }
 0x201   : > { %v12396_v51 = vpop.f32.mrb[38].mxu1  ;;  %v12417_v58 = vsel %vm18296_vm2, %v18114_v36, %v3419_v31 }
 0x202   : > { %18361 = vst [vmem:[#allocation37_spill] sm:$0xff] %v12396_v51  ;;  %v12398_v52 = vpop.f32.mrb[39].mxu1  ;;  %18366 = vst [vmem:[#allocation42_spill] sm:$0xff] %v12417_v58 }
 0x203   : > { %18362 = vst [vmem:[#allocation38_spill] sm:$0xff] %v12398_v52  ;;  %v2335_v47 = vpop.permute.xlu1 %2334  ;;  %v2333_v48 = vpop.permute.xlu0 %2332  ;;  %v18120_v61 = vrot.slane %v12398_v52, 7  ;;  %v12489_v52 = vmul.f32 0.1875, %v12252_v9 }
 0x204   : > { %11068 = vmatprep.mubr.msk.f32.mxu0 %vm18315_vm9, %v2333_v48  ;;  %v3422_v48 = vrot.slane %v12396_v51, 7  ;;  %v12482_v51 = vmul.f32 0.5625, %v12246_v18 }
 0x205   : > { %11069 = vmatmul.mubr.msk.f32.gmra.mrb[70].mxu0 %vm18315_vm9, %v2335_v47  ;;  %v12409_v7 = vpop.f32.mrb[40].mxu1 }
 0x206   : > { %18364 = vst [vmem:[#allocation40_spill] sm:$0xff] %v12409_v7  ;;  %v12411_v42 = vpop.f32.mrb[41].mxu1  ;;  %v12435_v31 = vsel %vm18296_vm2, %v18120_v61, %v3422_v48 }
 0x207   : > { %18365 = vst [vmem:[#allocation41_spill] sm:$0xff] %v12411_v42  ;;  %v2688_v12 = vpop.permute.xlu1 %2687  ;;  %v2686_v10 = vpop.permute.xlu0 %2685  ;;  %18372 = vst [vmem:[#allocation48_spill] sm:$0xff] %v12435_v31  ;;  %v18127_v36 = vrot.slane %v12411_v42, 7  ;;  %v3616_v42 = vmul.f32 0.1875, %v12232_v11 }
 0x208   : > { %11118 = vmatprep.mubr.msk.f32.mxu1 %vm18315_vm9, %v2686_v10 }
 0x209   : > { %11119 = vmatmul.mubr.msk.f32.gmra.mrb[102].mxu1 %vm18315_vm9, %v2688_v12  ;;  %v12422_v47 = vpop.f32.mrb[42].mxu1  ;;  %v3425_v12 = vrot.slane %v12409_v7, 7  ;;  %v12456_v7 = vmul.f32 0.5625, %v12262_v25 }
 0x20a   : > { %18367 = vst [vmem:[#allocation43_spill] sm:$0xff] %v12422_v47  ;;  %v12424_v26 = vpop.f32.mrb[43].mxu1 }
 0x20b   : > { %18368 = vst [vmem:[#allocation44_spill] sm:$0xff] %v12424_v26  ;;  %v12426_v37 = vpop.permute.xlu1 %3040  ;;  %v12428_v2 = vpop.permute.xlu0 %3038  ;;  %v12450_v48 = vsel %vm18296_vm2, %v18127_v36, %v3425_v12  ;;  %18376 = vst [vmem:[#allocation52_spill] sm:$0xff] %v12456_v7  ;;  %v18377_v12 = vrot.slane %v12262_v25, 7 }
 0x20c   : > { %18369 = vst [vmem:[#allocation45_spill] sm:$0xff] %v12426_v37  ;;  %18370 = vst [vmem:[#allocation46_spill] sm:$0xff] %v12428_v2 }
 0x20d   : > { %v12430_v10 = vpop.f32.mrb[44].mxu1  ;;  %18375 = vst [vmem:[#allocation51_spill] sm:$0xff] %v12450_v48  ;;  %v12469_v36 = vsel %vm18296_vm2, %v12262_v25, %v18377_v12  ;;  %v3615_v48 = vmul.f32 0.1875, %v12240_v14 }
 0x20e   : > { %18371 = vst [vmem:[#allocation47_spill] sm:$0xff] %v12430_v10  ;;  %v12439_v58 = vpop.f32.mrb[45].mxu1  ;;  %18378 = vst [vmem:[#allocation53_spill] sm:$0xff] %v12469_v36  ;;  %v12502_v38 = vmul.f32 0.1875, %v12469_v36  ;;  %v12517_v36 = vadd.f32 %v3616_v42, %v12482_v51  ;;  %v3431_v1 = vrot.slane %v12430_v10, 7  ;;  %v18386_v10 = vrot.slane %v12232_v11, 1 }
 0x20f   : > { %18373 = vst [vmem:[#allocation49_spill] sm:$0xff] %v12439_v58  ;;  %v2339_v46 = vpop.permute.xlu1 %2338 }
 0x210   : > { %v2337_v16 = vpop.permute.xlu0 %2336  ;;  %18383 = vst [vmem:[#allocation57_spill] sm:$0xff] %v12502_v38  ;;  %v12538_v59 = vsel %vm3484_vm6, %v18386_v10, %v12232_v11  ;;  %v12563_v10 = vmul.f32 0.1875, %v12257_v23 }
 0x211   : > { %11071 = vmatprep.mubr.msk.f32.mxu0 %vm18315_vm9, %v2337_v16  ;;  %v12442_v62 = vpop.f32.mrb[46].mxu1 }
 0x212   : > { %11072 = vmatmul.mubr.msk.f32.gmra.mrb[72].mxu0 %vm18315_vm9, %v2339_v46  ;;  %v12445_v53 = vpop.f32.mrb[47].mxu1  ;;  %v12462_v46 = vmul.f32 0.5625, %v12240_v14  ;;  %v18486_v34 = vld [vmem:[#allocation52_spill] sm:$0xff] }
 0x213   : > { %18374 = vst [vmem:[#allocation50_spill] sm:$0xff] %v12445_v53  ;;  %v2692_v61 = vpop.permute.xlu1 %2691 }
 0x214   : > { %v2690_v31 = vpop.permute.xlu0 %2689 }
 0x215   : > { %v12458_v16 = vpop.f32.mrb[48].mxu1  ;;  %11121 = vmatprep.mubr.msk.f32.mxu1 %vm18315_vm9, %v2690_v31  ;;  %v18379_v31 = vrot.slane %v12240_v14, 7 }
 0x216   : > { %v3614_v19 = vmul.f32 0.1875, %v12458_v16  ;;  %v3744_v37 = vrot.slane %v12458_v16, 7  ;;  %v12474_v2 = vpop.f32.mrb[49].mxu1  ;;  %11122 = vmatmul.mubr.msk.f32.gmra.mrb[104].mxu1 %vm18315_vm9, %v2692_v61  ;;  %v3428_v61 = vrot.slane %v12422_v47, 7 }
 0x217   : > { %v3468_v20 = vsel %vm18296_vm2, %v12240_v14, %v18379_v31  ;;  %v3613_v12 = vmul.f32 0.1875, %v12474_v2  ;;  %v3743_v54 = vrot.slane %v12474_v2, 7  ;;  %v12486_v8 = vpop.permute.xlu1 %3044  ;;  %v12499_v31 = vadd.f32 %v3615_v48, %v12456_v7 }
 0x218   : > { %18380 = vst [vmem:[#allocation54_spill] sm:$0xff] %v12486_v8  ;;  %v12495_v15 = vpop.permute.xlu0 %3042  ;;  %v3646_v14 = vadd.f32 %v3614_v19, %v12453_v40  ;;  %v12514_v48 = vmul.f32 0.1875, %v3468_v20 }
 0x219   : > { %18382 = vst [vmem:[#allocation56_spill] sm:$0xff] %v12495_v15  ;;  %v12505_v28 = vpop.f32.mrb[50].mxu1  ;;  %v3745_v3 = vsel %vm18296_vm2, %v3743_v54, %v3744_v37  ;;  %v3645_v21 = vadd.f32 %v3613_v12, %v12462_v46  ;;  %v3748_v47 = vsel %vm18296_vm2, %v12474_v2, %v3743_v54  ;;  %v3712_v12 = vadd.f32 %v12492_v13, %v12517_v36 }
 0x21a   : > { %v12511_v15 = vpop.f32.mrb[51].mxu1  ;;  %v3710_v19 = vadd.f32 %v12489_v52, %v3646_v14  ;;  %v3750_v8 = vmul.f32 0.0625, %v3745_v3  ;;  %v3749_v37 = vmul.f32 0.0625, %v3748_v47  ;;  %v3711_v54 = vadd.f32 %v12502_v38, %v12499_v31 }
 0x21b   : > { %v2343_v4 = vpop.permute.xlu1 %2342  ;;  %v3709_v0 = vadd.f32 %v12514_v48, %v3645_v21  ;;  %v18384_v3 = vrot.slane %v12424_v26, 7  ;;  %v3752_v13 = vmul.f32 0.0625, %v12252_v9  ;;  %v3910_v26 = vrot.slane %v12458_v16, 1 }
 0x21c   : > { %v2341_v5 = vpop.permute.xlu0 %2340  ;;  %v3782_v39 = vadd.f32 %v3750_v8, %v3710_v19  ;;  %v3751_v19 = vmul.f32 0.0625, %v3468_v20  ;;  %v18389_v9 = vrot.slane %v12439_v58, 7 }
 0x21d   : > { %v10993_v45 = vpop.f32.mrb[52].mxu1  ;;  %11074 = vmatprep.mubr.msk.f32.mxu0 %vm18315_vm9, %v2341_v5  ;;  %v12530_v42 = vsel %vm18296_vm2, %v18384_v3, %v3428_v61  ;;  %v3781_v7 = vadd.f32 %v3749_v37, %v3709_v0  ;;  %v3784_v0 = vadd.f32 %v3752_v13, %v3712_v12  ;;  %v18145_v12 = vrot.slane %v12445_v53, 7 }
 0x21e   : > { %18385 = vst [vmem:[#allocation58_spill] sm:$0xff] %v12530_v42  ;;  %v2137_v47 = vpop.f32.mrb[53].mxu1  ;;  %11075 = vmatmul.mubr.msk.f32.gmra.mrb[74].mxu0 %vm18315_vm9, %v2343_v4  ;;  %v12540_v8 = vadd.f32 %v10993_v45, %v3782_v39  ;;  %v3783_v4 = vadd.f32 %v3751_v19, %v3711_v54  ;;  %v12549_v42 = vsel %vm18296_vm2, %v18389_v9, %v3431_v1  ;;  %v12552_v39 = vmul.f32 0.1875, %v12538_v59 }
 0x21f   : > { %v2696_v5 = vpop.permute.xlu1 %2695  ;;  %v12543_v61 = vadd.f32 %v3781_v7, %v2137_v47  ;;  %18390 = vst [vmem:[#allocation61_spill] sm:$0xff] %v12549_v42  ;;  %v3434_v1 = vrot.slane %v12442_v62, 7  ;;  %v3909_v54 = vrot.slane %v12474_v2, 1  ;;  %v3618_v9 = vmul.f32 0.1875, %v12246_v18 }
 0x220   : > { %18387 = vst [vmem:[#allocation59_spill] sm:$0xff] %v12540_v8  ;;  %v2694_v3 = vpop.permute.xlu0 %2693  ;;  %v3878_v20 = vadd.f32 %v12552_v39, %v3646_v14  ;;  %v3877_v14 = vadd.f32 %v12563_v10, %v3645_v21 }
 0x221   : > { %18388 = vst [vmem:[#allocation60_spill] sm:$0xff] %v12543_v61  ;;  %v10996_v37 = vpop.f32.mrb[54].mxu1  ;;  %11124 = vmatprep.mubr.msk.f32.mxu1 %vm18315_vm9, %v2694_v3  ;;  %v3911_v2 = vsel %vm3484_vm6, %v3909_v54, %v3910_v26  ;;  %v12584_v61 = vsel %vm18296_vm2, %v18145_v12, %v3434_v1  ;;  %v12597_v54 = vmul.f32 0.5625, %v12272_v29  ;;  %v12600_v12 = vadd.f32 %v3618_v9, %v12453_v40 }
 0x222   : > { %v12554_v45 = vadd.f32 %v10996_v37, %v3784_v0  ;;  %v2147_v11 = vpop.f32.mrb[55].mxu1  ;;  %11125 = vmatmul.mubr.msk.f32.gmra.mrb[106].mxu1 %vm18315_vm9, %v2696_v5  ;;  %v3914_v5 = vsel %vm3484_vm6, %v3910_v26, %v12458_v16  ;;  %18398 = vst [vmem:[#allocation69_spill] sm:$0xff] %v12584_v61  ;;  %v3617_v16 = vmul.f32 0.1875, %v12262_v25  ;;  %v3915_v21 = vmul.f32 0.0625, %v3911_v2 }
 0x223   : > { %v12557_v7 = vadd.f32 %v3783_v4, %v2147_v11  ;;  %v12559_v13 = vpop.permute.xlu1 %3048  ;;  %v3916_v3 = vmul.f32 0.0625, %v3914_v5  ;;  %v12617_v40 = vadd.f32 %v12600_v12, %v12489_v52  ;;  %v12632_v52 = vadd.f32 %v3618_v9, %v12597_v54 }
 0x224   : > { %18391 = vst [vmem:[#allocation62_spill] sm:$0xff] %v12554_v45  ;;  %18393 = vst [vmem:[#allocation64_spill] sm:$0xff] %v12559_v13  ;;  %v12568_v47 = vpop.permute.xlu0 %3046  ;;  %v12594_v26 = vadd.f32 %v3915_v21, %v3877_v14  ;;  %v3492_v21 = vrot.slane %v12272_v29, 1  ;;  %v12651_v9 = vmul.f32 0.5625, %v12299_v17  ;;  %v3497_v13 = vrot.slane %v12313_v41, 1 }
 0x225   : > { %18392 = vst [vmem:[#allocation63_spill] sm:$0xff] %v12557_v7  ;;  %18394 = vst [vmem:[#allocation65_spill] sm:$0xff] %v12568_v47  ;;  %v12572_v19 = vpop.f32.mrb[56].mxu1  ;;  %v12577_v4 = vadd.f32 %v3916_v3, %v3878_v20  ;;  %v3489_v20 = vrot.slane %v12246_v18, 1  ;;  %v12642_v7 = vmul.f32 0.5625, %v12287_v44 }
 0x226   : > { %18395 = vst [vmem:[#allocation66_spill] sm:$0xff] %v12572_v19  ;;  %v12574_v0 = vpop.f32.mrb[57].mxu1  ;;  %18401 = vst [vmem:[#allocation72_spill] sm:$0xff] %v12594_v26  ;;  %v3488_v19 = vrot.slane %v12262_v25, 1 }
 0x227   : > { %18396 = vst [vmem:[#allocation67_spill] sm:$0xff] %v12574_v0  ;;  %v2347_v37 = vpop.permute.xlu1 %2346  ;;  %18397 = vst [vmem:[#allocation68_spill] sm:$0xff] %v12577_v4  ;;  %v3566_v25 = vsel %vm3484_vm6, %v3489_v20, %v12246_v18 }
 0x228   : > { %v2345_v11 = vpop.permute.xlu0 %2344  ;;  %18404 = vst [vmem:[#allocation75_spill] sm:$0xff] %v12617_v40  ;;  %18407 = vst [vmem:[#allocation78_spill] sm:$0xff] %v12632_v52  ;;  %v12636_v18 = vmul.f32 0.1875, %v3566_v25  ;;  %v3490_v45 = vsel %vm3484_vm6, %v3488_v19, %v3489_v20  ;;  %v3567_v19 = vsel %vm3484_vm6, %v3492_v21, %v12272_v29  ;;  %v12677_v40 = vmul.f32 0.1875, %v12282_v33 }
 0x229   : > { %v12587_v5 = vpop.f32.mrb[58].mxu1  ;;  %11077 = vmatprep.mubr.msk.f32.mxu0 %vm18315_vm9, %v2345_v11  ;;  %v12604_v11 = vmul.f32 0.5625, %v12282_v33 }
 0x22a   : > { %18399 = vst [vmem:[#allocation70_spill] sm:$0xff] %v12587_v5  ;;  %v12591_v3 = vpop.f32.mrb[59].mxu1  ;;  %11078 = vmatmul.mubr.msk.f32.gmra.mrb[76].mxu0 %vm18315_vm9, %v2347_v37  ;;  %v12610_v37 = vadd.f32 %v3617_v16, %v12462_v46  ;;  %v3880_v58 = vadd.f32 %v12636_v18, %v12517_v36 }
 0x22b   : > { %18400 = vst [vmem:[#allocation71_spill] sm:$0xff] %v12591_v3  ;;  %v2700_v0 = vpop.permute.xlu1 %2699  ;;  %v12639_v5 = vadd.f32 %v3617_v16, %v12604_v11  ;;  %v3918_v16 = vmul.f32 0.0625, %v12538_v59 }
 0x22c   : > { %v2698_v1 = vpop.permute.xlu0 %2697  ;;  %v12627_v46 = vadd.f32 %v12610_v37, %v12514_v48  ;;  %v12645_v48 = vmul.f32 0.1875, %v12272_v29 }
 0x22d   : > { %v12606_v2 = vpop.f32.mrb[60].mxu1  ;;  %11127 = vmatprep.mubr.msk.f32.mxu1 %vm18315_vm9, %v2698_v1  ;;  %v3495_v1 = vrot.slane %v12287_v44, 1  ;;  %18409 = vst [vmem:[#allocation80_spill] sm:$0xff] %v12639_v5  ;;  %v12665_v38 = vadd.f32 %v3918_v16, %v3880_v58  ;;  %v12694_v16 = vmul.f32 0.0625, %v3566_v25 }
 0x22e   : > { %18402 = vst [vmem:[#allocation73_spill] sm:$0xff] %v12606_v2  ;;  %v12612_v14 = vpop.f32.mrb[61].mxu1  ;;  %11128 = vmatmul.mubr.msk.f32.gmra.mrb[108].mxu1 %vm18315_vm9, %v2700_v0  ;;  %v3491_v2 = vrot.slane %v12282_v33, 1  ;;  %18406 = vst [vmem:[#allocation77_spill] sm:$0xff] %v12627_v46  ;;  %v3494_v0 = vrot.slane %v12299_v17, 1  ;;  %v12674_v46 = vadd.f32 %v12645_v48, %v12642_v7 }
 0x22f   : > { %18403 = vst [vmem:[#allocation74_spill] sm:$0xff] %v12612_v14  ;;  %v12623_v3 = vpop.permute.xlu1 %3052  ;;  %18413 = vst [vmem:[#allocation84_spill] sm:$0xff] %v12665_v38  ;;  %v3568_v38 = vsel %vm3484_vm6, %v3495_v1, %v12287_v44 }
 0x230   : > { %18405 = vst [vmem:[#allocation76_spill] sm:$0xff] %v12623_v3  ;;  %v12634_v14 = vpop.permute.xlu0 %3050  ;;  %v12658_v3 = vmul.f32 0.1875, %v3490_v45  ;;  %v3493_v59 = vsel %vm3484_vm6, %v3491_v2, %v3492_v21  ;;  %18415 = vst [vmem:[#allocation86_spill] sm:$0xff] %v12674_v46  ;;  %v3496_v33 = vsel %vm3484_vm6, %v3494_v0, %v3495_v1  ;;  %v12735_v1 = vmul.f32 0.5625, %v12321_v50 }
 0x231   : > { %18408 = vst [vmem:[#allocation79_spill] sm:$0xff] %v12634_v14  ;;  %v12647_v8 = vpop.f32.mrb[62].mxu1  ;;  %v3498_v14 = vrot.slane %v12304_v22, 1  ;;  %v12685_v58 = vmul.f32 0.1875, %v3493_v59  ;;  %v12729_v4 = vmul.f32 0.1875, %v3496_v33 }
 0x232   : > { %18410 = vst [vmem:[#allocation81_spill] sm:$0xff] %v12647_v8  ;;  %v12653_v42 = vpop.f32.mrb[63].mxu1  ;;  %18412 = vst [vmem:[#allocation83_spill] sm:$0xff] %v12658_v3  ;;  %v3917_v8 = vmul.f32 0.0625, %v12257_v23  ;;  %v3879_v36 = vadd.f32 %v12658_v3, %v12499_v31  ;;  %v12680_v23 = vmul.f32 0.5625, %v12304_v22 }
 0x233   : > { %18411 = vst [vmem:[#allocation82_spill] sm:$0xff] %v12653_v42  ;;  %v2351_v47 = vpop.permute.xlu1 %2350  ;;  %v12669_v42 = vmul.f32 0.1875, %v3567_v19  ;;  %18417 = vst [vmem:[#allocation88_spill] sm:$0xff] %v12685_v58 }
 0x234   : > { %v2349_v20 = vpop.permute.xlu0 %2348  ;;  %v12690_v2 = vadd.f32 %v3917_v8, %v3879_v36  ;;  %v3881_v8 = vadd.f32 %v12685_v58, %v12639_v5  ;;  %v12710_v36 = vmul.f32 0.5625, %v12313_v41  ;;  %18427 = vst [vmem:[#allocation98_spill] sm:$0xff] %v12729_v4 }
 0x235   : > { %18414 = vst [vmem:[#allocation85_spill] sm:$0xff] %v12669_v42  ;;  %v12682_v29 = vpop.f32.mrb[64].mxu1  ;;  %11080 = vmatprep.mubr.msk.f32.mxu0 %vm18315_vm9, %v2349_v20  ;;  %v3882_v21 = vadd.f32 %v12669_v42, %v12632_v52  ;;  %v12703_v20 = vmul.f32 0.1875, %v12287_v44  ;;  %v3501_v44 = vrot.slane %v12321_v50, 1  ;;  %v3499_v42 = vsel %vm3484_vm6, %v3497_v13, %v3498_v14 }
 0x236   : > { %18416 = vst [vmem:[#allocation87_spill] sm:$0xff] %v12682_v29  ;;  %v12687_v31 = vpop.f32.mrb[65].mxu1  ;;  %11081 = vmatmul.mubr.msk.f32.gmra.mrb[78].mxu0 %vm18315_vm9, %v2351_v47  ;;  %18419 = vst [vmem:[#allocation90_spill] sm:$0xff] %v12690_v2  ;;  %v12700_v29 = vadd.f32 %v12677_v40, %v12651_v9  ;;  %v12707_v47 = vmul.f32 0.0625, %v3490_v45  ;;  %v12715_v2 = vmul.f32 0.1875, %v3568_v38 }
 0x237   : > { %18418 = vst [vmem:[#allocation89_spill] sm:$0xff] %v12687_v31  ;;  %v2704_v31 = vpop.permute.xlu1 %2703  ;;  %v12713_v52 = vadd.f32 %v12694_v16, %v3882_v21  ;;  %v12721_v26 = vadd.f32 %v12703_v20, %v12680_v23  ;;  %v12732_v21 = vmul.f32 0.1875, %v12299_v17  ;;  %v12751_v17 = vmul.f32 0.0625, %v3493_v59 }
 0x238   : > { %18420 = vst [vmem:[#allocation91_spill] sm:$0xff] %v12700_v29  ;;  %18421 = vst [vmem:[#allocation92_spill] sm:$0xff] %v12707_v47  ;;  %v2702_v25 = vpop.permute.xlu0 %2701  ;;  %v12727_v45 = vadd.f32 %v12707_v47, %v3881_v8  ;;  %v12745_v8 = vmul.f32 0.5625, %v12329_v57  ;;  %v12771_v59 = vmul.f32 0.1875, %v12313_v41  ;;  %v3503_v41 = vrot.slane %v12335_v43, 1 }
 0x239   : > { %18422 = vst [vmem:[#allocation93_spill] sm:$0xff] %v12713_v52  ;;  %18423 = vst [vmem:[#allocation94_spill] sm:$0xff] %v12715_v2  ;;  %v12723_v5 = vpop.f32.mrb[66].mxu1  ;;  %11130 = vmatprep.mubr.msk.f32.mxu1 %vm18315_vm9, %v2702_v25  ;;  %v12742_v52 = vmul.f32 0.0625, %v3567_v19 }
 0x23a   : > { %18424 = vst [vmem:[#allocation95_spill] sm:$0xff] %v12721_v26  ;;  %18425 = vst [vmem:[#allocation96_spill] sm:$0xff] %v12723_v5  ;;  %v12737_v0 = vpop.f32.mrb[67].mxu1  ;;  %11131 = vmatmul.mubr.msk.f32.gmra.mrb[110].mxu1 %vm18315_vm9, %v2704_v31  ;;  %v3884_v5 = vadd.f32 %v12715_v2, %v12674_v46  ;;  %v3500_v31 = vrot.slane %v12329_v57, 1  ;;  %v12758_v46 = vadd.f32 %v12732_v21, %v12710_v36 }
 0x23b   : > { %18426 = vst [vmem:[#allocation97_spill] sm:$0xff] %v12727_v45  ;;  %18428 = vst [vmem:[#allocation99_spill] sm:$0xff] %v12737_v0  ;;  %v12747_v25 = vpop.permute.xlu1 %3056  ;;  %v3883_v45 = vadd.f32 %v12729_v4, %v12700_v29  ;;  %v3569_v0 = vsel %vm3484_vm6, %v3498_v14, %v12304_v22  ;;  %v12768_v29 = vmul.f32 0.1875, %v12304_v22  ;;  %v12786_v22 = vmul.f32 0.1875, %v3499_v42 }
 0x23c   : > { %18429 = vst [vmem:[#allocation100_spill] sm:$0xff] %v12742_v52  ;;  %18430 = vst [vmem:[#allocation101_spill] sm:$0xff] %v12747_v25  ;;  %v12760_v19 = vpop.permute.xlu0 %3054  ;;  %v12763_v2 = vadd.f32 %v12742_v52, %v3884_v5  ;;  %v12765_v25 = vmul.f32 0.1875, %v3569_v0  ;;  %v12795_v13 = vadd.f32 %v12771_v59, %v12745_v8  ;;  %v12798_v14 = vmul.f32 0.5625, %v12332_v60 }
 0x23d   : > { %18431 = vst [vmem:[#allocation102_spill] sm:$0xff] %v12751_v17  ;;  %18432 = vst [vmem:[#allocation103_spill] sm:$0xff] %v12758_v46  ;;  %v12773_v4 = vpop.f32.mrb[68].mxu1  ;;  %v12776_v58 = vadd.f32 %v12751_v17, %v3883_v45  ;;  %v12810_v17 = vmul.f32 0.1875, %v12321_v50  ;;  %v12813_v52 = vmul.f32 0.5625, %v12335_v43 }
 0x23e   : > { %18433 = vst [vmem:[#allocation104_spill] sm:$0xff] %v12760_v19  ;;  %18434 = vst [vmem:[#allocation105_spill] sm:$0xff] %v12763_v2  ;;  %v3504_v19 = vrot.slane %v12332_v60, 1  ;;  %v12780_v3 = vpop.f32.mrb[69].mxu1  ;;  %v3886_v5 = vadd.f32 %v12765_v25, %v12721_v26  ;;  %v12784_v2 = vmul.f32 0.0625, %v3568_v38  ;;  %v3885_v26 = vadd.f32 %v12786_v22, %v12758_v46 }
 0x23f   : > { %18435 = vst [vmem:[#allocation106_spill] sm:$0xff] %v12765_v25  ;;  %18436 = vst [vmem:[#allocation107_spill] sm:$0xff] %v12773_v4  ;;  %v12791_v4 = vadd.f32 %v12768_v29, %v12735_v1  ;;  %v2355_v45 = vpop.permute.xlu1 %2354  ;;  %v3570_v25 = vsel %vm3484_vm6, %v3501_v44, %v12321_v50 }
 0x240   : > { %18437 = vst [vmem:[#allocation108_spill] sm:$0xff] %v12776_v58  ;;  %18438 = vst [vmem:[#allocation109_spill] sm:$0xff] %v12780_v3  ;;  %v2353_v3 = vpop.permute.xlu0 %2352  ;;  %v12801_v38 = vadd.f32 %v12784_v2, %v3886_v5  ;;  %v12805_v58 = vmul.f32 0.0625, %v3496_v33  ;;  %v12818_v5 = vmul.f32 0.1875, %v3570_v25  ;;  %v3507_v33 = vrot.slane %v12345_v27, 1 }
 0x241   : > { %18439 = vst [vmem:[#allocation110_spill] sm:$0xff] %v12784_v2  ;;  %18440 = vst [vmem:[#allocation111_spill] sm:$0xff] %v12786_v22  ;;  %11083 = vmatprep.mubr.msk.f32.mxu0 %vm18315_vm9, %v2353_v3  ;;  %v12816_v47 = vpop.f32.mrb[70].mxu1  ;;  %v12832_v3 = vadd.f32 %v12810_v17, %v12798_v14 }
 0x242   : > { %18441 = vst [vmem:[#allocation112_spill] sm:$0xff] %v12791_v4  ;;  %18442 = vst [vmem:[#allocation113_spill] sm:$0xff] %v12795_v13  ;;  %11084 = vmatmul.mubr.msk.f32.gmra.mrb[80].mxu0 %vm18315_vm9, %v2355_v45  ;;  %v12823_v46 = vpop.f32.mrb[71].mxu1  ;;  %v12826_v50 = vadd.f32 %v12805_v58, %v3885_v26  ;;  %v12842_v45 = vmul.f32 0.5625, %v12345_v27 }
 0x243   : > { %18443 = vst [vmem:[#allocation114_spill] sm:$0xff] %v12801_v38  ;;  %18444 = vst [vmem:[#allocation115_spill] sm:$0xff] %v12805_v58  ;;  %v3502_v38 = vsel %vm3484_vm6, %v3500_v31, %v3501_v44  ;;  %v2708_v2 = vpop.permute.xlu1 %2707  ;;  %v3888_v44 = vadd.f32 %v12818_v5, %v12791_v4  ;;  %v12839_v31 = vmul.f32 0.0625, %v3569_v0  ;;  %v3571_v58 = vsel %vm3484_vm6, %v3504_v19, %v12332_v60 }
 0x244   : > { %18445 = vst [vmem:[#allocation116_spill] sm:$0xff] %v12813_v52  ;;  %18446 = vst [vmem:[#allocation117_spill] sm:$0xff] %v12816_v47  ;;  %v12828_v22 = vmul.f32 0.1875, %v3502_v38  ;;  %v12835_v47 = vmul.f32 0.1875, %v12329_v57  ;;  %v2706_v26 = vpop.permute.xlu0 %2705 }
 0x245   : > { %18447 = vst [vmem:[#allocation118_spill] sm:$0xff] %v12818_v5  ;;  %18448 = vst [vmem:[#allocation119_spill] sm:$0xff] %v12823_v46  ;;  %11133 = vmatprep.mubr.msk.f32.mxu1 %vm18315_vm9, %v2706_v26  ;;  %v12855_v0 = vpop.f32.mrb[72].mxu1  ;;  %v12858_v4 = vadd.f32 %v12839_v31, %v3888_v44  ;;  %v12860_v5 = vmul.f32 0.1875, %v3571_v58  ;;  %v3506_v44 = vrot.slane %v12348_v6, 1 }
 0x246   : > { %18449 = vst [vmem:[#allocation120_spill] sm:$0xff] %v12826_v50  ;;  %18450 = vst [vmem:[#allocation121_spill] sm:$0xff] %v12828_v22  ;;  %v3887_v46 = vadd.f32 %v12828_v22, %v12795_v13  ;;  %v12846_v50 = vmul.f32 0.0625, %v3499_v42  ;;  %v12852_v57 = vadd.f32 %v12835_v47, %v12813_v52  ;;  %v3505_v13 = vsel %vm3484_vm6, %v3503_v41, %v3504_v19  ;;  %v12870_v52 = vpop.f32.mrb[73].mxu1 }
 0x247   : > { %18451 = vst [vmem:[#allocation122_spill] sm:$0xff] %v12832_v3  ;;  %18452 = vst [vmem:[#allocation123_spill] sm:$0xff] %v12839_v31  ;;  %v12864_v42 = vmul.f32 0.1875, %v12332_v60  ;;  %v12867_v22 = vmul.f32 0.5625, %v12348_v6  ;;  %11134 = vmatmul.mubr.msk.f32.gmra.mrb[112].mxu1 %vm18315_vm9, %v2708_v2  ;;  %v3890_v41 = vadd.f32 %v12860_v5, %v12832_v3  ;;  %v12880_v19 = vmul.f32 0.0625, %v3570_v25 }
 0x248   : > { %18453 = vst [vmem:[#allocation124_spill] sm:$0xff] %v12846_v50  ;;  %18454 = vst [vmem:[#allocation125_spill] sm:$0xff] %v12852_v57  ;;  %v12873_v26 = vadd.f32 %v12846_v50, %v3887_v46  ;;  %v12882_v60 = vmul.f32 0.1875, %v3505_v13  ;;  %v12889_v2 = vmul.f32 0.1875, %v12335_v43  ;;  %v12891_v46 = vpop.permute.xlu0 %3058  ;;  %v12900_v3 = vmul.f32 0.0625, %v3502_v38 }
 0x249   : > { %18455 = vst [vmem:[#allocation126_spill] sm:$0xff] %v12855_v0  ;;  %18456 = vst [vmem:[#allocation127_spill] sm:$0xff] %v12858_v4  ;;  %v12876_v0 = vpop.permute.xlu1 %3060  ;;  %v12886_v4 = vadd.f32 %v12864_v42, %v12842_v45  ;;  %v12925_v50 = vmul.f32 0.0625, %v3571_v58  ;;  %v18473_v31 = vrot.slane %v12362_v24, 1 }
 0x24a   : > { %18457 = vst [vmem:[#allocation128_spill] sm:$0xff] %v12860_v5  ;;  %18458 = vst [vmem:[#allocation129_spill] sm:$0xff] %v12870_v52  ;;  %v12893_v52 = vpop.f32.mrb[74].mxu1  ;;  %v3889_v25 = vadd.f32 %v12882_v60, %v12852_v57  ;;  %v12908_v43 = vadd.f32 %v12889_v2, %v12867_v22 }
 0x24b   : > { %18459 = vst [vmem:[#allocation130_spill] sm:$0xff] %v12873_v26  ;;  %18460 = vst [vmem:[#allocation131_spill] sm:$0xff] %v12876_v0  ;;  %v12896_v26 = vadd.f32 %v12880_v19, %v3890_v41  ;;  %v12904_v0 = vsel %vm3484_vm6, %v3507_v33, %v12345_v27  ;;  %v12910_v5 = vpop.f32.mrb[75].mxu1 }
 0x24c   : > { %18461 = vst [vmem:[#allocation132_spill] sm:$0xff] %v12880_v19  ;;  %18462 = vst [vmem:[#allocation133_spill] sm:$0xff] %v12882_v60  ;;  %v12918_v38 = vadd.f32 %v12900_v3, %v3889_v25  ;;  %v2357_v60 = vpop.permute.xlu0 %2356 }
 0x24d   : > { %18463 = vst [vmem:[#allocation134_spill] sm:$0xff] %v12886_v4  ;;  %18464 = vst [vmem:[#allocation135_spill] sm:$0xff] %v12891_v46  ;;  %v2359_v57 = vpop.permute.xlu1 %2358  ;;  %v12921_v46 = vsel %vm3484_vm6, %v3506_v44, %v3507_v33  ;;  %11086 = vmatprep.mubr.msk.f32.mxu0 %vm18315_vm9, %v2357_v60  ;;  %v12931_v41 = vpop.f32.mrb[76].mxu1  ;;  %v12942_v44 = vmul.f32 0.0625, %v3505_v13 }
 0x24e   : > { %18465 = vst [vmem:[#allocation136_spill] sm:$0xff] %v12893_v52  ;;  %18466 = vst [vmem:[#allocation137_spill] sm:$0xff] %v12896_v26  ;;  %v12913_v52 = vmul.f32 0.1875, %v12904_v0  ;;  %v3509_v26 = vrot.slane %v12364_v32, 1  ;;  %11087 = vmatmul.mubr.msk.f32.gmra.mrb[82].mxu0 %vm18315_vm9, %v2359_v57  ;;  %v12935_v25 = vpop.f32.mrb[77].mxu1 }
 0x24f   : > { %18467 = vst [vmem:[#allocation138_spill] sm:$0xff] %v12908_v43  ;;  %18468 = vst [vmem:[#allocation139_spill] sm:$0xff] %v12910_v5  ;;  %v12928_v5 = vmul.f32 0.1875, %v12921_v46  ;;  %11141 = vmatprep.mubr.msk.f32.mxu0 %vm18315_vm9, %v12150_v30  ;;  %v12967_v30 = vmul.f32 0.1875, %v12362_v24 }
 0x250   : > { %18469 = vst [vmem:[#allocation140_spill] sm:$0xff] %v12918_v38  ;;  %v3892_v19 = vadd.f32 %v12913_v52, %v12886_v4  ;;  %18470 = vst [vmem:[#allocation141_spill] sm:$0xff] %v12931_v41  ;;  %v3512_v4 = vrot.slane %v12377_v56, 1  ;;  %v12947_v41 = vmul.f32 0.1875, %v12345_v27  ;;  %v2710_v56 = vpop.permute.xlu0 %2709  ;;  %v12963_v27 = vmul.f32 0.1875, %v12348_v6 }
 0x251   : > { %18471 = vst [vmem:[#allocation142_spill] sm:$0xff] %v12935_v25  ;;  %v3891_v58 = vadd.f32 %v12928_v5, %v12908_v43  ;;  %v2712_v57 = vpop.permute.xlu1 %2711  ;;  %v3530_v43 = vrot.slane %v12445_v53, 1  ;;  %11136 = vmatprep.mubr.msk.f32.mxu1 %vm18315_vm9, %v2710_v56  ;;  %v18476_v25 = vrot.slane %v12445_v53, 7  ;;  %v7040_v56 = vrot.slane %v12511_v15, 7 }
 0x252   : > { %v12938_v33 = vadd.f32 %v12925_v50, %v3892_v19  ;;  %v12954_v19 = vsel %vm3484_vm6, %v3509_v26, %v18473_v31  ;;  %v12970_v31 = vmul.f32 0.1875, %v12364_v32  ;;  %v12972_v26 = vpop.f32.mrb[78].mxu1  ;;  %11137 = vmatmul.mubr.msk.f32.gmra.mrb[114].mxu1 %vm18315_vm9, %v2712_v57  ;;  %11142 = vmatmul.mubr.msk.f32.vlgmr.msra.gmra.mrb[84].mxu0 %vm18315_vm9, %v12134_v35  ;;  %v12996_v38 = vmul.f32 0.1875, %v12584_v61 }
 0x253   : > { %v12960_v60 = vadd.f32 %v12942_v44, %v3891_v58  ;;  %18475 = vst [vmem:[#allocation145_spill] sm:$0xff] %v12972_v26  ;;  %v12978_v13 = vsel %vm18296_vm2, %v12445_v53, %v18476_v25  ;;  %v6973_v58 = vmul.f32 0.1875, %v12505_v28  ;;  %v12989_v26 = vmul.f32 0.5625, %v12442_v62  ;;  %11144 = vmatprep.mubr.msk.f32.mxu0 %vm18315_vm9, %v12164_v55 }
 0x254   : > { %18472 = vst [vmem:[#allocation143_spill] sm:$0xff] %v12938_v33  ;;  %18477 = vst [vmem:[#allocation146_spill] sm:$0xff] %v12978_v13  ;;  %v12986_v33 = vpop.f32.mrb[79].mxu1  ;;  %v6972_v25 = vmul.f32 0.1875, %v12511_v15  ;;  %v12999_v57 = vmul.f32 0.5625, %v12445_v53  ;;  %v13002_v35 = vmul.f32 0.1875, %v12978_v13  ;;  %v7115_v55 = vadd.f32 %v12600_v12, %v12552_v39 }
 0x255   : > { %18474 = vst [vmem:[#allocation144_spill] sm:$0xff] %v12960_v60  ;;  %v7041_v60 = vrot.slane %v12505_v28, 7  ;;  %18478 = vst [vmem:[#allocation147_spill] sm:$0xff] %v12986_v33  ;;  %v13006_v33 = vadd.f32 %v12645_v48, %v12482_v51  ;;  %v18483_v32 = vrot.slane %v12442_v62, 1  ;;  %v13015_v61 = vpop.f32.mrb[80].mxu1  ;;  %v13019_v53 = vadd.f32 %v12677_v40, %v18486_v34  ;;  %v18490_v40 = vld [vmem:[#allocation7_spill] sm:$0xff] }
 0x256   : > { %18479 = vst [vmem:[#allocation148_spill] sm:$0xff] %v12989_v26  ;;  %18480 = vst [vmem:[#allocation149_spill] sm:$0xff] %v12996_v38  ;;  %v13023_v13 = vadd.f32 %v12703_v20, %v12597_v54  ;;  %v13027_v51 = vadd.f32 %v12732_v21, %v12604_v11  ;;  %v13035_v39 = vpop.f32.mrb[81].mxu1  ;;  %v13039_v34 = vadd.f32 %v12771_v59, %v12651_v9 }
 0x257   : > { %18481 = vst [vmem:[#allocation150_spill] sm:$0xff] %v12999_v57  ;;  %18482 = vst [vmem:[#allocation151_spill] sm:$0xff] %v13002_v35  ;;  %v13011_v6 = vsel %vm3484_vm6, %v3530_v43, %v18483_v32  ;;  %v13031_v43 = vadd.f32 %v12768_v29, %v12642_v7  ;;  %v18487_v32 = vld [vmem:[#allocation5_spill] sm:$0xff]  ;;  %v13042_v12 = vadd.f32 %v7115_v55, %v12694_v16 }
 0x258   : > { %18484 = vst [vmem:[#allocation152_spill] sm:$0xff] %v13011_v6  ;;  %18485 = vst [vmem:[#allocation153_spill] sm:$0xff] %v13015_v61  ;;  %11145 = vmatmul.mubr.msk.f32.gmra.mrb[86].mxu0 %vm18315_vm9, %v18487_v32  ;;  %v13045_v54 = vadd.f32 %v6973_v58, %v12989_v26  ;;  %v7042_v11 = vsel %vm18296_vm2, %v7040_v56, %v7041_v60  ;;  %v13052_v7 = vadd.f32 %v12810_v17, %v12680_v23  ;;  %v18498_v55 = vld [vmem:[#allocation9_spill] sm:$0xff] }
 0x259   : > { %18488 = vst [vmem:[#allocation52_spill] sm:$0xff] %v13035_v39  ;;  %18489 = vst [vmem:[#allocation5_spill] sm:$0xff] %v13042_v12  ;;  %11147 = vmatprep.mubr.msk.f32.mxu0 %vm18315_vm9, %v18490_v40  ;;  %v7049_v48 = vmul.f32 0.0625, %v7042_v11  ;;  %v7004_v29 = vadd.f32 %v6972_v25, %v12999_v57  ;;  %v7045_v9 = vsel %vm18296_vm2, %v12511_v15, %v7040_v56  ;;  %v13065_v60 = vpop.f32.mrb[82].mxu1  ;;  %v18492_v23 = vrot.slane %v12375_v49, 1  ;;  %v18493_v56 = vld [vmem:[#allocation6_spill] sm:$0xff] }
 0x25a   : > { %v13059_v16 = vadd.f32 %v12835_v47, %v12710_v36  ;;  %v7037_v20 = vadd.f32 %v13045_v54, %v12996_v38  ;;  %v7048_v21 = vmul.f32 0.0625, %v7045_v9  ;;  %v7114_v59 = vadd.f32 %v12610_v37, %v12563_v10  ;;  %18491 = vst [vmem:[#allocation7_spill] sm:$0xff] %v13065_v60  ;;  %v13081_v10 = vpop.f32.mrb[83].mxu1  ;;  %v18502_v11 = vld [vmem:[#allocation100_spill] sm:$0xff]  ;;  %v18515_v39 = vld [vmem:[#allocation11_spill] sm:$0xff]  ;;  %v18525_v60 = vld [vmem:[#allocation118_spill] sm:$0xff] }
 0x25b   : > { %v13069_v17 = vadd.f32 %v12864_v42, %v12735_v1  ;;  %v13074_v58 = vsel %vm3484_vm6, %v3512_v4, %v18492_v23  ;;  %v7036_v47 = vadd.f32 %v7004_v29, %v13002_v35  ;;  %v7117_v36 = vadd.f32 %v13006_v33, %v12636_v18  ;;  %18494 = vst [vmem:[#allocation6_spill] sm:$0xff] %v13081_v10  ;;  %v18496_v42 = vld [vmem:[#allocation92_spill] sm:$0xff]  ;;  %v18521_v35 = vld [vmem:[#allocation98_spill] sm:$0xff]  ;;  %v18607_v12 = vld [vmem:[#allocation101_spill] sm:$0xff] }
 0x25c   : > { %11148 = vmatmul.mubr.msk.f32.gmra.mrb[88].mxu0 %vm18315_vm9, %v18493_v56  ;;  %v13085_v37 = vadd.f32 %v12889_v2, %v12745_v8  ;;  %v13089_v1 = vadd.f32 %v12947_v41, %v12798_v14  ;;  %v13091_v4 = vadd.f32 %v7049_v48, %v7037_v20  ;;  %v13094_v25 = vadd.f32 %v7114_v59, %v18496_v42  ;;  %v18499_v18 = vld [vmem:[#allocation116_spill] sm:$0xff]  ;;  %v18506_v59 = vld [vmem:[#allocation83_spill] sm:$0xff]  ;;  %v18507_v56 = vld [vmem:[#allocation85_spill] sm:$0xff] }
 0x25d   : > { %11150 = vmatprep.mubr.msk.f32.mxu0 %vm18315_vm9, %v18498_v55  ;;  %v13100_v32 = vadd.f32 %v12963_v27, %v18499_v18  ;;  %v18500_v8 = vrot.slane %v12362_v24, 1  ;;  %v13108_v14 = vadd.f32 %v7048_v21, %v7036_v47  ;;  %v13111_v40 = vadd.f32 %v7117_v36, %v18502_v11  ;;  %v18509_v55 = vld [vmem:[#allocation94_spill] sm:$0xff]  ;;  %v18617_v57 = vld [vmem:[#allocation131_spill] sm:$0xff] }
 0x25e   : > { %18495 = vst [vmem:[#allocation154_spill] sm:$0xff] %v13091_v4  ;;  %18497 = vst [vmem:[#allocation92_spill] sm:$0xff] %v13094_v25  ;;  %v13115_v48 = vadd.f32 %v12967_v30, %v12842_v45  ;;  %v18504_v9 = vrot.slane %v12442_v62, 1  ;;  %v7116_v23 = vadd.f32 %v13019_v53, %v18506_v59  ;;  %v7119_v21 = vadd.f32 %v13023_v13, %v18507_v56  ;;  %v18508_v45 = vld [vmem:[#allocation88_spill] sm:$0xff]  ;;  %v18606_v4 = vld [vmem:[#allocation97_spill] sm:$0xff] }
 0x25f   : > { %v13106_v2 = vsel %vm3484_vm6, %v18500_v8, %v12362_v24  ;;  %18501 = vst [vmem:[#allocation9_spill] sm:$0xff] %v13108_v14  ;;  %18503 = vst [vmem:[#allocation116_spill] sm:$0xff] %v13111_v40  ;;  %v13129_v47 = vadd.f32 %v12970_v31, %v12867_v22  ;;  %v13132_v36 = vmul.f32 0.0625, %v12904_v0  ;;  %v7118_v42 = vadd.f32 %v13027_v51, %v18508_v45  ;;  %v18510_v8 = vld [vmem:[#allocation8_spill] sm:$0xff]  ;;  %v18511_v22 = vld [vmem:[#allocation102_spill] sm:$0xff] }
 0x260   : > { %v13121_v20 = vsel %vm3484_vm6, %v18504_v9, %v12442_v62  ;;  %v7121_v18 = vadd.f32 %v13031_v43, %v18509_v55  ;;  %11151 = vmatmul.mubr.msk.f32.gmra.mrb[90].mxu0 %vm18315_vm9, %v18510_v8  ;;  %v13141_v11 = vmul.f32 0.0625, %v12921_v46  ;;  %v13144_v9 = vmul.f32 0.0625, %v13106_v2  ;;  %v18513_v0 = vld [vmem:[#allocation110_spill] sm:$0xff]  ;;  %v18517_v55 = vld [vmem:[#allocation115_spill] sm:$0xff]  ;;  %v18599_v25 = vld [vmem:[#allocation76_spill] sm:$0xff] }
 0x261   : > { %18505 = vst [vmem:[#allocation100_spill] sm:$0xff] %v13121_v20  ;;  %v13147_v59 = vadd.f32 %v7116_v23, %v18511_v22  ;;  %v13150_v56 = vadd.f32 %v7119_v21, %v18513_v0  ;;  %11153 = vmatprep.mubr.msk.f32.mxu0 %vm18315_vm9, %v18515_v39  ;;  %v13155_v45 = vmul.f32 0.1875, %v13121_v20  ;;  %v13158_v8 = vadd.f32 %v7118_v42, %v18517_v55  ;;  %v18519_v46 = vld [vmem:[#allocation123_spill] sm:$0xff]  ;;  %v18523_v21 = vld [vmem:[#allocation106_spill] sm:$0xff]  ;;  %v18600_v14 = vld [vmem:[#allocation104_spill] sm:$0xff] }
 0x262   : > { %v13161_v10 = vadd.f32 %v7121_v18, %v18519_v46  ;;  %v7120_v61 = vadd.f32 %v13039_v34, %v18521_v35  ;;  %v13166_v23 = vmul.f32 0.1875, %v13011_v6  ;;  %v7123_v22 = vadd.f32 %v13052_v7, %v18523_v21  ;;  %v18524_v0 = vld [vmem:[#allocation111_spill] sm:$0xff]  ;;  %v18526_v18 = vld [vmem:[#allocation124_spill] sm:$0xff]  ;;  %v18528_v46 = vld [vmem:[#allocation121_spill] sm:$0xff] }
 0x263   : > { %18512 = vst [vmem:[#allocation83_spill] sm:$0xff] %v13147_v59  ;;  %18514 = vst [vmem:[#allocation85_spill] sm:$0xff] %v13150_v56  ;;  %v7122_v39 = vadd.f32 %v13059_v16, %v18524_v0  ;;  %v7125_v38 = vadd.f32 %v13069_v17, %v18525_v60  ;;  %v13175_v42 = vmul.f32 0.0625, %v12954_v19  ;;  %v7124_v35 = vadd.f32 %v13085_v37, %v18528_v46  ;;  %v18529_v6 = vld [vmem:[#allocation128_spill] sm:$0xff]  ;;  %v18593_v59 = vld [vmem:[#allocation18_spill] sm:$0xff] }
 0x264   : > { %18516 = vst [vmem:[#allocation88_spill] sm:$0xff] %v13155_v45  ;;  %18518 = vst [vmem:[#allocation94_spill] sm:$0xff] %v13158_v8  ;;  %v13178_v55 = vadd.f32 %v7120_v61, %v18526_v18  ;;  %v7127_v20 = vadd.f32 %v13089_v1, %v18529_v6  ;;  %v18531_v21 = vld [vmem:[#allocation132_spill] sm:$0xff]  ;;  %v18535_v61 = vld [vmem:[#allocation133_spill] sm:$0xff] }
 0x265   : > { %18520 = vst [vmem:[#allocation8_spill] sm:$0xff] %v13161_v10  ;;  %18522 = vst [vmem:[#allocation102_spill] sm:$0xff] %v13166_v23  ;;  %v18530_v10 = vld [vmem:[#allocation10_spill] sm:$0xff]  ;;  %v13187_v0 = vadd.f32 %v7123_v22, %v18531_v21  ;;  %v13190_v60 = vadd.f32 %v7122_v39, %v12900_v3  ;;  %v13193_v8 = vadd.f32 %v7125_v38, %v12925_v50  ;;  %v18540_v39 = vrot.slane %v12505_v28, 1  ;;  %v18543_v46 = vld [vmem:[#allocation12_spill] sm:$0xff] }
 0x266   : > { %18527 = vst [vmem:[#allocation110_spill] sm:$0xff] %v13178_v55  ;;  %11154 = vmatmul.mubr.msk.f32.gmra.mrb[92].mxu0 %vm18315_vm9, %v18530_v10  ;;  %v7126_v18 = vadd.f32 %v13100_v32, %v18535_v61  ;;  %v18536_v55 = vld [vmem:[#allocation13_spill] sm:$0xff]  ;;  %v13200_v6 = vadd.f32 %v7124_v35, %v12942_v44  ;;  %v13203_v10 = vadd.f32 %v7127_v20, %v13132_v36  ;;  %v18545_v35 = vld [vmem:[#allocation34_spill] sm:$0xff] }
 0x267   : > { %18532 = vst [vmem:[#allocation11_spill] sm:$0xff] %v13187_v0  ;;  %18533 = vst [vmem:[#allocation115_spill] sm:$0xff] %v13190_v60  ;;  %11156 = vmatprep.mubr.msk.f32.mxu0 %vm18315_vm9, %v18536_v55  ;;  %v7129_v22 = vadd.f32 %v13115_v48, %v12913_v52  ;;  %v7128_v3 = vadd.f32 %v13129_v47, %v12928_v5  ;;  %v7145_v38 = vadd.f32 %v13045_v54, %v13155_v45  ;;  %v18591_v60 = vld [vmem:[#allocation17_spill] sm:$0xff] }
 0x268   : > { %18534 = vst [vmem:[#allocation123_spill] sm:$0xff] %v13193_v8  ;;  %18537 = vst [vmem:[#allocation98_spill] sm:$0xff] %v13200_v6  ;;  %v13210_v50 = vadd.f32 %v7126_v18, %v13141_v11  ;;  %v7151_v44 = vsel %vm3484_vm6, %v18540_v39, %v12505_v28  ;;  %v7144_v20 = vadd.f32 %v7004_v29, %v13166_v23  ;;  %v7146_v55 = vrot.slane %v12511_v15, 1  ;;  %v18547_v29 = vld [vmem:[#allocation21_spill] sm:$0xff]  ;;  %v18557_v28 = vld [vmem:[#allocation36_spill] sm:$0xff] }
 0x269   : > { %18538 = vst [vmem:[#allocation106_spill] sm:$0xff] %v13203_v10  ;;  %v13221_v52 = vadd.f32 %v7129_v22, %v13144_v9  ;;  %v13224_v5 = vadd.f32 %v7128_v3, %v13175_v42  ;;  %v18544_v54 = vrot.slane %v12381_v63, 1  ;;  %v18546_v21 = vrot.slane %v18545_v35, 1  ;;  %v18612_v23 = vld [vmem:[#allocation44_spill] sm:$0xff] }
 0x26a   : > { %18539 = vst [vmem:[#allocation111_spill] sm:$0xff] %v13210_v50  ;;  %11157 = vmatmul.mubr.msk.f32.gmra.mrb[94].mxu0 %vm18315_vm9, %v18543_v46  ;;  %v7155_v18 = vmul.f32 0.0625, %v7151_v44  ;;  %v18549_v22 = vmov %v18540_v39  ;;  %v18550_v39 = vld [vmem:[#allocation20_spill] sm:$0xff]  ;;  %v18563_v50 = vld [vmem:[#allocation35_spill] sm:$0xff]  ;;  %v18592_v0 = vrot.slane %v18591_v60, 7 }
 0x26b   : > { %18541 = vst [vmem:[#allocation118_spill] sm:$0xff] %v13221_v52  ;;  %18542 = vst [vmem:[#allocation124_spill] sm:$0xff] %v13224_v5  ;;  %v13233_v61 = vsel %vm3484_vm6, %v18546_v21, %v18544_v54  ;;  %11159 = vmatprep.mubr.msk.f32.mxu0 %vm18315_vm9, %v18547_v29  ;;  %v7148_v3 = vsel %vm3484_vm6, %v7146_v55, %v18549_v22  ;;  %v18551_v5 = vld [vmem:[#allocation28_spill] sm:$0xff]  ;;  %v18553_v54 = vld [vmem:[#allocation38_spill] sm:$0xff] }
 0x26c   : > { %v13237_v15 = vadd.f32 %v7155_v18, %v7145_v38  ;;  %v7154_v46 = vmul.f32 0.0625, %v7148_v3  ;;  %v3518_v44 = vrot.slane %v18553_v54, 1  ;;  %v18554_v21 = vld [vmem:[#allocation27_spill] sm:$0xff]  ;;  %v18555_v38 = vld [vmem:[#allocation14_spill] sm:$0xff]  ;;  %v18558_v55 = vld [vmem:[#allocation37_spill] sm:$0xff]  ;;  %v3471_v56 = vsel %vm18296_vm2, %v18591_v60, %v18592_v0 }
 0x26d   : > { %v13252_v18 = vmul.f32 0.0625, %v18555_v38  ;;  %v3519_v29 = vrot.slane %v18558_v55, 1  ;;  %v18559_v22 = vld [vmem:[#allocation53_spill] sm:$0xff]  ;;  %v18565_v38 = vld [vmem:[#allocation46_spill] sm:$0xff] }
 0x26e   : > { %18548 = vst [vmem:[#allocation121_spill] sm:$0xff] %v13237_v15  ;;  %11160 = vmatmul.mubr.msk.f32.gmra.mrb[96].mxu0 %vm18315_vm9, %v18550_v39  ;;  %v13246_v52 = vadd.f32 %v7154_v46, %v7144_v20  ;;  %v13258_v3 = vmul.f32 0.0625, %v18559_v22 }
 0x26f   : > { %11162 = vmatprep.mubr.msk.f32.mxu0 %vm18315_vm9, %v18551_v5  ;;  %18556 = vst [vmem:[#allocation10_spill] sm:$0xff] %v13252_v18  ;;  %v18561_v5 = vld [vmem:[#allocation68_spill] sm:$0xff] }
 0x270   : > { %18552 = vst [vmem:[#allocation128_spill] sm:$0xff] %v13246_v52  ;;  %18560 = vst [vmem:[#allocation132_spill] sm:$0xff] %v13258_v3  ;;  %v11043_v39 = vpop.f32.mrb[52].mxu0  ;;  %v18562_v52 = vld [vmem:[#allocation72_spill] sm:$0xff] }
 0x271   : > { %v3980_v20 = vadd.f32 %v11043_v39, %v18561_v5  ;;  %v2490_v46 = vpop.f32.mrb[53].mxu0 }
 0x272   : > { %11163 = vmatmul.mubr.msk.f32.gmra.mrb[98].mxu0 %vm18315_vm9, %v18554_v21  ;;  %v3979_v15 = vadd.f32 %v18562_v52, %v2490_v46  ;;  %v13265_v21 = vsel %vm3484_vm6, %v3518_v44, %v3519_v29  ;;  %v18567_v52 = vld [vmem:[#allocation77_spill] sm:$0xff]  ;;  %v18568_v46 = vld [vmem:[#allocation15_spill] sm:$0xff] }
 0x273   : > { %11165 = vmatprep.mubr.msk.f32.mxu0 %vm18315_vm9, %v18557_v28  ;;  %18564 = vst [vmem:[#allocation133_spill] sm:$0xff] %v13265_v21  ;;  %4045 = vrot.lane.b32.xlu1 %v3980_v20, %s18291_s12  ;;  %v18566_v28 = vld [vmem:[#allocation75_spill] sm:$0xff]  ;;  %v7050_v5 = vadd.f32 %v18567_v52, %v13258_v3  ;;  %v18572_v20 = vld [vmem:[#allocation45_spill] sm:$0xff] }
 0x274   : > { %v7051_v22 = vadd.f32 %v18566_v28, %v13252_v18  ;;  %4043 = vrot.lane.b32.xlu0 %v3979_v15, %s18291_s12  ;;  %v11093_v39 = vpop.f32.mrb[84].mxu1  ;;  %v18573_v28 = vld [vmem:[#allocation16_spill] sm:$0xff]  ;;  %v18576_v52 = vld [vmem:[#allocation55_spill] sm:$0xff] }
 0x275   : > { %v13286_v18 = vmul.f32 0.0625, %v18573_v28  ;;  %v18575_v15 = vld [vmem:[#allocation56_spill] sm:$0xff]  ;;  %v7009_v3 = vadd.f32 %v13006_v33, %v18576_v52  ;;  %v13307_v52 = vmul.f32 0.1875, %v18558_v55 }
 0x276   : > { %11166 = vmatmul.mubr.msk.f32.gmra.mrb[100].mxu0 %vm18315_vm9, %v18563_v50  ;;  %v18569_v50 = vrot.slane %v18568_v46, 7  ;;  %v13279_v10 = vadd.f32 %v11093_v39, %v7051_v22  ;;  %v18579_v39 = vld [vmem:[#allocation54_spill] sm:$0xff] }
 0x277   : > { %11168 = vmatprep.mubr.msk.f32.mxu0 %vm18315_vm9, %v18565_v38  ;;  %v2843_v38 = vpop.f32.mrb[85].mxu1  ;;  %18574 = vst [vmem:[#allocation21_spill] sm:$0xff] %v13286_v18  ;;  %18582 = vst [vmem:[#allocation28_spill] sm:$0xff] %v13307_v52 }
 0x278   : > { %v3470_v44 = vsel %vm18296_vm2, %v18568_v46, %v18569_v50  ;;  %18570 = vst [vmem:[#allocation13_spill] sm:$0xff] %v13279_v10  ;;  %v13281_v6 = vadd.f32 %v7050_v5, %v2843_v38  ;;  %v18578_v46 = vld [vmem:[#allocation57_spill] sm:$0xff]  ;;  %v7053_v50 = vadd.f32 %v7009_v3, %v13286_v18  ;;  %v13316_v3 = vmul.f32 0.1875, %v18553_v54  ;;  %v18588_v18 = vld [vmem:[#allocation79_spill] sm:$0xff] }
 0x279   : > { %v13292_v8 = vmul.f32 0.0625, %v3470_v44  ;;  %v7008_v22 = vadd.f32 %v13019_v53, %v18578_v46  ;;  %v18580_v5 = vld [vmem:[#allocation65_spill] sm:$0xff] }
 0x27a   : > { %18571 = vst [vmem:[#allocation12_spill] sm:$0xff] %v13281_v6  ;;  %11169 = vmatmul.mubr.msk.f32.gmra.mrb[102].mxu0 %vm18315_vm9, %v18572_v20  ;;  %18585 = vst [vmem:[#allocation14_spill] sm:$0xff] %v13316_v3 }
 0x27b   : > { %11171 = vmatprep.mubr.msk.f32.mxu0 %vm18315_vm9, %v18575_v15  ;;  %18577 = vst [vmem:[#allocation20_spill] sm:$0xff] %v13292_v8  ;;  %v7052_v20 = vadd.f32 %v7008_v22, %v13292_v8  ;;  %v18581_v15 = vld [vmem:[#allocation40_spill] sm:$0xff] }
 0x27c   : > { %v11096_v38 = vpop.f32.mrb[86].mxu1  ;;  %v3522_v10 = vrot.slane %v18581_v15, 1  ;;  %v13304_v33 = vmul.f32 0.5625, %v18581_v15  ;;  %v18587_v8 = vld [vmem:[#allocation64_spill] sm:$0xff] }
 0x27d   : > { %v13309_v53 = vadd.f32 %v11096_v38, %v7053_v50  ;;  %v2853_v46 = vpop.f32.mrb[87].mxu1  ;;  %v13325_v50 = vmul.f32 0.1875, %v18573_v28  ;;  %v13327_v38 = vmul.f32 0.1875, %v3470_v44  ;;  %v18598_v28 = vld [vmem:[#allocation90_spill] sm:$0xff] }
 0x27e   : > { %11172 = vmatmul.mubr.msk.f32.gmra.mrb[104].mxu0 %vm18315_vm9, %v18579_v39  ;;  %v18584_v39 = vld [vmem:[#allocation41_spill] sm:$0xff]  ;;  %v13318_v22 = vadd.f32 %v7052_v20, %v2853_v46  ;;  %v13334_v20 = vmul.f32 0.0625, %v18593_v59  ;;  %v18596_v46 = vld [vmem:[#allocation84_spill] sm:$0xff]  ;;  %v3577_v0 = vsel %vm3484_vm6, %v3522_v10, %v18581_v15 }
 0x27f   : > { %11174 = vmatprep.mubr.msk.f32.mxu0 %vm18315_vm9, %v18580_v5  ;;  %18583 = vst [vmem:[#allocation27_spill] sm:$0xff] %v13309_v53  ;;  %v3521_v6 = vrot.slane %v18584_v39, 1  ;;  %v13313_v5 = vmul.f32 0.5625, %v18584_v39  ;;  %18589 = vst [vmem:[#allocation37_spill] sm:$0xff] %v13325_v50 }
 0x280   : > { %18586 = vst [vmem:[#allocation36_spill] sm:$0xff] %v13318_v22  ;;  %18590 = vst [vmem:[#allocation53_spill] sm:$0xff] %v13327_v38  ;;  %v11046_v53 = vpop.f32.mrb[54].mxu0 }
 0x281   : > { %18594 = vst [vmem:[#allocation68_spill] sm:$0xff] %v13334_v20  ;;  %v2500_v22 = vpop.f32.mrb[55].mxu0  ;;  %v13343_v44 = vadd.f32 %v13316_v3, %v13313_v5  ;;  %v3523_v60 = vsel %vm3484_vm6, %v3521_v6, %v3522_v10 }
 0x282   : > { %11175 = vmatmul.mubr.msk.f32.gmra.mrb[106].mxu0 %vm18315_vm9, %v18587_v8  ;;  %v13338_v8 = vadd.f32 %v13307_v52, %v13304_v33  ;;  %v3981_v40 = vadd.f32 %v18598_v28, %v2500_v22  ;;  %v13360_v22 = vmul.f32 0.1875, %v3577_v0  ;;  %v13364_v28 = vmul.f32 0.0625, %v3471_v56 }
 0x283   : > { %11177 = vmatprep.mubr.msk.f32.mxu0 %vm18315_vm9, %v18588_v18  ;;  %v3982_v18 = vadd.f32 %v11046_v53, %v18596_v46  ;;  %18597 = vst [vmem:[#allocation35_spill] sm:$0xff] %v13343_v44  ;;  %v7011_v53 = vadd.f32 %v13023_v13, %v13325_v50  ;;  %v13358_v46 = vsel %vm3484_vm6, %v3519_v29, %v18558_v55  ;;  %v18604_v13 = vld [vmem:[#allocation93_spill] sm:$0xff]  ;;  %v13378_v52 = vmul.f32 0.0625, %v13265_v21 }
 0x284   : > { %18595 = vst [vmem:[#allocation72_spill] sm:$0xff] %v13338_v8  ;;  %18601 = vst [vmem:[#allocation46_spill] sm:$0xff] %v13358_v46  ;;  %v11049_v3 = vpop.f32.mrb[56].mxu0  ;;  %4047 = vrot.lane.b32.xlu0 %v3981_v40, %s18291_s12  ;;  %v13370_v6 = vmul.f32 0.0625, %v13358_v46  ;;  %v3902_v29 = vadd.f32 %v13360_v22, %v13338_v8  ;;  %v18611_v8 = vld [vmem:[#allocation43_spill] sm:$0xff]  ;;  %v13452_v26 = vmul.f32 0.0625, %v3523_v60 }
 0x285   : > { %4049 = vrot.lane.b32.xlu1 %v3982_v18, %s18291_s12  ;;  %18602 = vst [vmem:[#allocation75_spill] sm:$0xff] %v13364_v28  ;;  %v3984_v10 = vadd.f32 %v11049_v3, %v18604_v13  ;;  %v2510_v18 = vpop.f32.mrb[57].mxu0  ;;  %18605 = vst [vmem:[#allocation15_spill] sm:$0xff] %v13378_v52  ;;  %v7055_v3 = vadd.f32 %v7011_v53, %v13334_v20  ;;  %v13401_v53 = vmul.f32 0.1875, %v18581_v15  ;;  %v13417_v15 = vmul.f32 0.1875, %v18593_v59  ;;  %v18634_v21 = vld [vmem:[#allocation49_spill] sm:$0xff] }
 0x286   : > { %11178 = vmatmul.mubr.msk.f32.gmra.mrb[108].mxu0 %vm18315_vm9, %v18599_v25  ;;  %v13362_v25 = vmul.f32 0.1875, %v3523_v60  ;;  %18603 = vst [vmem:[#allocation77_spill] sm:$0xff] %v13370_v6  ;;  %v3983_v40 = vadd.f32 %v18606_v4, %v2510_v18  ;;  %v13388_v13 = vadd.f32 %v13370_v6, %v3902_v29  ;;  %v3524_v4 = vrot.slane %v18612_v23, 1  ;;  %18627 = vst [vmem:[#allocation84_spill] sm:$0xff] %v13452_v26 }
 0x287   : > { %11180 = vmatprep.mubr.msk.f32.mxu0 %vm18315_vm9, %v18600_v14  ;;  %v7010_v14 = vadd.f32 %v13027_v51, %v13327_v38  ;;  %v18608_v51 = vld [vmem:[#allocation135_spill] sm:$0xff]  ;;  %v3525_v38 = vrot.slane %v18611_v8, 1  ;;  %v13396_v18 = vmul.f32 0.5625, %v18611_v8  ;;  %18613 = vst [vmem:[#allocation56_spill] sm:$0xff] %v13401_v53  ;;  %v13404_v29 = vmul.f32 0.5625, %v18612_v23  ;;  %18618 = vst [vmem:[#allocation65_spill] sm:$0xff] %v13417_v15 }
 0x288   : > { %v3901_v50 = vadd.f32 %v13362_v25, %v13343_v44  ;;  %18609 = vst [vmem:[#allocation45_spill] sm:$0xff] %v13388_v13  ;;  %4051 = vrot.lane.b32.xlu0 %v3983_v40, %s18291_s12  ;;  %v3527_v46 = vrot.slane %v18634_v21, 1 }
 0x289   : > { %4053 = vrot.lane.b32.xlu1 %v3984_v10, %s18291_s12  ;;  %v7054_v10 = vadd.f32 %v7010_v14, %v13364_v28  ;;  %v18619_v14 = vld [vmem:[#allocation19_spill] sm:$0xff] }
 0x28a   : > { %11181 = vmatmul.mubr.msk.f32.gmra.mrb[110].mxu0 %vm18315_vm9, %v18607_v12  ;;  %v13391_v44 = vadd.f32 %v13378_v52, %v3901_v50  ;;  %v11099_v12 = vpop.f32.mrb[88].mxu1  ;;  %v13407_v50 = vmul.f32 0.1875, %v18584_v39  ;;  %v3063_v52 = vpop.permute.xlu0 %3062  ;;  %v18620_v40 = vrot.slane %v18619_v14, 7 }
 0x28b   : > { %11183 = vmatprep.mubr.msk.f32.mxu0 %vm18315_vm9, %v18608_v51  ;;  %v13409_v51 = vadd.f32 %v11099_v12, %v7055_v3  ;;  %v2863_v20 = vpop.f32.mrb[89].mxu1  ;;  %v3578_v3 = vsel %vm3484_vm6, %v3525_v38, %v18611_v8  ;;  %v3526_v12 = vsel %vm3484_vm6, %v3524_v4, %v3525_v38  ;;  %v7013_v38 = vadd.f32 %v13031_v43, %v13417_v15 }
 0x28c   : > { %18610 = vst [vmem:[#allocation16_spill] sm:$0xff] %v13391_v44  ;;  %18614 = vst [vmem:[#allocation55_spill] sm:$0xff] %v13407_v50  ;;  %v13411_v6 = vadd.f32 %v7054_v10, %v2863_v20  ;;  %v3472_v28 = vsel %vm18296_vm2, %v18619_v14, %v18620_v40  ;;  %v3065_v20 = vpop.permute.xlu1 %3064  ;;  %v13428_v10 = vadd.f32 %v13401_v53, %v13396_v18  ;;  %v13434_v59 = vmul.f32 0.1875, %v3578_v3  ;;  %v18624_v14 = vld [vmem:[#allocation22_spill] sm:$0xff] }
 0x28d   : > { %18615 = vst [vmem:[#allocation57_spill] sm:$0xff] %v13409_v51  ;;  %v13438_v51 = vmul.f32 0.1875, %v3471_v56  ;;  %v13441_v40 = vmul.f32 0.0625, %v18624_v14  ;;  %v13454_v56 = vmul.f32 0.0625, %v3472_v28 }
 0x28e   : > { %18616 = vst [vmem:[#allocation54_spill] sm:$0xff] %v13411_v6  ;;  %11184 = vmatmul.mubr.msk.f32.gmra.mrb[112].mxu0 %vm18315_vm9, %v18617_v57  ;;  %18621 = vst [vmem:[#allocation40_spill] sm:$0xff] %v13428_v10  ;;  %v13432_v57 = vadd.f32 %v13407_v50, %v13404_v29  ;;  %v3904_v4 = vadd.f32 %v13434_v59, %v13428_v10  ;;  %v13448_v6 = vmul.f32 0.0625, %v3577_v0  ;;  %v18632_v10 = vld [vmem:[#allocation108_spill] sm:$0xff] }
 0x28f   : > { %11186 = vmatprep.mubr.msk.f32.mxu0 %vm18315_vm9, %v3063_v52  ;;  %v13436_v52 = vmul.f32 0.1875, %v3526_v12  ;;  %18623 = vst [vmem:[#allocation79_spill] sm:$0xff] %v13438_v51  ;;  %18625 = vst [vmem:[#allocation17_spill] sm:$0xff] %v13441_v40  ;;  %v7012_v13 = vadd.f32 %v13039_v34, %v13438_v51  ;;  %v7057_v60 = vadd.f32 %v7013_v38, %v13441_v40  ;;  %v13489_v40 = vmul.f32 0.1875, %v18624_v14 }
 0x290   : > { %18622 = vst [vmem:[#allocation64_spill] sm:$0xff] %v13432_v57  ;;  %18626 = vst [vmem:[#allocation18_spill] sm:$0xff] %v13448_v6  ;;  %v11052_v44 = vpop.f32.mrb[58].mxu0  ;;  %v13460_v43 = vadd.f32 %v13448_v6, %v3904_v4 }
 0x291   : > { %v3903_v45 = vadd.f32 %v13436_v52, %v13432_v57  ;;  %18628 = vst [vmem:[#allocation90_spill] sm:$0xff] %v13454_v56  ;;  %v2520_v50 = vpop.f32.mrb[59].mxu0  ;;  %v18633_v57 = vld [vmem:[#allocation47_spill] sm:$0xff]  ;;  %v7056_v4 = vadd.f32 %v7012_v13, %v13454_v56  ;;  %18637 = vst [vmem:[#allocation101_spill] sm:$0xff] %v13489_v40 }
 0x292   : > { %11187 = vmatmul.mubr.msk.f32.gmra.mrb[114].mxu0 %vm18315_vm9, %v3065_v20  ;;  %v18629_v20 = vld [vmem:[#allocation105_spill] sm:$0xff]  ;;  %18630 = vst [vmem:[#allocation76_spill] sm:$0xff] %v13460_v43  ;;  %v3985_v15 = vadd.f32 %v18632_v10, %v2520_v50  ;;  %v3528_v53 = vrot.slane %v18633_v57, 1  ;;  %v13471_v34 = vmul.f32 0.5625, %v18633_v57  ;;  %v13479_v50 = vmul.f32 0.5625, %v18634_v21  ;;  %v18646_v43 = vld [vmem:[#allocation114_spill] sm:$0xff] }
 0x293   : > { %v3986_v39 = vadd.f32 %v11052_v44, %v18629_v20  ;;  %v13463_v0 = vadd.f32 %v13452_v26, %v3903_v45  ;;  %v13476_v45 = vmul.f32 0.1875, %v18611_v8  ;;  %v13529_v26 = vmul.f32 0.0625, %v3526_v12 }
 0x294   : > { %4055 = vrot.lane.b32.xlu0 %v3985_v15, %s18291_s12  ;;  %v11102_v44 = vpop.f32.mrb[90].mxu1  ;;  %v18638_v15 = vld [vmem:[#allocation23_spill] sm:$0xff]  ;;  %v13497_v13 = vsel %vm3484_vm6, %v3528_v53, %v18633_v57  ;;  %v13500_v56 = vsel %vm3484_vm6, %v3527_v46, %v3528_v53  ;;  %v7015_v46 = vadd.f32 %v13052_v7, %v13489_v40 }
 0x295   : > { %18631 = vst [vmem:[#allocation104_spill] sm:$0xff] %v13463_v0  ;;  %4057 = vrot.lane.b32.xlu1 %v3986_v39, %s18291_s12  ;;  %v13482_v39 = vmul.f32 0.1875, %v18612_v23  ;;  %v13484_v10 = vadd.f32 %v11102_v44, %v7057_v60  ;;  %v2873_v38 = vpop.f32.mrb[91].mxu1  ;;  %v18639_v51 = vrot.slane %v18638_v15, 7  ;;  %v13504_v60 = vadd.f32 %v13476_v45, %v13471_v34 }
 0x296   : > { %v13486_v20 = vadd.f32 %v7056_v4, %v2873_v38  ;;  %v13511_v44 = vmul.f32 0.1875, %v13497_v13  ;;  %v13516_v4 = vmul.f32 0.1875, %v3472_v28  ;;  %v18643_v38 = vld [vmem:[#allocation25_spill] sm:$0xff] }
 0x297   : > { %18635 = vst [vmem:[#allocation93_spill] sm:$0xff] %v13484_v10  ;;  %v3473_v8 = vsel %vm18296_vm2, %v18638_v15, %v18639_v51  ;;  %18640 = vst [vmem:[#allocation135_spill] sm:$0xff] %v13504_v60  ;;  %v13508_v14 = vadd.f32 %v13482_v39, %v13479_v50  ;;  %v13514_v51 = vmul.f32 0.1875, %v13500_v56  ;;  %v13519_v15 = vmul.f32 0.0625, %v18643_v38 }
 0x298   : > { %18636 = vst [vmem:[#allocation97_spill] sm:$0xff] %v13486_v20  ;;  %18642 = vst [vmem:[#allocation131_spill] sm:$0xff] %v13516_v4  ;;  %v3906_v53 = vadd.f32 %v13511_v44, %v13504_v60  ;;  %v13525_v10 = vmul.f32 0.0625, %v3578_v3  ;;  %v13531_v6 = vmul.f32 0.0625, %v3473_v8  ;;  %v7014_v0 = vadd.f32 %v13059_v16, %v13516_v4  ;;  %v18648_v60 = vld [vmem:[#allocation120_spill] sm:$0xff] }
 0x299   : > { %18641 = vst [vmem:[#allocation43_spill] sm:$0xff] %v13508_v14  ;;  %18644 = vst [vmem:[#allocation19_spill] sm:$0xff] %v13519_v15  ;;  %v3905_v20 = vadd.f32 %v13514_v51, %v13508_v14  ;;  %v7059_v12 = vadd.f32 %v7015_v46, %v13519_v15 }
 0x29a   : > { %18645 = vst [vmem:[#allocation22_spill] sm:$0xff] %v13531_v6  ;;  %v13537_v7 = vadd.f32 %v13525_v10, %v3906_v53  ;;  %v7058_v16 = vadd.f32 %v7014_v0, %v13531_v6  ;;  %v13552_v53 = vmul.f32 0.1875, %v18643_v38 }
 0x29b   : > { %v13540_v3 = vadd.f32 %v13529_v26, %v3905_v20  ;;  %v18651_v20 = vld [vmem:[#allocation24_spill] sm:$0xff] }
 0x29c   : > { %v11055_v28 = vpop.f32.mrb[60].mxu0  ;;  %v7017_v0 = vadd.f32 %v13069_v17, %v13552_v53 }
 0x29d   : > { %v3988_v23 = vadd.f32 %v11055_v28, %v18646_v43  ;;  %v2530_v54 = vpop.f32.mrb[61].mxu0  ;;  %18647 = vst [vmem:[#allocation105_spill] sm:$0xff] %v13540_v3  ;;  %v18652_v3 = vrot.slane %v18651_v20, 7 }
 0x29e   : > { %v3987_v40 = vadd.f32 %v18648_v60, %v2530_v54  ;;  %v13558_v54 = vmul.f32 0.1875, %v3473_v8  ;;  %v18653_v60 = vld [vmem:[#allocation29_spill] sm:$0xff] }
 0x29f   : > { %4061 = vrot.lane.b32.xlu1 %v3988_v23, %s18291_s12  ;;  %v3474_v23 = vsel %vm18296_vm2, %v18651_v20, %v18652_v3 }
 0x2a0   : > { %4059 = vrot.lane.b32.xlu0 %v3987_v40, %s18291_s12  ;;  %v11105_v14 = vpop.f32.mrb[92].mxu1  ;;  %v13561_v40 = vmul.f32 0.0625, %v18653_v60  ;;  %v7016_v38 = vadd.f32 %v13085_v37, %v13558_v54  ;;  %v13580_v37 = vmul.f32 0.1875, %v18653_v60 }
 0x2a1   : > { %v13547_v4 = vadd.f32 %v11105_v14, %v7059_v12  ;;  %v2883_v43 = vpop.f32.mrb[93].mxu1  ;;  %v13565_v14 = vmul.f32 0.0625, %v3474_v23  ;;  %v18656_v12 = vld [vmem:[#allocation127_spill] sm:$0xff] }
 0x2a2   : > { %v13549_v28 = vadd.f32 %v7058_v16, %v2883_v43  ;;  %18654 = vst [vmem:[#allocation49_spill] sm:$0xff] %v13561_v40  ;;  %v7061_v8 = vadd.f32 %v7017_v0, %v13561_v40  ;;  %v18663_v0 = vld [vmem:[#allocation31_spill] sm:$0xff] }
 0x2a3   : > { %18649 = vst [vmem:[#allocation108_spill] sm:$0xff] %v13547_v4  ;;  %18655 = vst [vmem:[#allocation23_spill] sm:$0xff] %v13565_v14  ;;  %v18657_v4 = vld [vmem:[#allocation130_spill] sm:$0xff]  ;;  %v7060_v17 = vadd.f32 %v7016_v38, %v13565_v14  ;;  %v7019_v38 = vadd.f32 %v13089_v1, %v13580_v37 }
 0x2a4   : > { %18650 = vst [vmem:[#allocation47_spill] sm:$0xff] %v13549_v28 }
 0x2a8   : > { %v11058_v46 = vpop.f32.mrb[62].mxu0 }
 0x2a9   : > { %v3990_v16 = vadd.f32 %v11058_v46, %v18656_v12  ;;  %v2540_v43 = vpop.f32.mrb[63].mxu0  ;;  %v18660_v46 = vld [vmem:[#allocation26_spill] sm:$0xff] }
 0x2aa   : > { %v3989_v28 = vadd.f32 %v18657_v4, %v2540_v43  ;;  %v18661_v12 = vrot.slane %v18660_v46, 7 }
 0x2ab   : > { %4065 = vrot.lane.b32.xlu1 %v3990_v16, %s18291_s12  ;;  %v13586_v16 = vmul.f32 0.1875, %v3474_v23 }
 0x2ac   : > { %4063 = vrot.lane.b32.xlu0 %v3989_v28, %s18291_s12  ;;  %v11108_v3 = vpop.f32.mrb[94].mxu1  ;;  %v3475_v4 = vsel %vm18296_vm2, %v18660_v46, %v18661_v12  ;;  %v13589_v28 = vmul.f32 0.0625, %v18663_v0  ;;  %v13603_v46 = vadd.f32 %v13476_v45, %v13304_v33 }
 0x2ad   : > { %v13575_v20 = vadd.f32 %v11108_v3, %v7061_v8  ;;  %v2893_v6 = vpop.f32.mrb[95].mxu1  ;;  %18662 = vst [vmem:[#allocation120_spill] sm:$0xff] %v13586_v16  ;;  %v13593_v43 = vmul.f32 0.0625, %v3475_v4  ;;  %v7018_v60 = vadd.f32 %v13100_v32, %v13586_v16  ;;  %v18666_v8 = vld [vmem:[#allocation137_spill] sm:$0xff]  ;;  %v13609_v32 = vadd.f32 %v13482_v39, %v13313_v5 }
 0x2ae   : > { %v13577_v15 = vadd.f32 %v7060_v17, %v2893_v6  ;;  %18664 = vst [vmem:[#allocation24_spill] sm:$0xff] %v13589_v28  ;;  %v7063_v23 = vadd.f32 %v7019_v38, %v13589_v28  ;;  %v13617_v38 = vmul.f32 0.1875, %v18634_v21  ;;  %v7139_v5 = vadd.f32 %v13603_v46, %v13360_v22 }
 0x2af   : > { %18658 = vst [vmem:[#allocation25_spill] sm:$0xff] %v13575_v20  ;;  %18665 = vst [vmem:[#allocation29_spill] sm:$0xff] %v13593_v43  ;;  %v18667_v20 = vld [vmem:[#allocation140_spill] sm:$0xff]  ;;  %v7062_v12 = vadd.f32 %v7018_v60, %v13593_v43  ;;  %v18670_v60 = vld [vmem:[#allocation50_spill] sm:$0xff]  ;;  %v13647_v22 = vmul.f32 0.0625, %v13497_v13  ;;  %v13771_v43 = vmul.f32 0.1875, %v12375_v49 }
 0x2b0   : > { %18659 = vst [vmem:[#allocation114_spill] sm:$0xff] %v13577_v15  ;;  %v13633_v39 = vadd.f32 %v13617_v38, %v13404_v29  ;;  %v13653_v29 = vmul.f32 0.5625, %v12362_v24 }
 0x2b4   : > { %v11061_v6 = vpop.f32.mrb[64].mxu0 }
 0x2b5   : > { %v3992_v3 = vadd.f32 %v11061_v6, %v18666_v8  ;;  %v2550_v17 = vpop.f32.mrb[65].mxu0  ;;  %v13612_v6 = vmul.f32 0.1875, %v18633_v57  ;;  %v13629_v57 = vmul.f32 0.1875, %v18663_v0  ;;  %v13650_v0 = vadd.f32 %v7139_v5, %v13525_v10 }
 0x2b6   : > { %v3991_v15 = vadd.f32 %v18667_v20, %v2550_v17  ;;  %v7138_v17 = vadd.f32 %v13609_v32, %v13362_v25  ;;  %v13659_v25 = vmul.f32 0.0625, %v13500_v56 }
 0x2b7   : > { %4069 = vrot.lane.b32.xlu1 %v3992_v3, %s18291_s12  ;;  %v13623_v45 = vadd.f32 %v13612_v6, %v13396_v18  ;;  %v6970_v3 = vmul.f32 0.1875, %v18670_v60  ;;  %v18672_v18 = vld [vmem:[#allocation30_spill] sm:$0xff]  ;;  %v7021_v13 = vadd.f32 %v13115_v48, %v13629_v57  ;;  %v18678_v48 = vld [vmem:[#allocation143_spill] sm:$0xff] }
 0x2b8   : > { %4067 = vrot.lane.b32.xlu0 %v3991_v15, %s18291_s12  ;;  %v11111_v1 = vpop.f32.mrb[96].mxu1  ;;  %v6971_v15 = vmul.f32 0.1875, %v12442_v62 }
 0x2b9   : > { %v13614_v20 = vadd.f32 %v11111_v1, %v7063_v23  ;;  %v2903_v8 = vpop.f32.mrb[97].mxu1  ;;  %v13638_v23 = vmul.f32 0.1875, %v3475_v4  ;;  %v18673_v1 = vrot.slane %v18672_v18, 7  ;;  %v13662_v4 = vadd.f32 %v7138_v17, %v13529_v26 }
 0x2ba   : > { %v13619_v33 = vadd.f32 %v7062_v12, %v2903_v8  ;;  %v13656_v12 = vmul.f32 0.5625, %v18672_v18  ;;  %v18675_v8 = vld [vmem:[#allocation33_spill] sm:$0xff]  ;;  %v13670_v10 = vadd.f32 %v6971_v15, %v13471_v34  ;;  %v7141_v24 = vadd.f32 %v13623_v45, %v13434_v59  ;;  %v18679_v59 = vld [vmem:[#allocation144_spill] sm:$0xff] }
 0x2bb   : > { %18668 = vst [vmem:[#allocation127_spill] sm:$0xff] %v13614_v20  ;;  %18671 = vst [vmem:[#allocation26_spill] sm:$0xff] %v13638_v23  ;;  %v13644_v62 = vsel %vm18296_vm2, %v18672_v18, %v18673_v1  ;;  %v13665_v60 = vmul.f32 0.0625, %v18675_v8  ;;  %v7020_v26 = vadd.f32 %v13129_v47, %v13638_v23  ;;  %v13680_v17 = vadd.f32 %v6970_v3, %v13479_v50 }
 0x2bc   : > { %18669 = vst [vmem:[#allocation130_spill] sm:$0xff] %v13619_v33  ;;  %18674 = vst [vmem:[#allocation31_spill] sm:$0xff] %v13644_v62  ;;  %v13675_v5 = vmul.f32 0.0625, %v13644_v62  ;;  %v7140_v18 = vadd.f32 %v13633_v39, %v13436_v52  ;;  %v13686_v15 = vadd.f32 %v7141_v24, %v13647_v22  ;;  %v13694_v47 = vadd.f32 %v12947_v41, %v13653_v29 }
 0x2bd   : > { %18676 = vst [vmem:[#allocation137_spill] sm:$0xff] %v13665_v60  ;;  %v7065_v50 = vadd.f32 %v7021_v13, %v13665_v60  ;;  %v13699_v52 = vmul.f32 0.1875, %v13106_v2  ;;  %v13703_v3 = vadd.f32 %v13670_v10, %v13511_v44  ;;  %v13707_v24 = vadd.f32 %v12963_v27, %v13656_v12 }
 0x2be   : > { %18677 = vst [vmem:[#allocation140_spill] sm:$0xff] %v13675_v5  ;;  %v13690_v33 = vadd.f32 %v7140_v18, %v13659_v25  ;;  %18680 = vst [vmem:[#allocation50_spill] sm:$0xff] %v13694_v47  ;;  %v7064_v41 = vadd.f32 %v7020_v26, %v13675_v5  ;;  %v13712_v18 = vmul.f32 0.1875, %v12954_v19  ;;  %v13716_v2 = vadd.f32 %v13680_v17, %v13514_v51 }
 0x2bf   : > { %18681 = vst [vmem:[#allocation30_spill] sm:$0xff] %v13707_v24  ;;  %v3894_v27 = vadd.f32 %v13699_v52, %v13694_v47  ;;  %v18684_v51 = vrot.slane %v12375_v49, 1  ;;  %v13811_v62 = vmul.f32 0.1875, %v12381_v63  ;;  %v18695_v47 = vld [vmem:[#allocation38_spill] sm:$0xff] }
 0x2c0   : > { %v11064_v56 = vpop.f32.mrb[66].mxu0  ;;  %v3603_v60 = vmul.f32 0.5625, %v18695_v47 }
 0x2c1   : > { %v3994_v1 = vadd.f32 %v11064_v56, %v18678_v48  ;;  %v2560_v34 = vpop.f32.mrb[67].mxu0  ;;  %v3964_v26 = vadd.f32 %v13132_v36, %v3894_v27  ;;  %v13745_v27 = vmul.f32 0.1875, %v13074_v58 }
 0x2c2   : > { %v3993_v20 = vadd.f32 %v18679_v59, %v2560_v34  ;;  %v3574_v34 = vsel %vm3484_vm6, %v18684_v51, %v12375_v49  ;;  %v13733_v59 = vmul.f32 0.5625, %v12375_v49  ;;  %v13788_v49 = vmul.f32 0.1875, %v13233_v61 }
 0x2c3   : > { %4073 = vrot.lane.b32.xlu1 %v3994_v1, %s18291_s12  ;;  %v13739_v36 = vmul.f32 0.1875, %v3574_v34 }
 0x2c4   : > { %4071 = vrot.lane.b32.xlu0 %v3993_v20, %s18291_s12  ;;  %v11114_v56 = vpop.f32.mrb[98].mxu1  ;;  %v3893_v20 = vadd.f32 %v13712_v18, %v13707_v24  ;;  %v13774_v24 = vmul.f32 0.5625, %v18545_v35 }
 0x2c5   : > { %v13718_v13 = vadd.f32 %v11114_v56, %v7065_v50  ;;  %v2913_v44 = vpop.f32.mrb[99].mxu1 }
 0x2c6   : > { %v13720_v48 = vadd.f32 %v7064_v41, %v2913_v44  ;;  %v3963_v19 = vadd.f32 %v13141_v11, %v3893_v20  ;;  %v18685_v41 = vld [vmem:[#allocation32_spill] sm:$0xff]  ;;  %v13749_v20 = vadd.f32 %v12967_v30, %v13733_v59 }
 0x2c7   : > { %18682 = vst [vmem:[#allocation143_spill] sm:$0xff] %v13718_v13  ;;  %v13736_v44 = vmul.f32 0.5625, %v18685_v41 }
 0x2c8   : > { %18683 = vst [vmem:[#allocation144_spill] sm:$0xff] %v13720_v48  ;;  %18687 = vst [vmem:[#allocation156_spill] sm:$0xff] %v13749_v20 }
 0x2cc   : > { %v11067_v1 = vpop.f32.mrb[68].mxu0 }
 0x2cd   : > { %v3996_v50 = vadd.f32 %v11067_v1, %v3964_v26  ;;  %v2570_v56 = vpop.f32.mrb[69].mxu0  ;;  %v13755_v1 = vadd.f32 %v12970_v31, %v13736_v44  ;;  %v13768_v31 = vmul.f32 0.5625, %v12381_v63 }
 0x2ce   : > { %v3995_v13 = vadd.f32 %v3963_v19, %v2570_v56  ;;  %v3896_v19 = vadd.f32 %v13739_v36, %v13749_v20 }
 0x2cf   : > { %4077 = vrot.lane.b32.xlu1 %v3996_v50, %s18291_s12  ;;  %18689 = vst [vmem:[#allocation158_spill] sm:$0xff] %v13755_v1 }
 0x2d0   : > { %4075 = vrot.lane.b32.xlu0 %v3995_v13, %s18291_s12  ;;  %v13742_v11 = vpop.f32.mrb[100].mxu1  ;;  %v3895_v13 = vadd.f32 %v13745_v27, %v13755_v1  ;;  %v3966_v51 = vadd.f32 %v13144_v9, %v3896_v19  ;;  %v13777_v9 = vmul.f32 0.1875, %v18685_v41  ;;  %v3604_v1 = vmul.f32 0.5625, %v18558_v55  ;;  %v18698_v55 = vld [vmem:[#allocation133_spill] sm:$0xff]  ;;  %v18706_v41 = vld [vmem:[#allocation48_spill] sm:$0xff] }
 0x2d1   : > { %18686 = vst [vmem:[#allocation155_spill] sm:$0xff] %v13742_v11  ;;  %v13751_v26 = vpop.f32.mrb[101].mxu1  ;;  %v13852_v8 = vmul.f32 0.1875, %v18706_v41  ;;  %v18709_v41 = vld [vmem:[#allocation41_spill] sm:$0xff] }
 0x2d2   : > { %18688 = vst [vmem:[#allocation157_spill] sm:$0xff] %v13751_v26  ;;  %v3965_v56 = vadd.f32 %v13175_v42, %v3895_v13  ;;  %v18690_v26 = vrot.slane %v12381_v63, 1  ;;  %v13792_v13 = vadd.f32 %v13771_v43, %v13768_v31 }
 0x2d4   : > { %v3575_v48 = vsel %vm3484_vm6, %v18690_v26, %v12381_v63  ;;  %18693 = vst [vmem:[#allocation161_spill] sm:$0xff] %v13792_v13  ;;  %v13825_v63 = vmul.f32 0.1875, %v18698_v55  ;;  %vm6919_vm6 = vcmask 457728  }
 0x2d5   : > { %v13783_v26 = vmul.f32 0.1875, %v3575_v48  ;;  %v13854_v20 = vmul.f32 0.0625, %v3575_v48  ;;  %v18710_v48 = vrot.slane %v18709_v41, 7 }
 0x2d8   : > { %v11070_v50 = vpop.f32.mrb[70].mxu0 }
 0x2d9   : > { %v3998_v11 = vadd.f32 %v11070_v50, %v3966_v51  ;;  %v2580_v30 = vpop.f32.mrb[71].mxu0  ;;  %v13796_v51 = vadd.f32 %v13777_v9, %v13774_v24  ;;  %v13802_v50 = vmul.f32 0.0625, %v3574_v34  ;;  %v13815_v34 = vmul.f32 0.1875, %v18545_v35 }
 0x2da   : > { %v3997_v5 = vadd.f32 %v3965_v56, %v2580_v30  ;;  %v13805_v56 = vmul.f32 0.0625, %v13074_v58  ;;  %v18696_v58 = vld [vmem:[#allocation46_spill] sm:$0xff] }
 0x2db   : > { %4081 = vrot.lane.b32.xlu1 %v3998_v11, %s18291_s12  ;;  %18694 = vst [vmem:[#allocation162_spill] sm:$0xff] %v13796_v51  ;;  %v3897_v11 = vadd.f32 %v13788_v49, %v13796_v51  ;;  %v13833_v35 = vadd.f32 %v13815_v34, %v3603_v60 }
 0x2dc   : > { %4079 = vrot.lane.b32.xlu0 %v3997_v5, %s18291_s12  ;;  %v13781_v42 = vpop.f32.mrb[102].mxu1  ;;  %v3898_v5 = vadd.f32 %v13783_v26, %v13792_v13 }
 0x2dd   : > { %18691 = vst [vmem:[#allocation159_spill] sm:$0xff] %v13781_v42  ;;  %v13785_v19 = vpop.f32.mrb[103].mxu1  ;;  %18701 = vst [vmem:[#allocation163_spill] sm:$0xff] %v13833_v35  ;;  %v3899_v55 = vadd.f32 %v13825_v63, %v13833_v35 }
 0x2de   : > { %18692 = vst [vmem:[#allocation160_spill] sm:$0xff] %v13785_v19  ;;  %v3968_v30 = vadd.f32 %v13802_v50, %v3898_v5  ;;  %v3967_v19 = vadd.f32 %v13805_v56, %v3897_v11  ;;  %v13819_v5 = vmul.f32 0.1875, %v18696_v58 }
 0x2e5   : > { %v11073_v42 = vpop.f32.mrb[72].mxu0 }
 0x2e6   : > { %v4000_v28 = vadd.f32 %v11073_v42, %v3968_v30  ;;  %v2590_v13 = vpop.f32.mrb[73].mxu0  ;;  %v13828_v42 = vadd.f32 %v13811_v62, %v3604_v1 }
 0x2e7   : > { %v3999_v51 = vadd.f32 %v3967_v19, %v2590_v13 }
 0x2e8   : > { %4085 = vrot.lane.b32.xlu1 %v4000_v28, %s18291_s12  ;;  %18699 = vst [vmem:[#allocation46_spill] sm:$0xff] %v13828_v42  ;;  %v18702_v28 = vrot.slane %v18695_v47, 7  ;;  %v3900_v13 = vadd.f32 %v13819_v5, %v13828_v42  ;;  %v18711_v42 = vld [vmem:[#allocation51_spill] sm:$0xff] }
 0x2e9   : > { %4083 = vrot.lane.b32.xlu0 %v3999_v51, %s18291_s12  ;;  %v13822_v11 = vpop.f32.mrb[104].mxu1  ;;  %v18704_v51 = vld [vmem:[#allocation56_spill] sm:$0xff]  ;;  %v13873_v14 = vmul.f32 0.0625, %v18711_v42 }
 0x2ea   : > { %18697 = vst [vmem:[#allocation38_spill] sm:$0xff] %v13822_v11  ;;  %v13830_v30 = vpop.f32.mrb[105].mxu1  ;;  %v13839_v19 = vsel %vm18296_vm2, %v18695_v47, %v18702_v28  ;;  %v13844_v58 = vadd.f32 %v18704_v51, %v3604_v1  ;;  %v18705_v11 = vld [vmem:[#allocation55_spill] sm:$0xff]  ;;  %18707 = vst [vmem:[#allocation56_spill] sm:$0xff] %v13852_v8  ;;  %v13860_v28 = vmul.f32 0.0625, %v13233_v61  ;;  %v3970_v1 = vadd.f32 %v13854_v20, %v3900_v13 }
 0x2eb   : > { %18700 = vst [vmem:[#allocation133_spill] sm:$0xff] %v13830_v30  ;;  %18703 = vst [vmem:[#allocation164_spill] sm:$0xff] %v13839_v19  ;;  %v13849_v30 = vadd.f32 %v18705_v11, %v3603_v60  ;;  %v13857_v47 = vmul.f32 0.1875, %v13839_v19  ;;  %v3480_v19 = vsel %vm18296_vm2, %v18709_v41, %v18710_v48 }
 0x2ec   : > { %v7029_v51 = vadd.f32 %v13844_v58, %v13852_v8  ;;  %v3969_v60 = vadd.f32 %v13860_v28, %v3899_v55  ;;  %18712 = vst [vmem:[#allocation41_spill] sm:$0xff] %v13873_v14  ;;  %v13875_v13 = vmul.f32 0.0625, %v3480_v19 }
 0x2ed   : > { %18708 = vst [vmem:[#allocation55_spill] sm:$0xff] %v13857_v47  ;;  %v7028_v11 = vadd.f32 %v13849_v30, %v13857_v47 }
 0x2ee   : > { %18713 = vst [vmem:[#allocation51_spill] sm:$0xff] %v13875_v13  ;;  %v7073_v55 = vadd.f32 %v7029_v51, %v13873_v14  ;;  %v18718_v51 = vld [vmem:[#allocation44_spill] sm:$0xff] }
 0x2ef   : > { %v7072_v8 = vadd.f32 %v7028_v11, %v13875_v13  ;;  %v18720_v11 = vld [vmem:[#allocation45_spill] sm:$0xff] }
 0x2f1   : > { %v11076_v35 = vpop.f32.mrb[74].mxu0 }
 0x2f2   : > { %v4002_v61 = vadd.f32 %v11076_v35, %v3970_v1  ;;  %v2600_v23 = vpop.f32.mrb[75].mxu0  ;;  %v13886_v35 = vmul.f32 0.1875, %v18711_v42  ;;  %v13888_v1 = vmul.f32 0.1875, %v3480_v19 }
 0x2f3   : > { %v4001_v40 = vadd.f32 %v3969_v60, %v2600_v23 }
 0x2f4   : > { %4089 = vrot.lane.b32.xlu1 %v4002_v61, %s18291_s12  ;;  %18716 = vst [vmem:[#allocation167_spill] sm:$0xff] %v13886_v35  ;;  %18717 = vst [vmem:[#allocation168_spill] sm:$0xff] %v13888_v1  ;;  %v7031_v60 = vadd.f32 %v13603_v46, %v13886_v35  ;;  %v18719_v61 = vrot.slane %v18718_v51, 7  ;;  %v18862_v35 = vld [vmem:[#allocation134_spill] sm:$0xff] }
 0x2f5   : > { %4087 = vrot.lane.b32.xlu0 %v4001_v40, %s18291_s12  ;;  %v11126_v47 = vpop.f32.mrb[106].mxu1  ;;  %v7030_v40 = vadd.f32 %v13609_v32, %v13888_v1 }
 0x2f6   : > { %v13881_v16 = vadd.f32 %v11126_v47, %v7073_v55  ;;  %v2953_v41 = vpop.f32.mrb[107].mxu1  ;;  %v3481_v47 = vsel %vm18296_vm2, %v18718_v51, %v18719_v61 }
 0x2f7   : > { %v13883_v48 = vadd.f32 %v7072_v8, %v2953_v41  ;;  %v18721_v41 = vld [vmem:[#allocation58_spill] sm:$0xff]  ;;  %v13902_v19 = vmul.f32 0.0625, %v3481_v47  ;;  %v13916_v1 = vmul.f32 0.1875, %v3481_v47 }
 0x2f8   : > { %18714 = vst [vmem:[#allocation165_spill] sm:$0xff] %v13881_v16  ;;  %v13900_v42 = vmul.f32 0.0625, %v18721_v41  ;;  %v18724_v16 = vld [vmem:[#allocation16_spill] sm:$0xff] }
 0x2f9   : > { %18715 = vst [vmem:[#allocation166_spill] sm:$0xff] %v13883_v48  ;;  %18723 = vst [vmem:[#allocation45_spill] sm:$0xff] %v13902_v19  ;;  %v7074_v13 = vadd.f32 %v7030_v40, %v13902_v19 }
 0x2fa   : > { %18722 = vst [vmem:[#allocation44_spill] sm:$0xff] %v13900_v42  ;;  %v7075_v32 = vadd.f32 %v7031_v60, %v13900_v42  ;;  %18728 = vst [vmem:[#allocation170_spill] sm:$0xff] %v13916_v1  ;;  %v18729_v60 = vrot.slane %v18634_v21, 7 }
 0x2fc   : > { %v3482_v40 = vsel %vm18296_vm2, %v18634_v21, %v18729_v60 }
 0x2fd   : > { %v11079_v23 = vpop.f32.mrb[76].mxu0  ;;  %v13930_v47 = vmul.f32 0.0625, %v3482_v40 }
 0x2fe   : > { %v4004_v8 = vadd.f32 %v11079_v23, %v18720_v11  ;;  %v2610_v55 = vpop.f32.mrb[77].mxu0  ;;  %v13914_v11 = vmul.f32 0.1875, %v18721_v41 }
 0x2ff   : > { %v4003_v48 = vadd.f32 %v18724_v16, %v2610_v55  ;;  %v18730_v55 = vld [vmem:[#allocation61_spill] sm:$0xff] }
 0x300   : > { %4093 = vrot.lane.b32.xlu1 %v4004_v8, %s18291_s12  ;;  %18727 = vst [vmem:[#allocation169_spill] sm:$0xff] %v13914_v11  ;;  %v7033_v16 = vadd.f32 %v13623_v45, %v13914_v11  ;;  %v18863_v11 = vld [vmem:[#allocation19_spill] sm:$0xff] }
 0x301   : > { %4091 = vrot.lane.b32.xlu0 %v4003_v48, %s18291_s12  ;;  %v11129_v46 = vpop.f32.mrb[108].mxu1  ;;  %v7032_v48 = vadd.f32 %v13633_v39, %v13916_v1 }
 0x302   : > { %v2963_v51 = vpop.f32.mrb[109].mxu1  ;;  %v13909_v61 = vadd.f32 %v11129_v46, %v7075_v32  ;;  %v18732_v46 = vld [vmem:[#allocation76_spill] sm:$0xff] }
 0x303   : > { %v13911_v23 = vadd.f32 %v7074_v13, %v2963_v51  ;;  %v13927_v13 = vmul.f32 0.0625, %v18730_v55  ;;  %18733 = vst [vmem:[#allocation76_spill] sm:$0xff] %v13930_v47  ;;  %v18734_v51 = vld [vmem:[#allocation104_spill] sm:$0xff] }
 0x304   : > { %18725 = vst [vmem:[#allocation58_spill] sm:$0xff] %v13909_v61 }
 0x305   : > { %18726 = vst [vmem:[#allocation16_spill] sm:$0xff] %v13911_v23  ;;  %18731 = vst [vmem:[#allocation61_spill] sm:$0xff] %v13927_v13  ;;  %v7077_v45 = vadd.f32 %v7033_v16, %v13927_v13  ;;  %v7076_v23 = vadd.f32 %v7032_v48, %v13930_v47  ;;  %v18742_v47 = vld [vmem:[#allocation148_spill] sm:$0xff] }
 0x309   : > { %v11082_v8 = vpop.f32.mrb[78].mxu0 }
 0x30a   : > { %v4006_v41 = vadd.f32 %v11082_v8, %v18732_v46  ;;  %v2620_v32 = vpop.f32.mrb[79].mxu0  ;;  %v13942_v8 = vmul.f32 0.1875, %v18730_v55  ;;  %v13944_v46 = vmul.f32 0.1875, %v3482_v40 }
 0x30b   : > { %v4005_v61 = vadd.f32 %v18734_v51, %v2620_v32 }
 0x30c   : > { %4097 = vrot.lane.b32.xlu1 %v4006_v41, %s18291_s12  ;;  %18737 = vst [vmem:[#allocation172_spill] sm:$0xff] %v13942_v8  ;;  %18738 = vst [vmem:[#allocation173_spill] sm:$0xff] %v13944_v46  ;;  %v7035_v16 = vadd.f32 %v13670_v10, %v13942_v8  ;;  %v18739_v41 = vld [vmem:[#allocation69_spill] sm:$0xff]  ;;  %v7034_v48 = vadd.f32 %v13680_v17, %v13944_v46  ;;  %v13957_v10 = vadd.f32 %v13612_v6, %v18742_v47 }
 0x30d   : > { %v11132_v39 = vpop.f32.mrb[110].mxu1  ;;  %4095 = vrot.lane.b32.xlu0 %v4005_v61, %s18291_s12  ;;  %v7047_v32 = vmul.f32 0.0625, %v18739_v41 }
 0x30e   : > { %v13936_v19 = vadd.f32 %v11132_v39, %v7077_v45  ;;  %v2973_v21 = vpop.f32.mrb[111].mxu1  ;;  %v18740_v45 = vld [vmem:[#allocation146_spill] sm:$0xff]  ;;  %18743 = vst [vmem:[#allocation69_spill] sm:$0xff] %v13957_v10 }
 0x30f   : > { %v13939_v60 = vadd.f32 %v7076_v23, %v2973_v21  ;;  %v7046_v39 = vmul.f32 0.0625, %v18740_v45  ;;  %v7079_v55 = vadd.f32 %v7047_v32, %v7035_v16  ;;  %v18741_v21 = vld [vmem:[#allocation105_spill] sm:$0xff]  ;;  %v18747_v45 = vld [vmem:[#allocation150_spill] sm:$0xff] }
 0x310   : > { %18735 = vst [vmem:[#allocation104_spill] sm:$0xff] %v13936_v19  ;;  %v13968_v16 = vadd.f32 %v13617_v38, %v18747_v45  ;;  %v18749_v32 = vld [vmem:[#allocation102_spill] sm:$0xff] }
 0x311   : > { %18736 = vst [vmem:[#allocation171_spill] sm:$0xff] %v13939_v60  ;;  %v7078_v60 = vadd.f32 %v7046_v39, %v7034_v48 }
 0x312   : > { %18748 = vst [vmem:[#allocation148_spill] sm:$0xff] %v13968_v16  ;;  %v3907_v48 = vadd.f32 %v18749_v32, %v13968_v16  ;;  %v18755_v32 = vld [vmem:[#allocation92_spill] sm:$0xff] }
 0x315   : > { %v11085_v51 = vpop.f32.mrb[80].mxu0 }
 0x316   : > { %v4008_v61 = vadd.f32 %v11085_v51, %v13537_v7  ;;  %v2630_v23 = vpop.f32.mrb[81].mxu0  ;;  %v18746_v7 = vld [vmem:[#allocation88_spill] sm:$0xff] }
 0x317   : > { %v4007_v40 = vadd.f32 %v18741_v21, %v2630_v23  ;;  %v3908_v51 = vadd.f32 %v18746_v7, %v13957_v10 }
 0x318   : > { %4101 = vrot.lane.b32.xlu1 %v4008_v61, %s18291_s12  ;;  %v3977_v61 = vadd.f32 %v13659_v25, %v3907_v48  ;;  %v18756_v48 = vld [vmem:[#allocation116_spill] sm:$0xff] }
 0x319   : > { %4099 = vrot.lane.b32.xlu0 %v4007_v40, %s18291_s12  ;;  %v3978_v6 = vadd.f32 %v13647_v22, %v3908_v51  ;;  %v18751_v40 = vld [vmem:[#allocation154_spill] sm:$0xff]  ;;  %v18753_v22 = vld [vmem:[#allocation9_spill] sm:$0xff] }
 0x31a   : > { %v11135_v19 = vpop.f32.mrb[112].mxu1 }
 0x31b   : > { %v13959_v41 = vadd.f32 %v11135_v19, %v7079_v55  ;;  %v2983_v42 = vpop.f32.mrb[113].mxu1  ;;  %v18750_v55 = vld [vmem:[#allocation5_spill] sm:$0xff] }
 0x31c   : > { %v13962_v17 = vadd.f32 %v7078_v60, %v2983_v42 }
 0x31d   : > { %18744 = vst [vmem:[#allocation146_spill] sm:$0xff] %v13959_v41 }
 0x31e   : > { %18745 = vst [vmem:[#allocation105_spill] sm:$0xff] %v13962_v17 }
 0x321   : > { %v11088_v47 = vpop.f32.mrb[82].mxu0 }
 0x322   : > { %v4010_v19 = vadd.f32 %v11088_v47, %v3978_v6  ;;  %v2640_v39 = vpop.f32.mrb[83].mxu0 }
 0x323   : > { %v4009_v42 = vadd.f32 %v3977_v61, %v2640_v39  ;;  %v18757_v39 = vld [vmem:[#allocation83_spill] sm:$0xff] }
 0x324   : > { %4105 = vrot.lane.b32.xlu1 %v4010_v19, %s18291_s12 }
 0x325   : > { %v11143_v60 = vpop.f32.mrb[84].mxu0  ;;  %v11138_v23 = vpop.f32.mrb[114].mxu1  ;;  %4103 = vrot.lane.b32.xlu0 %v4009_v42, %s18291_s12 }
 0x326   : > { %v7189_v21 = vadd.f32 %v11143_v60, %v18750_v55  ;;  %v13977_v38 = vadd.f32 %v11138_v23, %v18751_v40  ;;  %v2993_v7 = vpop.f32.mrb[115].mxu1  ;;  %v3196_v45 = vpop.f32.mrb[85].mxu0  ;;  %v18758_v23 = vld [vmem:[#allocation85_spill] sm:$0xff]  ;;  %v18759_v40 = vld [vmem:[#allocation94_spill] sm:$0xff] }
 0x327   : > { %v13981_v51 = vadd.f32 %v18753_v22, %v2993_v7  ;;  %v7188_v6 = vadd.f32 %v18755_v32, %v3196_v45  ;;  %v18760_v45 = vld [vmem:[#allocation8_spill] sm:$0xff] }
 0x328   : > { %18752 = vst [vmem:[#allocation88_spill] sm:$0xff] %v13977_v38  ;;  %7254 = vrot.lane.b32.xlu1 %v7189_v21, %s18291_s12 }
 0x329   : > { %18754 = vst [vmem:[#allocation150_spill] sm:$0xff] %v13981_v51  ;;  %7252 = vrot.lane.b32.xlu0 %v7188_v6, %s18291_s12  ;;  %v18761_v6 = vld [vmem:[#allocation110_spill] sm:$0xff] }
 0x32b   : > { %v11146_v25 = vpop.f32.mrb[86].mxu0 }
 0x32c   : > { %v7191_v47 = vadd.f32 %v11146_v25, %v18756_v48  ;;  %v3206_v19 = vpop.f32.mrb[87].mxu0 }
 0x32d   : > { %v7190_v61 = vadd.f32 %v18757_v39, %v3206_v19 }
 0x32e   : > { %7258 = vrot.lane.b32.xlu1 %v7191_v47, %s18291_s12  ;;  %v18762_v47 = vld [vmem:[#allocation11_spill] sm:$0xff] }
 0x32f   : > { %v11149_v60 = vpop.f32.mrb[88].mxu0  ;;  %7256 = vrot.lane.b32.xlu0 %v7190_v61, %s18291_s12  ;;  %v18763_v61 = vld [vmem:[#allocation115_spill] sm:$0xff] }
 0x330   : > { %v7193_v42 = vadd.f32 %v11149_v60, %v18758_v23  ;;  %v3216_v55 = vpop.f32.mrb[89].mxu0 }
 0x331   : > { %v7192_v21 = vadd.f32 %v18759_v40, %v3216_v55 }
 0x332   : > { %7262 = vrot.lane.b32.xlu1 %v7193_v42, %s18291_s12  ;;  %v18764_v42 = vld [vmem:[#allocation123_spill] sm:$0xff] }
 0x333   : > { %v11152_v7 = vpop.f32.mrb[90].mxu0  ;;  %7260 = vrot.lane.b32.xlu0 %v7192_v21, %s18291_s12  ;;  %v14005_v21 = vadd.f32 %v13771_v43, %v13653_v29  ;;  %v14018_v43 = vadd.f32 %v13811_v62, %v13733_v59  ;;  %v11296_v59 = vmov 1983009808  }
 0x334   : > { %v7195_v22 = vadd.f32 %v11152_v7, %v18760_v45  ;;  %v3226_v32 = vpop.f32.mrb[91].mxu0  ;;  %v18766_v7 = vld [vmem:[#allocation98_spill] sm:$0xff] }
 0x335   : > { %v7194_v25 = vadd.f32 %v18761_v6, %v3226_v32  ;;  %18765 = vst [vmem:[#allocation102_spill] sm:$0xff] %v14005_v21  ;;  %v18767_v32 = vld [vmem:[#allocation106_spill] sm:$0xff]  ;;  %18770 = vst [vmem:[#allocation154_spill] sm:$0xff] %v14018_v43  ;;  %v7131_v29 = vadd.f32 %v14005_v21, %v13699_v52  ;;  %v18774_v52 = vld [vmem:[#allocation28_spill] sm:$0xff] }
 0x336   : > { %7266 = vrot.lane.b32.xlu1 %v7195_v22, %s18291_s12  ;;  %v18802_v21 = vld [vmem:[#allocation78_spill] sm:$0xff] }
 0x337   : > { %7264 = vrot.lane.b32.xlu0 %v7194_v25, %s18291_s12 }
 0x339   : > { %v11155_v48 = vpop.f32.mrb[92].mxu0 }
 0x33a   : > { %v7197_v19 = vadd.f32 %v11155_v48, %v18762_v47  ;;  %v3236_v39 = vpop.f32.mrb[93].mxu0  ;;  %v14012_v48 = vadd.f32 %v13777_v9, %v13656_v12  ;;  %v18769_v47 = vld [vmem:[#allocation111_spill] sm:$0xff]  ;;  %v18772_v12 = vld [vmem:[#allocation118_spill] sm:$0xff] }
 0x33b   : > { %v7196_v60 = vadd.f32 %v18763_v61, %v3236_v39  ;;  %v14025_v39 = vadd.f32 %v13815_v34, %v13736_v44  ;;  %v7173_v44 = vadd.f32 %v7131_v29, %v13802_v50  ;;  %v7133_v34 = vadd.f32 %v14018_v43, %v13739_v36 }
 0x33c   : > { %7270 = vrot.lane.b32.xlu1 %v7197_v19, %s18291_s12  ;;  %18768 = vst [vmem:[#allocation5_spill] sm:$0xff] %v14012_v48  ;;  %v7130_v62 = vadd.f32 %v14012_v48, %v13712_v18  ;;  %v11297_v50 = vmov 1934713408   ;;  %v18816_v48 = vld [vmem:[#allocation20_spill] sm:$0xff] }
 0x33d   : > { %v11158_v23 = vpop.f32.mrb[94].mxu0  ;;  %7268 = vrot.lane.b32.xlu0 %v7196_v60, %s18291_s12  ;;  %18771 = vst [vmem:[#allocation9_spill] sm:$0xff] %v14025_v39  ;;  %v7132_v18 = vadd.f32 %v14025_v39, %v13745_v27  ;;  %v4188_v29 = vunpack.c.l.s4 %v11297_v50 }
 0x33e   : > { %v7199_v55 = vadd.f32 %v11158_v23, %v18764_v42  ;;  %v3246_v40 = vpop.f32.mrb[95].mxu0  ;;  %v4175_v23 = vlaneseq  ;;  %v18773_v42 = vld [vmem:[#allocation124_spill] sm:$0xff] }
 0x33f   : > { %v7198_v45 = vadd.f32 %v18766_v7, %v3246_v40  ;;  %v4173_v40 = vunpack.c.l.s4 %v11296_v59  ;;  %v4046_v7 = vpop.permute.xlu1 %4045 }
 0x340   : > { %7274 = vrot.lane.b32.xlu1 %v7199_v55, %s18291_s12 }
 0x341   : > { %v11161_v22 = vpop.f32.mrb[96].mxu0  ;;  %7272 = vrot.lane.b32.xlu0 %v7198_v45, %s18291_s12  ;;  %v14034_v45 = vadd.f32 %v18774_v52, %v13768_v31  ;;  %v7172_v31 = vadd.f32 %v7130_v62, %v13805_v56 }
 0x342   : > { %v7201_v6 = vadd.f32 %v11161_v22, %v18767_v32  ;;  %v3256_v25 = vpop.f32.mrb[97].mxu0  ;;  %v18776_v22 = vld [vmem:[#allocation14_spill] sm:$0xff] }
 0x343   : > { %v7200_v19 = vadd.f32 %v18769_v47, %v3256_v25  ;;  %18775 = vst [vmem:[#allocation92_spill] sm:$0xff] %v14034_v45  ;;  %v14042_v32 = vadd.f32 %v18776_v22, %v13774_v24  ;;  %v7175_v24 = vadd.f32 %v7133_v34, %v13854_v20  ;;  %v7135_v36 = vadd.f32 %v14034_v45, %v13783_v26  ;;  %v18779_v26 = vld [vmem:[#allocation77_spill] sm:$0xff]  ;;  %v18781_v22 = vld [vmem:[#allocation59_spill] sm:$0xff] }
 0x344   : > { %7278 = vrot.lane.b32.xlu1 %v7201_v6, %s18291_s12  ;;  %v4189_v20 = vunpack.c.0.s8 %v4188_v29  ;;  %v4044_v29 = vpop.permute.xlu0 %4043  ;;  %v18801_v45 = vld [vmem:[#allocation65_spill] sm:$0xff] }
 0x345   : > { %v11164_v61 = vpop.f32.mrb[98].mxu0  ;;  %7276 = vrot.lane.b32.xlu0 %v7200_v19, %s18291_s12  ;;  %18777 = vst [vmem:[#allocation116_spill] sm:$0xff] %v14042_v32  ;;  %v4176_v19 = vshrl.u32 %v4175_v23, 7  ;;  %v7134_v23 = vadd.f32 %v14042_v32, %v13788_v49  ;;  %v7177_v52 = vadd.f32 %v7135_v36, %v18779_v26  ;;  %v18780_v49 = vld [vmem:[#allocation15_spill] sm:$0xff]  ;;  %v18804_v32 = vld [vmem:[#allocation21_spill] sm:$0xff] }
 0x346   : > { %v7203_v9 = vadd.f32 %v11164_v61, %v18772_v12  ;;  %v3266_v60 = vpop.f32.mrb[99].mxu0  ;;  %v4174_v61 = vunpack.c.0.s8 %v4173_v40  ;;  %v4050_v12 = vpop.permute.xlu1 %4049 }
 0x347   : > { %v7202_v55 = vadd.f32 %v18773_v42, %v3266_v60  ;;  %v7174_v60 = vadd.f32 %v7132_v18, %v13860_v28  ;;  %v7137_v28 = vadd.f32 %v13844_v58, %v13819_v5  ;;  %v7176_v34 = vadd.f32 %v7134_v23, %v18780_v49  ;;  %v18782_v5 = vld [vmem:[#allocation18_spill] sm:$0xff] }
 0x348   : > { %7282 = vrot.lane.b32.xlu1 %v7203_v9, %s18291_s12  ;;  %v14058_v40 = vsub.s32 %v4174_v61, %v4176_v19  ;;  %v7136_v61 = vadd.f32 %v13849_v30, %v13825_v63  ;;  %v14071_v50 = vsub.s32 %v4189_v20, %v4176_v19  ;;  %v4048_v63 = vpop.permute.xlu0 %4047 }
 0x349   : > { %v11167_v6 = vpop.f32.mrb[100].mxu0  ;;  %7280 = vrot.lane.b32.xlu0 %v7202_v55, %s18291_s12  ;;  %v18778_v55 = vld [vmem:[#allocation62_spill] sm:$0xff]  ;;  %v7179_v58 = vadd.f32 %v7137_v28, %v18782_v5 }
 0x34a   : > { %v7205_v25 = vadd.f32 %v11167_v6, %v7173_v44  ;;  %v3276_v47 = vpop.f32.mrb[101].mxu0  ;;  %v4142_v62 = vsel %vm18315_vm9, %v18778_v55, %v4050_v12  ;;  %v4140_v6 = vsel %vm18315_vm9, %v18781_v22, %v4046_v7 }
 0x34b   : > { %v7204_v9 = vadd.f32 %v7172_v31, %v3276_v47  ;;  %v4325_v18 = vrot.slane %v4142_v62, %v14058_v40  ;;  %v4227_v12 = vrot.slane %v4140_v6, %v14058_v40 }
 0x34c   : > { %7286 = vrot.lane.b32.xlu1 %v7205_v25, %s18291_s12 }
 0x34d   : > { %v11170_v27 = vpop.f32.mrb[102].mxu0  ;;  %7284 = vrot.lane.b32.xlu0 %v7204_v9, %s18291_s12  ;;  %v4242_v30 = vrot.slane %v4227_v12, %v14071_v50 }
 0x34e   : > { %v7207_v42 = vadd.f32 %v11170_v27, %v7175_v24  ;;  %v3286_v56 = vpop.f32.mrb[103].mxu0  ;;  %v4340_v24 = vrot.slane %v4325_v18, %v14071_v50  ;;  %v18784_v27 = vld [vmem:[#allocation84_spill] sm:$0xff] }
 0x34f   : > { %v7206_v59 = vadd.f32 %v7174_v60, %v3286_v56  ;;  %v7178_v60 = vadd.f32 %v7136_v61, %v18784_v27 }
 0x350   : > { %7290 = vrot.lane.b32.xlu1 %v7207_v42, %s18291_s12  ;;  %v18277_v42 = vmov 0.0  }
 0x351   : > { %v11173_v44 = vpop.f32.mrb[104].mxu0  ;;  %7288 = vrot.lane.b32.xlu0 %v7206_v59, %s18291_s12  ;;  %v4318_v56 = vcombine.high %v4142_v62, %v18277_v42  ;;  %v4333_v55 = vcombine.high %v4325_v18, %v18277_v42  ;;  %v4363_v59 = vcombine.high %v4340_v24, %v18277_v42  ;;  %v18789_v62 = vld [vmem:[#allocation100_spill] sm:$0xff]  ;;  %v4220_v18 = vcombine.high %v4140_v6, %v18277_v42 }
 0x352   : > { %v7209_v25 = vadd.f32 %v11173_v44, %v7177_v52  ;;  %v3296_v47 = vpop.f32.mrb[105].mxu0  ;;  %v18787_v52 = vld [vmem:[#allocation63_spill] sm:$0xff]  ;;  %v7153_v49 = vmul.f32 0.0625, %v18789_v62  ;;  %v14142_v62 = vpop.permute.xlu1 %4053 }
 0x353   : > { %v7208_v31 = vadd.f32 %v7176_v34, %v3296_v47  ;;  %v4141_v28 = vsel %vm18315_vm9, %v18787_v52, %v4048_v63  ;;  %v18790_v34 = vld [vmem:[#allocation152_spill] sm:$0xff]  ;;  %v4347_v5 = vrot.slane %v4333_v55, %v14071_v50 }
 0x354   : > { %7294 = vrot.lane.b32.xlu1 %v7209_v25, %s18291_s12  ;;  %v7152_v22 = vmul.f32 0.0625, %v18790_v34  ;;  %v4265_v25 = vcombine.high %v4242_v30, %v18277_v42  ;;  %v18791_v47 = vld [vmem:[#allocation60_spill] sm:$0xff] }
 0x355   : > { %v11176_v7 = vpop.f32.mrb[106].mxu0  ;;  %7292 = vrot.lane.b32.xlu0 %v7208_v31, %s18291_s12  ;;  %v4139_v31 = vsel %vm18315_vm9, %v18791_v47, %v4044_v29  ;;  %v7185_v29 = vadd.f32 %v7153_v49, %v13703_v3  ;;  %v18796_v49 = vld [vmem:[#allocation121_spill] sm:$0xff]  ;;  %s18883_s12 = smov 24  }
 0x356   : > { %v14077_v36 = vadd.f32 %v11176_v7, %v7179_v58  ;;  %v3306_v9 = vpop.f32.mrb[107].mxu0  ;;  %v4276_v58 = vrot.slane %v4141_v28, %v14058_v40  ;;  %v4178_v27 = vrot.slane %v4139_v31, %v14058_v40 }
 0x357   : > { %v14083_v19 = vadd.f32 %v7178_v60, %v3306_v9 }
 0x358   : > { %18783 = vst [vmem:[#allocation83_spill] sm:$0xff] %v14077_v36  ;;  %6205 = vrot.lane.b32.xlu1 %v4340_v24, %s11298_s14 }
 0x359   : > { %18785 = vst [vmem:[#allocation85_spill] sm:$0xff] %v14083_v19  ;;  %v11179_v23 = vpop.f32.mrb[108].mxu0  ;;  %6203 = vrot.lane.b32.xlu0 %v4242_v30, %s11298_s14 }
 0x35a   : > { %v14089_v20 = vadd.f32 %v11179_v23, %v13650_v0  ;;  %v3316_v26 = vpop.f32.mrb[109].mxu0  ;;  %v4235_v0 = vcombine.high %v4227_v12, %v18277_v42  ;;  %v4234_v12 = vrot.slane %v4220_v18, %v14058_v40  ;;  %v18798_v18 = vld [vmem:[#allocation128_spill] sm:$0xff] }
 0x35b   : > { %v14095_v44 = vadd.f32 %v13662_v4, %v3316_v26  ;;  %v14106_v4 = vrot.slane %v4318_v56, %v14058_v40  ;;  %v4284_v26 = vcombine.high %v4276_v58, %v18277_v42 }
 0x35c   : > { %18786 = vst [vmem:[#allocation94_spill] sm:$0xff] %v14089_v20  ;;  %6269 = vrot.lane.b32.xlu1 %v4363_v59, %s11300_s15  ;;  %v4249_v9 = vrot.slane %v4235_v0, %v14071_v50  ;;  %v4257_v56 = vrot.slane %v4234_v12, %v14071_v50  ;;  %v4269_v59 = vcombine.high %v4141_v28, %v18277_v42 }
 0x35d   : > { %18788 = vst [vmem:[#allocation8_spill] sm:$0xff] %v14095_v44  ;;  %v11182_v61 = vpop.f32.mrb[110].mxu0  ;;  %6267 = vrot.lane.b32.xlu0 %v4265_v25, %s11300_s15  ;;  %v4355_v63 = vrot.slane %v14106_v4, %v14071_v50  ;;  %v4171_v28 = vcombine.high %v4139_v31, %v18277_v42  ;;  %v4186_v25 = vcombine.high %v4178_v27, %v18277_v42 }
 0x35e   : > { %v14111_v7 = vadd.f32 %v11182_v61, %v13686_v15  ;;  %v3326_v24 = vpop.f32.mrb[111].mxu0  ;;  %v7184_v15 = vadd.f32 %v7152_v22, %v13716_v2  ;;  %v14136_v2 = vrot.slane %v4178_v27, %v14071_v50  ;;  %v14156_v61 = vpop.permute.xlu0 %4051 }
 0x35f   : > { %v14115_v6 = vadd.f32 %v13690_v33, %v3326_v24  ;;  %v14126_v33 = vrot.slane %v4276_v58, %v14071_v50  ;;  %v4283_v58 = vrot.slane %v4269_v59, %v14058_v40  ;;  %v4298_v24 = vrot.slane %v4284_v26, %v14071_v50 }
 0x360   : > { %18792 = vst [vmem:[#allocation110_spill] sm:$0xff] %v14111_v7  ;;  %6333 = vrot.lane.b32.xlu1 %v4347_v5, %s11301_s16  ;;  %v4216_v47 = vcombine.high %v14136_v2, %v18277_v42  ;;  %v4185_v31 = vrot.slane %v4171_v28, %v14058_v40  ;;  %v4200_v27 = vrot.slane %v4186_v25, %v14071_v50 }
 0x361   : > { %18793 = vst [vmem:[#allocation11_spill] sm:$0xff] %v14115_v6  ;;  %v11185_v60 = vpop.f32.mrb[112].mxu0  ;;  %6331 = vrot.lane.b32.xlu0 %v4249_v9, %s11301_s16  ;;  %v4314_v52 = vcombine.high %v14126_v33, %v18277_v42  ;;  %v4365_v25 = vcombine.high %v4355_v63, %v18277_v42 }
 0x362   : > { %v14128_v30 = vadd.f32 %v11185_v60, %v7185_v29  ;;  %v3336_v23 = vpop.f32.mrb[113].mxu0  ;;  %v14160_v29 = vpop.permute.xlu1 %4057 }
 0x363   : > { %v14131_v3 = vadd.f32 %v7184_v15, %v3336_v23  ;;  %v14166_v60 = vpop.permute.xlu0 %4055  ;;  %v4306_v15 = vrot.slane %v4283_v58, %v14071_v50 }
 0x364   : > { %18794 = vst [vmem:[#allocation115_spill] sm:$0xff] %v14128_v30  ;;  %6461 = vrot.lane.b32.xlu1 %v4355_v63, %s11302_s17 }
 0x365   : > { %18795 = vst [vmem:[#allocation123_spill] sm:$0xff] %v14131_v3  ;;  %v11188_v55 = vpop.f32.mrb[114].mxu0  ;;  %6459 = vrot.lane.b32.xlu0 %v4257_v56, %s11302_s17  ;;  %v4316_v41 = vcombine.high %v4306_v15, %v18277_v42 }
 0x366   : > { %v14145_v34 = vadd.f32 %v11188_v55, %v18796_v49  ;;  %v3346_v22 = vpop.f32.mrb[115].mxu0  ;;  %v14169_v23 = vpop.permute.xlu1 %4061  ;;  %v4208_v55 = vrot.slane %v4185_v31, %v14071_v50 }
 0x367   : > { %v14149_v0 = vadd.f32 %v18798_v18, %v3346_v22  ;;  %v14174_v59 = vpop.permute.xlu0 %4059  ;;  %v4266_v22 = vcombine.high %v4249_v9, %v18277_v42  ;;  %v4348_v18 = vcombine.high %v14106_v4, %v18277_v42 }
 0x368   : > { %18797 = vst [vmem:[#allocation98_spill] sm:$0xff] %v14145_v34  ;;  %5757 = vrot.lane.b32.xlu1 %v4314_v52, %s11303_s18  ;;  %v4364_v52 = vcombine.high %v4347_v5, %v18277_v42  ;;  %v4250_v5 = vcombine.high %v4234_v12, %v18277_v42  ;;  %v4315_v12 = vcombine.high %v4298_v24, %v18277_v42 }
 0x369   : > { %18799 = vst [vmem:[#allocation106_spill] sm:$0xff] %v14149_v0  ;;  %5755 = vrot.lane.b32.xlu0 %v4216_v47, %s11303_s18  ;;  %v4362_v9 = vrot.slane %v4348_v18, %v14071_v50  ;;  %v4217_v18 = vcombine.high %v4200_v27, %v18277_v42 }
 0x36a   : > { %v14176_v26 = vpop.permute.xlu1 %4065  ;;  %v4264_v63 = vrot.slane %v4250_v5, %v14071_v50  ;;  %v18800_v5 = vld [vmem:[#allocation86_spill] sm:$0xff] }
 0x36b   : > { %v14181_v49 = vpop.permute.xlu0 %4063  ;;  %v3716_v43 = vadd.f32 %v18801_v45, %v18800_v5  ;;  %v18806_v5 = vld [vmem:[#allocation10_spill] sm:$0xff] }
 0x36c   : > { %5821 = vrot.lane.b32.xlu1 %v4298_v24, %s11304_s19  ;;  %v4201_v24 = vcombine.high %v4185_v31, %v18277_v42 }
 0x36d   : > { %5819 = vrot.lane.b32.xlu0 %v4200_v27, %s11304_s19  ;;  %v4218_v27 = vcombine.high %v4208_v55, %v18277_v42  ;;  %v3788_v45 = vadd.f32 %v18804_v32, %v3716_v43  ;;  %v18808_v32 = vld [vmem:[#allocation66_spill] sm:$0xff] }
 0x36e   : > { %v14186_v28 = vpop.permute.xlu1 %4069 }
 0x36f   : > { %v14192_v47 = vpop.permute.xlu0 %4067 }
 0x370   : > { %5949 = vrot.lane.b32.xlu1 %v4306_v15, %s11305_s20 }
 0x371   : > { %5947 = vrot.lane.b32.xlu0 %v4208_v55, %s11305_s20  ;;  %v4215_v55 = vrot.slane %v4201_v24, %v14071_v50 }
 0x372   : > { %v14195_v38 = vpop.permute.xlu1 %4073 }
 0x373   : > { %v14200_v4 = vpop.permute.xlu0 %4071 }
 0x374   : > { %6397 = vrot.lane.b32.xlu1 %v4364_v52, %s11306_s21  ;;  %v4267_v52 = vcombine.high %v4257_v56, %v18277_v42 }
 0x375   : > { %6395 = vrot.lane.b32.xlu0 %v4266_v22, %s11306_s21 }
 0x376   : > { %v14203_v22 = vpop.permute.xlu1 %4077 }
 0x377   : > { %v14208_v56 = vpop.permute.xlu0 %4075 }
 0x378   : > { %6525 = vrot.lane.b32.xlu1 %v4365_v25, %s11307_s22  ;;  %v4299_v25 = vcombine.high %v4283_v58, %v18277_v42  ;;  %v18803_v58 = vld [vmem:[#allocation37_spill] sm:$0xff] }
 0x379   : > { %6523 = vrot.lane.b32.xlu0 %v4267_v52, %s11307_s22  ;;  %v3714_v51 = vadd.f32 %v18803_v58, %v18802_v21  ;;  %v18807_v58 = vmov 0.0  }
 0x37a   : > { %v14212_v52 = vpop.permute.xlu1 %4081  ;;  %v4313_v15 = vrot.slane %v4299_v25, %v14071_v50  ;;  %v4366_v0 = vcombine.high %v4362_v9, %v18807_v58  ;;  %v4268_v24 = vcombine.high %v4264_v63, %v18807_v58 }
 0x37b   : > { %v3786_v42 = vadd.f32 %v18806_v5, %v3714_v51 }
 0x37c   : > { %6589 = vrot.lane.b32.xlu1 %v4362_v9, %s11308_s23 }
 0x37d   : > { %6587 = vrot.lane.b32.xlu0 %v4264_v63, %s11308_s23  ;;  %v3818_v25 = vadd.f32 %v18808_v32, %v3786_v42  ;;  %v18813_v63 = vld [vmem:[#allocation80_spill] sm:$0xff]  ;;  %v18814_v32 = vld [vmem:[#allocation53_spill] sm:$0xff] }
 0x37e   : > { %v14225_v17 = vpop.permute.xlu1 %4085 }
 0x37f   : > { %v4144_v51 = vsel %vm18315_vm9, %v3818_v25, %v14142_v62  ;;  %v4219_v62 = vcombine.high %v4215_v55, %v18807_v58  ;;  %v3713_v25 = vadd.f32 %v18814_v32, %v18813_v63 }
 0x380   : > { %5885 = vrot.lane.b32.xlu1 %v4315_v12, %s11309_s24  ;;  %v14220_v12 = vpop.permute.xlu0 %4079  ;;  %v4423_v42 = vrot.slane %v4144_v51, %v14058_v40 }
 0x381   : > { %5883 = vrot.lane.b32.xlu0 %v4217_v18, %s11309_s24 }
 0x382   : > { %v14236_v21 = vpop.permute.xlu1 %4089 }
 0x384   : > { %6013 = vrot.lane.b32.xlu1 %v4316_v41, %s11310_s25  ;;  %v18805_v41 = vld [vmem:[#allocation70_spill] sm:$0xff]  ;;  %v14232_v18 = vpop.permute.xlu0 %4083 }
 0x385   : > { %6011 = vrot.lane.b32.xlu0 %v4218_v27, %s11310_s25  ;;  %v3820_v31 = vadd.f32 %v18805_v41, %v3788_v45  ;;  %v18810_v41 = vld [vmem:[#allocation91_spill] sm:$0xff] }
 0x386   : > { %v14250_v9 = vpop.permute.xlu1 %4093 }
 0x387   : > { %v4146_v43 = vsel %vm18315_vm9, %v3820_v31, %v14160_v29  ;;  %18809 = vst [vmem:[#allocation111_spill] sm:$0xff] %v14250_v9  ;;  %v4317_v29 = vcombine.high %v4313_v15, %v18807_v58  ;;  %v18811_v31 = vld [vmem:[#allocation79_spill] sm:$0xff] }
 0x388   : > { %6077 = vrot.lane.b32.xlu1 %v4313_v15, %s18293_s26  ;;  %v14244_v27 = vpop.permute.xlu0 %4087  ;;  %v4521_v45 = vrot.slane %v4146_v43, %v14058_v40  ;;  %v3715_v5 = vadd.f32 %v18811_v31, %v18810_v41  ;;  %v4438_v31 = vrot.slane %v4423_v42, %v14071_v50  ;;  %v4514_v63 = vcombine.high %v4146_v43, %v18807_v58 }
 0x389   : > { %6075 = vrot.lane.b32.xlu0 %v4215_v55, %s18293_s26  ;;  %v18819_v55 = vld [vmem:[#allocation132_spill] sm:$0xff] }
 0x38a   : > { %v4536_v34 = vrot.slane %v4521_v45, %v14071_v50  ;;  %v14264_v15 = vpop.permute.xlu1 %4097  ;;  %v3787_v41 = vadd.f32 %v18816_v48, %v3715_v5  ;;  %v3785_v39 = vadd.f32 %v18819_v55, %v3713_v25  ;;  %v4529_v32 = vcombine.high %v4521_v45, %v18807_v58  ;;  %v18821_v5 = vld [vmem:[#allocation67_spill] sm:$0xff] }
 0x38b   : > { %18815 = vst [vmem:[#allocation124_spill] sm:$0xff] %v14264_v15  ;;  %v4431_v25 = vcombine.high %v4423_v42, %v18807_v58  ;;  %v4461_v43 = vcombine.high %v4438_v31, %v18807_v58 }
 0x38c   : > { %6653 = vrot.lane.b32.xlu1 %v4366_v0, %s11312_s27  ;;  %v14258_v0 = vpop.permute.xlu0 %4091  ;;  %v4559_v30 = vcombine.high %v4536_v34, %v18807_v58 }
 0x38d   : > { %6651 = vrot.lane.b32.xlu0 %v4268_v24, %s11312_s27  ;;  %18812 = vst [vmem:[#allocation118_spill] sm:$0xff] %v14258_v0  ;;  %v18817_v24 = vld [vmem:[#allocation71_spill] sm:$0xff] }
 0x38e   : > { %v14277_v6 = vpop.permute.xlu1 %4101 }
 0x38f   : > { %18820 = vst [vmem:[#allocation14_spill] sm:$0xff] %v14277_v6 }
 0x390   : > { %6141 = vrot.lane.b32.xlu1 %v4317_v29, %s11313_s28  ;;  %v3819_v29 = vadd.f32 %v3787_v41, %v18817_v24  ;;  %v14271_v3 = vpop.permute.xlu0 %4095  ;;  %v4416_v41 = vcombine.high %v4144_v51, %v18807_v58  ;;  %v4528_v24 = vrot.slane %v4514_v63, %v14058_v40  ;;  %v4445_v51 = vrot.slane %v4431_v25, %v14071_v50 }
 0x391   : > { %6139 = vrot.lane.b32.xlu0 %v4219_v62, %s11313_s28  ;;  %18818 = vst [vmem:[#allocation28_spill] sm:$0xff] %v14271_v3  ;;  %v3817_v62 = vadd.f32 %v3785_v39, %v18821_v5 }
 0x392   : > { %v4145_v48 = vsel %vm18315_vm9, %v3819_v29, %v14166_v60  ;;  %v4543_v60 = vrot.slane %v4529_v32, %v14071_v50 }
 0x393   : > { %v4472_v29 = vrot.slane %v4145_v48, %v14058_v40 }
 0x394   : > { %6209 = vrot.lane.b32.xlu1 %v4536_v34, %s11298_s14  ;;  %v14287_v45 = vpop.permute.xlu0 %4099  ;;  %v4143_v34 = vsel %vm18315_vm9, %v3817_v62, %v14156_v61  ;;  %v4551_v61 = vrot.slane %v4528_v24, %v14071_v50 }
 0x395   : > { %6207 = vrot.lane.b32.xlu0 %v4438_v31, %s11298_s14  ;;  %18822 = vst [vmem:[#allocation62_spill] sm:$0xff] %v14287_v45  ;;  %v4374_v42 = vrot.slane %v4143_v34, %v14058_v40  ;;  %v14305_v55 = vrot.slane %v4472_v29, %v14071_v50  ;;  %v4480_v25 = vcombine.high %v4472_v29, %v18807_v58 }
 0x396   : > { %v14294_v39 = vpop.permute.xlu1 %4105 }
 0x397   : > { %18823 = vst [vmem:[#allocation77_spill] sm:$0xff] %v14294_v39  ;;  %v14313_v5 = vrot.slane %v4374_v42, %v14071_v50  ;;  %v4382_v44 = vcombine.high %v4374_v42, %v18807_v58  ;;  %v4494_v29 = vrot.slane %v4480_v25, %v14071_v50 }
 0x398   : > { %6273 = vrot.lane.b32.xlu1 %v4559_v30, %s11300_s15  ;;  %v4430_v30 = vrot.slane %v4416_v41, %v14058_v40  ;;  %v14301_v31 = vpop.permute.xlu0 %4103  ;;  %v4465_v41 = vcombine.high %v4145_v48, %v18807_v58 }
 0x399   : > { %6271 = vrot.lane.b32.xlu0 %v4461_v43, %s11300_s15  ;;  %18824 = vst [vmem:[#allocation15_spill] sm:$0xff] %v14301_v31  ;;  %v4510_v43 = vcombine.high %v14305_v55, %v18807_v58 }
 0x39a   : > { %v14307_v63 = vpop.permute.xlu1 %7254  ;;  %v4453_v32 = vrot.slane %v4430_v30, %v14071_v50  ;;  %v4479_v48 = vrot.slane %v4465_v41, %v14058_v40 }
 0x39b   : > { %18825 = vst [vmem:[#allocation59_spill] sm:$0xff] %v14307_v63  ;;  %v4367_v63 = vcombine.high %v4143_v34, %v18807_v58  ;;  %v4396_v34 = vrot.slane %v4382_v44, %v14071_v50 }
 0x39c   : > { %6337 = vrot.lane.b32.xlu1 %v4543_v60, %s11301_s16  ;;  %v14315_v62 = vpop.permute.xlu0 %7252 }
 0x39d   : > { %6335 = vrot.lane.b32.xlu0 %v4445_v51, %s11301_s16  ;;  %18826 = vst [vmem:[#allocation18_spill] sm:$0xff] %v14315_v62  ;;  %v4412_v62 = vcombine.high %v14313_v5, %v18807_v58 }
 0x3a0   : > { %6465 = vrot.lane.b32.xlu1 %v4551_v61, %s11302_s17  ;;  %v14321_v7 = vpop.permute.xlu1 %7258 }
 0x3a1   : > { %18827 = vst [vmem:[#allocation84_spill] sm:$0xff] %v14321_v7  ;;  %6463 = vrot.lane.b32.xlu0 %v4453_v32, %s11302_s17  ;;  %v14329_v20 = vpop.permute.xlu0 %7256  ;;  %v4502_v7 = vrot.slane %v4479_v48, %v14071_v50 }
 0x3a2   : > { %18828 = vst [vmem:[#allocation63_spill] sm:$0xff] %v14329_v20  ;;  %v4561_v20 = vcombine.high %v4551_v61, %v18807_v58 }
 0x3a4   : > { %5761 = vrot.lane.b32.xlu1 %v4510_v43, %s11303_s18  ;;  %v14333_v19 = vpop.permute.xlu1 %7262  ;;  %v4381_v43 = vrot.slane %v4367_v63, %v14058_v40  ;;  %v4560_v63 = vcombine.high %v4543_v60, %v18807_v58  ;;  %v4446_v60 = vcombine.high %v4430_v30, %v18807_v58 }
 0x3a5   : > { %18829 = vst [vmem:[#allocation100_spill] sm:$0xff] %v14333_v19  ;;  %5759 = vrot.lane.b32.xlu0 %v4412_v62, %s11303_s18  ;;  %v14339_v42 = vpop.permute.xlu0 %7260  ;;  %v4544_v19 = vcombine.high %v4528_v24, %v18807_v58 }
 0x3a6   : > { %18830 = vst [vmem:[#allocation152_spill] sm:$0xff] %v14339_v42  ;;  %v4404_v41 = vrot.slane %v4381_v43, %v14071_v50 }
 0x3a8   : > { %5825 = vrot.lane.b32.xlu1 %v4494_v29, %s11304_s19  ;;  %v14342_v36 = vpop.permute.xlu1 %7266 }
 0x3a9   : > { %18831 = vst [vmem:[#allocation60_spill] sm:$0xff] %v14342_v36  ;;  %5823 = vrot.lane.b32.xlu0 %v4396_v34, %s11304_s19  ;;  %v14347_v25 = vpop.permute.xlu0 %7264  ;;  %v4462_v36 = vcombine.high %v4445_v51, %v18807_v58  ;;  %v4558_v51 = vrot.slane %v4544_v19, %v14071_v50  ;;  %v4413_v19 = vcombine.high %v4396_v34, %v18807_v58  ;;  %v18844_v34 = vld [vmem:[#allocation95_spill] sm:$0xff] }
 0x3aa   : > { %18832 = vst [vmem:[#allocation121_spill] sm:$0xff] %v14347_v25 }
 0x3ac   : > { %5953 = vrot.lane.b32.xlu1 %v4502_v7, %s11305_s20 }
 0x3ad   : > { %5951 = vrot.lane.b32.xlu0 %v4404_v41, %s11305_s20 }
 0x3ae   : > { %v14349_v62 = vpop.permute.xlu1 %7270 }
 0x3af   : > { %18833 = vst [vmem:[#allocation128_spill] sm:$0xff] %v14349_v62  ;;  %v14354_v44 = vpop.permute.xlu0 %7268 }
 0x3b0   : > { %6401 = vrot.lane.b32.xlu1 %v4560_v63, %s11306_s21  ;;  %18834 = vst [vmem:[#allocation86_spill] sm:$0xff] %v14354_v44  ;;  %v4463_v63 = vcombine.high %v4453_v32, %v18807_v58  ;;  %v4495_v32 = vcombine.high %v4479_v48, %v18807_v58 }
 0x3b1   : > { %6399 = vrot.lane.b32.xlu0 %v4462_v36, %s11306_s21  ;;  %v4460_v36 = vrot.slane %v4446_v60, %v14071_v50 }
 0x3b2   : > { %v14358_v42 = vpop.permute.xlu1 %7274 }
 0x3b3   : > { %18835 = vst [vmem:[#allocation65_spill] sm:$0xff] %v14358_v42  ;;  %v14364_v62 = vpop.permute.xlu0 %7272  ;;  %v18842_v42 = vld [vmem:[#allocation112_spill] sm:$0xff] }
 0x3b4   : > { %6529 = vrot.lane.b32.xlu1 %v4561_v20, %s11307_s22  ;;  %18836 = vst [vmem:[#allocation78_spill] sm:$0xff] %v14364_v62  ;;  %v4511_v20 = vcombine.high %v4494_v29, %v18807_v58  ;;  %v3720_v60 = vadd.f32 %v13552_v53, %v18842_v42  ;;  %v4397_v29 = vcombine.high %v4381_v43, %v18807_v58  ;;  %v18848_v53 = vld [vmem:[#allocation81_spill] sm:$0xff] }
 0x3b5   : > { %6527 = vrot.lane.b32.xlu0 %v4463_v63, %s11307_s22 }
 0x3b6   : > { %v14367_v25 = vpop.permute.xlu1 %7278 }
 0x3b7   : > { %18837 = vst [vmem:[#allocation37_spill] sm:$0xff] %v14367_v25  ;;  %v14372_v24 = vpop.permute.xlu0 %7276  ;;  %v4512_v25 = vcombine.high %v4502_v7, %v18807_v58  ;;  %v4509_v7 = vrot.slane %v4495_v32, %v14071_v50 }
 0x3b8   : > { %6593 = vrot.lane.b32.xlu1 %v4558_v51, %s11308_s23  ;;  %18838 = vst [vmem:[#allocation21_spill] sm:$0xff] %v14372_v24  ;;  %v18845_v24 = vld [vmem:[#allocation101_spill] sm:$0xff] }
 0x3b9   : > { %6591 = vrot.lane.b32.xlu0 %v4460_v36, %s11308_s23  ;;  %v3718_v48 = vadd.f32 %v18845_v24, %v18844_v34  ;;  %v4562_v24 = vcombine.high %v4558_v51, %v18807_v58  ;;  %v4513_v51 = vcombine.high %v4509_v7, %v18807_v58 }
 0x3ba   : > { %v14375_v61 = vpop.permute.xlu1 %7282 }
 0x3bb   : > { %18839 = vst [vmem:[#allocation70_spill] sm:$0xff] %v14375_v61  ;;  %v14380_v30 = vpop.permute.xlu0 %7280  ;;  %v4414_v61 = vcombine.high %v4404_v41, %v18807_v58  ;;  %v18850_v41 = vld [vmem:[#allocation68_spill] sm:$0xff] }
 0x3bc   : > { %5889 = vrot.lane.b32.xlu1 %v4511_v20, %s11309_s24  ;;  %18840 = vst [vmem:[#allocation10_spill] sm:$0xff] %v14380_v30 }
 0x3bd   : > { %5887 = vrot.lane.b32.xlu0 %v4413_v19, %s11309_s24  ;;  %v3790_v19 = vadd.f32 %v18850_v41, %v3718_v48 }
 0x3be   : > { %v14384_v63 = vpop.permute.xlu1 %7286 }
 0x3bf   : > { %18841 = vst [vmem:[#allocation66_spill] sm:$0xff] %v14384_v63  ;;  %v14392_v20 = vpop.permute.xlu0 %7284  ;;  %v18847_v63 = vld [vmem:[#allocation17_spill] sm:$0xff] }
 0x3c0   : > { %6017 = vrot.lane.b32.xlu1 %v4512_v25, %s11310_s25  ;;  %18843 = vst [vmem:[#allocation91_spill] sm:$0xff] %v14392_v20  ;;  %v3792_v44 = vadd.f32 %v18847_v63, %v3720_v60  ;;  %v4411_v25 = vrot.slane %v4397_v29, %v14071_v50  ;;  %v4464_v60 = vcombine.high %v4460_v36, %v18807_v58 }
 0x3c1   : > { %6015 = vrot.lane.b32.xlu0 %v4414_v61, %s11310_s25  ;;  %v18852_v61 = vld [vmem:[#allocation73_spill] sm:$0xff] }
 0x3c2   : > { %v14397_v30 = vpop.permute.xlu1 %7290  ;;  %v3824_v42 = vadd.f32 %v18848_v53, %v3792_v44  ;;  %v3822_v63 = vadd.f32 %v18852_v61, %v3790_v19  ;;  %v4415_v36 = vcombine.high %v4411_v25, %v18807_v58  ;;  %v18856_v19 = vld [vmem:[#allocation131_spill] sm:$0xff] }
 0x3c3   : > { %18846 = vst [vmem:[#allocation79_spill] sm:$0xff] %v14397_v30  ;;  %v14404_v43 = vpop.permute.xlu0 %7288 }
 0x3c4   : > { %6081 = vrot.lane.b32.xlu1 %v4509_v7, %s18293_s26  ;;  %18849 = vst [vmem:[#allocation80_spill] sm:$0xff] %v14404_v43  ;;  %v4150_v32 = vsel %vm18315_vm9, %v3824_v42, %v14176_v26  ;;  %v4148_v29 = vsel %vm18315_vm9, %v3822_v63, %v14169_v23  ;;  %v18854_v26 = vld [vmem:[#allocation113_spill] sm:$0xff]  ;;  %v18855_v23 = vld [vmem:[#allocation103_spill] sm:$0xff]  ;;  %v18857_v7 = vld [vmem:[#allocation90_spill] sm:$0xff] }
 0x3c5   : > { %6079 = vrot.lane.b32.xlu0 %v4411_v25, %s18293_s26  ;;  %v4717_v34 = vrot.slane %v4150_v32, %v14058_v40  ;;  %v3719_v53 = vadd.f32 %v13558_v54, %v18854_v26  ;;  %v4619_v42 = vrot.slane %v4148_v29, %v14058_v40  ;;  %v18858_v54 = vld [vmem:[#allocation82_spill] sm:$0xff]  ;;  %v18859_v25 = vld [vmem:[#allocation75_spill] sm:$0xff] }
 0x3c6   : > { %v14408_v20 = vpop.permute.xlu1 %7294 }
 0x3c7   : > { %18851 = vst [vmem:[#allocation53_spill] sm:$0xff] %v14408_v20  ;;  %v14416_v44 = vpop.permute.xlu0 %7292  ;;  %v4732_v61 = vrot.slane %v4717_v34, %v14071_v50  ;;  %v3791_v20 = vadd.f32 %v18857_v7, %v3719_v53  ;;  %v4612_v7 = vcombine.high %v4148_v29, %v18807_v58 }
 0x3c8   : > { %6657 = vrot.lane.b32.xlu1 %v4562_v24, %s11312_s27  ;;  %18853 = vst [vmem:[#allocation20_spill] sm:$0xff] %v14416_v44  ;;  %v3717_v24 = vadd.f32 %v18856_v19, %v18855_v23  ;;  %v4710_v23 = vcombine.high %v4150_v32, %v18807_v58  ;;  %v4725_v19 = vcombine.high %v4717_v34, %v18807_v58 }
 0x3c9   : > { %6655 = vrot.lane.b32.xlu0 %v4464_v60, %s11312_s27  ;;  %v3823_v60 = vadd.f32 %v3791_v20, %v18858_v54  ;;  %v4755_v44 = vcombine.high %v4732_v61, %v18807_v58  ;;  %v18860_v20 = vld [vmem:[#allocation74_spill] sm:$0xff] }
 0x3ca   : > { %v14422_v48 = vpop.permute.xlu1 %6205  ;;  %v3789_v30 = vadd.f32 %v18859_v25, %v3717_v24  ;;  %v4627_v24 = vcombine.high %v4619_v42, %v18807_v58  ;;  %v4724_v54 = vrot.slane %v4710_v23, %v14058_v40 }
 0x3cb   : > { %v14430_v41 = vpop.permute.xlu0 %6203  ;;  %v4149_v53 = vsel %vm18315_vm9, %v3823_v60, %v14181_v49  ;;  %v4739_v49 = vrot.slane %v4725_v19, %v14071_v50 }
 0x3cc   : > { %6145 = vrot.lane.b32.xlu1 %v4513_v51, %s11313_s28  ;;  %v4634_v51 = vrot.slane %v4619_v42, %v14071_v50  ;;  %v4668_v60 = vrot.slane %v4149_v53, %v14058_v40  ;;  %v4641_v29 = vrot.slane %v4627_v24, %v14071_v50  ;;  %v4740_v10 = vcombine.high %v4724_v54, %v18807_v58 }
 0x3cd   : > { %6143 = vrot.lane.b32.xlu0 %v4415_v36, %s11313_s28  ;;  %v3821_v36 = vadd.f32 %v3789_v30, %v18860_v20 }
 0x3ce   : > { %v14436_v63 = vpop.permute.xlu1 %6269  ;;  %v4657_v32 = vcombine.high %v4634_v51, %v18807_v58  ;;  %v14477_v25 = vrot.slane %v4668_v60, %v14071_v50  ;;  %v4676_v24 = vcombine.high %v4668_v60, %v18807_v58  ;;  %v4658_v8 = vcombine.high %v4641_v29, %v18807_v58 }
 0x3cf   : > { %v14443_v26 = vpop.permute.xlu0 %6267  ;;  %v4754_v15 = vrot.slane %v4740_v10, %v14071_v50 }
 0x3d0   : > { %6213 = vrot.lane.b32.xlu1 %v4732_v61, %s11298_s14  ;;  %v4147_v61 = vsel %vm18315_vm9, %v3821_v36, %v14174_v59  ;;  %v4747_v59 = vrot.slane %v4724_v54, %v14071_v50  ;;  %v4690_v60 = vrot.slane %v4676_v24, %v14071_v50 }
 0x3d1   : > { %6211 = vrot.lane.b32.xlu0 %v4634_v51, %s11298_s14  ;;  %v4570_v42 = vrot.slane %v4147_v61, %v14058_v40  ;;  %v4563_v45 = vcombine.high %v4147_v61, %v18807_v58 }
 0x3d2   : > { %v14449_v43 = vpop.permute.xlu1 %6333  ;;  %v4757_v3 = vcombine.high %v4747_v59, %v18807_v58 }
 0x3d3   : > { %v14459_v34 = vpop.permute.xlu0 %6331  ;;  %v14485_v20 = vrot.slane %v4570_v42, %v14071_v50  ;;  %v4578_v31 = vcombine.high %v4570_v42, %v18807_v58 }
 0x3d4   : > { %6277 = vrot.lane.b32.xlu1 %v4755_v44, %s11300_s15  ;;  %v4626_v44 = vrot.slane %v4612_v7, %v14058_v40  ;;  %v4661_v7 = vcombine.high %v4149_v53, %v18807_v58 }
 0x3d5   : > { %6275 = vrot.lane.b32.xlu0 %v4657_v32, %s11300_s15  ;;  %v4706_v32 = vcombine.high %v14477_v25, %v18807_v58  ;;  %v4608_v46 = vcombine.high %v14485_v20, %v18807_v58  ;;  %v4592_v61 = vrot.slane %v4578_v31, %v14071_v50 }
 0x3d6   : > { %v14466_v30 = vpop.permute.xlu1 %6461  ;;  %v4649_v19 = vrot.slane %v4626_v44, %v14071_v50  ;;  %v4675_v53 = vrot.slane %v4661_v7, %v14058_v40 }
 0x3d7   : > { %v14473_v51 = vpop.permute.xlu0 %6459 }
 0x3d8   : > { %6341 = vrot.lane.b32.xlu1 %v4739_v49, %s11301_s16  ;;  %v4698_v39 = vrot.slane %v4675_v53, %v14071_v50 }
 0x3d9   : > { %6339 = vrot.lane.b32.xlu0 %v4641_v29, %s11301_s16 }
 0x3da   : > { %v14479_v23 = vpop.permute.xlu1 %5757 }
 0x3db   : > { %v14487_v36 = vpop.permute.xlu0 %5755 }
 0x3dc   : > { %6469 = vrot.lane.b32.xlu1 %v4747_v59, %s11302_s17 }
 0x3dd   : > { %6467 = vrot.lane.b32.xlu0 %v4649_v19, %s11302_s17 }
 0x3de   : > { %v5822_v62 = vpop.permute.xlu1 %5821 }
 0x3df   : > { %v14499_v6 = vpop.permute.xlu0 %5819 }
 0x3e0   : > { %5765 = vrot.lane.b32.xlu1 %v4706_v32, %s11303_s18  ;;  %v4577_v32 = vrot.slane %v4563_v45, %v14058_v40  ;;  %v4756_v45 = vcombine.high %v4739_v49, %v18807_v58  ;;  %v4642_v49 = vcombine.high %v4626_v44, %v18807_v58  ;;  %v4609_v44 = vcombine.high %v4592_v61, %v18807_v58 }
 0x3e1   : > { %5763 = vrot.lane.b32.xlu0 %v4608_v46, %s11303_s18 }
 0x3e2   : > { %v14503_v16 = vpop.permute.xlu1 %5949  ;;  %v4600_v7 = vrot.slane %v4577_v32, %v14071_v50  ;;  %v4656_v29 = vrot.slane %v4642_v49, %v14071_v50  ;;  %v4708_v49 = vcombine.high %v4698_v39, %v18807_v58 }
 0x3e3   : > { %v14509_v42 = vpop.permute.xlu0 %5947 }
 0x3e4   : > { %5829 = vrot.lane.b32.xlu1 %v4690_v60, %s11304_s19 }
 0x3e5   : > { %5827 = vrot.lane.b32.xlu0 %v4592_v61, %s11304_s19 }
 0x3e6   : > { %v14512_v13 = vpop.permute.xlu1 %6397 }
 0x3e7   : > { %v14517_v24 = vpop.permute.xlu0 %6395 }
 0x3e8   : > { %5957 = vrot.lane.b32.xlu1 %v4698_v39, %s11305_s20  ;;  %v4610_v39 = vcombine.high %v4600_v7, %v18807_v58 }
 0x3e9   : > { %5955 = vrot.lane.b32.xlu0 %v4600_v7, %s11305_s20 }
 0x3ea   : > { %v14519_v46 = vpop.permute.xlu1 %6525 }
 0x3eb   : > { %v14524_v31 = vpop.permute.xlu0 %6523 }
 0x3ec   : > { %6405 = vrot.lane.b32.xlu1 %v4756_v45, %s11306_s21  ;;  %v4659_v45 = vcombine.high %v4649_v19, %v18807_v58  ;;  %v18861_v19 = vld [vmem:[#allocation122_spill] sm:$0xff] }
 0x3ed   : > { %6403 = vrot.lane.b32.xlu0 %v4658_v8, %s11306_s21  ;;  %v4707_v8 = vcombine.high %v4690_v60, %v18807_v58  ;;  %v3722_v10 = vadd.f32 %v13580_v37, %v18861_v19  ;;  %v3724_v60 = vadd.f32 %v13629_v57, %v18862_v35  ;;  %v4593_v37 = vcombine.high %v4577_v32, %v18807_v58 }
 0x3ee   : > { %v14528_v0 = vpop.permute.xlu1 %6589  ;;  %v6699_v35 = vsel %vm556_vm1, %v14136_v2, %v14487_v36 }
 0x3ef   : > { %v14534_v9 = vpop.permute.xlu0 %6587  ;;  %v3794_v57 = vadd.f32 %v18863_v11, %v3722_v10  ;;  %v6716_v7 = vsel %vm18299_vm7, %v6699_v35, %v14499_v6  ;;  %v18867_v11 = vld [vmem:[#allocation87_spill] sm:$0xff]  ;;  %v4607_v6 = vrot.slane %v4593_v37, %v14071_v50 }
 0x3f0   : > { %6533 = vrot.lane.b32.xlu1 %v4757_v3, %s11307_s22 }
 0x3f1   : > { %6531 = vrot.lane.b32.xlu0 %v4659_v45, %s11307_s22  ;;  %v4691_v45 = vcombine.high %v4675_v53, %v18807_v58  ;;  %v3826_v10 = vadd.f32 %v18867_v11, %v3794_v57  ;;  %v4611_v11 = vcombine.high %v4607_v6, %v18807_v58 }
 0x3f2   : > { %v5886_v1 = vpop.permute.xlu1 %5885 }
 0x3f3   : > { %v5884_v54 = vpop.permute.xlu0 %5883 }
 0x3f4   : > { %6597 = vrot.lane.b32.xlu1 %v4754_v15, %s11308_s23  ;;  %v6733_v2 = vsel %vm18297_vm8, %v6716_v7, %v5884_v54  ;;  %v4758_v54 = vcombine.high %v4754_v15, %v18807_v58 }
 0x3f5   : > { %6595 = vrot.lane.b32.xlu0 %v4656_v29, %s11308_s23 }
 0x3f6   : > { %v6014_v59 = vpop.permute.xlu1 %6013 }
 0x3f7   : > { %v6012_v3 = vpop.permute.xlu0 %6011 }
 0x3f8   : > { %5893 = vrot.lane.b32.xlu1 %v4707_v8, %s11309_s24  ;;  %v6700_v8 = vsel %vm556_vm1, %v14126_v33, %v14479_v23  ;;  %v18864_v23 = vld [vmem:[#allocation125_spill] sm:$0xff] }
 0x3f9   : > { %5891 = vrot.lane.b32.xlu0 %v4609_v44, %s11309_s24  ;;  %v6717_v61 = vsel %vm18299_vm7, %v6700_v8, %v5822_v62  ;;  %v4705_v62 = vrot.slane %v4691_v45, %v14071_v50  ;;  %v18865_v44 = vld [vmem:[#allocation120_spill] sm:$0xff] }
 0x3fa   : > { %v6078_v14 = vpop.permute.xlu1 %6077  ;;  %v6734_v53 = vsel %vm18297_vm8, %v6717_v61, %v5886_v1  ;;  %v14569_v32 = vadd.f32 %v18865_v44, %v18864_v23  ;;  %v18866_v1 = vld [vmem:[#allocation49_spill] sm:$0xff]  ;;  %v18868_v45 = vld [vmem:[#allocation96_spill] sm:$0xff] }
 0x3fb   : > { %v6076_v19 = vpop.permute.xlu0 %6075  ;;  %v6751_v36 = vsel %vm6749_vm10, %v6734_v53, %v14503_v16  ;;  %v4660_v16 = vcombine.high %v4656_v29, %v18807_v58  ;;  %v4709_v29 = vcombine.high %v4705_v62, %v18807_v58 }
 0x3fc   : > { %6021 = vrot.lane.b32.xlu1 %v4708_v49, %s11310_s25  ;;  %v3796_v49 = vadd.f32 %v18866_v1, %v3724_v60  ;;  %v6768_v60 = vsel %vm6766_vm11, %v6751_v36, %v6014_v59  ;;  %v6750_v59 = vsel %vm6749_vm10, %v6733_v2, %v14509_v42  ;;  %v18869_v1 = vld [vmem:[#allocation138_spill] sm:$0xff] }
 0x3fd   : > { %6019 = vrot.lane.b32.xlu0 %v4610_v39, %s11310_s25  ;;  %v6785_v39 = vsel %vm18290_vm0, %v6768_v60, %v6078_v14  ;;  %v6767_v14 = vsel %vm6766_vm11, %v6750_v59, %v6012_v3 }
 0x3fe   : > { %v14564_v33 = vpop.permute.xlu1 %6653  ;;  %v3828_v8 = vadd.f32 %v18868_v45, %v3796_v49  ;;  %v6784_v42 = vsel %vm18290_vm0, %v6767_v14, %v6076_v19  ;;  %vm18326_vm0 = vcmask 490496  }
 0x3ff   : > { %v14582_v61 = vpop.permute.xlu0 %6651 }
 0x400   : > { %6085 = vrot.lane.b32.xlu1 %v4705_v62, %s18293_s26  ;;  %v4154_v53 = vsel %vm18315_vm9, %v3828_v8, %v14195_v38  ;;  %v4152_v38 = vsel %vm18315_vm9, %v3826_v10, %v14186_v28  ;;  %v18870_v28 = vld [vmem:[#allocation26_spill] sm:$0xff]  ;;  %v18871_v8 = vld [vmem:[#allocation23_spill] sm:$0xff] }
 0x401   : > { %6083 = vrot.lane.b32.xlu0 %v4607_v6, %s18293_s26  ;;  %v4913_v3 = vrot.slane %v4154_v53, %v14058_v40  ;;  %v3723_v49 = vadd.f32 %v18870_v28, %v18869_v1  ;;  %v4815_v10 = vrot.slane %v4152_v38, %v14058_v40  ;;  %s14628_s26 = scalar_lea.vmem %s18100_s9, %s10574_s29  ;;  %s18967_s29 = smov 2  }
 0x402   : > { %v6142_v57 = vpop.permute.xlu1 %6141 }
 0x403   : > { %v6802_v37 = vsel %vm6800_vm12, %v6785_v39, %v6142_v57  ;;  %v6140_v23 = vpop.permute.xlu0 %6139  ;;  %v3795_v60 = vadd.f32 %v18871_v8, %v3723_v49  ;;  %v18873_v39 = vld [vmem:[#allocation99_spill] sm:$0xff]  ;;  %v4921_v59 = vcombine.high %v4913_v3, %v18807_v58 }
 0x404   : > { %v6819_v15 = vsel %vm18295_vm13, %v6802_v37, %v14422_v48  ;;  %6661 = vrot.lane.b32.xlu1 %v4758_v54, %s11312_s27  ;;  %v6801_v44 = vsel %vm6800_vm12, %v6784_v42, %v6140_v23 }
 0x405   : > { %v6836_v35 = vsel %vm6834_vm14, %v6819_v15, %v14436_v63  ;;  %v6818_v63 = vsel %vm18295_vm13, %v6801_v44, %v14430_v41  ;;  %6659 = vrot.lane.b32.xlu0 %v4660_v16, %s11312_s27  ;;  %vm18316_vm13 = vcmask 516096   ;;  %v3827_v57 = vadd.f32 %v3795_v60, %v18873_v39 }
 0x406   : > { %v6853_v48 = vsel %vm6851_vm15, %v6836_v35, %v14449_v43  ;;  %v14609_v62 = vpop.permute.xlu1 %6209  ;;  %v6835_v7 = vsel %vm6834_vm14, %v6818_v63, %v14443_v26  ;;  %v4906_v16 = vcombine.high %v4154_v53, %v18807_v58  ;;  %v4808_v53 = vcombine.high %v4152_v38, %v18807_v58 }
 0x407   : > { %v6870_v19 = vsel %vm6868_vm3, %v6853_v48, %v14512_v13  ;;  %v6852_v41 = vsel %vm6851_vm15, %v6835_v7, %v14459_v34  ;;  %v14634_v26 = vpop.permute.xlu0 %6207  ;;  %v4935_v23 = vrot.slane %v4921_v59, %v14071_v50 }
 0x408   : > { %v6887_v43 = vsel %vm6885_vm4, %v6870_v19, %v14466_v30  ;;  %6149 = vrot.lane.b32.xlu1 %v4709_v29, %s11313_s28  ;;  %v4928_v30 = vrot.slane %v4913_v3, %v14071_v50  ;;  %v6869_v36 = vsel %vm6868_vm3, %v6852_v41, %v14517_v24  ;;  %v18872_v24 = vld [vmem:[#allocation22_spill] sm:$0xff]  ;;  %v4823_v29 = vcombine.high %v4815_v10, %v18807_v58 }
 0x409   : > { %v6904_v13 = vsel %vm6902_vm5, %v6887_v43, %v14519_v46  ;;  %v6886_v34 = vsel %vm6885_vm4, %v6869_v36, %v14473_v51  ;;  %6147 = vrot.lane.b32.xlu0 %v4611_v11, %s11313_s28  ;;  %v3793_v6 = vadd.f32 %v18872_v24, %v14569_v32  ;;  %v4153_v32 = vsel %vm18315_vm9, %v3827_v57, %v14200_v4 }
 0x40a   : > { %v6921_v2 = vsel %vm6919_vm6, %v6904_v13, %v14528_v0  ;;  %v14641_v45 = vpop.permute.xlu1 %6273  ;;  %v6903_v0 = vsel %vm6902_vm5, %v6886_v34, %v14524_v31  ;;  %v4951_v31 = vcombine.high %v4928_v30, %v18807_v58  ;;  %v4920_v4 = vrot.slane %v4906_v16, %v14058_v40 }
 0x40b   : > { %v6938_v46 = vsel %vm18326_vm0, %v6921_v2, %v14564_v33  ;;  %v4830_v33 = vrot.slane %v4815_v10, %v14071_v50  ;;  %v6920_v51 = vsel %vm6919_vm6, %v6903_v0, %v14534_v9  ;;  %v14660_v54 = vpop.permute.xlu0 %6271  ;;  %v18874_v9 = vld [vmem:[#allocation89_spill] sm:$0xff]  ;;  %v4864_v3 = vrot.slane %v4153_v32, %v14058_v40 }
 0x40c   : > { %6955 = vst.msk [vmem:[%s14628_s26 + $0x2] sm:$0x1] %vm18316_vm13, %v6938_v46  ;;  %6217 = vrot.lane.b32.xlu1 %v4928_v30, %s11298_s14  ;;  %v6937_v37 = vsel %vm18326_vm0, %v6920_v51, %v14582_v61  ;;  %v3825_v15 = vadd.f32 %v3793_v6, %v18874_v9  ;;  %v4822_v38 = vrot.slane %v4808_v53, %v14058_v40 }
 0x40d   : > { %6954 = vst.msk [vmem:[%s14628_s26] sm:$0x1] %vm18316_vm13, %v6937_v37  ;;  %6215 = vrot.lane.b32.xlu0 %v4830_v33, %s11298_s14  ;;  %v4853_v42 = vcombine.high %v4830_v33, %v18807_v58  ;;  %v4837_v44 = vrot.slane %v4823_v29, %v14071_v50  ;;  %v14697_v49 = vrot.slane %v4864_v3, %v14071_v50 }
 0x40e   : > { %v14667_v14 = vpop.permute.xlu1 %6337  ;;  %v4151_v35 = vsel %vm18315_vm9, %v3825_v15, %v14192_v47  ;;  %v4943_v47 = vrot.slane %v4920_v4, %v14071_v50  ;;  %v4845_v63 = vrot.slane %v4822_v38, %v14071_v50  ;;  %v4857_v11 = vcombine.high %v4153_v32, %v18807_v58 }
 0x40f   : > { %v14679_v61 = vpop.permute.xlu0 %6335  ;;  %v4766_v1 = vrot.slane %v4151_v35, %v14058_v40  ;;  %v4872_v10 = vcombine.high %v4864_v3, %v18807_v58  ;;  %v4902_v13 = vcombine.high %v14697_v49, %v18807_v58  ;;  %v4759_v30 = vcombine.high %v4151_v35, %v18807_v58 }
 0x410   : > { %6281 = vrot.lane.b32.xlu1 %v4951_v31, %s11300_s15  ;;  %v4871_v60 = vrot.slane %v4857_v11, %v14058_v40  ;;  %v4952_v59 = vcombine.high %v4935_v23, %v18807_v58  ;;  %v4854_v37 = vcombine.high %v4837_v44, %v18807_v58  ;;  %v4936_v32 = vcombine.high %v4920_v4, %v18807_v58  ;;  %v18875_v4 = vld [vmem:[#allocation39_spill] sm:$0xff] }
 0x411   : > { %6279 = vrot.lane.b32.xlu0 %v4853_v42, %s11300_s15  ;;  %v14705_v43 = vrot.slane %v4766_v1, %v14071_v50  ;;  %v4774_v2 = vcombine.high %v4766_v1, %v18807_v58  ;;  %v4886_v46 = vrot.slane %v4872_v10, %v14071_v50  ;;  %v4773_v0 = vrot.slane %v4759_v30, %v14058_v40  ;;  %v18878_v30 = vld [vmem:[#allocation33_spill] sm:$0xff] }
 0x412   : > { %v14686_v48 = vpop.permute.xlu1 %6465  ;;  %v4894_v39 = vrot.slane %v4871_v60, %v14071_v50  ;;  %v4953_v15 = vcombine.high %v4943_v47, %v18807_v58  ;;  %v4838_v53 = vcombine.high %v4822_v38, %v18807_v58  ;;  %v4855_v42 = vcombine.high %v4845_v63, %v18807_v58 }
 0x413   : > { %v14693_v28 = vpop.permute.xlu0 %6463  ;;  %v4804_v36 = vcombine.high %v14705_v43, %v18807_v58  ;;  %v4788_v24 = vrot.slane %v4774_v2, %v14071_v50  ;;  %v4796_v33 = vrot.slane %v4773_v0, %v14071_v50  ;;  %v14759_v3 = vmul.f32 0.1875, %v18875_v4 }
 0x414   : > { %6345 = vrot.lane.b32.xlu1 %v4935_v23, %s11301_s16  ;;  %v4950_v23 = vrot.slane %v4936_v32, %v14071_v50  ;;  %v4852_v1 = vrot.slane %v4838_v53, %v14071_v50  ;;  %v4903_v38 = vcombine.high %v4886_v46, %v18807_v58  ;;  %v14769_v2 = vmul.f32 0.1875, %v18878_v30  ;;  %v18879_v32 = vld [vmem:[#allocation32_spill] sm:$0xff] }
 0x415   : > { %6343 = vrot.lane.b32.xlu0 %v4837_v44, %s11301_s16  ;;  %18876 = vst [vmem:[#allocation71_spill] sm:$0xff] %v14759_v3 }
 0x416   : > { %v14699_v19 = vpop.permute.xlu1 %5761 }
 0x417   : > { %v14707_v7 = vpop.permute.xlu0 %5759 }
 0x418   : > { %6473 = vrot.lane.b32.xlu1 %v4943_v47, %s11302_s17  ;;  %v6701_v30 = vsel %vm556_vm1, %v14313_v5, %v14707_v7 }
 0x419   : > { %6471 = vrot.lane.b32.xlu0 %v4845_v63, %s11302_s17  ;;  %v18877_v63 = vld [vmem:[#allocation156_spill] sm:$0xff] }
 0x41a   : > { %v5826_v41 = vpop.permute.xlu1 %5825  ;;  %v3728_v11 = vadd.f32 %v14759_v3, %v18877_v63 }
 0x41b   : > { %v5824_v8 = vpop.permute.xlu0 %5823 }
 0x41c   : > { %5769 = vrot.lane.b32.xlu1 %v4902_v13, %s11303_s18  ;;  %v4805_v13 = vcombine.high %v4788_v24, %v18807_v58 }
 0x41d   : > { %5767 = vrot.lane.b32.xlu0 %v4804_v36, %s11303_s18  ;;  %v4887_v36 = vcombine.high %v4871_v60, %v18807_v58  ;;  %v18881_v60 = vld [vmem:[#allocation137_spill] sm:$0xff] }
 0x41e   : > { %v14721_v34 = vpop.permute.xlu1 %5953 }
 0x41f   : > { %v14727_v6 = vpop.permute.xlu0 %5951 }
 0x420   : > { %5833 = vrot.lane.b32.xlu1 %v4886_v46, %s11304_s19  ;;  %v6702_v46 = vsel %vm556_vm1, %v14305_v55, %v14699_v19  ;;  %v4806_v55 = vcombine.high %v4796_v33, %v18807_v58  ;;  %v18882_v19 = vld [vmem:[#allocation50_spill] sm:$0xff] }
 0x421   : > { %5831 = vrot.lane.b32.xlu0 %v4788_v24, %s11304_s19  ;;  %v6719_v24 = vsel %vm18299_vm7, %v6702_v46, %v5826_v41  ;;  %v4901_v41 = vrot.slane %v4887_v36, %v14071_v50 }
 0x422   : > { %v14730_v57 = vpop.permute.xlu1 %6401 }
 0x423   : > { %v14735_v51 = vpop.permute.xlu0 %6399 }
 0x424   : > { %5961 = vrot.lane.b32.xlu1 %v4894_v39, %s11305_s20 }
 0x425   : > { %5959 = vrot.lane.b32.xlu0 %v4796_v33, %s11305_s20 }
 0x426   : > { %v14737_v16 = vpop.permute.xlu1 %6529 }
 0x427   : > { %v14742_v31 = vpop.permute.xlu0 %6527 }
 0x428   : > { %6409 = vrot.lane.b32.xlu1 %v4952_v59, %s11306_s21 }
 0x429   : > { %6407 = vrot.lane.b32.xlu0 %v4854_v37, %s11306_s21  ;;  %v4904_v37 = vcombine.high %v4894_v39, %v18807_v58  ;;  %v4789_v39 = vcombine.high %v4773_v0, %v18807_v58 }
 0x42a   : > { %v14746_v9 = vpop.permute.xlu1 %6593 }
 0x42b   : > { %v14752_v29 = vpop.permute.xlu0 %6591  ;;  %v4803_v36 = vrot.slane %v4789_v39, %v14071_v50  ;;  %v18888_v39 = vld [vmem:[#allocation107_spill] sm:$0xff] }
 0x42c   : > { %6537 = vrot.lane.b32.xlu1 %v4953_v15, %s11307_s22  ;;  %v18880_v15 = vrot.slane %v18879_v32, 7 }
 0x42d   : > { %6535 = vrot.lane.b32.xlu0 %v4855_v42, %s11307_s22  ;;  %v3800_v42 = vadd.f32 %v18881_v60, %v3728_v11  ;;  %v18884_v11 = vld [vmem:[#allocation117_spill] sm:$0xff] }
 0x42e   : > { %v5890_v35 = vpop.permute.xlu1 %5889  ;;  %v14781_v53 = vsel %vm18296_vm2, %v18879_v32, %v18880_v15  ;;  %vm18886_vm2 = vcmask 195584  }
 0x42f   : > { %v5888_v44 = vpop.permute.xlu0 %5887  ;;  %v14798_v0 = vmul.f32 0.1875, %v14781_v53  ;;  %v3832_v46 = vadd.f32 %v18884_v11, %v3800_v42 }
 0x430   : > { %6601 = vrot.lane.b32.xlu1 %v4950_v23, %s11308_s23 }
 0x431   : > { %6599 = vrot.lane.b32.xlu0 %v4852_v1, %s11308_s23 }
 0x432   : > { %v6018_v47 = vpop.permute.xlu1 %6017 }
 0x433   : > { %v6016_v10 = vpop.permute.xlu0 %6015 }
 0x434   : > { %5897 = vrot.lane.b32.xlu1 %v4903_v38, %s11309_s24  ;;  %v6736_v38 = vsel %vm18297_vm8, %v6719_v24, %v5890_v35 }
 0x435   : > { %5895 = vrot.lane.b32.xlu0 %v4805_v13, %s11309_s24  ;;  %v3726_v13 = vadd.f32 %v14769_v2, %v18882_v19  ;;  %v6753_v33 = vsel %vm6749_vm10, %v6736_v38, %v14721_v34  ;;  %v4158_v34 = vsel %vm18315_vm9, %v3832_v46, %v14212_v52 }
 0x436   : > { %v6082_v59 = vpop.permute.xlu1 %6081  ;;  %v6770_v5 = vsel %vm6766_vm11, %v6753_v33, %v6018_v47  ;;  %v4905_v33 = vcombine.high %v4901_v41, %v18807_v58 }
 0x437   : > { %v6080_v63 = vpop.permute.xlu0 %6079  ;;  %v6787_v24 = vsel %vm18886_vm2, %v6770_v5, %v6082_v59  ;;  %vm18890_vm2 = vcmask 261120  }
 0x438   : > { %6025 = vrot.lane.b32.xlu1 %v4904_v37, %s11310_s25  ;;  %v6718_v37 = vsel %vm18299_vm7, %v6701_v30, %v5824_v8  ;;  %v18885_v8 = vld [vmem:[#allocation24_spill] sm:$0xff] }
 0x439   : > { %6023 = vrot.lane.b32.xlu0 %v4806_v55, %s11310_s25  ;;  %v6735_v35 = vsel %vm18297_vm8, %v6718_v37, %v5888_v44  ;;  %v3798_v15 = vadd.f32 %v18885_v8, %v3726_v13  ;;  %v4954_v55 = vcombine.high %v4950_v23, %v18807_v58  ;;  %v18887_v44 = vld [vmem:[#allocation31_spill] sm:$0xff]  ;;  %v18889_v13 = vld [vmem:[#allocation158_spill] sm:$0xff]  ;;  %vm18891_vm8 = vcmask 195584  }
 0x43a   : > { %v6658_v32 = vpop.permute.xlu1 %6657  ;;  %v14811_v19 = vmul.f32 0.1875, %v18887_v44  ;;  %v6752_v42 = vsel %vm6749_vm10, %v6735_v35, %v14727_v6  ;;  %v3727_v59 = vadd.f32 %v14798_v0, %v18889_v13  ;;  %v4856_v35 = vcombine.high %v4852_v1, %v18807_v58 }
 0x43b   : > { %v6656_v7 = vpop.permute.xlu0 %6655  ;;  %v3830_v38 = vadd.f32 %v18888_v39, %v3798_v15  ;;  %v6769_v23 = vsel %vm6766_vm11, %v6752_v42, %v6016_v10  ;;  %v5109_v10 = vrot.slane %v4158_v34, %v14058_v40  ;;  %v5102_v13 = vcombine.high %v4158_v34, %v18807_v58 }
 0x43c   : > { %6089 = vrot.lane.b32.xlu1 %v4901_v41, %s18883_s12  ;;  %v6786_v52 = vsel %vm18891_vm8, %v6769_v23, %v6080_v63  ;;  %vm18892_vm8 = vmmov %vm18890_vm2  ;;  %v18893_v63 = vld [vmem:[#allocation30_spill] sm:$0xff]  ;;  %v18894_v41 = vld [vmem:[#allocation140_spill] sm:$0xff] }
 0x43d   : > { %6087 = vrot.lane.b32.xlu0 %v4803_v36, %s18883_s12  ;;  %v4156_v11 = vsel %vm18315_vm9, %v3830_v38, %v14203_v22  ;;  %v3725_v22 = vadd.f32 %v14811_v19, %v18893_v63  ;;  %v3799_v8 = vadd.f32 %v18894_v41, %v3727_v59  ;;  %v5124_v44 = vrot.slane %v5109_v10, %v14071_v50 }
 0x43e   : > { %v6146_v60 = vpop.permute.xlu1 %6145  ;;  %v5117_v59 = vcombine.high %v5109_v10, %v18807_v58  ;;  %v5004_v34 = vcombine.high %v4156_v11, %v18807_v58 }
 0x43f   : > { %v6804_v47 = vsel %vm6800_vm12, %v6787_v24, %v6146_v60  ;;  %v6144_v37 = vpop.permute.xlu0 %6143  ;;  %v5147_v23 = vcombine.high %v5124_v44, %v18807_v58 }
 0x440   : > { %v6821_v30 = vsel %vm18890_vm2, %v6804_v47, %v14609_v62  ;;  %6665 = vrot.lane.b32.xlu1 %v4954_v55, %s11312_s27  ;;  %v6803_v46 = vsel %vm6800_vm12, %v6786_v52, %v6144_v37  ;;  %v4807_v55 = vcombine.high %v4803_v36, %v18807_v58  ;;  %v5131_v10 = vrot.slane %v5117_v59, %v14071_v50 }
 0x441   : > { %v6838_v6 = vsel %vm6834_vm14, %v6821_v30, %v14641_v45  ;;  %v6820_v1 = vsel %vm18892_vm8, %v6803_v46, %v14634_v26  ;;  %6663 = vrot.lane.b32.xlu0 %v4856_v35, %s11312_s27  ;;  %vm18905_vm2 = vcmask 97280   ;;  %vm18908_vm8 = vcmask 1040384  }
 0x442   : > { %v6855_v62 = vsel %vm6851_vm15, %v6838_v6, %v14667_v14  ;;  %v14837_v5 = vpop.permute.xlu1 %6213  ;;  %v6837_v15 = vsel %vm6834_vm14, %v6820_v1, %v14660_v54 }
 0x443   : > { %v6872_v45 = vsel %vm6868_vm3, %v6855_v62, %v14730_v57  ;;  %v5011_v57 = vrot.slane %v4156_v11, %v14058_v40  ;;  %v6854_v24 = vsel %vm6851_vm15, %v6837_v15, %v14679_v61  ;;  %v14857_v60 = vpop.permute.xlu0 %6211  ;;  %v5018_v11 = vrot.slane %v5004_v34, %v14058_v40 }
 0x444   : > { %v6889_v14 = vsel %vm6885_vm4, %v6872_v45, %v14686_v48  ;;  %6153 = vrot.lane.b32.xlu1 %v4905_v33, %s11313_s28  ;;  %v6871_v54 = vsel %vm6868_vm3, %v6854_v24, %v14735_v51  ;;  %v18896_v51 = vld [vmem:[#allocation119_spill] sm:$0xff] }
 0x445   : > { %v6906_v26 = vsel %vm6902_vm5, %v6889_v14, %v14737_v16  ;;  %v6888_v16 = vsel %vm6885_vm4, %v6871_v54, %v14693_v28  ;;  %6151 = vrot.lane.b32.xlu0 %v4807_v55, %s11313_s28  ;;  %v3831_v39 = vadd.f32 %v3799_v8, %v18896_v51  ;;  %v5026_v38 = vrot.slane %v5011_v57, %v14071_v50 }
 0x446   : > { %v6923_v48 = vsel %vm6919_vm6, %v6906_v26, %v14746_v9  ;;  %v14865_v42 = vpop.permute.xlu1 %6277  ;;  %v6905_v61 = vsel %vm6902_vm5, %v6888_v16, %v14742_v31  ;;  %v18895_v9 = vld [vmem:[#allocation29_spill] sm:$0xff]  ;;  %v5019_v37 = vcombine.high %v5011_v57, %v18807_v58  ;;  %v5041_v8 = vrot.slane %v5018_v11, %v14071_v50 }
 0x447   : > { %v6940_v47 = vsel %vm18326_vm0, %v6923_v48, %v6658_v32  ;;  %v3797_v36 = vadd.f32 %v18895_v9, %v3725_v22  ;;  %v6922_v32 = vsel %vm6919_vm6, %v6905_v61, %v14752_v29  ;;  %v14881_v28 = vpop.permute.xlu0 %6275  ;;  %v4157_v52 = vsel %vm18315_vm9, %v3831_v39, %v14220_v12  ;;  %v18897_v29 = vld [vmem:[#allocation109_spill] sm:$0xff] }
 0x448   : > { %6957 = vst.msk [vmem:[%s14628_s26 + $0x6] sm:$0x1] %vm18316_vm13, %v6940_v47  ;;  %6221 = vrot.lane.b32.xlu1 %v5124_v44, %s11298_s14  ;;  %v6939_v31 = vsel %vm18326_vm0, %v6922_v32, %v6656_v7  ;;  %v5049_v35 = vcombine.high %v5026_v38, %v18807_v58  ;;  %v5116_v12 = vrot.slane %v5102_v13, %v14058_v40 }
 0x449   : > { %6956 = vst.msk [vmem:[%s14628_s26 + $0x4] sm:$0x1] %vm18316_vm13, %v6939_v31  ;;  %6219 = vrot.lane.b32.xlu0 %v5026_v38, %s11298_s14  ;;  %v3829_v6 = vadd.f32 %v3797_v36, %v18897_v29  ;;  %v5060_v62 = vrot.slane %v4157_v52, %v14058_v40  ;;  %v5033_v45 = vrot.slane %v5019_v37, %v14071_v50 }
 0x44a   : > { %v14887_v30 = vpop.permute.xlu1 %6341  ;;  %v5053_v57 = vcombine.high %v4157_v52, %v18807_v58  ;;  %v5148_v31 = vcombine.high %v5131_v10, %v18807_v58 }
 0x44b   : > { %v14899_v7 = vpop.permute.xlu0 %6339  ;;  %v4155_v33 = vsel %vm18315_vm9, %v3829_v6, %v14208_v56  ;;  %v5139_v56 = vrot.slane %v5116_v12, %v14071_v50  ;;  %v14917_v22 = vrot.slane %v5060_v62, %v14071_v50  ;;  %v5068_v26 = vcombine.high %v5060_v62, %v18807_v58 }
 0x44c   : > { %6285 = vrot.lane.b32.xlu1 %v5147_v23, %s11300_s15  ;;  %v4962_v1 = vrot.slane %v4155_v33, %v14058_v40  ;;  %v4955_v44 = vcombine.high %v4155_v33, %v18807_v58  ;;  %v5067_v16 = vrot.slane %v5053_v57, %v14058_v40  ;;  %v5050_v29 = vcombine.high %v5033_v45, %v18807_v58 }
 0x44d   : > { %6283 = vrot.lane.b32.xlu0 %v5049_v35, %s11300_s15  ;;  %v5098_v24 = vcombine.high %v14917_v22, %v18807_v58  ;;  %v5082_v61 = vrot.slane %v5068_v26, %v14071_v50  ;;  %v5132_v6 = vcombine.high %v5116_v12, %v18807_v58  ;;  %v5149_v37 = vcombine.high %v5139_v56, %v18807_v58 }
 0x44e   : > { %v14906_v46 = vpop.permute.xlu1 %6469  ;;  %v14925_v14 = vrot.slane %v4962_v1, %v14071_v50  ;;  %v4970_v48 = vcombine.high %v4962_v1, %v18807_v58  ;;  %v4969_v36 = vrot.slane %v4955_v44, %v14058_v40  ;;  %v5090_v38 = vrot.slane %v5067_v16, %v14071_v50 }
 0x44f   : > { %v14913_v63 = vpop.permute.xlu0 %6467  ;;  %v5034_v35 = vcombine.high %v5018_v11, %v18807_v58  ;;  %v5146_v1 = vrot.slane %v5132_v6, %v14071_v50  ;;  %v5099_v57 = vcombine.high %v5082_v61, %v18807_v58  ;;  %v18898_v11 = vld [vmem:[#allocation42_spill] sm:$0xff] }
 0x450   : > { %6349 = vrot.lane.b32.xlu1 %v5131_v10, %s11301_s16  ;;  %v5000_v54 = vcombine.high %v14925_v14, %v18807_v58  ;;  %v4984_v51 = vrot.slane %v4970_v48, %v14071_v50  ;;  %v4992_v13 = vrot.slane %v4969_v36, %v14071_v50  ;;  %v5051_v10 = vcombine.high %v5041_v8, %v18807_v58 }
 0x451   : > { %6347 = vrot.lane.b32.xlu0 %v5033_v45, %s11301_s16  ;;  %v5048_v45 = vrot.slane %v5034_v35, %v14071_v50  ;;  %v14984_v26 = vmul.f32 0.1875, %v18898_v11  ;;  %v14990_v48 = vmul.f32 0.0625, %v18898_v11  ;;  %v18903_v35 = vld [vmem:[#allocation161_spill] sm:$0xff] }
 0x452   : > { %v14919_v41 = vpop.permute.xlu1 %5765 }
 0x453   : > { %v14927_v15 = vpop.permute.xlu0 %5763  ;;  %18899 = vst [vmem:[#allocation132_spill] sm:$0xff] %v14984_v26  ;;  %18902 = vst [vmem:[#allocation67_spill] sm:$0xff] %v14990_v48 }
 0x454   : > { %6477 = vrot.lane.b32.xlu1 %v5139_v56, %s11302_s17 }
 0x455   : > { %6475 = vrot.lane.b32.xlu0 %v5041_v8, %s11302_s17  ;;  %v18900_v8 = vld [vmem:[#allocation46_spill] sm:$0xff] }
 0x456   : > { %v5830_v55 = vpop.permute.xlu1 %5829 }
 0x457   : > { %v14939_v47 = vpop.permute.xlu0 %5827 }
 0x458   : > { %5773 = vrot.lane.b32.xlu1 %v5098_v24, %s11303_s18  ;;  %v18901_v24 = vld [vmem:[#allocation56_spill] sm:$0xff] }
 0x459   : > { %5771 = vrot.lane.b32.xlu0 %v5000_v54, %s11303_s18  ;;  %v3732_v44 = vadd.f32 %v18901_v24, %v18900_v8 }
 0x45a   : > { %v14943_v9 = vpop.permute.xlu1 %5957 }
 0x45b   : > { %v14949_v39 = vpop.permute.xlu0 %5955 }
 0x45c   : > { %5837 = vrot.lane.b32.xlu1 %v5082_v61, %s11304_s19  ;;  %v5100_v61 = vcombine.high %v5090_v38, %v18807_v58 }
 0x45d   : > { %5835 = vrot.lane.b32.xlu0 %v4984_v51, %s11304_s19 }
 0x45e   : > { %v14952_v32 = vpop.permute.xlu1 %6405 }
 0x45f   : > { %v14957_v59 = vpop.permute.xlu0 %6403 }
 0x460   : > { %5965 = vrot.lane.b32.xlu1 %v5090_v38, %s11305_s20 }
 0x461   : > { %5963 = vrot.lane.b32.xlu0 %v4992_v13, %s11305_s20 }
 0x462   : > { %v14959_v23 = vpop.permute.xlu1 %6533 }
 0x463   : > { %v14964_v52 = vpop.permute.xlu0 %6531 }
 0x464   : > { %6413 = vrot.lane.b32.xlu1 %v5148_v31, %s11306_s21  ;;  %v5001_v31 = vcombine.high %v4984_v51, %v18807_v58  ;;  %v4985_v51 = vcombine.high %v4969_v36, %v18807_v58 }
 0x465   : > { %6411 = vrot.lane.b32.xlu0 %v5050_v29, %s11306_s21  ;;  %v5083_v29 = vcombine.high %v5067_v16, %v18807_v58  ;;  %v3804_v16 = vadd.f32 %v14990_v48, %v3732_v44 }
 0x466   : > { %v14968_v34 = vpop.permute.xlu1 %6597 }
 0x467   : > { %v14974_v33 = vpop.permute.xlu0 %6595 }
 0x468   : > { %6541 = vrot.lane.b32.xlu1 %v5149_v37, %s11307_s22  ;;  %v6704_v37 = vsel %vm556_vm1, %v14477_v25, %v14919_v41  ;;  %v5002_v25 = vcombine.high %v4992_v13, %v18807_v58  ;;  %v6703_v41 = vsel %vm556_vm1, %v14485_v20, %v14927_v15  ;;  %v18909_v15 = vld [vmem:[#allocation136_spill] sm:$0xff] }
 0x469   : > { %6539 = vrot.lane.b32.xlu0 %v5051_v10, %s11307_s22  ;;  %v3730_v10 = vadd.f32 %v14984_v26, %v18903_v35  ;;  %v6721_v11 = vsel %vm18299_vm7, %v6704_v37, %v5830_v55  ;;  %v6720_v36 = vsel %vm18299_vm7, %v6703_v41, %v14939_v47  ;;  %v3836_v44 = vadd.f32 %v18909_v15, %v3804_v16  ;;  %v18912_v41 = vld [vmem:[#allocation163_spill] sm:$0xff] }
 0x46a   : > { %v5894_v62 = vpop.permute.xlu1 %5893  ;;  %v4999_v35 = vrot.slane %v4985_v51, %v14071_v50  ;;  %v18911_v51 = vld [vmem:[#allocation126_spill] sm:$0xff] }
 0x46b   : > { %v5892_v12 = vpop.permute.xlu0 %5891  ;;  %v6738_v38 = vsel %vm18905_vm2, %v6721_v11, %v5894_v62 }
 0x46c   : > { %6605 = vrot.lane.b32.xlu1 %v5146_v1, %s11308_s23  ;;  %v6737_v13 = vsel %vm18905_vm2, %v6720_v36, %v5892_v12  ;;  %v6755_v20 = vsel %vm6749_vm10, %v6738_v38, %v14943_v9  ;;  %v4162_v9 = vsel %vm18315_vm9, %v3836_v44, %v14236_v21  ;;  %vm18914_vm2 = vcmask 261120  }
 0x46d   : > { %6603 = vrot.lane.b32.xlu0 %v5048_v45, %s11308_s23  ;;  %v6754_v16 = vsel %vm6749_vm10, %v6737_v13, %v14949_v39  ;;  %v5052_v36 = vcombine.high %v5048_v45, %v18807_v58 }
 0x46e   : > { %v6022_v56 = vpop.permute.xlu1 %6021 }
 0x46f   : > { %v6020_v54 = vpop.permute.xlu0 %6019 }
 0x470   : > { %5901 = vrot.lane.b32.xlu1 %v5099_v57, %s11309_s24  ;;  %v15002_v57 = vmul.f32 0.0625, %v18875_v4  ;;  %v5097_v4 = vrot.slane %v5083_v29, %v14071_v50  ;;  %v6772_v29 = vsel %vm6766_vm11, %v6755_v20, %v6022_v56 }
 0x471   : > { %5899 = vrot.lane.b32.xlu0 %v5001_v31, %s11309_s24  ;;  %v18906_v31 = vld [vmem:[#allocation34_spill] sm:$0xff] }
 0x472   : > { %v6086_v6 = vpop.permute.xlu1 %6085  ;;  %18904 = vst [vmem:[#allocation112_spill] sm:$0xff] %v15002_v57  ;;  %v18907_v55 = vrot.slane %v18906_v31, 7  ;;  %v3802_v62 = vadd.f32 %v15002_v57, %v3730_v10  ;;  %v5150_v10 = vcombine.high %v5146_v1, %v18807_v58 }
 0x473   : > { %v6084_v8 = vpop.permute.xlu0 %6083 }
 0x474   : > { %6029 = vrot.lane.b32.xlu1 %v5100_v61, %s11310_s25  ;;  %v3478_v61 = vsel %vm18908_vm8, %v18906_v31, %v18907_v55  ;;  %vm18910_vm8 = vcmask 195584   ;;  %v3834_v38 = vadd.f32 %v18911_v51, %v3802_v62  ;;  %v18913_v31 = vld [vmem:[#allocation55_spill] sm:$0xff]  ;;  %v6771_v55 = vsel %vm6766_vm11, %v6754_v16, %v6020_v54 }
 0x475   : > { %6027 = vrot.lane.b32.xlu0 %v5002_v25, %s11310_s25  ;;  %v15029_v11 = vmul.f32 0.1875, %v3478_v61  ;;  %v6789_v47 = vsel %vm18910_vm8, %v6772_v29, %v6086_v6  ;;  %v15033_v12 = vmul.f32 0.0625, %v3478_v61  ;;  %v3731_v6 = vadd.f32 %v18913_v31, %v18912_v41 }
 0x476   : > { %v6662_v24 = vpop.permute.xlu1 %6661  ;;  %v6788_v21 = vsel %vm18910_vm8, %v6771_v55, %v6084_v8  ;;  %v5101_v62 = vcombine.high %v5097_v4, %v18807_v58  ;;  %v4160_v13 = vsel %vm18315_vm9, %v3834_v38, %v14225_v17  ;;  %v5305_v54 = vrot.slane %v4162_v9, %v14058_v40  ;;  %v18915_v17 = vld [vmem:[#allocation162_spill] sm:$0xff] }
 0x477   : > { %v6660_v37 = vpop.permute.xlu0 %6659  ;;  %v15062_v8 = vmul.f32 0.0625, %v14781_v53  ;;  %v5298_v38 = vcombine.high %v4162_v9, %v18807_v58  ;;  %v5200_v9 = vcombine.high %v4160_v13, %v18807_v58  ;;  %vm18925_vm8 = vcmask 97280  }
 0x478   : > { %6093 = vrot.lane.b32.xlu1 %v5097_v4, %s18883_s12  ;;  %v3729_v4 = vadd.f32 %v15029_v11, %v18915_v17  ;;  %v5313_v41 = vcombine.high %v5305_v54, %v18807_v58 }
 0x479   : > { %6091 = vrot.lane.b32.xlu0 %v4999_v35, %s18883_s12 }
 0x47a   : > { %v6150_v25 = vpop.permute.xlu1 %6149 }
 0x47b   : > { %v6806_v56 = vsel %vm6800_vm12, %v6789_v47, %v6150_v25  ;;  %v6148_v61 = vpop.permute.xlu0 %6147  ;;  %v5003_v25 = vcombine.high %v4999_v35, %v18807_v58 }
 0x47c   : > { %v6823_v1 = vsel %vm18914_vm2, %v6806_v56, %v14837_v5  ;;  %6669 = vrot.lane.b32.xlu1 %v5150_v10, %s11312_s27  ;;  %v6805_v20 = vsel %vm6800_vm12, %v6788_v21, %v6148_v61 }
 0x47d   : > { %v6840_v39 = vsel %vm6834_vm14, %v6823_v1, %v14865_v42  ;;  %v6822_v45 = vsel %vm18914_vm2, %v6805_v20, %v14857_v60  ;;  %6667 = vrot.lane.b32.xlu0 %v5052_v36, %s11312_s27  ;;  %v5327_v36 = vrot.slane %v5313_v41, %v14071_v50  ;;  %vm18926_vm2 = vmmov %vm18925_vm8 }
 0x47e   : > { %v6857_v5 = vsel %vm6851_vm15, %v6840_v39, %v14887_v30  ;;  %v15059_v15 = vpop.permute.xlu1 %6217  ;;  %v3803_v30 = vadd.f32 %v15033_v12, %v3731_v6  ;;  %v6839_v53 = vsel %vm6834_vm14, %v6822_v45, %v14881_v28 }
 0x47f   : > { %v6874_v42 = vsel %vm6868_vm3, %v6857_v5, %v14952_v32  ;;  %v5207_v32 = vrot.slane %v4160_v13, %v14058_v40  ;;  %v6856_v29 = vsel %vm6851_vm15, %v6839_v53, %v14899_v7  ;;  %v15082_v47 = vpop.permute.xlu0 %6215  ;;  %v3801_v7 = vadd.f32 %v15062_v8, %v3729_v4 }
 0x480   : > { %v6891_v44 = vsel %vm6885_vm4, %v6874_v42, %v14906_v46  ;;  %6157 = vrot.lane.b32.xlu1 %v5101_v62, %s11313_s28  ;;  %v5320_v46 = vrot.slane %v5305_v54, %v14071_v50  ;;  %v6873_v28 = vsel %vm6868_vm3, %v6856_v29, %v14957_v59  ;;  %v18916_v59 = vld [vmem:[#allocation139_spill] sm:$0xff]  ;;  %v5214_v13 = vrot.slane %v5200_v9, %v14058_v40 }
 0x481   : > { %v6908_v60 = vsel %vm6902_vm5, %v6891_v44, %v14959_v23  ;;  %v6890_v23 = vsel %vm6885_vm4, %v6873_v28, %v14913_v63  ;;  %6155 = vrot.lane.b32.xlu0 %v5003_v25, %s11313_s28  ;;  %v3835_v35 = vadd.f32 %v3803_v30, %v18916_v59  ;;  %v5222_v51 = vrot.slane %v5207_v32, %v14071_v50 }
 0x482   : > { %v6925_v10 = vsel %vm6919_vm6, %v6908_v60, %v14968_v34  ;;  %v15090_v16 = vpop.permute.xlu1 %6281  ;;  %v6907_v34 = vsel %vm6902_vm5, %v6890_v23, %v14964_v52  ;;  %v5343_v31 = vcombine.high %v5320_v46, %v18807_v58  ;;  %v5215_v21 = vcombine.high %v5207_v32, %v18807_v58 }
 0x483   : > { %v6942_v56 = vsel %vm18326_vm0, %v6925_v10, %v6662_v24  ;;  %v6924_v24 = vsel %vm6919_vm6, %v6907_v34, %v14974_v33  ;;  %v15106_v63 = vpop.permute.xlu0 %6279  ;;  %v4161_v55 = vsel %vm18315_vm9, %v3835_v35, %v14244_v27  ;;  %v18917_v33 = vld [vmem:[#allocation129_spill] sm:$0xff]  ;;  %v5245_v39 = vcombine.high %v5222_v51, %v18807_v58 }
 0x484   : > { %6959 = vst.msk [vmem:[%s14628_s26 + $0xa] sm:$0x1] %vm18316_vm13, %v6942_v56  ;;  %6225 = vrot.lane.b32.xlu1 %v5320_v46, %s11298_s14  ;;  %v6941_v6 = vsel %vm18326_vm0, %v6924_v24, %v6660_v37  ;;  %v3833_v1 = vadd.f32 %v3801_v7, %v18917_v33  ;;  %v5312_v27 = vrot.slane %v5298_v38, %v14058_v40 }
 0x485   : > { %6958 = vst.msk [vmem:[%s14628_s26 + $0x8] sm:$0x1] %vm18316_vm13, %v6941_v6  ;;  %6223 = vrot.lane.b32.xlu0 %v5222_v51, %s11298_s14  ;;  %v5256_v62 = vrot.slane %v4161_v55, %v14058_v40  ;;  %v5229_v5 = vrot.slane %v5215_v21, %v14071_v50  ;;  %v5237_v4 = vrot.slane %v5214_v13, %v14071_v50 }
 0x486   : > { %v15112_v52 = vpop.permute.xlu1 %6345  ;;  %v4159_v61 = vsel %vm18315_vm9, %v3833_v1, %v14232_v18  ;;  %v5335_v18 = vrot.slane %v5312_v27, %v14071_v50  ;;  %v5249_v53 = vcombine.high %v4161_v55, %v18807_v58  ;;  %v5344_v6 = vcombine.high %v5327_v36, %v18807_v58 }
 0x487   : > { %v15124_v37 = vpop.permute.xlu0 %6343  ;;  %v5158_v20 = vrot.slane %v4159_v61, %v14058_v40  ;;  %v15142_v45 = vrot.slane %v5256_v62, %v14071_v50  ;;  %v5264_v32 = vcombine.high %v5256_v62, %v18807_v58  ;;  %v5151_v25 = vcombine.high %v4159_v61, %v18807_v58 }
 0x488   : > { %6289 = vrot.lane.b32.xlu1 %v5343_v31, %s11300_s15  ;;  %v5263_v56 = vrot.slane %v5249_v53, %v14058_v40  ;;  %v5246_v33 = vcombine.high %v5229_v5, %v18807_v58  ;;  %v5328_v1 = vcombine.high %v5312_v27, %v18807_v58  ;;  %v5345_v21 = vcombine.high %v5335_v18, %v18807_v58 }
 0x489   : > { %6287 = vrot.lane.b32.xlu0 %v5245_v39, %s11300_s15  ;;  %v15148_v30 = vrot.slane %v5158_v20, %v14071_v50  ;;  %v5294_v60 = vcombine.high %v15142_v45, %v18807_v58  ;;  %v5166_v46 = vcombine.high %v5158_v20, %v18807_v58  ;;  %v5278_v23 = vrot.slane %v5264_v32, %v14071_v50  ;;  %v18919_v32 = vld [vmem:[#allocation169_spill] sm:$0xff] }
 0x48a   : > { %v15131_v54 = vpop.permute.xlu1 %6473  ;;  %v5165_v34 = vrot.slane %v5151_v25, %v14058_v40  ;;  %v5286_v51 = vrot.slane %v5263_v56, %v14071_v50  ;;  %v5230_v39 = vcombine.high %v5214_v13, %v18807_v58  ;;  %v5342_v20 = vrot.slane %v5328_v1, %v14071_v50  ;;  %v18918_v13 = vld [vmem:[#allocation40_spill] sm:$0xff]  ;;  %v18921_v1 = vld [vmem:[#allocation167_spill] sm:$0xff] }
 0x48b   : > { %v15138_v42 = vpop.permute.xlu0 %6471  ;;  %v5196_v10 = vcombine.high %v15148_v30, %v18807_v58  ;;  %v5180_v59 = vrot.slane %v5166_v46, %v14071_v50  ;;  %v5295_v53 = vcombine.high %v5278_v23, %v18807_v58  ;;  %v5279_v46 = vcombine.high %v5263_v56, %v18807_v58 }
 0x48c   : > { %6353 = vrot.lane.b32.xlu1 %v5327_v36, %s11301_s16  ;;  %v5188_v38 = vrot.slane %v5165_v34, %v14071_v50  ;;  %v5247_v36 = vcombine.high %v5237_v4, %v18807_v58 }
 0x48d   : > { %6351 = vrot.lane.b32.xlu0 %v5229_v5, %s11301_s16  ;;  %v5244_v5 = vrot.slane %v5230_v39, %v14071_v50  ;;  %v5197_v25 = vcombine.high %v5180_v59, %v18807_v58  ;;  %v18922_v39 = vld [vmem:[#allocation48_spill] sm:$0xff] }
 0x48e   : > { %v5770_v17 = vpop.permute.xlu1 %5769 }
 0x48f   : > { %v15150_v44 = vpop.permute.xlu0 %5767 }
 0x490   : > { %6481 = vrot.lane.b32.xlu1 %v5335_v18, %s11302_s17 }
 0x491   : > { %6479 = vrot.lane.b32.xlu0 %v5237_v4, %s11302_s17  ;;  %v3736_v4 = vadd.f32 %v18919_v32, %v18918_v13  ;;  %v5181_v13 = vcombine.high %v5165_v34, %v18807_v58 }
 0x492   : > { %v5834_v29 = vpop.permute.xlu1 %5833 }
 0x493   : > { %v5832_v28 = vpop.permute.xlu0 %5831 }
 0x494   : > { %5777 = vrot.lane.b32.xlu1 %v5294_v60, %s11303_s18 }
 0x495   : > { %5775 = vrot.lane.b32.xlu0 %v5196_v10, %s11303_s18 }
 0x496   : > { %v5962_v7 = vpop.permute.xlu1 %5961 }
 0x497   : > { %v15168_v35 = vpop.permute.xlu0 %5959 }
 0x498   : > { %5841 = vrot.lane.b32.xlu1 %v5278_v23, %s11304_s19  ;;  %v18920_v23 = vld [vmem:[#allocation72_spill] sm:$0xff] }
 0x499   : > { %5839 = vrot.lane.b32.xlu0 %v5180_v59, %s11304_s19  ;;  %v18924_v59 = vld [vmem:[#allocation41_spill] sm:$0xff] }
 0x49a   : > { %v15171_v24 = vpop.permute.xlu1 %6409  ;;  %v3808_v56 = vadd.f32 %v18924_v59, %v3736_v4  ;;  %v18931_v59 = vld [vmem:[#allocation64_spill] sm:$0xff] }
 0x49b   : > { %v15176_v41 = vpop.permute.xlu0 %6407 }
 0x49c   : > { %5969 = vrot.lane.b32.xlu1 %v5286_v51, %s11305_s20 }
 0x49d   : > { %5967 = vrot.lane.b32.xlu0 %v5188_v38, %s11305_s20 }
 0x49e   : > { %v15178_v31 = vpop.permute.xlu1 %6537 }
 0x49f   : > { %v15183_v55 = vpop.permute.xlu0 %6535 }
 0x4a0   : > { %6417 = vrot.lane.b32.xlu1 %v5344_v6, %s11306_s21  ;;  %v5296_v6 = vcombine.high %v5286_v51, %v18807_v58 }
 0x4a1   : > { %6415 = vrot.lane.b32.xlu0 %v5246_v33, %s11306_s21  ;;  %v6706_v33 = vsel %vm556_vm1, %v14697_v49, %v5770_v17  ;;  %v5198_v49 = vcombine.high %v5188_v38, %v18807_v58  ;;  %v6705_v17 = vsel %vm556_vm1, %v14705_v43, %v15150_v44  ;;  %v18927_v38 = vld [vmem:[#allocation145_spill] sm:$0xff]  ;;  %v5195_v44 = vrot.slane %v5181_v13, %v14071_v50 }
 0x4a2   : > { %v15187_v9 = vpop.permute.xlu1 %6601 }
 0x4a3   : > { %v15193_v61 = vpop.permute.xlu0 %6599 }
 0x4a4   : > { %6545 = vrot.lane.b32.xlu1 %v5345_v21, %s11307_s22  ;;  %v3734_v21 = vadd.f32 %v18921_v1, %v18920_v23  ;;  %v5293_v23 = vrot.slane %v5279_v46, %v14071_v50  ;;  %v5346_v1 = vcombine.high %v5342_v20, %v18807_v58 }
 0x4a5   : > { %6543 = vrot.lane.b32.xlu0 %v5247_v36, %s11307_s22  ;;  %v15214_v36 = vmul.f32 0.0625, %v18922_v39  ;;  %v18929_v39 = vld [vmem:[#allocation124_spill] sm:$0xff] }
 0x4a6   : > { %v5898_v62 = vpop.permute.xlu1 %5897 }
 0x4a7   : > { %v5896_v27 = vpop.permute.xlu0 %5895  ;;  %18923 = vst [vmem:[#allocation95_spill] sm:$0xff] %v15214_v36  ;;  %v3806_v4 = vadd.f32 %v15214_v36, %v3734_v21 }
 0x4a8   : > { %6609 = vrot.lane.b32.xlu1 %v5342_v20, %s11308_s23 }
 0x4a9   : > { %6607 = vrot.lane.b32.xlu0 %v5244_v5, %s11308_s23 }
 0x4aa   : > { %v6026_v18 = vpop.permute.xlu1 %6025 }
 0x4ab   : > { %v6024_v60 = vpop.permute.xlu0 %6023 }
 0x4ac   : > { %5905 = vrot.lane.b32.xlu1 %v5295_v53, %s11309_s24  ;;  %v6723_v53 = vsel %vm18299_vm7, %v6706_v33, %v5834_v29  ;;  %v6722_v29 = vsel %vm18299_vm7, %v6705_v17, %v5832_v28  ;;  %v5248_v17 = vcombine.high %v5244_v5, %v18807_v58 }
 0x4ad   : > { %5903 = vrot.lane.b32.xlu0 %v5197_v25, %s11309_s24  ;;  %v6740_v51 = vsel %vm18925_vm8, %v6723_v53, %v5898_v62  ;;  %v6739_v34 = vsel %vm18926_vm2, %v6722_v29, %v5896_v27  ;;  %vm18928_vm8 = vcmask 195584   ;;  %v18930_v53 = vld [vmem:[#allocation141_spill] sm:$0xff]  ;;  %vm18933_vm2 = vcmask 261120  }
 0x4ae   : > { %v6090_v10 = vpop.permute.xlu1 %6089  ;;  %v6757_v62 = vsel %vm6749_vm10, %v6740_v51, %v5962_v7  ;;  %v6756_v7 = vsel %vm6749_vm10, %v6739_v34, %v15168_v35  ;;  %v5297_v29 = vcombine.high %v5293_v23, %v18807_v58 }
 0x4af   : > { %v6088_v32 = vpop.permute.xlu0 %6087  ;;  %v6774_v33 = vsel %vm6766_vm11, %v6757_v62, %v6026_v18  ;;  %v3838_v18 = vadd.f32 %v18930_v53, %v3806_v4  ;;  %v18934_v4 = vld [vmem:[#allocation111_spill] sm:$0xff]  ;;  %v5199_v53 = vcombine.high %v5195_v44, %v18807_v58 }
 0x4b0   : > { %6033 = vrot.lane.b32.xlu1 %v5296_v6, %s11310_s25  ;;  %v3840_v6 = vadd.f32 %v18927_v38, %v3808_v56  ;;  %v6791_v46 = vsel %vm18928_vm8, %v6774_v33, %v6090_v10  ;;  %v18932_v56 = vld [vmem:[#allocation170_spill] sm:$0xff]  ;;  %v6773_v10 = vsel %vm6766_vm11, %v6756_v7, %v6024_v60  ;;  %v18937_v33 = vld [vmem:[#allocation168_spill] sm:$0xff] }
 0x4b1   : > { %6031 = vrot.lane.b32.xlu0 %v5198_v49, %s11310_s25  ;;  %v3735_v13 = vadd.f32 %v18932_v56, %v18931_v59  ;;  %v6790_v51 = vsel %vm18928_vm8, %v6773_v10, %v6088_v32  ;;  %v4164_v34 = vsel %vm18315_vm9, %v3838_v18, %v18934_v4  ;;  %v18935_v32 = vld [vmem:[#allocation164_spill] sm:$0xff]  ;;  %vm18948_vm8 = vcmask 97280  }
 0x4b2   : > { %v6666_v25 = vpop.permute.xlu1 %6665  ;;  %v4166_v21 = vsel %vm18315_vm9, %v3840_v6, %v18929_v39  ;;  %v15264_v6 = vmul.f32 0.0625, %v18935_v32 }
 0x4b3   : > { %v6664_v43 = vpop.permute.xlu0 %6663  ;;  %v5501_v60 = vrot.slane %v4166_v21, %v14058_v40  ;;  %v5494_v10 = vcombine.high %v4166_v21, %v18807_v58  ;;  %v5396_v21 = vcombine.high %v4164_v34, %v18807_v58 }
 0x4b4   : > { %6097 = vrot.lane.b32.xlu1 %v5293_v23, %s18883_s12  ;;  %v18936_v23 = vld [vmem:[#allocation35_spill] sm:$0xff] }
 0x4b5   : > { %6095 = vrot.lane.b32.xlu0 %v5195_v44, %s18883_s12  ;;  %v5508_v32 = vrot.slane %v5494_v10, %v14058_v40 }
 0x4b6   : > { %v6154_v28 = vpop.permute.xlu1 %6153 }
 0x4b7   : > { %v6808_v27 = vsel %vm6800_vm12, %v6791_v46, %v6154_v28  ;;  %v6152_v49 = vpop.permute.xlu0 %6151  ;;  %v3733_v46 = vadd.f32 %v18937_v33, %v18936_v23  ;;  %v18938_v28 = vld [vmem:[#allocation51_spill] sm:$0xff] }
 0x4b8   : > { %v6825_v20 = vsel %vm18933_vm2, %v6808_v27, %v15059_v15  ;;  %6673 = vrot.lane.b32.xlu1 %v5346_v1, %s11312_s27  ;;  %v6807_v62 = vsel %vm6800_vm12, %v6790_v51, %v6152_v49  ;;  %v18940_v49 = vld [vmem:[#allocation28_spill] sm:$0xff] }
 0x4b9   : > { %v6842_v35 = vsel %vm6834_vm14, %v6825_v20, %v15090_v16  ;;  %v6824_v5 = vsel %vm18933_vm2, %v6807_v62, %v15082_v47  ;;  %6671 = vrot.lane.b32.xlu0 %v5248_v17, %s11312_s27  ;;  %v5509_v20 = vcombine.high %v5501_v60, %v18807_v58  ;;  %vm18950_vm2 = vmmov %vm18948_vm8 }
 0x4ba   : > { %v6859_v15 = vsel %vm6851_vm15, %v6842_v35, %v15112_v52  ;;  %v15261_v38 = vpop.permute.xlu1 %6221  ;;  %v3807_v52 = vadd.f32 %v18938_v28, %v3735_v13  ;;  %v6841_v39 = vsel %vm6834_vm14, %v6824_v5, %v15106_v63 }
 0x4bb   : > { %v6876_v16 = vsel %vm6868_vm3, %v6859_v15, %v15171_v24  ;;  %v5403_v24 = vrot.slane %v4164_v34, %v14058_v40  ;;  %v6858_v7 = vsel %vm6851_vm15, %v6841_v39, %v15124_v37  ;;  %v15284_v27 = vpop.permute.xlu0 %6219  ;;  %v3805_v37 = vadd.f32 %v15264_v6, %v3733_v46  ;;  %v18942_v15 = vld [vmem:[#allocation118_spill] sm:$0xff] }
 0x4bc   : > { %v6893_v1 = vsel %vm6885_vm4, %v6876_v16, %v15131_v54  ;;  %6161 = vrot.lane.b32.xlu1 %v5297_v29, %s11313_s28  ;;  %v5516_v54 = vrot.slane %v5501_v60, %v14071_v50  ;;  %v6875_v63 = vsel %vm6868_vm3, %v6858_v7, %v15176_v41  ;;  %v18939_v41 = vld [vmem:[#allocation147_spill] sm:$0xff]  ;;  %v5523_v16 = vrot.slane %v5509_v20, %v14071_v50 }
 0x4bd   : > { %v6910_v47 = vsel %vm6902_vm5, %v6893_v1, %v15178_v31  ;;  %v6892_v31 = vsel %vm6885_vm4, %v6875_v63, %v15138_v42  ;;  %6159 = vrot.lane.b32.xlu0 %v5199_v53, %s11313_s28  ;;  %v3839_v44 = vadd.f32 %v3807_v52, %v18939_v41  ;;  %v5418_v13 = vrot.slane %v5403_v24, %v14071_v50 }
 0x4be   : > { %v6927_v18 = vsel %vm6919_vm6, %v6910_v47, %v15187_v9  ;;  %v15292_v59 = vpop.permute.xlu1 %6285  ;;  %v6909_v9 = vsel %vm6902_vm5, %v6892_v31, %v15183_v55  ;;  %v5539_v51 = vcombine.high %v5516_v54, %v18807_v58  ;;  %v5411_v4 = vcombine.high %v5403_v24, %v18807_v58 }
 0x4bf   : > { %v6944_v56 = vsel %vm18326_vm0, %v6927_v18, %v6666_v25  ;;  %v6926_v25 = vsel %vm6919_vm6, %v6909_v9, %v15193_v61  ;;  %v15308_v42 = vpop.permute.xlu0 %6283  ;;  %v4165_v17 = vsel %vm18315_vm9, %v3839_v44, %v18940_v49  ;;  %v18941_v61 = vld [vmem:[#allocation142_spill] sm:$0xff]  ;;  %v5441_v60 = vcombine.high %v5418_v13, %v18807_v58 }
 0x4c0   : > { %6961 = vst.msk [vmem:[%s14628_s26 + $0xe] sm:$0x1] %vm18316_vm13, %v6944_v56  ;;  %6229 = vrot.lane.b32.xlu1 %v5516_v54, %s11298_s14  ;;  %v6943_v35 = vsel %vm18326_vm0, %v6926_v25, %v6664_v43  ;;  %v3837_v29 = vadd.f32 %v3805_v37, %v18941_v61  ;;  %v5452_v5 = vrot.slane %v4165_v17, %v14058_v40 }
 0x4c1   : > { %6960 = vst.msk [vmem:[%s14628_s26 + $0xc] sm:$0x1] %vm18316_vm13, %v6943_v35  ;;  %6227 = vrot.lane.b32.xlu0 %v5418_v13, %s11298_s14  ;;  %v5410_v34 = vrot.slane %v5396_v21, %v14058_v40  ;;  %v5425_v33 = vrot.slane %v5411_v4, %v14071_v50  ;;  %v5531_v52 = vrot.slane %v5508_v32, %v14071_v50 }
 0x4c2   : > { %v15314_v55 = vpop.permute.xlu1 %6349  ;;  %v4163_v62 = vsel %vm18315_vm9, %v3837_v29, %v18942_v15  ;;  %v15344_v1 = vrot.slane %v5452_v5, %v14071_v50  ;;  %v5445_v53 = vcombine.high %v4165_v17, %v18807_v58  ;;  %v5460_v54 = vcombine.high %v5452_v5, %v18807_v58 }
 0x4c3   : > { %v15326_v43 = vpop.permute.xlu0 %6347  ;;  %v5354_v46 = vrot.slane %v4163_v62, %v14058_v40  ;;  %v5433_v24 = vrot.slane %v5410_v34, %v14071_v50  ;;  %v5347_v56 = vcombine.high %v4163_v62, %v18807_v58  ;;  %v5540_v29 = vcombine.high %v5523_v16, %v18807_v58 }
 0x4c4   : > { %6293 = vrot.lane.b32.xlu1 %v5539_v51, %s11300_s15  ;;  %v5490_v18 = vcombine.high %v15344_v1, %v18807_v58  ;;  %v5459_v41 = vrot.slane %v5445_v53, %v14058_v40  ;;  %v5474_v44 = vrot.slane %v5460_v54, %v14071_v50  ;;  %v5442_v4 = vcombine.high %v5425_v33, %v18807_v58 }
 0x4c5   : > { %6291 = vrot.lane.b32.xlu0 %v5441_v60, %s11300_s15  ;;  %v15350_v47 = vrot.slane %v5354_v46, %v14071_v50  ;;  %v5362_v31 = vcombine.high %v5354_v46, %v18807_v58  ;;  %v5361_v25 = vrot.slane %v5347_v56, %v14058_v40  ;;  %v5524_v60 = vcombine.high %v5508_v32, %v18807_v58  ;;  %v18944_v56 = vld [vmem:[#allocation149_spill] sm:$0xff] }
 0x4c6   : > { %v15333_v23 = vpop.permute.xlu1 %6477  ;;  %v5482_v51 = vrot.slane %v5459_v41, %v14071_v50  ;;  %v5541_v62 = vcombine.high %v5531_v52, %v18807_v58  ;;  %v5443_v46 = vcombine.high %v5433_v24, %v18807_v58 }
 0x4c7   : > { %v15340_v28 = vpop.permute.xlu0 %6475  ;;  %v5392_v37 = vcombine.high %v15350_v47, %v18807_v58  ;;  %v5376_v10 = vrot.slane %v5362_v31, %v14071_v50  ;;  %v5384_v49 = vrot.slane %v5361_v25, %v14071_v50  ;;  %v5538_v54 = vrot.slane %v5524_v60, %v14071_v50 }
 0x4c8   : > { %6357 = vrot.lane.b32.xlu1 %v5523_v16, %s11301_s16  ;;  %v5426_v16 = vcombine.high %v5410_v34, %v18807_v58  ;;  %v18943_v34 = vld [vmem:[#allocation69_spill] sm:$0xff]  ;;  %v5492_v60 = vcombine.high %v5482_v51, %v18807_v58 }
 0x4c9   : > { %6355 = vrot.lane.b32.xlu0 %v5425_v33, %s11301_s16 }
 0x4ca   : > { %v5774_v39 = vpop.permute.xlu1 %5773  ;;  %v5440_v33 = vrot.slane %v5426_v16, %v14071_v50  ;;  %v18946_v16 = vld [vmem:[#allocation172_spill] sm:$0xff] }
 0x4cb   : > { %v15352_v7 = vpop.permute.xlu0 %5771 }
 0x4cc   : > { %6485 = vrot.lane.b32.xlu1 %v5531_v52, %s11302_s17 }
 0x4cd   : > { %6483 = vrot.lane.b32.xlu0 %v5433_v24, %s11302_s17  ;;  %v3740_v24 = vadd.f32 %v18944_v56, %v18943_v34  ;;  %v18947_v34 = vld [vmem:[#allocation61_spill] sm:$0xff] }
 0x4ce   : > { %v5838_v63 = vpop.permute.xlu1 %5837 }
 0x4cf   : > { %v5836_v9 = vpop.permute.xlu0 %5835  ;;  %v3812_v56 = vadd.f32 %v18947_v34, %v3740_v24  ;;  %v18954_v34 = vld [vmem:[#allocation77_spill] sm:$0xff] }
 0x4d0   : > { %5781 = vrot.lane.b32.xlu1 %v5490_v18, %s11303_s18  ;;  %v5491_v18 = vcombine.high %v5474_v44, %v18807_v58 }
 0x4d1   : > { %5779 = vrot.lane.b32.xlu0 %v5392_v37, %s11303_s18  ;;  %v5393_v37 = vcombine.high %v5376_v10, %v18807_v58 }
 0x4d2   : > { %v5966_v13 = vpop.permute.xlu1 %5965 }
 0x4d3   : > { %v15370_v20 = vpop.permute.xlu0 %5963 }
 0x4d4   : > { %5845 = vrot.lane.b32.xlu1 %v5474_v44, %s11304_s19  ;;  %v6708_v44 = vsel %vm556_vm1, %v14917_v22, %v5774_v39 }
 0x4d5   : > { %5843 = vrot.lane.b32.xlu0 %v5376_v10, %s11304_s19  ;;  %v5377_v10 = vcombine.high %v5361_v25, %v18807_v58 }
 0x4d6   : > { %v15373_v35 = vpop.permute.xlu1 %6413 }
 0x4d7   : > { %v15378_v17 = vpop.permute.xlu0 %6411 }
 0x4d8   : > { %5973 = vrot.lane.b32.xlu1 %v5482_v51, %s11305_s20  ;;  %v5394_v51 = vcombine.high %v5384_v49, %v18807_v58 }
 0x4d9   : > { %5971 = vrot.lane.b32.xlu0 %v5384_v49, %s11305_s20  ;;  %v18951_v49 = vld [vmem:[#allocation7_spill] sm:$0xff] }
 0x4da   : > { %v15380_v61 = vpop.permute.xlu1 %6541  ;;  %v3844_v24 = vadd.f32 %v18951_v49, %v3812_v56  ;;  %v18955_v56 = vld [vmem:[#allocation148_spill] sm:$0xff] }
 0x4db   : > { %v15385_v21 = vpop.permute.xlu0 %6539 }
 0x4dc   : > { %6421 = vrot.lane.b32.xlu1 %v5540_v29, %s11306_s21  ;;  %v5475_v29 = vcombine.high %v5459_v41, %v18807_v58 }
 0x4dd   : > { %6419 = vrot.lane.b32.xlu0 %v5442_v4, %s11306_s21 }
 0x4de   : > { %v15389_v15 = vpop.permute.xlu1 %6605  ;;  %v5489_v39 = vrot.slane %v5475_v29, %v14071_v50 }
 0x4df   : > { %v15395_v5 = vpop.permute.xlu0 %6603 }
 0x4e0   : > { %6549 = vrot.lane.b32.xlu1 %v5541_v62, %s11307_s22  ;;  %v18945_v62 = vld [vmem:[#allocation135_spill] sm:$0xff]  ;;  %v5493_v49 = vcombine.high %v5489_v39, %v18807_v58 }
 0x4e1   : > { %6547 = vrot.lane.b32.xlu0 %v5443_v46, %s11307_s22  ;;  %v3738_v46 = vadd.f32 %v18946_v16, %v18945_v62  ;;  %v6707_v62 = vsel %vm556_vm1, %v14925_v14, %v15352_v7  ;;  %v5391_v7 = vrot.slane %v5377_v10, %v14071_v50 }
 0x4e2   : > { %v5902_v53 = vpop.permute.xlu1 %5901 }
 0x4e3   : > { %v5900_v32 = vpop.permute.xlu0 %5899 }
 0x4e4   : > { %6613 = vrot.lane.b32.xlu1 %v5538_v54, %s11308_s23 }
 0x4e5   : > { %6611 = vrot.lane.b32.xlu0 %v5440_v33, %s11308_s23 }
 0x4e6   : > { %v6030_v52 = vpop.permute.xlu1 %6029 }
 0x4e7   : > { %v6028_v31 = vpop.permute.xlu0 %6027 }
 0x4e8   : > { %5909 = vrot.lane.b32.xlu1 %v5491_v18, %s11309_s24  ;;  %v6725_v18 = vsel %vm18299_vm7, %v6708_v44, %v5838_v63  ;;  %v18953_v44 = vld [vmem:[#allocation153_spill] sm:$0xff] }
 0x4e9   : > { %5907 = vrot.lane.b32.xlu0 %v5393_v37, %s11309_s24  ;;  %v6742_v41 = vsel %vm18948_vm8, %v6725_v18, %v5902_v53  ;;  %v18949_v37 = vld [vmem:[#allocation44_spill] sm:$0xff]  ;;  %vm18952_vm8 = vcmask 195584  }
 0x4ea   : > { %v6094_v4 = vpop.permute.xlu1 %6093  ;;  %v3810_v63 = vadd.f32 %v18949_v37, %v3738_v46  ;;  %v6759_v53 = vsel %vm6749_vm10, %v6742_v41, %v5966_v13  ;;  %v18956_v41 = vld [vmem:[#allocation151_spill] sm:$0xff] }
 0x4eb   : > { %v6092_v36 = vpop.permute.xlu0 %6091  ;;  %v6776_v16 = vsel %vm6766_vm11, %v6759_v53, %v6030_v52  ;;  %v3739_v10 = vadd.f32 %v18956_v41, %v18955_v56 }
 0x4ec   : > { %6037 = vrot.lane.b32.xlu1 %v5492_v60, %s11310_s25  ;;  %v6724_v60 = vsel %vm18299_vm7, %v6707_v62, %v5836_v9  ;;  %v6793_v29 = vsel %vm18952_vm8, %v6776_v16, %v6094_v4  ;;  %v5542_v9 = vcombine.high %v5538_v54, %v18807_v58  ;;  %v3842_v18 = vadd.f32 %v18953_v44, %v3810_v63 }
 0x4ed   : > { %6035 = vrot.lane.b32.xlu0 %v5394_v51, %s11310_s25  ;;  %v6741_v25 = vsel %vm18950_vm2, %v6724_v60, %v5900_v32  ;;  %v4170_v32 = vsel %vm18315_vm9, %v3844_v24, %v18954_v34  ;;  %vm18957_vm2 = vcmask 261120   ;;  %v18958_v51 = vld [vmem:[#allocation14_spill] sm:$0xff]  ;;  %v5444_v60 = vcombine.high %v5440_v33, %v18807_v58  ;;  %v18959_v33 = vld [vmem:[#allocation43_spill] sm:$0xff]  ;;  %v18960_v24 = vld [vmem:[#allocation173_spill] sm:$0xff] }
 0x4ee   : > { %v6670_v22 = vpop.permute.xlu1 %6669  ;;  %v6758_v13 = vsel %vm6749_vm10, %v6741_v25, %v15370_v20  ;;  %v4168_v62 = vsel %vm18315_vm9, %v3842_v18, %v18958_v51  ;;  %v5697_v25 = vrot.slane %v4170_v32, %v14058_v40  ;;  %v3737_v16 = vadd.f32 %v18960_v24, %v18959_v33 }
 0x4ef   : > { %v6668_v14 = vpop.permute.xlu0 %6667  ;;  %v6775_v4 = vsel %vm6766_vm11, %v6758_v13, %v6028_v31  ;;  %v5395_v18 = vcombine.high %v5391_v7, %v18807_v58 }
 0x4f0   : > { %6101 = vrot.lane.b32.xlu1 %v5489_v39, %s18883_s12  ;;  %v6792_v37 = vsel %vm18952_vm8, %v6775_v4, %v6092_v36  ;;  %v5705_v4 = vcombine.high %v5697_v25, %v18807_v58  ;;  %vm18969_vm8 = vcmask 97280  }
 0x4f1   : > { %6099 = vrot.lane.b32.xlu0 %v5391_v7, %s18883_s12 }
 0x4f2   : > { %v6158_v46 = vpop.permute.xlu1 %6157 }
 0x4f3   : > { %v6810_v52 = vsel %vm6800_vm12, %v6793_v29, %v6158_v46  ;;  %v6156_v63 = vpop.permute.xlu0 %6155  ;;  %v18961_v29 = vld [vmem:[#allocation76_spill] sm:$0xff] }
 0x4f4   : > { %v6827_v54 = vsel %vm18957_vm2, %v6810_v52, %v15261_v38  ;;  %6677 = vrot.lane.b32.xlu1 %v5542_v9, %s11312_s27  ;;  %v6809_v38 = vsel %vm6800_vm12, %v6792_v37, %v6156_v63  ;;  %v3811_v46 = vadd.f32 %v18961_v29, %v3739_v10  ;;  %v5690_v10 = vcombine.high %v4170_v32, %v18807_v58  ;;  %v18964_v37 = vld [vmem:[#allocation15_spill] sm:$0xff] }
 0x4f5   : > { %v6844_v20 = vsel %vm6834_vm14, %v6827_v54, %v15292_v59  ;;  %v6826_v59 = vsel %vm18957_vm2, %v6809_v38, %v15284_v27  ;;  %6675 = vrot.lane.b32.xlu0 %v5444_v60, %s11312_s27  ;;  %v5592_v32 = vcombine.high %v4168_v62, %v18807_v58  ;;  %vm18970_vm2 = vmmov %vm18969_vm8 }
 0x4f6   : > { %v6861_v31 = vsel %vm6851_vm15, %v6844_v20, %v15314_v55  ;;  %v15459_v53 = vpop.permute.xlu1 %6225  ;;  %v6843_v39 = vsel %vm6834_vm14, %v6826_v59, %v15308_v42 }
 0x4f7   : > { %v6878_v36 = vsel %vm6868_vm3, %v6861_v31, %v15373_v35  ;;  %v5599_v35 = vrot.slane %v4168_v62, %v14058_v40  ;;  %v6860_v9 = vsel %vm6851_vm15, %v6843_v39, %v15326_v43  ;;  %v15480_v44 = vpop.permute.xlu0 %6223  ;;  %v18962_v43 = vld [vmem:[#allocation45_spill] sm:$0xff]  ;;  %v18966_v31 = vld [vmem:[#allocation62_spill] sm:$0xff]  ;;  %v5606_v62 = vrot.slane %v5592_v32, %v14058_v40 }
 0x4f8   : > { %v6895_v55 = vsel %vm6885_vm4, %v6878_v36, %v15333_v23  ;;  %6165 = vrot.lane.b32.xlu1 %v5493_v49, %s11313_s28  ;;  %v5712_v23 = vrot.slane %v5697_v25, %v14071_v50  ;;  %v6877_v42 = vsel %vm6868_vm3, %v6860_v9, %v15378_v17  ;;  %v3809_v7 = vadd.f32 %v18962_v43, %v3737_v16  ;;  %v18963_v17 = vld [vmem:[#allocation6_spill] sm:$0xff] }
 0x4f9   : > { %v6912_v27 = vsel %vm6902_vm5, %v6895_v55, %v15380_v61  ;;  %v6894_v61 = vsel %vm6885_vm4, %v6877_v42, %v15340_v28  ;;  %6163 = vrot.lane.b32.xlu0 %v5395_v18, %s11313_s28  ;;  %v3843_v56 = vadd.f32 %v3811_v46, %v18963_v17  ;;  %v5614_v41 = vrot.slane %v5599_v35, %v14071_v50 }
 0x4fa   : > { %v6929_v34 = vsel %vm6919_vm6, %v6912_v27, %v15389_v15  ;;  %v15488_v13 = vpop.permute.xlu1 %6289  ;;  %v6911_v15 = vsel %vm6902_vm5, %v6894_v61, %v15385_v21  ;;  %v5735_v54 = vcombine.high %v5712_v23, %v18807_v58  ;;  %v5607_v60 = vcombine.high %v5599_v35, %v18807_v58 }
 0x4fb   : > { %v6946_v52 = vsel %vm18326_vm0, %v6929_v34, %v6670_v22  ;;  %v6928_v22 = vsel %vm6919_vm6, %v6911_v15, %v15395_v5  ;;  %v15504_v28 = vpop.permute.xlu0 %6287  ;;  %v4169_v20 = vsel %vm18315_vm9, %v3843_v56, %v18964_v37  ;;  %v18965_v5 = vld [vmem:[#allocation52_spill] sm:$0xff]  ;;  %v5637_v25 = vcombine.high %v5614_v41, %v18807_v58 }
 0x4fc   : > { %6963 = vst.msk [vmem:[%s14628_s26 + $0x12] sm:$0x1] %vm18316_vm13, %v6946_v52  ;;  %6233 = vrot.lane.b32.xlu1 %v5712_v23, %s11298_s14  ;;  %v6945_v51 = vsel %vm18326_vm0, %v6928_v22, %v6668_v14  ;;  %v3841_v63 = vadd.f32 %v3809_v7, %v18965_v5  ;;  %v5704_v49 = vrot.slane %v5690_v10, %v14058_v40  ;;  %v18968_v5 = vld [vmem:[#allocation83_spill] sm:$0xff] }
 0x4fd   : > { %6962 = vst.msk [vmem:[%s14628_s26 + $0x10] sm:$0x1] %vm18316_vm13, %v6945_v51  ;;  %6231 = vrot.lane.b32.xlu0 %v5614_v41, %s11298_s14  ;;  %v5719_v36 = vrot.slane %v5705_v4, %v14071_v50  ;;  %v5648_v59 = vrot.slane %v4169_v20, %v14058_v40  ;;  %v5621_v24 = vrot.slane %v5607_v60, %v14071_v50 }
 0x4fe   : > { %v15510_v21 = vpop.permute.xlu1 %6353  ;;  %v4167_v38 = vsel %vm18315_vm9, %v3841_v63, %v18966_v31  ;;  %v5727_v46 = vrot.slane %v5704_v49, %v14071_v50  ;;  %v5629_v35 = vrot.slane %v5606_v62, %v14071_v50  ;;  %v5641_v18 = vcombine.high %v4169_v20, %v18807_v58 }
 0x4ff   : > { %v15522_v14 = vpop.permute.xlu0 %6351  ;;  %v5550_v16 = vrot.slane %v4167_v38, %v14058_v40  ;;  %v15540_v55 = vrot.slane %v5648_v59, %v14071_v50  ;;  %v5656_v23 = vcombine.high %v5648_v59, %v18807_v58  ;;  %v5543_v52 = vcombine.high %v4167_v38, %v18807_v58 }
 0x500   : > { %6297 = vrot.lane.b32.xlu1 %v5735_v54, %s11300_s15  ;;  %v5655_v15 = vrot.slane %v5641_v18, %v14058_v40  ;;  %v5638_v32 = vcombine.high %v5621_v24, %v18807_v58  ;;  %v5622_v31 = vcombine.high %v5606_v62, %v18807_v58  ;;  %v5639_v59 = vcombine.high %v5629_v35, %v18807_v58 }
 0x501   : > { %6295 = vrot.lane.b32.xlu0 %v5637_v25, %s11300_s15  ;;  %v15546_v27 = vrot.slane %v5550_v16, %v14071_v50  ;;  %v5686_v34 = vcombine.high %v15540_v55, %v18807_v58  ;;  %v5558_v61 = vcombine.high %v5550_v16, %v18807_v58  ;;  %v5670_v17 = vrot.slane %v5656_v23, %v14071_v50 }
 0x502   : > { %v15529_v33 = vpop.permute.xlu1 %6481  ;;  %v5557_v41 = vrot.slane %v5543_v52, %v14058_v40  ;;  %v5678_v4 = vrot.slane %v5655_v15, %v14071_v50  ;;  %v5736_v25 = vcombine.high %v5719_v36, %v18807_v58  ;;  %v5720_v16 = vcombine.high %v5704_v49, %v18807_v58 }
 0x503   : > { %v15536_v29 = vpop.permute.xlu0 %6479  ;;  %v5588_v43 = vcombine.high %v15546_v27, %v18807_v58  ;;  %v5572_v22 = vrot.slane %v5558_v61, %v14071_v50  ;;  %v5737_v23 = vcombine.high %v5727_v46, %v18807_v58 }
 0x504   : > { %6361 = vrot.lane.b32.xlu1 %v5719_v36, %s11301_s16  ;;  %v5580_v51 = vrot.slane %v5557_v41, %v14071_v50  ;;  %v5734_v52 = vrot.slane %v5720_v16, %v14071_v50 }
 0x505   : > { %6359 = vrot.lane.b32.xlu0 %v5621_v24, %s11301_s16  ;;  %v5636_v24 = vrot.slane %v5622_v31, %v14071_v50  ;;  %v5589_v49 = vcombine.high %v5572_v22, %v18807_v58 }
 0x506   : > { %v5778_v39 = vpop.permute.xlu1 %5777  ;;  %v5590_v31 = vcombine.high %v5580_v51, %v18807_v58 }
 0x507   : > { %v5776_v9 = vpop.permute.xlu0 %5775  ;;  %v6710_v61 = vsel %vm556_vm1, %v15142_v45, %v5778_v39  ;;  %v5688_v45 = vcombine.high %v5678_v4, %v18807_v58 }
 0x508   : > { %6489 = vrot.lane.b32.xlu1 %v5727_v46, %s11302_s17  ;;  %v5687_v46 = vcombine.high %v5670_v17, %v18807_v58 }
 0x509   : > { %6487 = vrot.lane.b32.xlu0 %v5629_v35, %s11302_s17 }
 0x50a   : > { %v5842_v42 = vpop.permute.xlu1 %5841 }
 0x50b   : > { %v5840_v7 = vpop.permute.xlu0 %5839 }
 0x50c   : > { %5785 = vrot.lane.b32.xlu1 %v5686_v34, %s11303_s18 }
 0x50d   : > { %5783 = vrot.lane.b32.xlu0 %v5588_v43, %s11303_s18  ;;  %v6727_v43 = vsel %vm18299_vm7, %v6710_v61, %v5842_v42 }
 0x50e   : > { %v5970_v56 = vpop.permute.xlu1 %5969 }
 0x50f   : > { %v5968_v10 = vpop.permute.xlu0 %5967 }
 0x510   : > { %5849 = vrot.lane.b32.xlu1 %v5670_v17, %s11304_s19  ;;  %v6709_v17 = vsel %vm556_vm1, %v15148_v30, %v5776_v9 }
 0x511   : > { %5847 = vrot.lane.b32.xlu0 %v5572_v22, %s11304_s19  ;;  %v5671_v22 = vcombine.high %v5655_v15, %v18807_v58  ;;  %v6726_v39 = vsel %vm18299_vm7, %v6709_v17, %v5840_v7  ;;  %v18976_v17 = vld [vmem:[#allocation94_spill] sm:$0xff] }
 0x512   : > { %v15565_v54 = vpop.permute.xlu1 %6417 }
 0x513   : > { %v15570_v37 = vpop.permute.xlu0 %6415 }
 0x514   : > { %5977 = vrot.lane.b32.xlu1 %v5678_v4, %s11305_s20  ;;  %v5685_v4 = vrot.slane %v5671_v22, %v14071_v50 }
 0x515   : > { %5975 = vrot.lane.b32.xlu0 %v5580_v51, %s11305_s20 }
 0x516   : > { %v15572_v20 = vpop.permute.xlu1 %6545 }
 0x517   : > { %v15577_v63 = vpop.permute.xlu0 %6543 }
 0x518   : > { %7298 = vrot.lane.b32.xlu1 %v18968_v5, %s18967_s29  ;;  %v5573_v5 = vcombine.high %v5557_v41, %v18807_v58 }
 0x519   : > { %6423 = vrot.lane.b32.xlu0 %v5638_v32, %s11306_s21 }
 0x51a   : > { %v15580_v60 = vpop.permute.xlu1 %6609  ;;  %v5587_v15 = vrot.slane %v5573_v5, %v14071_v50 }
 0x51b   : > { %v15586_v38 = vpop.permute.xlu0 %6607 }
 0x51c   : > { %6425 = vrot.lane.b32.xlu1 %v5736_v25, %s11306_s21 }
 0x51d   : > { %6551 = vrot.lane.b32.xlu0 %v5639_v59, %s11307_s22 }
 0x51e   : > { %v5906_v18 = vpop.permute.xlu1 %5905 }
 0x51f   : > { %v5904_v36 = vpop.permute.xlu0 %5903  ;;  %v6744_v32 = vsel %vm18969_vm8, %v6727_v43, %v5906_v18  ;;  %vm18971_vm8 = vcmask 195584  }
 0x520   : > { %6553 = vrot.lane.b32.xlu1 %v5737_v23, %s11307_s22  ;;  %v6743_v42 = vsel %vm18970_vm2, %v6726_v39, %v5904_v36  ;;  %v6761_v41 = vsel %vm6749_vm10, %v6744_v32, %v5970_v56  ;;  %vm18972_vm2 = vcmask 261120   ;;  %vm18973_vm7 = vmmov %vm18971_vm8  ;;  %v5689_v32 = vcombine.high %v5685_v4, %v18807_v58 }
 0x521   : > { %6615 = vrot.lane.b32.xlu0 %v5636_v24, %s11308_s23  ;;  %v6760_v7 = vsel %vm6749_vm10, %v6743_v42, %v5968_v10  ;;  %v18979_v42 = vld [vmem:[#allocation8_spill] sm:$0xff] }
 0x522   : > { %v6034_v34 = vpop.permute.xlu1 %6033 }
 0x523   : > { %v6032_v62 = vpop.permute.xlu0 %6031  ;;  %v6778_v51 = vsel %vm6766_vm11, %v6761_v41, %v6034_v34  ;;  %v18980_v41 = vld [vmem:[#allocation110_spill] sm:$0xff] }
 0x524   : > { %6617 = vrot.lane.b32.xlu1 %v5734_v52, %s11308_s23  ;;  %v6777_v56 = vsel %vm6766_vm11, %v6760_v7, %v6032_v62  ;;  %v5738_v62 = vcombine.high %v5734_v52, %v18807_v58  ;;  %v18983_v7 = vld [vmem:[#allocation121_spill] sm:$0xff] }
 0x525   : > { %5911 = vrot.lane.b32.xlu0 %v5589_v49, %s11309_s24 }
 0x526   : > { %v6098_v35 = vpop.permute.xlu1 %6097 }
 0x527   : > { %v6096_v25 = vpop.permute.xlu0 %6095  ;;  %v6795_v30 = vsel %vm18971_vm8, %v6778_v51, %v6098_v35  ;;  %v5640_v35 = vcombine.high %v5636_v24, %v18807_v58  ;;  %vm19020_vm8 = vcmask 64512  }
 0x528   : > { %5913 = vrot.lane.b32.xlu1 %v5687_v46, %s11309_s24  ;;  %v6794_v36 = vsel %vm18973_vm7, %v6777_v56, %v6096_v25  ;;  %vm18974_vm7 = vmmov %vm18972_vm2 }
 0x529   : > { %6039 = vrot.lane.b32.xlu0 %v5590_v31, %s11310_s25 }
 0x52a   : > { %v6674_v59 = vpop.permute.xlu1 %6673 }
 0x52b   : > { %v6672_v16 = vpop.permute.xlu0 %6671 }
 0x52c   : > { %6041 = vrot.lane.b32.xlu1 %v5688_v45, %s11310_s25  ;;  %v18977_v45 = vld [vmem:[#allocation63_spill] sm:$0xff] }
 0x52d   : > { %6103 = vrot.lane.b32.xlu0 %v5587_v15, %s18883_s12 }
 0x52e   : > { %v6162_v9 = vpop.permute.xlu1 %6161 }
 0x52f   : > { %v6812_v18 = vsel %vm6800_vm12, %v6795_v30, %v6162_v9  ;;  %v6160_v49 = vpop.permute.xlu0 %6159 }
 0x530   : > { %v6829_v23 = vsel %vm18972_vm2, %v6812_v18, %v15459_v53  ;;  %6105 = vrot.lane.b32.xlu1 %v5685_v4, %s18883_s12  ;;  %v6811_v46 = vsel %vm6800_vm12, %v6794_v36, %v6160_v49  ;;  %v18984_v18 = vld [vmem:[#allocation97_spill] sm:$0xff]  ;;  %v18986_v36 = vld [vmem:[#allocation115_spill] sm:$0xff]  ;;  %vm19021_vm2 = vcmask 97280  }
 0x531   : > { %v6846_v34 = vsel %vm6834_vm14, %v6829_v23, %v15488_v13  ;;  %v6828_v43 = vsel %vm18974_vm7, %v6811_v46, %v15480_v44  ;;  %6679 = vrot.lane.b32.xlu0 %v5640_v35, %s11312_s27  ;;  %v5591_v44 = vcombine.high %v5587_v15, %v18807_v58  ;;  %v18982_v15 = vld [vmem:[#allocation12_spill] sm:$0xff]  ;;  %v15712_v56 = vsel %vm18315_vm9, %v18984_v18, %v18983_v7  ;;  %v18985_v23 = vld [vmem:[#allocation11_spill] sm:$0xff]  ;;  %v18989_v46 = vld [vmem:[#allocation54_spill] sm:$0xff] }
 0x532   : > { %v6863_v10 = vsel %vm6851_vm15, %v6846_v34, %v15510_v21  ;;  %v15634_v61 = vpop.permute.xlu1 %6229  ;;  %v6845_v21 = vsel %vm6834_vm14, %v6828_v43, %v15504_v28  ;;  %v19002_v7 = vld [vmem:[#allocation106_spill] sm:$0xff]  ;;  %vm19022_vm7 = vmmov %vm19020_vm8 }
 0x533   : > { %v6880_v53 = vsel %vm6868_vm3, %v6863_v10, %v15565_v54  ;;  %v6862_v54 = vsel %vm6851_vm15, %v6845_v21, %v15522_v14  ;;  %v15651_v52 = vpop.permute.xlu0 %6227  ;;  %v18988_v10 = vld [vmem:[#allocation152_spill] sm:$0xff] }
 0x534   : > { %v6897_v13 = vsel %vm6885_vm4, %v6880_v53, %v15529_v33  ;;  %6681 = vrot.lane.b32.xlu1 %v5738_v62, %s11312_s27  ;;  %v6879_v33 = vsel %vm6868_vm3, %v6862_v54, %v15570_v37  ;;  %v15731_v62 = vsel %vm18315_vm9, %v18989_v46, %v18988_v10  ;;  %v15735_v53 = vrot.slane %v15712_v56, %v14058_v40  ;;  %v18992_v54 = vld [vmem:[#allocation114_spill] sm:$0xff]  ;;  %v19004_v10 = vld [vmem:[#allocation160_spill] sm:$0xff] }
 0x535   : > { %v6914_v24 = vsel %vm6902_vm5, %v6897_v13, %v15572_v20  ;;  %v6896_v14 = vsel %vm6885_vm4, %v6879_v33, %v15536_v29  ;;  %6167 = vrot.lane.b32.xlu0 %v5591_v44, %s11313_s28  ;;  %v18975_v29 = vld [vmem:[#allocation85_spill] sm:$0xff] }
 0x536   : > { %v6931_v5 = vsel %vm6919_vm6, %v6914_v24, %v15580_v60  ;;  %v15658_v28 = vpop.permute.xlu1 %6293  ;;  %v6913_v25 = vsel %vm6902_vm5, %v6896_v14, %v15577_v63  ;;  %v18990_v13 = vld [vmem:[#allocation9_spill] sm:$0xff]  ;;  %v18991_v24 = vld [vmem:[#allocation78_spill] sm:$0xff] }
 0x537   : > { %v6948_v20 = vsel %vm18326_vm0, %v6931_v5, %v6674_v59  ;;  %v6930_v37 = vsel %vm6919_vm6, %v6913_v25, %v15586_v38  ;;  %v15672_v60 = vpop.permute.xlu0 %6291  ;;  %v18978_v38 = vld [vmem:[#allocation36_spill] sm:$0xff]  ;;  %v7024_v21 = vadd.f32 %v18990_v13, %v14798_v0  ;;  %v15744_v44 = vsel %vm18315_vm9, %v18992_v54, %v18991_v24  ;;  %v18993_v5 = vld [vmem:[#allocation123_spill] sm:$0xff]  ;;  %v18994_v33 = vld [vmem:[#allocation5_spill] sm:$0xff] }
 0x538   : > { %6965 = vst.msk [vmem:[%s14628_s26 + $0x16] sm:$0x1] %vm18316_vm13, %v6948_v20  ;;  %6169 = vrot.lane.b32.xlu1 %v5689_v32, %s11313_s28  ;;  %v6947_v31 = vsel %vm18326_vm0, %v6930_v37, %v6672_v16  ;;  %v15690_v39 = vsel %vm18315_vm9, %v18978_v38, %v18977_v45  ;;  %v18981_v16 = vld [vmem:[#allocation18_spill] sm:$0xff]  ;;  %v7022_v32 = vadd.f32 %v18994_v33, %v14811_v19  ;;  %v19007_v54 = vld [vmem:[#allocation21_spill] sm:$0xff] }
 0x539   : > { %6964 = vst.msk [vmem:[%s14628_s26 + $0x14] sm:$0x1] %vm18316_vm13, %v6947_v31  ;;  %7296 = vrot.lane.b32.xlu0 %v18975_v29, %s18967_s29  ;;  %v15701_v30 = vsel %vm18315_vm9, %v18982_v15, %v18981_v16  ;;  %v15705_v9 = vrot.slane %v15690_v39, %v14058_v40  ;;  %v18995_v20 = vld [vmem:[#allocation98_spill] sm:$0xff]  ;;  %v15758_v0 = vrot.slane %v15731_v62, %v14058_v40  ;;  %v18999_v29 = vld [vmem:[#allocation47_spill] sm:$0xff]  ;;  %v19001_v16 = vld [vmem:[#allocation144_spill] sm:$0xff] }
 0x53a   : > { %v15675_v22 = vpop.permute.xlu1 %6357  ;;  %v15720_v34 = vrot.slane %v15701_v30, %v14058_v40  ;;  %v15766_v31 = vrot.slane %v15735_v53, %v14071_v50  ;;  %v18998_v19 = vld [vmem:[#allocation86_spill] sm:$0xff]  ;;  %v15775_v45 = vrot.slane %v15744_v44, %v14058_v40  ;;  %v7066_v18 = vadd.f32 %v7022_v32, %v15062_v8 }
 0x53b   : > { %v15683_v63 = vpop.permute.xlu0 %6355  ;;  %v15726_v35 = vrot.slane %v15705_v9, %v14071_v50  ;;  %v15796_v13 = vrot.slane %v15758_v0, %v14071_v50 }
 0x53c   : > { %7302 = vrot.lane.b32.xlu1 %v18976_v17, %s18967_s29  ;;  %v15754_v14 = vrot.slane %v15720_v34, %v14071_v50  ;;  %18997 = vst [vmem:[#allocation81_spill] sm:$0xff] %v15766_v31  ;;  %v15771_v17 = vsel %vm18315_vm9, %v18999_v29, %v18998_v19  ;;  %v15808_v8 = vrot.slane %v15775_v45, %v14071_v50  ;;  %v19010_v29 = vld [vmem:[#allocation157_spill] sm:$0xff] }
 0x53d   : > { %7300 = vrot.lane.b32.xlu0 %v18979_v42, %s18967_s29  ;;  %18987 = vst [vmem:[#allocation101_spill] sm:$0xff] %v15726_v35  ;;  %v7523_v37 = vcombine.high %v15726_v35, %v18807_v58  ;;  %v7068_v42 = vadd.f32 %v7024_v21, %v15033_v12  ;;  %19005 = vst [vmem:[#allocation68_spill] sm:$0xff] %v15796_v13  ;;  %v15800_v21 = vrot.slane %v15771_v17, %v14058_v40 }
 0x53e   : > { %v15685_v59 = vpop.permute.xlu1 %6485  ;;  %18996 = vst [vmem:[#allocation17_spill] sm:$0xff] %v15754_v14  ;;  %v7425_v12 = vcombine.high %v15754_v14, %v18807_v58  ;;  %19006 = vst [vmem:[#allocation73_spill] sm:$0xff] %v15808_v8 }
 0x53f   : > { %v15696_v51 = vpop.permute.xlu0 %6483  ;;  %v7100_v46 = vadd.f32 %v7068_v42, %v19004_v10  ;;  %v7098_v42 = vadd.f32 %v7066_v18, %v19010_v29  ;;  %v7915_v18 = vcombine.high %v15808_v8, %v18807_v58 }
 0x540   : > { %7306 = vrot.lane.b32.xlu1 %v18980_v41, %s18967_s29  ;;  %v19000_v41 = vld [vmem:[#allocation10_spill] sm:$0xff] }
 0x541   : > { %7304 = vrot.lane.b32.xlu0 %v18985_v23, %s18967_s29  ;;  %v15783_v15 = vsel %vm18315_vm9, %v19001_v16, %v19000_v41  ;;  %v19003_v23 = vld [vmem:[#allocation116_spill] sm:$0xff]  ;;  %v7621_v16 = vcombine.high %v15796_v13, %v18807_v58 }
 0x542   : > { %v15707_v4 = vpop.permute.xlu1 %5781  ;;  %v15817_v32 = vrot.slane %v15783_v15, %v14058_v40 }
 0x543   : > { %v15722_v49 = vpop.permute.xlu0 %5779  ;;  %v6712_v48 = vsel %vm556_vm1, %v15344_v1, %v15707_v4 }
 0x544   : > { %7310 = vrot.lane.b32.xlu1 %v18986_v36, %s18967_s29  ;;  %v7026_v36 = vadd.f32 %v19003_v23, %v15029_v11  ;;  %v7719_v11 = vcombine.high %v15766_v31, %v18807_v58 }
 0x545   : > { %7308 = vrot.lane.b32.xlu0 %v18993_v5, %s18967_s29  ;;  %v19008_v5 = vld [vmem:[#allocation130_spill] sm:$0xff] }
 0x546   : > { %v15737_v43 = vpop.permute.xlu1 %5845  ;;  %v15813_v33 = vsel %vm18315_vm9, %v19008_v5, %v19007_v54  ;;  %v7070_v41 = vadd.f32 %v7026_v36, %v15264_v6  ;;  %v19013_v6 = vld [vmem:[#allocation91_spill] sm:$0xff]  ;;  %v19014_v54 = vld [vmem:[#allocation133_spill] sm:$0xff] }
 0x547   : > { %v15760_v25 = vpop.permute.xlu0 %5843  ;;  %v15837_v23 = vrot.slane %v15813_v33, %v14058_v40  ;;  %v15849_v36 = vsel %vm18315_vm9, %v7098_v42, %v19013_v6 }
 0x548   : > { %7314 = vrot.lane.b32.xlu1 %v18995_v20, %s18967_s29  ;;  %v7102_v5 = vadd.f32 %v7070_v41, %v19014_v54  ;;  %v15868_v42 = vrot.slane %v15849_v36, %v14058_v40 }
 0x549   : > { %7312 = vrot.lane.b32.xlu0 %v19002_v7, %s18967_s29  ;;  %v15833_v7 = vrot.slane %v15800_v21, %v14071_v50  ;;  %v15864_v29 = vrot.slane %v15837_v23, %v14071_v50 }
 0x54a   : > { %v15777_v38 = vpop.permute.xlu1 %5973  ;;  %v15888_v13 = vrot.slane %v15868_v42, %v14071_v50 }
 0x54b   : > { %v15802_v24 = vpop.permute.xlu0 %5971  ;;  %19011 = vst [vmem:[#allocation113_spill] sm:$0xff] %v15833_v7  ;;  %19015 = vst [vmem:[#allocation131_spill] sm:$0xff] %v15864_v29  ;;  %v8013_v8 = vcombine.high %v15864_v29, %v18807_v58 }
 0x54c   : > { %8966 = vrot.lane.b32.xlu1 %v7523_v37, %s11303_s18  ;;  %v19009_v37 = vld [vmem:[#allocation80_spill] sm:$0xff]  ;;  %19018 = vst [vmem:[#allocation82_spill] sm:$0xff] %v15888_v13 }
 0x54d   : > { %v15823_v19 = vsel %vm18315_vm9, %v7100_v46, %v19009_v37  ;;  %8964 = vrot.lane.b32.xlu0 %v7425_v12, %s11303_s18  ;;  %v15845_v46 = vrot.slane %v15817_v32, %v14071_v50  ;;  %v7817_v37 = vcombine.high %v15833_v7, %v18807_v58 }
 0x54e   : > { %v15819_v20 = vpop.permute.xlu1 %6421  ;;  %v15853_v12 = vrot.slane %v15823_v19, %v14058_v40 }
 0x54f   : > { %v15839_v10 = vpop.permute.xlu0 %6419  ;;  %19012 = vst [vmem:[#allocation103_spill] sm:$0xff] %v15845_v46 }
 0x550   : > { %8970 = vrot.lane.b32.xlu1 %v7719_v11, %s11303_s18  ;;  %v15876_v41 = vrot.slane %v15853_v12, %v14071_v50 }
 0x551   : > { %8968 = vrot.lane.b32.xlu0 %v7621_v16, %s11303_s18  ;;  %v8111_v16 = vcombine.high %v15845_v46, %v18807_v58 }
 0x552   : > { %v15855_v11 = vpop.permute.xlu1 %6549  ;;  %19016 = vst [vmem:[#allocation90_spill] sm:$0xff] %v15876_v41 }
 0x553   : > { %v15870_v6 = vpop.permute.xlu0 %6547 }
 0x554   : > { %8974 = vrot.lane.b32.xlu1 %v7915_v18, %s11303_s18  ;;  %v19017_v18 = vld [vmem:[#allocation20_spill] sm:$0xff] }
 0x555   : > { %v15880_v54 = vsel %vm18315_vm9, %v7102_v5, %v19017_v18  ;;  %8972 = vrot.lane.b32.xlu0 %v7817_v37, %s11303_s18  ;;  %v7493_v5 = vcombine.high %v15705_v9, %v18807_v58  ;;  %v8307_v37 = vcombine.high %v15876_v41, %v18807_v58  ;;  %vm19023_vm9 = vmmov %vm19021_vm2 }
 0x556   : > { %v6614_v7 = vpop.permute.xlu1 %6613  ;;  %v15892_v46 = vrot.slane %v15880_v54, %v14058_v40 }
 0x557   : > { %v6612_v31 = vpop.permute.xlu0 %6611  ;;  %v15907_v35 = vrot.slane %v7493_v5, %v14071_v50  ;;  %v6729_v5 = vsel %vm19020_vm8, %v6712_v48, %v15737_v43  ;;  %vm19024_vm8 = vcmask 195584  }
 0x558   : > { %8978 = vrot.lane.b32.xlu1 %v8111_v16, %s11303_s18  ;;  %v8209_v16 = vcombine.high %v15888_v13, %v18807_v58  ;;  %v15904_v29 = vrot.slane %v15892_v46, %v14071_v50 }
 0x559   : > { %8976 = vrot.lane.b32.xlu0 %v8013_v8, %s11303_s18  ;;  %v7395_v8 = vcombine.high %v15720_v34, %v18807_v58 }
 0x55a   : > { %v5910_v18 = vpop.permute.xlu1 %5909  ;;  %19019 = vst [vmem:[#allocation75_spill] sm:$0xff] %v15904_v29 }
 0x55b   : > { %v5908_v14 = vpop.permute.xlu0 %5907  ;;  %v6746_v26 = vsel %vm19021_vm2, %v6729_v5, %v5910_v18  ;;  %vm19025_vm2 = vcmask 261120  }
 0x55c   : > { %8982 = vrot.lane.b32.xlu1 %v8307_v37, %s11303_s18  ;;  %v8405_v37 = vcombine.high %v15904_v29, %v18807_v58  ;;  %v6711_v29 = vsel %vm556_vm1, %v15350_v47, %v15722_v49  ;;  %v6763_v48 = vsel %vm6749_vm10, %v6746_v26, %v15777_v38 }
 0x55d   : > { %8980 = vrot.lane.b32.xlu0 %v8209_v16, %s11303_s18  ;;  %v15923_v16 = vrot.slane %v7395_v8, %v14071_v50  ;;  %v6728_v3 = vsel %vm19022_vm7, %v6711_v29, %v15760_v25  ;;  %vm19027_vm7 = vmmov %vm19025_vm2 }
 0x55e   : > { %v6038_v9 = vpop.permute.xlu1 %6037  ;;  %v6745_v1 = vsel %vm19023_vm9, %v6728_v3, %v5908_v14  ;;  %vm19026_vm9 = vmmov %vm19024_vm8 }
 0x55f   : > { %v6036_v13 = vpop.permute.xlu0 %6035  ;;  %v6780_v4 = vsel %vm6766_vm11, %v6763_v48, %v6038_v9  ;;  %v6762_v47 = vsel %vm6749_vm10, %v6745_v1, %v15802_v24 }
 0x560   : > { %9030 = vrot.lane.b32.xlu1 %v15907_v35, %s11304_s19  ;;  %v6779_v25 = vsel %vm6766_vm11, %v6762_v47, %v6036_v13 }
 0x561   : > { %8984 = vrot.lane.b32.xlu0 %v8405_v37, %s11303_s18 }
 0x562   : > { %v6102_v41 = vpop.permute.xlu1 %6101 }
 0x563   : > { %v6100_v34 = vpop.permute.xlu0 %6099  ;;  %v6797_v18 = vsel %vm19024_vm8, %v6780_v4, %v6102_v41  ;;  %vm19029_vm8 = vcmask 64512  }
 0x564   : > { %v6796_v3 = vsel %vm19026_vm9, %v6779_v25, %v6100_v34  ;;  %vm19031_vm9 = vcmask 97280  }
 0x565   : > { %9028 = vrot.lane.b32.xlu0 %v15923_v16, %s11304_s19 }
 0x566   : > { %v6678_v57 = vpop.permute.xlu1 %6677 }
 0x567   : > { %v6676_v43 = vpop.permute.xlu0 %6675 }
 0x56a   : > { %v6166_v8 = vpop.permute.xlu1 %6165 }
 0x56b   : > { %v6814_v49 = vsel %vm6800_vm12, %v6797_v18, %v6166_v8  ;;  %v6164_v14 = vpop.permute.xlu0 %6163 }
 0x56c   : > { %v6831_v29 = vsel %vm19025_vm2, %v6814_v49, %v15634_v61  ;;  %v6813_v41 = vsel %vm6800_vm12, %v6796_v3, %v6164_v14  ;;  %vm19030_vm2 = vmmov %vm19029_vm8 }
 0x56d   : > { %v6848_v26 = vsel %vm6834_vm14, %v6831_v29, %v15658_v28  ;;  %v6830_v61 = vsel %vm19027_vm7, %v6813_v41, %v15651_v52  ;;  %vm19032_vm7 = vmmov %vm19031_vm9 }
 0x56e   : > { %v6865_v38 = vsel %vm6851_vm15, %v6848_v26, %v15675_v22  ;;  %v15950_v24 = vpop.permute.xlu1 %6233  ;;  %v6847_v28 = vsel %vm6834_vm14, %v6830_v61, %v15672_v60 }
 0x56f   : > { %v6882_v13 = vsel %vm6868_vm3, %v6865_v38, %v15819_v20  ;;  %v6864_v37 = vsel %vm6851_vm15, %v6847_v28, %v15683_v63  ;;  %v6232_v5 = vpop.permute.xlu0 %6231 }
 0x570   : > { %v6899_v9 = vsel %vm6885_vm4, %v6882_v13, %v15685_v59  ;;  %v6881_v20 = vsel %vm6868_vm3, %v6864_v37, %v15839_v10 }
 0x571   : > { %v6916_v22 = vsel %vm6902_vm5, %v6899_v9, %v15855_v11  ;;  %v6898_v59 = vsel %vm6885_vm4, %v6881_v20, %v15696_v51 }
 0x572   : > { %v6933_v34 = vsel %vm6919_vm6, %v6916_v22, %v6614_v7  ;;  %v6298_v52 = vpop.permute.xlu1 %6297  ;;  %v6915_v60 = vsel %vm6902_vm5, %v6898_v59, %v15870_v6 }
 0x573   : > { %v6950_v1 = vsel %vm18326_vm0, %v6933_v34, %v6678_v57  ;;  %v6932_v11 = vsel %vm6919_vm6, %v6915_v60, %v6612_v31  ;;  %v6296_v63 = vpop.permute.xlu0 %6295 }
 0x574   : > { %6967 = vst.msk [vmem:[%s14628_s26 + $0x1a] sm:$0x1] %vm18316_vm13, %v6950_v1  ;;  %v6949_v48 = vsel %vm18326_vm0, %v6932_v11, %v6676_v43 }
 0x575   : > { %6966 = vst.msk [vmem:[%s14628_s26 + $0x18] sm:$0x1] %vm18316_vm13, %v6949_v48  ;;  %vm19033_vm13 = vcmask 195584  }
 0x576   : > { %v6362_v7 = vpop.permute.xlu1 %6361 }
 0x577   : > { %v6360_v10 = vpop.permute.xlu0 %6359 }
 0x57a   : > { %v6490_v4 = vpop.permute.xlu1 %6489 }
 0x57b   : > { %v6488_v18 = vpop.permute.xlu0 %6487 }
 0x57e   : > { %v5786_v57 = vpop.permute.xlu1 %5785 }
 0x57f   : > { %v5784_v8 = vpop.permute.xlu0 %5783  ;;  %v6714_v37 = vsel %vm556_vm1, %v15540_v55, %v5786_v57 }
 0x580   : > { %v6713_v28 = vsel %vm556_vm1, %v15546_v27, %v5784_v8 }
 0x582   : > { %v5850_v47 = vpop.permute.xlu1 %5849 }
 0x583   : > { %v5848_v51 = vpop.permute.xlu0 %5847  ;;  %v6731_v20 = vsel %vm19030_vm2, %v6714_v37, %v5850_v47  ;;  %vm19035_vm2 = vcmask 261120   ;;  %v19037_v37 = vld [vmem:[#allocation166_spill] sm:$0xff] }
 0x584   : > { %v6730_v34 = vsel %vm19029_vm8, %v6713_v28, %v5848_v51  ;;  %vm19034_vm8 = vmmov %vm19033_vm13 }
 0x586   : > { %v5978_v49 = vpop.permute.xlu1 %5977 }
 0x587   : > { %v5976_v25 = vpop.permute.xlu0 %5975 }
 0x58a   : > { %v15978_v29 = vpop.permute.xlu1 %7298 }
 0x58b   : > { %19028 = vst [vmem:[#allocation74_spill] sm:$0xff] %v15978_v29  ;;  %v6424_v6 = vpop.permute.xlu0 %6423 }
 0x58e   : > { %v6426_v3 = vpop.permute.xlu1 %6425 }
 0x58f   : > { %v6552_v31 = vpop.permute.xlu0 %6551 }
 0x592   : > { %v6554_v26 = vpop.permute.xlu1 %6553 }
 0x593   : > { %v6616_v14 = vpop.permute.xlu0 %6615 }
 0x596   : > { %v6618_v43 = vpop.permute.xlu1 %6617 }
 0x597   : > { %v5912_v38 = vpop.permute.xlu0 %5911 }
 0x598   : > { %v6747_v1 = vsel %vm19031_vm9, %v6730_v34, %v5912_v38  ;;  %vm19036_vm9 = vmmov %vm19035_vm2 }
 0x599   : > { %v6764_v48 = vsel %vm6749_vm10, %v6747_v1, %v5976_v25 }
 0x59a   : > { %v5914_v41 = vpop.permute.xlu1 %5913 }
 0x59b   : > { %v6040_v13 = vpop.permute.xlu0 %6039  ;;  %v6748_v59 = vsel %vm19032_vm7, %v6731_v20, %v5914_v41  ;;  %vm19040_vm7 = vcmask 516096  }
 0x59c   : > { %v6781_v29 = vsel %vm6766_vm11, %v6764_v48, %v6040_v13  ;;  %v6765_v27 = vsel %vm6749_vm10, %v6748_v59, %v5978_v49  ;;  %v19045_v48 = vld [vmem:[#allocation171_spill] sm:$0xff] }
 0x59e   : > { %v6042_v61 = vpop.permute.xlu1 %6041 }
 0x59f   : > { %v6104_v9 = vpop.permute.xlu0 %6103  ;;  %v6782_v8 = vsel %vm6766_vm11, %v6765_v27, %v6042_v61 }
 0x5a0   : > { %v6798_v55 = vsel %vm19033_vm13, %v6781_v29, %v6104_v9  ;;  %vm19038_vm13 = vcmask 15360  }
 0x5a2   : > { %v6106_v22 = vpop.permute.xlu1 %6105 }
 0x5a3   : > { %v6680_v60 = vpop.permute.xlu0 %6679  ;;  %v6799_v51 = vsel %vm19034_vm8, %v6782_v8, %v6106_v22  ;;  %vm19041_vm8 = vmmov %vm19040_vm7  ;;  %v7591_v8 = vcombine.high %v15758_v0, %v18807_v58 }
 0x5a6   : > { %v6682_v11 = vpop.permute.xlu1 %6681 }
 0x5a7   : > { %v6168_v57 = vpop.permute.xlu0 %6167 }
 0x5a8   : > { %v6815_v47 = vsel %vm6800_vm12, %v6798_v55, %v6168_v57 }
 0x5a9   : > { %v6832_v41 = vsel %vm19035_vm2, %v6815_v47, %v6232_v5  ;;  %vm19043_vm2 = vmmov %vm19038_vm13  ;;  %v19047_v47 = vld [vmem:[#allocation105_spill] sm:$0xff] }
 0x5aa   : > { %v6170_v38 = vpop.permute.xlu1 %6169  ;;  %v6849_v25 = vsel %vm6834_vm14, %v6832_v41, %v6296_v63  ;;  %v7605_v41 = vrot.slane %v7591_v8, %v14071_v50 }
 0x5ab   : > { %v6816_v28 = vsel %vm6800_vm12, %v6799_v51, %v6170_v38  ;;  %v6866_v49 = vsel %vm6851_vm15, %v6849_v25, %v6360_v10  ;;  %v7297_v29 = vpop.permute.xlu0 %7296  ;;  %v7885_v25 = vcombine.high %v15775_v45, %v18807_v58  ;;  %v19051_v45 = vld [vmem:[#allocation150_spill] sm:$0xff] }
 0x5ac   : > { %v6833_v13 = vsel %vm19036_vm9, %v6816_v28, %v15950_v24  ;;  %v6883_v9 = vsel %vm6868_vm3, %v6866_v49, %v6424_v6  ;;  %v16006_v5 = vsel %vm19038_vm13, %v19037_v37, %v7297_v29  ;;  %vm19046_vm9 = vmmov %vm19043_vm2  ;;  %v7787_v29 = vcombine.high %v15800_v21, %v18807_v58 }
 0x5ad   : > { %v6850_v61 = vsel %vm6834_vm14, %v6833_v13, %v6298_v52  ;;  %v6900_v63 = vsel %vm6885_vm4, %v6883_v9, %v6488_v18  ;;  %v8465_v24 = vrot.slane %v16006_v5, %v14058_v40  ;;  %vm19048_vm13 = vmmov %vm19043_vm2  ;;  %v7899_v9 = vrot.slane %v7885_v25, %v14071_v50 }
 0x5ae   : > { %v6867_v22 = vsel %vm6851_vm15, %v6850_v61, %v6362_v7  ;;  %v6917_v52 = vsel %vm6902_vm5, %v6900_v63, %v6552_v31  ;;  %v7689_v31 = vcombine.high %v15735_v53, %v18807_v58  ;;  %v7983_v21 = vcombine.high %v15837_v23, %v18807_v58 }
 0x5af   : > { %v6884_v34 = vsel %vm6868_vm3, %v6867_v22, %v6426_v3  ;;  %v6934_v6 = vsel %vm6919_vm6, %v6917_v52, %v6616_v14  ;;  %v7301_v20 = vpop.permute.xlu0 %7300  ;;  %v16019_v18 = vrot.slane %v8465_v24, %v14071_v50 }
 0x5b0   : > { %v6901_v10 = vsel %vm6885_vm4, %v6884_v34, %v6490_v4  ;;  %v6951_v1 = vsel %vm18326_vm0, %v6934_v6, %v6680_v60  ;;  %v16041_v53 = vrot.slane %v7689_v31, %v14071_v50  ;;  %v7801_v34 = vrot.slane %v7787_v29, %v14071_v50 }
 0x5b1   : > { %v6918_v7 = vsel %vm6902_vm5, %v6901_v10, %v6554_v26  ;;  %19039 = vst [vmem:[#allocation122_spill] sm:$0xff] %v16019_v18  ;;  %6968 = vst.msk [vmem:[%s14628_s26 + $0x1c] sm:$0x1] %vm19040_vm7, %v6951_v1  ;;  %v8503_v4 = vcombine.high %v16019_v18, %v18807_v58  ;;  %v19042_v26 = vld [vmem:[#allocation16_spill] sm:$0xff]  ;;  %v8081_v10 = vcombine.high %v15817_v32, %v18807_v58 }
 0x5b2   : > { %v6935_v59 = vsel %vm6919_vm6, %v6918_v7, %v6618_v43  ;;  %v16032_v14 = vsel %vm19043_vm2, %v19042_v26, %v7301_v20  ;;  %vm19052_vm7 = vmmov %vm19043_vm2  ;;  %v7997_v7 = vrot.slane %v7983_v21, %v14071_v50  ;;  %v8179_v20 = vcombine.high %v15868_v42, %v18807_v58 }
 0x5b3   : > { %v6952_v3 = vsel %vm18326_vm0, %v6935_v59, %v6682_v11  ;;  %v8563_v43 = vrot.slane %v16032_v14, %v14058_v40  ;;  %v7305_v60 = vpop.permute.xlu0 %7304  ;;  %8986 = vrot.lane.b32.xlu1 %v8503_v4, %s11303_s18  ;;  %v8095_v23 = vrot.slane %v8081_v10, %v14071_v50  ;;  %v8277_v1 = vcombine.high %v15853_v12, %v18807_v58 }
 0x5b4   : > { %6969 = vst.msk [vmem:[%s14628_s26 + $0x1e] sm:$0x1] %vm19041_vm8, %v6952_v3  ;;  %v16045_v27 = vsel %vm19046_vm9, %v19045_v48, %v7305_v60  ;;  %v8193_v59 = vrot.slane %v8179_v20, %v14071_v50  ;;  %v8375_v32 = vcombine.high %v15892_v46, %v18807_v58  ;;  %v8473_v3 = vcombine.high %v8465_v24, %v18807_v58  ;;  %vm19101_vm8 = vmmov %vm19043_vm2 }
 0x5b5   : > { %v16038_v11 = vrot.slane %v8563_v43, %v14071_v50  ;;  %v8661_v51 = vrot.slane %v16045_v27, %v14058_v40  ;;  %v8291_v42 = vrot.slane %v8277_v1, %v14071_v50  ;;  %v8571_v4 = vcombine.high %v8563_v43, %v18807_v58  ;;  %vm19108_vm9 = vmmov %vm19043_vm2 }
 0x5b6   : > { %v8389_v31 = vrot.slane %v8375_v32, %v14071_v50  ;;  %v8487_v12 = vrot.slane %v8473_v3, %v14071_v50  ;;  %v8014_v25 = vcombine.high %v7997_v7, %v18807_v58  ;;  %v7772_v1 = vcombine.high %v15771_v17, %v18807_v58 }
 0x5b7   : > { %19044 = vst [vmem:[#allocation134_spill] sm:$0xff] %v16038_v11  ;;  %v8601_v55 = vcombine.high %v16038_v11, %v18807_v58  ;;  %v7309_v57 = vpop.permute.xlu0 %7308  ;;  %9034 = vrot.lane.b32.xlu1 %v16041_v53, %s11304_s19  ;;  %v16062_v0 = vrot.slane %v8661_v51, %v14071_v50  ;;  %v8669_v46 = vcombine.high %v8661_v51, %v18807_v58 }
 0x5b8   : > { %v16057_v38 = vsel %vm19048_vm13, %v19047_v47, %v7309_v57  ;;  %v8585_v26 = vrot.slane %v8571_v4, %v14071_v50  ;;  %v7524_v57 = vcombine.high %v15907_v35, %v18807_v58  ;;  %v7622_v51 = vcombine.high %v7605_v41, %v18807_v58  ;;  %v16148_v35 = vpop.permute.xlu1 %7302  ;;  %vm19112_vm13 = vmmov %vm19043_vm2 }
 0x5b9   : > { %8988 = vrot.lane.b32.xlu0 %v8601_v55, %s11303_s18  ;;  %19049 = vst [vmem:[#allocation19_spill] sm:$0xff] %v16062_v0  ;;  %v8759_v28 = vrot.slane %v16057_v38, %v14058_v40  ;;  %v8699_v13 = vcombine.high %v16062_v0, %v18807_v58  ;;  %v8683_v24 = vrot.slane %v8669_v46, %v14071_v50  ;;  %v19152_v0 = vld [vmem:[#allocation58_spill] sm:$0xff] }
 0x5ba   : > { %v7426_v55 = vcombine.high %v15923_v16, %v18807_v58  ;;  %v7720_v47 = vcombine.high %v16041_v53, %v18807_v58  ;;  %v7916_v16 = vcombine.high %v7899_v9, %v18807_v58  ;;  %v8210_v53 = vcombine.high %v8193_v59, %v18807_v58 }
 0x5bb   : > { %v16072_v49 = vrot.slane %v8759_v28, %v14071_v50  ;;  %8990 = vrot.lane.b32.xlu1 %v8699_v13, %s11303_s18  ;;  %v7313_v61 = vpop.permute.xlu0 %7312  ;;  %v8767_v60 = vcombine.high %v8759_v28, %v18807_v58  ;;  %v7818_v28 = vcombine.high %v7801_v34, %v18807_v58  ;;  %v8308_v13 = vcombine.high %v8291_v42, %v18807_v58 }
 0x5bc   : > { %v16082_v37 = vsel %vm19052_vm7, %v19051_v45, %v7313_v61  ;;  %v8406_v61 = vcombine.high %v8389_v31, %v18807_v58  ;;  %v16156_v29 = vpop.permute.xlu1 %7306  ;;  %v8602_v45 = vcombine.high %v8585_v26, %v18807_v58  ;;  %v8700_v21 = vcombine.high %v8683_v24, %v18807_v58  ;;  %vm19117_vm7 = vmmov %vm19043_vm2 }
 0x5bd   : > { %9032 = vrot.lane.b32.xlu0 %v7605_v41, %s11304_s19  ;;  %19050 = vst [vmem:[#allocation125_spill] sm:$0xff] %v16072_v49  ;;  %v8797_v22 = vcombine.high %v16072_v49, %v18807_v58  ;;  %v8857_v63 = vrot.slane %v16082_v37, %v14058_v40  ;;  %v8781_v48 = vrot.slane %v8767_v60, %v14071_v50 }
 0x5be   : > { %v8112_v41 = vcombine.high %v8095_v23, %v18807_v58  ;;  %v16213_v3 = vrot.slane %v7772_v1, %v14058_v40  ;;  %v8066_v46 = vcombine.high %v15783_v15, %v18807_v58 }
 0x5bf   : > { %9038 = vrot.lane.b32.xlu1 %v7899_v9, %s11304_s19  ;;  %v16092_v52 = vrot.slane %v8857_v63, %v14071_v50  ;;  %v8865_v43 = vcombine.high %v8857_v63, %v18807_v58  ;;  %v8504_v9 = vcombine.high %v8487_v12, %v18807_v58  ;;  %v7478_v63 = vcombine.high %v15690_v39, %v18807_v58  ;;  %v16219_v4 = vpop.permute.xlu0 %8964 }
 0x5c0   : > { %v7674_v39 = vcombine.high %v15712_v56, %v18807_v58  ;;  %v16247_v15 = vrot.slane %v8066_v46, %v14058_v40 }
 0x5c1   : > { %8992 = vrot.lane.b32.xlu0 %v8797_v22, %s11303_s18  ;;  %19053 = vst [vmem:[#allocation120_spill] sm:$0xff] %v16092_v52  ;;  %v8895_v6 = vcombine.high %v16092_v52, %v18807_v58  ;;  %v8879_v8 = vrot.slane %v8865_v43, %v14071_v50  ;;  %v7380_v22 = vcombine.high %v15701_v30, %v18807_v58 }
 0x5c2   : > { %v8798_v30 = vcombine.high %v8781_v48, %v18807_v58  ;;  %v16204_v32 = vrot.slane %v7674_v39, %v14058_v40 }
 0x5c3   : > { %8994 = vrot.lane.b32.xlu1 %v8895_v6, %s11303_s18  ;;  %v16172_v10 = vrot.slane %v7380_v22, %v14058_v40  ;;  %v7576_v6 = vcombine.high %v15731_v62, %v18807_v58  ;;  %v8896_v20 = vcombine.high %v8879_v8, %v18807_v58  ;;  %v8752_v22 = vcombine.high %v16057_v38, %v18807_v58 }
 0x5c5   : > { %9036 = vrot.lane.b32.xlu0 %v7801_v34, %s11304_s19  ;;  %v16168_v34 = vpop.permute.xlu1 %7310  ;;  %v16190_v62 = vrot.slane %v7576_v6, %v14058_v40  ;;  %v16310_v6 = vrot.slane %v8752_v22, %v14058_v40 }
 0x5c7   : > { %9042 = vrot.lane.b32.xlu1 %v8095_v23, %s11304_s19  ;;  %v16187_v23 = vrot.slane %v16172_v10, %v14071_v50  ;;  %v16210_v17 = vrot.slane %v16190_v62, %v14071_v50 }
 0x5c9   : > { %9040 = vrot.lane.b32.xlu0 %v7997_v7, %s11304_s19  ;;  %v16180_v7 = vrot.slane %v7478_v63, %v14058_v40  ;;  %v8850_v63 = vcombine.high %v16082_v37, %v18807_v58  ;;  %v8789_v37 = vrot.slane %v16310_v6, %v14071_v50  ;;  %v7427_v46 = vcombine.high %v16187_v23, %v18807_v58 }
 0x5cb   : > { %9046 = vrot.lane.b32.xlu1 %v8291_v42, %s11304_s19  ;;  %v16201_v56 = vrot.slane %v16180_v7, %v14071_v50  ;;  %v7870_v42 = vcombine.high %v15744_v44, %v18807_v58  ;;  %v16225_v44 = vrot.slane %v16204_v32, %v14071_v50 }
 0x5cd   : > { %9044 = vrot.lane.b32.xlu0 %v8193_v59, %s11304_s19  ;;  %v16194_v59 = vpop.permute.xlu1 %7314 }
 0x5cf   : > { %9050 = vrot.lane.b32.xlu1 %v8487_v12, %s11304_s19  ;;  %v16228_v12 = vrot.slane %v7870_v42, %v14058_v40 }
 0x5d1   : > { %9048 = vrot.lane.b32.xlu0 %v8389_v31, %s11304_s19  ;;  %v7968_v31 = vcombine.high %v15813_v33, %v18807_v58  ;;  %v7809_v33 = vrot.slane %v16213_v3, %v14071_v50  ;;  %v7907_v43 = vrot.slane %v16228_v12, %v14071_v50 }
 0x5d3   : > { %9054 = vrot.lane.b32.xlu1 %v8683_v24, %s11304_s19  ;;  %v16237_v60 = vrot.slane %v7968_v31, %v14058_v40  ;;  %v8164_v24 = vcombine.high %v15849_v36, %v18807_v58  ;;  %v8360_v36 = vcombine.high %v15880_v54, %v18807_v58 }
 0x5d5   : > { %9052 = vrot.lane.b32.xlu0 %v8585_v26, %s11304_s19  ;;  %v16232_v26 = vpop.permute.xlu1 %8966 }
 0x5d7   : > { %9058 = vrot.lane.b32.xlu1 %v8879_v8, %s11304_s19  ;;  %v8005_v8 = vrot.slane %v16237_v60, %v14071_v50 }
 0x5d9   : > { %9056 = vrot.lane.b32.xlu0 %v8781_v48, %s11304_s19  ;;  %v8262_v48 = vcombine.high %v15823_v19, %v18807_v58  ;;  %v8103_v19 = vrot.slane %v16247_v15, %v14071_v50  ;;  %v8015_v22 = vcombine.high %v8005_v8, %v18807_v58 }
 0x5db   : > { %9094 = vrot.lane.b32.xlu1 %v7524_v57, %s11309_s24  ;;  %v16258_v57 = vpop.permute.xlu0 %8968 }
 0x5dd   : > { %9092 = vrot.lane.b32.xlu0 %v7426_v55, %s11309_s24  ;;  %v16254_v55 = vrot.slane %v8164_v24, %v14058_v40  ;;  %v7525_v24 = vcombine.high %v16201_v56, %v18807_v58 }
 0x5df   : > { %9098 = vrot.lane.b32.xlu1 %v7720_v47, %s11309_s24  ;;  %v16267_v47 = vrot.slane %v8262_v48, %v14058_v40  ;;  %v8201_v54 = vrot.slane %v16254_v55, %v14071_v50 }
 0x5e1   : > { %9096 = vrot.lane.b32.xlu0 %v7622_v51, %s11309_s24  ;;  %v16260_v51 = vpop.permute.xlu1 %8970 }
 0x5e3   : > { %9102 = vrot.lane.b32.xlu1 %v7916_v16, %s11309_s24  ;;  %v16274_v16 = vrot.slane %v8360_v36, %v14058_v40  ;;  %v7623_v36 = vcombine.high %v16210_v17, %v18807_v58 }
 0x5e5   : > { %9100 = vrot.lane.b32.xlu0 %v7818_v28, %s11309_s24  ;;  %v8458_v28 = vcombine.high %v16006_v5, %v18807_v58 }
 0x5e7   : > { %9106 = vrot.lane.b32.xlu1 %v8112_v41, %s11309_s24  ;;  %v16279_v41 = vpop.permute.xlu0 %8972  ;;  %v16285_v5 = vrot.slane %v8458_v28, %v14058_v40 }
 0x5e9   : > { %9104 = vrot.lane.b32.xlu0 %v8014_v25, %s11309_s24  ;;  %v8556_v25 = vcombine.high %v16032_v14, %v18807_v58  ;;  %v8397_v14 = vrot.slane %v16274_v16, %v14071_v50 }
 0x5eb   : > { %9110 = vrot.lane.b32.xlu1 %v8308_v13, %s11309_s24  ;;  %v8654_v13 = vcombine.high %v16045_v27, %v18807_v58  ;;  %v16312_v38 = vpop.permute.xlu0 %8976 }
 0x5ec   : > { %19054 = vst [vmem:[#allocation49_spill] sm:$0xff] %v16312_v38 }
 0x5ed   : > { %9108 = vrot.lane.b32.xlu0 %v8210_v53, %s11309_s24  ;;  %v8299_v53 = vrot.slane %v16267_v47, %v14071_v50  ;;  %v16303_v27 = vrot.slane %v8654_v13, %v14058_v40 }
 0x5ef   : > { %9114 = vrot.lane.b32.xlu1 %v8504_v9, %s11309_s24  ;;  %v16294_v9 = vrot.slane %v8556_v25, %v14058_v40  ;;  %v8691_v39 = vrot.slane %v16303_v27, %v14071_v50  ;;  %v16326_v1 = vpop.permute.xlu0 %8980  ;;  %v7819_v25 = vcombine.high %v7809_v33, %v18807_v58 }
 0x5f0   : > { %19056 = vst [vmem:[#allocation96_spill] sm:$0xff] %v16326_v1 }
 0x5f1   : > { %9112 = vrot.lane.b32.xlu0 %v8406_v61, %s11309_s24  ;;  %v16289_v61 = vpop.permute.xlu1 %8974 }
 0x5f3   : > { %9118 = vrot.lane.b32.xlu1 %v8700_v21, %s11309_s24  ;;  %v8593_v21 = vrot.slane %v16294_v9, %v14071_v50  ;;  %v16339_v48 = vpop.permute.xlu0 %8984 }
 0x5f4   : > { %19058 = vst [vmem:[#allocation26_spill] sm:$0xff] %v16339_v48 }
 0x5f5   : > { %9116 = vrot.lane.b32.xlu0 %v8602_v45, %s11309_s24  ;;  %v8495_v45 = vrot.slane %v16285_v5, %v14071_v50 }
 0x5f7   : > { %9122 = vrot.lane.b32.xlu1 %v8896_v20, %s11309_s24  ;;  %v16321_v20 = vrot.slane %v8850_v63, %v14058_v40 }
 0x5f9   : > { %9120 = vrot.lane.b32.xlu0 %v8798_v30, %s11309_s24  ;;  %v16314_v30 = vpop.permute.xlu1 %8978  ;;  %v8887_v42 = vrot.slane %v16321_v20, %v14071_v50 }
 0x5fa   : > { %19055 = vst [vmem:[#allocation87_spill] sm:$0xff] %v16314_v30 }
 0x5fb   : > { %9158 = vrot.lane.b32.xlu1 %v16201_v56, %s11305_s20  ;;  %v16353_v56 = vpop.permute.xlu0 %9028 }
 0x5fc   : > { %19061 = vst [vmem:[#allocation99_spill] sm:$0xff] %v16353_v56 }
 0x5fd   : > { %9156 = vrot.lane.b32.xlu0 %v16187_v23, %s11305_s20  ;;  %v16331_v31 = vpop.permute.xlu1 %8982  ;;  %v7721_v23 = vcombine.high %v16225_v44, %v18807_v58 }
 0x5fe   : > { %19057 = vst [vmem:[#allocation138_spill] sm:$0xff] %v16331_v31 }
 0x5ff   : > { %9162 = vrot.lane.b32.xlu1 %v16225_v44, %s11305_s20 }
 0x601   : > { %9160 = vrot.lane.b32.xlu0 %v16210_v17, %s11305_s20  ;;  %v16343_v28 = vpop.permute.xlu1 %9030  ;;  %v7917_v17 = vcombine.high %v7907_v43, %v18807_v58 }
 0x602   : > { %19059 = vst [vmem:[#allocation23_spill] sm:$0xff] %v16343_v28 }
 0x603   : > { %9166 = vrot.lane.b32.xlu1 %v7907_v43, %s11305_s20  ;;  %v8309_v43 = vcombine.high %v8299_v53, %v18807_v58 }
 0x605   : > { %9164 = vrot.lane.b32.xlu0 %v7809_v33, %s11305_s20  ;;  %v8113_v33 = vcombine.high %v8103_v19, %v18807_v58 }
 0x607   : > { %9170 = vrot.lane.b32.xlu1 %v8103_v19, %s11305_s20  ;;  %v8505_v19 = vcombine.high %v8495_v45, %v18807_v58 }
 0x609   : > { %9168 = vrot.lane.b32.xlu0 %v8005_v8, %s11305_s20 }
 0x60b   : > { %9174 = vrot.lane.b32.xlu1 %v8299_v53, %s11305_s20  ;;  %v8701_v53 = vcombine.high %v8691_v39, %v18807_v58 }
 0x60d   : > { %9172 = vrot.lane.b32.xlu0 %v8201_v54, %s11305_s20 }
 0x60f   : > { %9178 = vrot.lane.b32.xlu1 %v8495_v45, %s11305_s20  ;;  %v7508_v45 = vcombine.high %v16180_v7, %v18807_v58 }
 0x611   : > { %9176 = vrot.lane.b32.xlu0 %v8397_v14, %s11305_s20  ;;  %v7522_v7 = vrot.slane %v7508_v45, %v14071_v50 }
 0x613   : > { %9182 = vrot.lane.b32.xlu1 %v8691_v39, %s11305_s20  ;;  %v7606_v39 = vcombine.high %v16190_v62, %v18807_v58 }
 0x615   : > { %9180 = vrot.lane.b32.xlu0 %v8593_v21, %s11305_s20  ;;  %v7620_v62 = vrot.slane %v7606_v39, %v14071_v50 }
 0x617   : > { %9186 = vrot.lane.b32.xlu1 %v8887_v42, %s11305_s20 }
 0x619   : > { %9184 = vrot.lane.b32.xlu0 %v8789_v37, %s11305_s20 }
 0x61b   : > { %9222 = vrot.lane.b32.xlu1 %v7525_v24, %s11310_s25 }
 0x61d   : > { %9220 = vrot.lane.b32.xlu0 %v7427_v46, %s11310_s25  ;;  %v8211_v46 = vcombine.high %v8201_v54, %v18807_v58  ;;  %v8603_v54 = vcombine.high %v8593_v21, %v18807_v58 }
 0x61f   : > { %9226 = vrot.lane.b32.xlu1 %v7721_v23, %s11310_s25 }
 0x621   : > { %9224 = vrot.lane.b32.xlu0 %v7623_v36, %s11310_s25  ;;  %v8407_v36 = vcombine.high %v8397_v14, %v18807_v58  ;;  %v7410_v14 = vcombine.high %v16172_v10, %v18807_v58 }
 0x623   : > { %9230 = vrot.lane.b32.xlu1 %v7917_v17, %s11310_s25  ;;  %v7424_v10 = vrot.slane %v7410_v14, %v14071_v50 }
 0x625   : > { %v16351_v13 = vpop.permute.xlu1 %8986  ;;  %9228 = vrot.lane.b32.xlu0 %v7819_v25, %s11310_s25 }
 0x626   : > { %19060 = vst [vmem:[#allocation22_spill] sm:$0xff] %v16351_v13 }
 0x627   : > { %9234 = vrot.lane.b32.xlu1 %v8113_v33, %s11310_s25  ;;  %v8897_v33 = vcombine.high %v8887_v42, %v18807_v58  ;;  %v7802_v42 = vcombine.high %v16213_v3, %v18807_v58 }
 0x629   : > { %9232 = vrot.lane.b32.xlu0 %v8015_v22, %s11310_s25  ;;  %v16360_v63 = vpop.permute.xlu1 %9034  ;;  %v8799_v22 = vcombine.high %v8789_v37, %v18807_v58  ;;  %v7704_v37 = vcombine.high %v16204_v32, %v18807_v58  ;;  %v7816_v3 = vrot.slane %v7802_v42, %v14071_v50 }
 0x62a   : > { %19062 = vst [vmem:[#allocation89_spill] sm:$0xff] %v16360_v63 }
 0x62b   : > { %v16362_v44 = vpop.permute.xlu0 %8988  ;;  %9238 = vrot.lane.b32.xlu1 %v8309_v43, %s11310_s25  ;;  %v7718_v32 = vrot.slane %v7704_v37, %v14071_v50  ;;  %v8292_v37 = vcombine.high %v16267_v47, %v18807_v58 }
 0x62c   : > { %19063 = vst [vmem:[#allocation39_spill] sm:$0xff] %v16362_v44  ;;  %v19158_v44 = vld [vmem:[#allocation146_spill] sm:$0xff] }
 0x62d   : > { %9236 = vrot.lane.b32.xlu0 %v8211_v46, %s11310_s25  ;;  %v16371_v8 = vpop.permute.xlu1 %8990  ;;  %v8306_v47 = vrot.slane %v8292_v37, %v14071_v50  ;;  %v8782_v37 = vcombine.high %v16310_v6, %v18807_v58 }
 0x62e   : > { %19065 = vst [vmem:[#allocation33_spill] sm:$0xff] %v16371_v8 }
 0x62f   : > { %v16368_v24 = vpop.permute.xlu0 %9032  ;;  %9242 = vrot.lane.b32.xlu1 %v8505_v19, %s11310_s25  ;;  %v7900_v19 = vcombine.high %v16228_v12, %v18807_v58 }
 0x630   : > { %19064 = vst [vmem:[#allocation156_spill] sm:$0xff] %v16368_v24 }
 0x631   : > { %9240 = vrot.lane.b32.xlu0 %v8407_v36, %s11310_s25  ;;  %v16381_v25 = vpop.permute.xlu1 %9038  ;;  %v7914_v12 = vrot.slane %v7900_v19, %v14071_v50  ;;  %v8390_v19 = vcombine.high %v16274_v16, %v18807_v58 }
 0x632   : > { %19067 = vst [vmem:[#allocation137_spill] sm:$0xff] %v16381_v25 }
 0x633   : > { %v16377_v23 = vpop.permute.xlu0 %8992  ;;  %9246 = vrot.lane.b32.xlu1 %v8701_v53, %s11310_s25  ;;  %v7998_v53 = vcombine.high %v16237_v60, %v18807_v58  ;;  %v8404_v16 = vrot.slane %v8390_v19, %v14071_v50  ;;  %v8880_v19 = vcombine.high %v16321_v20, %v18807_v58  ;;  %v7428_v20 = vcombine.high %v7424_v10, %v18807_v58 }
 0x634   : > { %19066 = vst [vmem:[#allocation32_spill] sm:$0xff] %v16377_v23 }
 0x635   : > { %9244 = vrot.lane.b32.xlu0 %v8603_v54, %s11310_s25  ;;  %v16394_v21 = vpop.permute.xlu1 %8994  ;;  %v8012_v60 = vrot.slane %v7998_v53, %v14071_v50  ;;  %v8488_v53 = vcombine.high %v16285_v5, %v18807_v58 }
 0x636   : > { %19069 = vst [vmem:[#allocation117_spill] sm:$0xff] %v16394_v21 }
 0x637   : > { %v16387_v17 = vpop.permute.xlu0 %9036  ;;  %9250 = vrot.lane.b32.xlu1 %v8897_v33, %s11310_s25  ;;  %v8194_v33 = vcombine.high %v16254_v55, %v18807_v58  ;;  %v8502_v5 = vrot.slane %v8488_v53, %v14071_v50  ;;  %v8796_v53 = vrot.slane %v8782_v37, %v14071_v50  ;;  %v7526_v37 = vcombine.high %v7522_v7, %v18807_v58 }
 0x638   : > { %19068 = vst [vmem:[#allocation50_spill] sm:$0xff] %v16387_v17  ;;  %v19141_v17 = vld [vmem:[#allocation38_spill] sm:$0xff] }
 0x639   : > { %9248 = vrot.lane.b32.xlu0 %v8799_v22, %s11310_s25  ;;  %v16406_v43 = vpop.permute.xlu1 %9042  ;;  %v8096_v22 = vcombine.high %v16247_v15, %v18807_v58  ;;  %v8208_v55 = vrot.slane %v8194_v33, %v14071_v50  ;;  %v8684_v33 = vcombine.high %v16303_v27, %v18807_v58 }
 0x63a   : > { %19071 = vst [vmem:[#allocation31_spill] sm:$0xff] %v16406_v43 }
 0x63b   : > { %v16399_v46 = vpop.permute.xlu0 %9040  ;;  %9286 = vrot.lane.b32.xlu1 %v7522_v7, %s18883_s12  ;;  %v8110_v15 = vrot.slane %v8096_v22, %v14071_v50  ;;  %v8586_v22 = vcombine.high %v16294_v9, %v18807_v58  ;;  %v8698_v27 = vrot.slane %v8684_v33, %v14071_v50 }
 0x63c   : > { %19070 = vst [vmem:[#allocation24_spill] sm:$0xff] %v16399_v46  ;;  %v19137_v46 = vld [vmem:[#allocation95_spill] sm:$0xff] }
 0x63d   : > { %9284 = vrot.lane.b32.xlu0 %v7424_v10, %s18883_s12  ;;  %v16418_v54 = vpop.permute.xlu1 %9046  ;;  %v8600_v9 = vrot.slane %v8586_v22, %v14071_v50  ;;  %v8894_v22 = vrot.slane %v8880_v19, %v14071_v50  ;;  %v7722_v10 = vcombine.high %v7718_v32, %v18807_v58 }
 0x63e   : > { %19073 = vst [vmem:[#allocation158_spill] sm:$0xff] %v16418_v54 }
 0x63f   : > { %v16411_v36 = vpop.permute.xlu0 %9044  ;;  %9290 = vrot.lane.b32.xlu1 %v7718_v32, %s18883_s12 }
 0x640   : > { %19072 = vst [vmem:[#allocation107_spill] sm:$0xff] %v16411_v36 }
 0x641   : > { %9288 = vrot.lane.b32.xlu0 %v7620_v62, %s18883_s12  ;;  %v16430_v45 = vpop.permute.xlu1 %9050 }
 0x642   : > { %19075 = vst [vmem:[#allocation140_spill] sm:$0xff] %v16430_v45 }
 0x643   : > { %v16423_v14 = vpop.permute.xlu0 %9048  ;;  %9294 = vrot.lane.b32.xlu1 %v7914_v12, %s18883_s12 }
 0x644   : > { %19074 = vst [vmem:[#allocation30_spill] sm:$0xff] %v16423_v14  ;;  %v19129_v14 = vld [vmem:[#allocation127_spill] sm:$0xff] }
 0x645   : > { %9292 = vrot.lane.b32.xlu0 %v7816_v3, %s18883_s12  ;;  %v16442_v42 = vpop.permute.xlu1 %9054 }
 0x646   : > { %19077 = vst [vmem:[#allocation119_spill] sm:$0xff] %v16442_v42 }
 0x647   : > { %v16435_v39 = vpop.permute.xlu0 %9052  ;;  %9298 = vrot.lane.b32.xlu1 %v8110_v15, %s18883_s12 }
 0x648   : > { %19076 = vst [vmem:[#allocation29_spill] sm:$0xff] %v16435_v39 }
 0x649   : > { %9296 = vrot.lane.b32.xlu0 %v8012_v60, %s18883_s12  ;;  %v16454_v39 = vpop.permute.xlu1 %9058 }
 0x64a   : > { %19079 = vst [vmem:[#allocation42_spill] sm:$0xff] %v16454_v39 }
 0x64b   : > { %v16447_v45 = vpop.permute.xlu0 %9056  ;;  %9302 = vrot.lane.b32.xlu1 %v8306_v47, %s18883_s12 }
 0x64c   : > { %19078 = vst [vmem:[#allocation109_spill] sm:$0xff] %v16447_v45 }
 0x64d   : > { %9300 = vrot.lane.b32.xlu0 %v8208_v55, %s18883_s12  ;;  %v16466_v45 = vpop.permute.xlu1 %9094 }
 0x64e   : > { %19081 = vst [vmem:[#allocation56_spill] sm:$0xff] %v16466_v45 }
 0x64f   : > { %v16459_v42 = vpop.permute.xlu0 %9092  ;;  %9306 = vrot.lane.b32.xlu1 %v8502_v5, %s18883_s12 }
 0x650   : > { %19080 = vst [vmem:[#allocation46_spill] sm:$0xff] %v16459_v42 }
 0x651   : > { %9304 = vrot.lane.b32.xlu0 %v8404_v16, %s18883_s12  ;;  %v16478_v42 = vpop.permute.xlu1 %9098 }
 0x652   : > { %19083 = vst [vmem:[#allocation34_spill] sm:$0xff] %v16478_v42  ;;  %v7624_v42 = vcombine.high %v7620_v62, %v18807_v58  ;;  %v7918_v62 = vcombine.high %v7914_v12, %v18807_v58 }
 0x653   : > { %v16471_v39 = vpop.permute.xlu0 %9096  ;;  %9310 = vrot.lane.b32.xlu1 %v8698_v27, %s18883_s12 }
 0x654   : > { %19082 = vst [vmem:[#allocation161_spill] sm:$0xff] %v16471_v39 }
 0x655   : > { %9308 = vrot.lane.b32.xlu0 %v8600_v9, %s18883_s12  ;;  %v16486_v6 = vpop.permute.xlu1 %9102 }
 0x656   : > { %19085 = vst [vmem:[#allocation126_spill] sm:$0xff] %v16486_v6  ;;  %v19126_v6 = vld [vmem:[#allocation132_spill] sm:$0xff] }
 0x657   : > { %v16481_v45 = vpop.permute.xlu0 %9100  ;;  %9314 = vrot.lane.b32.xlu1 %v8894_v22, %s18883_s12 }
 0x658   : > { %19084 = vst [vmem:[#allocation136_spill] sm:$0xff] %v16481_v45 }
 0x659   : > { %9312 = vrot.lane.b32.xlu0 %v8796_v53, %s18883_s12  ;;  %v16494_v33 = vpop.permute.xlu1 %9106 }
 0x65a   : > { %19087 = vst [vmem:[#allocation55_spill] sm:$0xff] %v16494_v33  ;;  %v19125_v33 = vld [vmem:[#allocation112_spill] sm:$0xff] }
 0x65b   : > { %v16489_v39 = vpop.permute.xlu0 %9104  ;;  %9350 = vrot.lane.b32.xlu1 %v7526_v37, %s11313_s28 }
 0x65c   : > { %19086 = vst [vmem:[#allocation163_spill] sm:$0xff] %v16489_v39 }
 0x65d   : > { %9348 = vrot.lane.b32.xlu0 %v7428_v20, %s11313_s28  ;;  %v16502_v19 = vpop.permute.xlu1 %9110  ;;  %v7820_v20 = vcombine.high %v7816_v3, %v18807_v58  ;;  %v8114_v3 = vcombine.high %v8110_v15, %v18807_v58 }
 0x65e   : > { %19089 = vst [vmem:[#allocation139_spill] sm:$0xff] %v16502_v19 }
 0x65f   : > { %v16497_v45 = vpop.permute.xlu0 %9108  ;;  %9354 = vrot.lane.b32.xlu1 %v7722_v10, %s11313_s28  ;;  %v8212_v10 = vcombine.high %v8208_v55, %v18807_v58  ;;  %v8506_v55 = vcombine.high %v8502_v5, %v18807_v58 }
 0x660   : > { %19088 = vst [vmem:[#allocation162_spill] sm:$0xff] %v16497_v45 }
 0x661   : > { %9352 = vrot.lane.b32.xlu0 %v7624_v42, %s11313_s28  ;;  %v16510_v7 = vpop.permute.xlu1 %9114  ;;  %v8016_v42 = vcombine.high %v8012_v60, %v18807_v58  ;;  %v8310_v60 = vcombine.high %v8306_v47, %v18807_v58 }
 0x662   : > { %19091 = vst [vmem:[#allocation40_spill] sm:$0xff] %v16510_v7 }
 0x663   : > { %v16505_v39 = vpop.permute.xlu0 %9112  ;;  %9358 = vrot.lane.b32.xlu1 %v7918_v62, %s11313_s28  ;;  %v8408_v62 = vcombine.high %v8404_v16, %v18807_v58 }
 0x664   : > { %19090 = vst [vmem:[#allocation129_spill] sm:$0xff] %v16505_v39 }
 0x665   : > { %9356 = vrot.lane.b32.xlu0 %v7820_v20, %s11313_s28  ;;  %v16518_v32 = vpop.permute.xlu1 %9118 }
 0x666   : > { %19093 = vst [vmem:[#allocation72_spill] sm:$0xff] %v16518_v32  ;;  %v19100_v32 = vld [vmem:[#allocation13_spill] sm:$0xff] }
 0x667   : > { %v16513_v45 = vpop.permute.xlu0 %9116  ;;  %9362 = vrot.lane.b32.xlu1 %v8114_v3, %s11313_s28  ;;  %v8604_v3 = vcombine.high %v8600_v9, %v18807_v58 }
 0x668   : > { %19092 = vst [vmem:[#allocation169_spill] sm:$0xff] %v16513_v45  ;;  %v19115_v45 = vld [vmem:[#allocation128_spill] sm:$0xff] }
 0x669   : > { %9360 = vrot.lane.b32.xlu0 %v8016_v42, %s11313_s28  ;;  %v16526_v12 = vpop.permute.xlu1 %9122 }
 0x66a   : > { %19095 = vst [vmem:[#allocation48_spill] sm:$0xff] %v16526_v12  ;;  %v19122_v12 = vld [vmem:[#allocation25_spill] sm:$0xff] }
 0x66b   : > { %v16521_v37 = vpop.permute.xlu0 %9120  ;;  %9366 = vrot.lane.b32.xlu1 %v8310_v60, %s11313_s28  ;;  %v8702_v60 = vcombine.high %v8698_v27, %v18807_v58 }
 0x66c   : > { %19094 = vst [vmem:[#allocation167_spill] sm:$0xff] %v16521_v37  ;;  %v19127_v37 = vld [vmem:[#allocation92_spill] sm:$0xff] }
 0x66d   : > { %9364 = vrot.lane.b32.xlu0 %v8212_v10, %s11313_s28  ;;  %v16534_v15 = vpop.permute.xlu1 %9158  ;;  %v19099_v10 = vld [vmem:[#allocation59_spill] sm:$0xff] }
 0x66e   : > { %19097 = vst [vmem:[#allocation145_spill] sm:$0xff] %v16534_v15  ;;  %v16543_v47 = vsel %vm19101_vm8, %v19100_v32, %v19099_v10  ;;  %v8800_v32 = vcombine.high %v8796_v53, %v18807_v58  ;;  %v19107_v10 = vld [vmem:[#allocation57_spill] sm:$0xff]  ;;  %vm19123_vm8 = vmmov %vm19043_vm2 }
 0x66f   : > { %v16529_v20 = vpop.permute.xlu0 %9156  ;;  %9370 = vrot.lane.b32.xlu1 %v8506_v55, %s11313_s28  ;;  %v16552_v5 = vrot.slane %v16543_v47, %v14058_v40  ;;  %v19106_v55 = vld [vmem:[#allocation100_spill] sm:$0xff] }
 0x670   : > { %19096 = vst [vmem:[#allocation41_spill] sm:$0xff] %v16529_v20 }
 0x671   : > { %9368 = vrot.lane.b32.xlu0 %v8408_v62, %s11313_s28  ;;  %v16547_v16 = vpop.permute.xlu1 %9162  ;;  %v19103_v62 = vld [vmem:[#allocation84_spill] sm:$0xff]  ;;  %v16578_v53 = vrot.slane %v16552_v5, %v14071_v50 }
 0x672   : > { %19102 = vst [vmem:[#allocation141_spill] sm:$0xff] %v16547_v16 }
 0x673   : > { %v16537_v42 = vpop.permute.xlu0 %9160  ;;  %9374 = vrot.lane.b32.xlu1 %v8702_v60, %s11313_s28  ;;  %v19111_v60 = vld [vmem:[#allocation93_spill] sm:$0xff]  ;;  %v7474_v1 = vcombine.high %v16578_v53, %v18807_v58 }
 0x674   : > { %19098 = vst [vmem:[#allocation124_spill] sm:$0xff] %v16537_v42  ;;  %v19104_v42 = vld [vmem:[#allocation27_spill] sm:$0xff] }
 0x675   : > { %9372 = vrot.lane.b32.xlu0 %v8604_v3, %s11313_s28  ;;  %v16557_v9 = vsel %vm19043_vm2, %v19104_v42, %v19103_v62  ;;  %v16565_v3 = vsel %vm19108_vm9, %v19107_v10, %v19106_v55  ;;  %v16573_v16 = vpop.permute.xlu1 %9166  ;;  %v8898_v42 = vcombine.high %v8894_v22, %v18807_v58  ;;  %v19110_v55 = vld [vmem:[#allocation60_spill] sm:$0xff]  ;;  %vm19135_vm9 = vmmov %vm19043_vm2 }
 0x676   : > { %v16571_v27 = vrot.slane %v16557_v9, %v14058_v40  ;;  %19109 = vst [vmem:[#allocation170_spill] sm:$0xff] %v16573_v16  ;;  %v16582_v62 = vrot.slane %v16565_v3, %v14058_v40  ;;  %v19116_v22 = vld [vmem:[#allocation108_spill] sm:$0xff] }
 0x677   : > { %v16559_v15 = vpop.permute.xlu0 %9164  ;;  %v16596_v20 = vsel %vm19117_vm7, %v19116_v22, %v19115_v45  ;;  %9378 = vrot.lane.b32.xlu1 %v8898_v42, %s11313_s28  ;;  %v19121_v22 = vld [vmem:[#allocation65_spill] sm:$0xff]  ;;  %vm19144_vm7 = vmmov %vm19043_vm2 }
 0x678   : > { %19105 = vst [vmem:[#allocation64_spill] sm:$0xff] %v16559_v15  ;;  %v19114_v15 = vld [vmem:[#allocation102_spill] sm:$0xff]  ;;  %v16603_v7 = vrot.slane %v16571_v27, %v14071_v50  ;;  %v16615_v45 = vrot.slane %v16582_v62, %v14071_v50  ;;  %v16619_v42 = vrot.slane %v16596_v20, %v14058_v40  ;;  %v16624_v39 = vsel %vm19123_vm8, %v19122_v12, %v19121_v22  ;;  %v19130_v12 = vld [vmem:[#allocation155_spill] sm:$0xff]  ;;  %vm19147_vm8 = vmmov %vm19043_vm2 }
 0x679   : > { %9376 = vrot.lane.b32.xlu0 %v8800_v32, %s11313_s28  ;;  %v16587_v32 = vsel %vm19112_vm13, %v19111_v60, %v19110_v55  ;;  %v7023_v16 = vadd.f32 %v19114_v15, %v14769_v2  ;;  %v16609_v60 = vpop.permute.xlu1 %9170  ;;  %v19119_v2 = vld [vmem:[#allocation71_spill] sm:$0xff]  ;;  %v19120_v15 = vld [vmem:[#allocation154_spill] sm:$0xff]  ;;  %vm19139_vm13 = vmmov %vm19043_vm2 }
 0x67a   : > { %v16607_v55 = vrot.slane %v16587_v32, %v14058_v40  ;;  %19118 = vst [vmem:[#allocation164_spill] sm:$0xff] %v16609_v60  ;;  %v7670_v38 = vcombine.high %v16615_v45, %v18807_v58 }
 0x67b   : > { %v16589_v10 = vpop.permute.xlu0 %9168  ;;  %v7067_v60 = vadd.f32 %v7023_v16, %v19125_v33  ;;  %9414 = vrot.lane.b32.xlu1 %v16603_v7, %s11298_s14  ;;  %v16654_v16 = vrot.slane %v16619_v42, %v14071_v50 }
 0x67c   : > { %19113 = vst [vmem:[#allocation111_spill] sm:$0xff] %v16589_v10  ;;  %v7025_v10 = vadd.f32 %v19120_v15, %v19119_v2  ;;  %v7027_v2 = vadd.f32 %v19127_v37, %v19126_v6  ;;  %v19128_v15 = vld [vmem:[#allocation37_spill] sm:$0xff]  ;;  %v16647_v6 = vrot.slane %v16624_v39, %v14058_v40 }
 0x67d   : > { %9412 = vrot.lane.b32.xlu0 %v16578_v53, %s11298_s14  ;;  %v16634_v54 = vsel %vm19043_vm2, %v19129_v14, %v19128_v15  ;;  %v7099_v22 = vadd.f32 %v19130_v12, %v7067_v60  ;;  %v16649_v33 = vpop.permute.xlu1 %9174  ;;  %v19132_v14 = vld [vmem:[#allocation67_spill] sm:$0xff]  ;;  %v19133_v60 = vld [vmem:[#allocation70_spill] sm:$0xff] }
 0x67e   : > { %19131 = vst [vmem:[#allocation168_spill] sm:$0xff] %v16649_v33  ;;  %v7069_v37 = vadd.f32 %v7025_v10, %v19132_v14  ;;  %v16658_v15 = vrot.slane %v16634_v54, %v14058_v40  ;;  %v19134_v12 = vld [vmem:[#allocation143_spill] sm:$0xff]  ;;  %v7071_v52 = vadd.f32 %v7027_v2, %v19137_v46  ;;  %v19138_v33 = vld [vmem:[#allocation66_spill] sm:$0xff] }
 0x67f   : > { %v16626_v19 = vpop.permute.xlu0 %9172  ;;  %v16663_v36 = vsel %vm19135_vm9, %v19134_v12, %v19133_v60  ;;  %v16670_v10 = vsel %vm19139_vm13, %v7099_v22, %v19138_v33  ;;  %v19140_v14 = vld [vmem:[#allocation159_spill] sm:$0xff]  ;;  %v16680_v60 = vrot.slane %v16647_v6, %v14071_v50  ;;  %v19146_v12 = vld [vmem:[#allocation53_spill] sm:$0xff]  ;;  %vm19153_vm9 = vmmov %vm19043_vm2 }
 0x680   : > { %19124 = vst [vmem:[#allocation35_spill] sm:$0xff] %v16626_v19  ;;  %v16643_v19 = vrot.slane %v16607_v55, %v14071_v50  ;;  %v7101_v21 = vadd.f32 %v19140_v14, %v7069_v37  ;;  %v7103_v49 = vadd.f32 %v19141_v17, %v7071_v52  ;;  %v16684_v46 = vrot.slane %v16663_v36, %v14058_v40  ;;  %v19143_v37 = vld [vmem:[#allocation79_spill] sm:$0xff]  ;;  %vm19156_vm13 = vmmov %vm19043_vm2 }
 0x681   : > { %9416 = vrot.lane.b32.xlu0 %v16615_v45, %s11298_s14  ;;  %v16686_v2 = vpop.permute.xlu1 %9178  ;;  %v16690_v22 = vrot.slane %v16658_v15, %v14071_v50  ;;  %v16694_v33 = vrot.slane %v16670_v10, %v14058_v40  ;;  %v16734_v8 = vsel %vm19153_vm9, %v19152_v0, %v16148_v35  ;;  %v19155_v35 = vld [vmem:[#allocation104_spill] sm:$0xff]  ;;  %v7964_v45 = vcombine.high %v16680_v60, %v18807_v58 }
 0x682   : > { %9418 = vrot.lane.b32.xlu1 %v16643_v19, %s11298_s14  ;;  %19142 = vst [vmem:[#allocation147_spill] sm:$0xff] %v16686_v2  ;;  %v16698_v52 = vsel %vm19144_vm7, %v7101_v21, %v19143_v37  ;;  %v16704_v14 = vsel %vm19147_vm8, %v7103_v49, %v19146_v12  ;;  %v8137_v2 = vrot.slane %v16684_v46, %v14071_v50  ;;  %v19149_v12 = vld [vmem:[#allocation74_spill] sm:$0xff]  ;;  %vm19159_vm7 = vmmov %vm19043_vm2 }
 0x683   : > { %v16665_v43 = vpop.permute.xlu0 %9176  ;;  %v8235_v37 = vrot.slane %v16694_v33, %v14071_v50  ;;  %v16722_v49 = vrot.slane %v16704_v14, %v14058_v40  ;;  %v16750_v0 = vrot.slane %v16734_v8, %v14058_v40  ;;  %v16762_v63 = vsel %vm19159_vm7, %v19158_v44, %v16168_v34  ;;  %v19161_v44 = vld [vmem:[#allocation88_spill] sm:$0xff]  ;;  %vm19162_vm8 = vmmov %vm19043_vm2 }
 0x684   : > { %19136 = vst [vmem:[#allocation51_spill] sm:$0xff] %v16665_v43  ;;  %v16714_v43 = vrot.slane %v16698_v52, %v14058_v40  ;;  %v16778_v34 = vrot.slane %v16762_v63, %v14058_v40  ;;  %v7768_v53 = vcombine.high %v16643_v19, %v18807_v58 }
 0x685   : > { %9420 = vrot.lane.b32.xlu0 %v16654_v16, %s11298_s14  ;;  %v16716_v21 = vpop.permute.xlu1 %9182 }
 0x686   : > { %9422 = vrot.lane.b32.xlu1 %v16680_v60, %s11298_s14  ;;  %19148 = vst [vmem:[#allocation142_spill] sm:$0xff] %v16716_v21  ;;  %v8333_v21 = vrot.slane %v16714_v43, %v14071_v50  ;;  %v8823_v28 = vrot.slane %v16778_v34, %v14071_v50 }
 0x687   : > { %v16700_v17 = vpop.permute.xlu0 %9180 }
 0x688   : > { %19145 = vst [vmem:[#allocation28_spill] sm:$0xff] %v16700_v17  ;;  %v19150_v17 = vld [vmem:[#allocation165_spill] sm:$0xff]  ;;  %v8356_v60 = vcombine.high %v8333_v21, %v18807_v58 }
 0x689   : > { %9424 = vrot.lane.b32.xlu0 %v16690_v22, %s11298_s14  ;;  %v16727_v23 = vsel %vm19043_vm2, %v19150_v17, %v19149_v12  ;;  %v16744_v17 = vpop.permute.xlu1 %9186  ;;  %v8431_v12 = vrot.slane %v16722_v49, %v14071_v50  ;;  %vm19247_vm2 = vcmask 64512  }
 0x68a   : > { %9426 = vrot.lane.b32.xlu1 %v8137_v2, %s11298_s14  ;;  %v16742_v24 = vrot.slane %v16727_v23, %v14058_v40  ;;  %19154 = vst [vmem:[#allocation69_spill] sm:$0xff] %v16744_v17  ;;  %vm19253_vm9 = vmmov %vm19247_vm2 }
 0x68b   : > { %v16729_v25 = vpop.permute.xlu0 %9184  ;;  %vm19261_vm7 = vmmov %vm19247_vm2 }
 0x68c   : > { %19151 = vst [vmem:[#allocation118_spill] sm:$0xff] %v16729_v25  ;;  %v16755_v25 = vsel %vm19156_vm13, %v19155_v35, %v16156_v29  ;;  %v8529_v17 = vrot.slane %v16742_v24, %v14071_v50  ;;  %v8627_v35 = vrot.slane %v16750_v0, %v14071_v50  ;;  %vm19257_vm13 = vmmov %vm19247_vm2 }
 0x68d   : > { %9428 = vrot.lane.b32.xlu0 %v8235_v37, %s11298_s14  ;;  %v16770_v18 = vrot.slane %v16755_v25, %v14058_v40  ;;  %v16772_v29 = vpop.permute.xlu1 %9222  ;;  %vm19282_vm0 = vmmov %vm19247_vm2 }
 0x68e   : > { %9430 = vrot.lane.b32.xlu1 %v8333_v21, %s11298_s14  ;;  %19160 = vst [vmem:[#allocation135_spill] sm:$0xff] %v16772_v29 }
 0x68f   : > { %v16757_v11 = vpop.permute.xlu0 %9220  ;;  %v8725_v29 = vrot.slane %v16770_v18, %v14071_v50 }
 0x690   : > { %19157 = vst [vmem:[#allocation149_spill] sm:$0xff] %v16757_v11  ;;  %v16783_v11 = vsel %vm19162_vm8, %v19161_v44, %v16194_v59  ;;  %vm19265_vm8 = vmmov %vm19247_vm2 }
 0x691   : > { %9432 = vrot.lane.b32.xlu0 %v8431_v12, %s11298_s14  ;;  %v16793_v56 = vrot.slane %v16783_v11, %v14058_v40  ;;  %v16795_v48 = vpop.permute.xlu1 %9226  ;;  %v8748_v21 = vcombine.high %v8725_v29, %v18807_v58 }
 0x692   : > { %9434 = vrot.lane.b32.xlu1 %v8529_v17, %s11298_s14  ;;  %19164 = vst [vmem:[#allocation61_spill] sm:$0xff] %v16795_v48 }
 0x693   : > { %v16785_v13 = vpop.permute.xlu0 %9224  ;;  %v8921_v44 = vrot.slane %v16793_v56, %v14071_v50 }
 0x694   : > { %19163 = vst [vmem:[#allocation172_spill] sm:$0xff] %v16785_v13 }
 0x695   : > { %9436 = vrot.lane.b32.xlu0 %v8627_v35, %s11298_s14  ;;  %v16805_v13 = vpop.permute.xlu1 %9230 }
 0x696   : > { %9438 = vrot.lane.b32.xlu1 %v8725_v29, %s11298_s14  ;;  %19166 = vst [vmem:[#allocation7_spill] sm:$0xff] %v16805_v13  ;;  %v8899_v13 = vcombine.high %v16783_v11, %v18807_v58 }
 0x697   : > { %v16799_v59 = vpop.permute.xlu0 %9228 }
 0x698   : > { %19165 = vst [vmem:[#allocation44_spill] sm:$0xff] %v16799_v59  ;;  %v7572_v59 = vcombine.high %v16603_v7, %v18807_v58  ;;  %v17211_v11 = vrot.slane %v8899_v13, %v14058_v40 }
 0x699   : > { %9440 = vrot.lane.b32.xlu0 %v8823_v28, %s11298_s14  ;;  %v16815_v48 = vpop.permute.xlu1 %9234 }
 0x69a   : > { %9442 = vrot.lane.b32.xlu1 %v8921_v44, %s11298_s14  ;;  %19168 = vst [vmem:[#allocation77_spill] sm:$0xff] %v16815_v48 }
 0x69b   : > { %v16809_v31 = vpop.permute.xlu0 %9232 }
 0x69c   : > { %19167 = vst [vmem:[#allocation153_spill] sm:$0xff] %v16809_v31 }
 0x69d   : > { %9476 = vrot.lane.b32.xlu0 %v7474_v1, %s11300_s15  ;;  %v16825_v31 = vpop.permute.xlu1 %9238  ;;  %v7866_v1 = vcombine.high %v16654_v16, %v18807_v58  ;;  %v8160_v16 = vcombine.high %v8137_v2, %v18807_v58  ;;  %v8552_v2 = vcombine.high %v8529_v17, %v18807_v58 }
 0x69e   : > { %9478 = vrot.lane.b32.xlu1 %v7572_v59, %s11300_s15  ;;  %19170 = vst [vmem:[#allocation151_spill] sm:$0xff] %v16825_v31 }
 0x69f   : > { %v16819_v30 = vpop.permute.xlu0 %9236 }
 0x6a0   : > { %19169 = vst [vmem:[#allocation148_spill] sm:$0xff] %v16819_v30 }
 0x6a1   : > { %9480 = vrot.lane.b32.xlu0 %v7670_v38, %s11300_s15  ;;  %v16835_v59 = vpop.permute.xlu1 %9242  ;;  %v8062_v38 = vcombine.high %v16690_v22, %v18807_v58 }
 0x6a2   : > { %9482 = vrot.lane.b32.xlu1 %v7768_v53, %s11300_s15  ;;  %19172 = vst [vmem:[#allocation43_spill] sm:$0xff] %v16835_v59  ;;  %v8258_v53 = vcombine.high %v8235_v37, %v18807_v58 }
 0x6a3   : > { %v16829_v7 = vpop.permute.xlu0 %9240 }
 0x6a4   : > { %19171 = vst [vmem:[#allocation14_spill] sm:$0xff] %v16829_v7 }
 0x6a5   : > { %9484 = vrot.lane.b32.xlu0 %v7866_v1, %s11300_s15  ;;  %v16844_v7 = vpop.permute.xlu1 %9246 }
 0x6a6   : > { %9486 = vrot.lane.b32.xlu1 %v7964_v45, %s11300_s15  ;;  %19174 = vst [vmem:[#allocation76_spill] sm:$0xff] %v16844_v7  ;;  %v8454_v45 = vcombine.high %v8431_v12, %v18807_v58 }
 0x6a7   : > { %v16839_v19 = vpop.permute.xlu0 %9244 }
 0x6a8   : > { %19173 = vst [vmem:[#allocation173_spill] sm:$0xff] %v16839_v19 }
 0x6a9   : > { %9488 = vrot.lane.b32.xlu0 %v8062_v38, %s11300_s15  ;;  %v16852_v22 = vpop.permute.xlu1 %9250  ;;  %v8650_v38 = vcombine.high %v8627_v35, %v18807_v58  ;;  %v7542_v35 = vcombine.high %v16571_v27, %v18807_v58  ;;  %v7738_v27 = vcombine.high %v16607_v55, %v18807_v58 }
 0x6aa   : > { %9490 = vrot.lane.b32.xlu1 %v8160_v16, %s11300_s15 }
 0x6ab   : > { %v16847_v1 = vpop.permute.xlu0 %9248 }
 0x6ad   : > { %9492 = vrot.lane.b32.xlu0 %v8258_v53, %s11300_s15  ;;  %v16860_v37 = vpop.permute.xlu1 %9286  ;;  %v7444_v53 = vcombine.high %v16552_v5, %v18807_v58  ;;  %v7640_v5 = vcombine.high %v16582_v62, %v18807_v58 }
 0x6ae   : > { %9494 = vrot.lane.b32.xlu1 %v8356_v60, %s11300_s15  ;;  %v8846_v60 = vcombine.high %v8823_v28, %v18807_v58 }
 0x6af   : > { %v16855_v19 = vpop.permute.xlu0 %9284  ;;  %v16883_v29 = vrot.slane %v7444_v53, %v14071_v50  ;;  %v7836_v53 = vcombine.high %v16619_v42, %v18807_v58 }
 0x6b1   : > { %9496 = vrot.lane.b32.xlu0 %v8454_v45, %s11300_s15  ;;  %v16868_v12 = vpop.permute.xlu1 %9290  ;;  %v8944_v45 = vcombine.high %v8921_v44, %v18807_v58  ;;  %v7850_v55 = vrot.slane %v7836_v53, %v14071_v50  ;;  %v8228_v53 = vcombine.high %v16694_v33, %v18807_v58 }
 0x6b2   : > { %9498 = vrot.lane.b32.xlu1 %v8552_v2, %s11300_s15  ;;  %19175 = vst [vmem:[#allocation45_spill] sm:$0xff] %v16868_v12 }
 0x6b3   : > { %v16863_v16 = vpop.permute.xlu0 %9288 }
 0x6b5   : > { %9500 = vrot.lane.b32.xlu0 %v8650_v38, %s11300_s15  ;;  %v16880_v2 = vpop.permute.xlu1 %9294  ;;  %v7556_v38 = vrot.slane %v7542_v35, %v14071_v50  ;;  %v7934_v35 = vcombine.high %v16647_v6, %v18807_v58 }
 0x6b6   : > { %9502 = vrot.lane.b32.xlu1 %v8748_v21, %s11300_s15  ;;  %19177 = vst [vmem:[#allocation15_spill] sm:$0xff] %v16880_v2  ;;  %v7654_v21 = vrot.slane %v7640_v5, %v14071_v50  ;;  %v8032_v5 = vcombine.high %v16658_v15, %v18807_v58 }
 0x6b7   : > { %v16873_v17 = vpop.permute.xlu0 %9292  ;;  %v7948_v42 = vrot.slane %v7934_v35, %v14071_v50  ;;  %v8326_v35 = vcombine.high %v16714_v43, %v18807_v58 }
 0x6b8   : > { %19176 = vst [vmem:[#allocation6_spill] sm:$0xff] %v16873_v17  ;;  %v8046_v6 = vrot.slane %v8032_v5, %v14071_v50  ;;  %v8424_v5 = vcombine.high %v16722_v49, %v18807_v58  ;;  %v7671_v2 = vcombine.high %v7654_v21, %v18807_v58 }
 0x6b9   : > { %9504 = vrot.lane.b32.xlu0 %v8846_v60, %s11300_s15  ;;  %v16895_v44 = vpop.permute.xlu1 %9298  ;;  %v7752_v60 = vrot.slane %v7738_v27, %v14071_v50  ;;  %v8130_v27 = vcombine.high %v16684_v46, %v18807_v58  ;;  %v8242_v46 = vrot.slane %v8228_v53, %v14071_v50  ;;  %v8340_v33 = vrot.slane %v8326_v35, %v14071_v50 }
 0x6ba   : > { %9506 = vrot.lane.b32.xlu1 %v8944_v45, %s11300_s15  ;;  %19179 = vst [vmem:[#allocation62_spill] sm:$0xff] %v16895_v44  ;;  %v8438_v43 = vrot.slane %v8424_v5, %v14071_v50  ;;  %v8620_v53 = vcombine.high %v16750_v0, %v18807_v58  ;;  %v8718_v35 = vcombine.high %v16770_v18, %v18807_v58 }
 0x6bb   : > { %v16887_v28 = vpop.permute.xlu0 %9296  ;;  %v8144_v15 = vrot.slane %v8130_v27, %v14071_v50  ;;  %v8522_v27 = vcombine.high %v16742_v24, %v18807_v58  ;;  %v8816_v5 = vcombine.high %v16778_v34, %v18807_v58 }
 0x6bc   : > { %19178 = vst [vmem:[#allocation52_spill] sm:$0xff] %v16887_v28  ;;  %v8634_v24 = vrot.slane %v8620_v53, %v14071_v50  ;;  %v8732_v0 = vrot.slane %v8718_v35, %v14071_v50  ;;  %v7475_v35 = vcombine.high %v16883_v29, %v18807_v58 }
 0x6bd   : > { %9540 = vrot.lane.b32.xlu0 %v16883_v29, %s11301_s16  ;;  %v16907_v45 = vpop.permute.xlu1 %9302  ;;  %v8536_v49 = vrot.slane %v8522_v27, %v14071_v50  ;;  %v8914_v27 = vcombine.high %v16793_v56, %v18807_v58  ;;  %v8830_v18 = vrot.slane %v8816_v5, %v14071_v50  ;;  %v7573_v5 = vcombine.high %v7556_v38, %v18807_v58 }
 0x6be   : > { %9542 = vrot.lane.b32.xlu1 %v7556_v38, %s11301_s16  ;;  %19181 = vst [vmem:[#allocation85_spill] sm:$0xff] %v16907_v45  ;;  %v7769_v29 = vcombine.high %v7752_v60, %v18807_v58 }
 0x6bf   : > { %v16900_v62 = vpop.permute.xlu0 %9300  ;;  %v8928_v34 = vrot.slane %v8914_v27, %v14071_v50 }
 0x6c0   : > { %19180 = vst [vmem:[#allocation83_spill] sm:$0xff] %v16900_v62 }
 0x6c1   : > { %9544 = vrot.lane.b32.xlu0 %v7654_v21, %s11301_s16  ;;  %v16919_v59 = vpop.permute.xlu1 %9306  ;;  %v7965_v21 = vcombine.high %v7948_v42, %v18807_v58 }
 0x6c2   : > { %9546 = vrot.lane.b32.xlu1 %v7752_v60, %s11301_s16  ;;  %19183 = vst [vmem:[#allocation63_spill] sm:$0xff] %v16919_v59 }
 0x6c3   : > { %v16912_v7 = vpop.permute.xlu0 %9304 }
 0x6c4   : > { %19182 = vst [vmem:[#allocation94_spill] sm:$0xff] %v16912_v7 }
 0x6c5   : > { %9548 = vrot.lane.b32.xlu0 %v7850_v55, %s11301_s16  ;;  %v16931_v7 = vpop.permute.xlu1 %9310 }
 0x6c6   : > { %9550 = vrot.lane.b32.xlu1 %v7948_v42, %s11301_s16  ;;  %19185 = vst [vmem:[#allocation8_spill] sm:$0xff] %v16931_v7 }
 0x6c7   : > { %v16924_v45 = vpop.permute.xlu0 %9308 }
 0x6c8   : > { %19184 = vst [vmem:[#allocation36_spill] sm:$0xff] %v16924_v45 }
 0x6c9   : > { %9552 = vrot.lane.b32.xlu0 %v8046_v6, %s11301_s16  ;;  %v16943_v45 = vpop.permute.xlu1 %9314 }
 0x6ca   : > { %9554 = vrot.lane.b32.xlu1 %v8144_v15, %s11301_s16 }
 0x6cb   : > { %v16936_v59 = vpop.permute.xlu0 %9312 }
 0x6cd   : > { %9556 = vrot.lane.b32.xlu0 %v8242_v46, %s11301_s16  ;;  %v16955_v31 = vpop.permute.xlu1 %9350 }
 0x6ce   : > { %9558 = vrot.lane.b32.xlu1 %v8340_v33, %s11301_s16 }
 0x6cf   : > { %v16948_v7 = vpop.permute.xlu0 %9348 }
 0x6d1   : > { %9560 = vrot.lane.b32.xlu0 %v8438_v43, %s11301_s16  ;;  %v16967_v44 = vpop.permute.xlu1 %9354 }
 0x6d2   : > { %9562 = vrot.lane.b32.xlu1 %v8536_v49, %s11301_s16  ;;  %19186 = vst [vmem:[#allocation110_spill] sm:$0xff] %v16967_v44 }
 0x6d3   : > { %v16960_v62 = vpop.permute.xlu0 %9352 }
 0x6d5   : > { %9564 = vrot.lane.b32.xlu0 %v8634_v24, %s11301_s16  ;;  %v16975_v53 = vpop.permute.xlu1 %9358 }
 0x6d6   : > { %9566 = vrot.lane.b32.xlu1 %v8732_v0, %s11301_s16  ;;  %19188 = vst [vmem:[#allocation12_spill] sm:$0xff] %v16975_v53  ;;  %v8801_v53 = vcombine.high %v16762_v63, %v18807_v58 }
 0x6d7   : > { %v16970_v30 = vpop.permute.xlu0 %9356 }
 0x6d8   : > { %19187 = vst [vmem:[#allocation18_spill] sm:$0xff] %v16970_v30 }
 0x6d9   : > { %9568 = vrot.lane.b32.xlu0 %v8830_v18, %s11301_s16  ;;  %v16983_v56 = vpop.permute.xlu1 %9362 }
 0x6da   : > { %9570 = vrot.lane.b32.xlu1 %v8928_v34, %s11301_s16  ;;  %19190 = vst [vmem:[#allocation97_spill] sm:$0xff] %v16983_v56  ;;  %v8605_v56 = vcombine.high %v16734_v8, %v18807_v58 }
 0x6db   : > { %v16977_v48 = vpop.permute.xlu0 %9360 }
 0x6dc   : > { %19189 = vst [vmem:[#allocation121_spill] sm:$0xff] %v16977_v48 }
 0x6dd   : > { %9604 = vrot.lane.b32.xlu0 %v7475_v35, %s11306_s21  ;;  %v16991_v27 = vpop.permute.xlu1 %9366  ;;  %v7867_v35 = vcombine.high %v7850_v55, %v18807_v58  ;;  %v8161_v55 = vcombine.high %v8144_v15, %v18807_v58 }
 0x6de   : > { %9606 = vrot.lane.b32.xlu1 %v7573_v5, %s11306_s21  ;;  %19192 = vst [vmem:[#allocation115_spill] sm:$0xff] %v16991_v27 }
 0x6df   : > { %v16986_v28 = vpop.permute.xlu0 %9364 }
 0x6e0   : > { %19191 = vst [vmem:[#allocation11_spill] sm:$0xff] %v16986_v28 }
 0x6e1   : > { %9608 = vrot.lane.b32.xlu0 %v7671_v2, %s11306_s21  ;;  %v16999_v38 = vpop.permute.xlu1 %9370  ;;  %v8063_v2 = vcombine.high %v8046_v6, %v18807_v58  ;;  %v8357_v6 = vcombine.high %v8340_v33, %v18807_v58  ;;  %v7527_v33 = vcombine.high %v16557_v9, %v18807_v58 }
 0x6e2   : > { %9610 = vrot.lane.b32.xlu1 %v7769_v29, %s11306_s21  ;;  %19194 = vst [vmem:[#allocation54_spill] sm:$0xff] %v16999_v38  ;;  %v8259_v29 = vcombine.high %v8242_v46, %v18807_v58  ;;  %v8553_v46 = vcombine.high %v8536_v49, %v18807_v58 }
 0x6e3   : > { %v16994_v48 = vpop.permute.xlu0 %9368  ;;  %v17049_v9 = vrot.slane %v7527_v33, %v14058_v40  ;;  %v7919_v33 = vcombine.high %v16624_v39, %v18807_v58 }
 0x6e4   : > { %19193 = vst [vmem:[#allocation152_spill] sm:$0xff] %v16994_v48  ;;  %v8213_v48 = vcombine.high %v16670_v10, %v18807_v58 }
 0x6e5   : > { %9612 = vrot.lane.b32.xlu0 %v7867_v35, %s11306_s21  ;;  %v17007_v60 = vpop.permute.xlu1 %9374 }
 0x6e6   : > { %9614 = vrot.lane.b32.xlu1 %v7965_v21, %s11306_s21  ;;  %19196 = vst [vmem:[#allocation78_spill] sm:$0xff] %v17007_v60  ;;  %v8455_v21 = vcombine.high %v8438_v43, %v18807_v58 }
 0x6e7   : > { %v17002_v28 = vpop.permute.xlu0 %9372 }
 0x6e8   : > { %19195 = vst [vmem:[#allocation9_spill] sm:$0xff] %v17002_v28 }
 0x6e9   : > { %9616 = vrot.lane.b32.xlu0 %v8063_v2, %s11306_s21  ;;  %v17015_v42 = vpop.permute.xlu1 %9378  ;;  %v7429_v2 = vcombine.high %v16543_v47, %v18807_v58  ;;  %v7625_v47 = vcombine.high %v16565_v3, %v18807_v58 }
 0x6ea   : > { %9618 = vrot.lane.b32.xlu1 %v8161_v55, %s11306_s21 }
 0x6eb   : > { %v17010_v5 = vpop.permute.xlu0 %9376  ;;  %v17039_v49 = vrot.slane %v7429_v2, %v14058_v40  ;;  %v8945_v2 = vcombine.high %v8928_v34, %v18807_v58 }
 0x6ed   : > { %9620 = vrot.lane.b32.xlu0 %v8259_v29, %s11306_s21  ;;  %v17023_v15 = vpop.permute.xlu1 %9414  ;;  %v8651_v29 = vcombine.high %v8634_v24, %v18807_v58  ;;  %v8847_v24 = vcombine.high %v8830_v18, %v18807_v58  ;;  %v17058_v3 = vrot.slane %v17039_v49, %v14071_v50  ;;  %v17061_v18 = vrot.slane %v7625_v47, %v14058_v40 }
 0x6ee   : > { %9622 = vrot.lane.b32.xlu1 %v8357_v6, %s11306_s21  ;;  %v8749_v6 = vcombine.high %v8732_v0, %v18807_v58  ;;  %v7723_v0 = vcombine.high %v16587_v32, %v18807_v58  ;;  %v17072_v32 = vrot.slane %v17049_v9, %v14071_v50 }
 0x6ef   : > { %v17018_v35 = vpop.permute.xlu0 %9412 }
 0x6f0   : > { %v17075_v34 = vrot.slane %v7723_v0, %v14058_v40  ;;  %v17101_v0 = vrot.slane %v7919_v33, %v14058_v40  ;;  %v7574_v12 = vcombine.high %v17072_v32, %v18807_v58 }
 0x6f1   : > { %9624 = vrot.lane.b32.xlu0 %v8455_v21, %s11306_s21 }
 0x6f2   : > { %9626 = vrot.lane.b32.xlu1 %v8553_v46, %s11306_s21  ;;  %v17098_v39 = vrot.slane %v17075_v34, %v14071_v50 }
 0x6f3   : > { %v17028_v55 = vpop.permute.xlu0 %9416 }
 0x6f4   : > { %v17035_v43 = vpop.permute.xlu1 %9418 }
 0x6f5   : > { %9628 = vrot.lane.b32.xlu0 %v8651_v29, %s11306_s21  ;;  %19197 = vst [vmem:[#allocation114_spill] sm:$0xff] %v17035_v43  ;;  %v7821_v29 = vcombine.high %v16596_v20, %v18807_v58  ;;  %v17083_v20 = vrot.slane %v17061_v18, %v14071_v50  ;;  %v17200_v43 = vrot.slane %v8801_v53, %v14058_v40 }
 0x6f6   : > { %9630 = vrot.lane.b32.xlu1 %v8749_v6, %s11306_s21 }
 0x6f7   : > { %v17043_v21 = vpop.permute.xlu0 %9420  ;;  %v17217_v17 = vrot.slane %v17200_v43, %v14071_v50 }
 0x6f8   : > { %19198 = vst [vmem:[#allocation123_spill] sm:$0xff] %v17043_v21  ;;  %v17053_v46 = vpop.permute.xlu1 %9422 }
 0x6f9   : > { %9632 = vrot.lane.b32.xlu0 %v8847_v24, %s11306_s21  ;;  %19199 = vst [vmem:[#allocation5_spill] sm:$0xff] %v17053_v46  ;;  %v17086_v24 = vrot.slane %v7821_v29, %v14058_v40  ;;  %v8115_v29 = vcombine.high %v16663_v36, %v18807_v58  ;;  %v17124_v36 = vrot.slane %v17101_v0, %v14071_v50 }
 0x6fa   : > { %9634 = vrot.lane.b32.xlu1 %v8945_v2, %s11306_s21  ;;  %v8017_v2 = vcombine.high %v16634_v54, %v18807_v58  ;;  %v17180_v46 = vrot.slane %v8605_v56, %v14058_v40 }
 0x6fb   : > { %v17065_v6 = vpop.permute.xlu0 %9424  ;;  %v17109_v54 = vrot.slane %v17086_v24, %v14071_v50  ;;  %v17127_v33 = vrot.slane %v8115_v29, %v14058_v40 }
 0x6fc   : > { %19200 = vst [vmem:[#allocation98_spill] sm:$0xff] %v17065_v6  ;;  %v17079_v47 = vpop.permute.xlu1 %9426  ;;  %v17112_v38 = vrot.slane %v8017_v2, %v14058_v40  ;;  %v8311_v2 = vcombine.high %v16698_v52, %v18807_v58  ;;  %v8642_v63 = vrot.slane %v17180_v46, %v14071_v50 }
 0x6fd   : > { %9668 = vrot.lane.b32.xlu0 %v17058_v3, %s11302_s17  ;;  %19201 = vst [vmem:[#allocation86_spill] sm:$0xff] %v17079_v47  ;;  %v8152_v52 = vrot.slane %v17127_v33, %v14071_v50 }
 0x6fe   : > { %9670 = vrot.lane.b32.xlu1 %v17072_v32, %s11302_s17  ;;  %v17135_v10 = vrot.slane %v17112_v38, %v14071_v50  ;;  %v17151_v29 = vrot.slane %v8311_v2, %v14058_v40 }
 0x6ff   : > { %v17090_v60 = vpop.permute.xlu0 %9428 }
 0x700   : > { %19202 = vst [vmem:[#allocation47_spill] sm:$0xff] %v17090_v60  ;;  %v17105_v28 = vpop.permute.xlu1 %9430  ;;  %v8409_v60 = vcombine.high %v16704_v14, %v18807_v58 }
 0x701   : > { %9672 = vrot.lane.b32.xlu0 %v17083_v20, %s11302_s17  ;;  %19203 = vst [vmem:[#allocation10_spill] sm:$0xff] %v17105_v28 }
 0x702   : > { %9674 = vrot.lane.b32.xlu1 %v17098_v39, %s11302_s17 }
 0x703   : > { %v17116_v27 = vpop.permute.xlu0 %9432 }
 0x704   : > { %19204 = vst [vmem:[#allocation144_spill] sm:$0xff] %v17116_v27  ;;  %v17131_v28 = vpop.permute.xlu1 %9434  ;;  %v17138_v27 = vrot.slane %v8213_v48, %v14058_v40  ;;  %v8507_v48 = vcombine.high %v16727_v23, %v18807_v58  ;;  %v8348_v23 = vrot.slane %v17151_v29, %v14071_v50 }
 0x705   : > { %9676 = vrot.lane.b32.xlu0 %v17109_v54, %s11302_s17  ;;  %19205 = vst [vmem:[#allocation106_spill] sm:$0xff] %v17131_v28 }
 0x706   : > { %9678 = vrot.lane.b32.xlu1 %v17124_v36, %s11302_s17  ;;  %v8250_v14 = vrot.slane %v17138_v27, %v14071_v50  ;;  %v17171_v2 = vrot.slane %v8507_v48, %v14058_v40 }
 0x707   : > { %v17142_v47 = vpop.permute.xlu0 %9436 }
 0x708   : > { %19206 = vst [vmem:[#allocation116_spill] sm:$0xff] %v17142_v47  ;;  %v17155_v28 = vpop.permute.xlu1 %9438  ;;  %v17160_v47 = vrot.slane %v8409_v60, %v14058_v40 }
 0x709   : > { %9680 = vrot.lane.b32.xlu0 %v17135_v10, %s11302_s17  ;;  %19207 = vst [vmem:[#allocation160_spill] sm:$0xff] %v17155_v28  ;;  %v8703_v28 = vcombine.high %v16755_v25, %v18807_v58  ;;  %v8544_v25 = vrot.slane %v17171_v2, %v14071_v50 }
 0x70a   : > { %9682 = vrot.lane.b32.xlu1 %v8152_v52, %s11302_s17  ;;  %v8446_v8 = vrot.slane %v17160_v47, %v14071_v50 }
 0x70b   : > { %v17164_v6 = vpop.permute.xlu0 %9440  ;;  %v17191_v48 = vrot.slane %v8703_v28, %v14058_v40 }
 0x70c   : > { %v17175_v60 = vpop.permute.xlu1 %9442 }
 0x70d   : > { %9684 = vrot.lane.b32.xlu0 %v8250_v14, %s11302_s17  ;;  %v17208_v28 = vrot.slane %v17191_v48, %v14071_v50 }
 0x70e   : > { %9686 = vrot.lane.b32.xlu1 %v8348_v23, %s11302_s17 }
 0x70f   : > { %v17184_v21 = vpop.permute.xlu0 %9476 }
 0x710   : > { %v17195_v56 = vpop.permute.xlu1 %9478 }
 0x711   : > { %9688 = vrot.lane.b32.xlu0 %v8446_v8, %s11302_s17  ;;  %19208 = vst [vmem:[#allocation21_spill] sm:$0xff] %v17195_v56 }
 0x712   : > { %9690 = vrot.lane.b32.xlu1 %v8544_v25, %s11302_s17 }
 0x713   : > { %v17202_v30 = vpop.permute.xlu0 %9480 }
 0x714   : > { %19209 = vst [vmem:[#allocation130_spill] sm:$0xff] %v17202_v30  ;;  %v17213_v44 = vpop.permute.xlu1 %9482  ;;  %v17227_v30 = vrot.slane %v17211_v11, %v14071_v50 }
 0x715   : > { %9692 = vrot.lane.b32.xlu0 %v8642_v63, %s11302_s17  ;;  %19210 = vst [vmem:[#allocation80_spill] sm:$0xff] %v17213_v44  ;;  %v7476_v44 = vcombine.high %v17058_v3, %v18807_v58 }
 0x716   : > { %9694 = vrot.lane.b32.xlu1 %v17208_v28, %s11302_s17 }
 0x717   : > { %v17219_v53 = vpop.permute.xlu0 %9484 }
 0x718   : > { %19211 = vst [vmem:[#allocation157_spill] sm:$0xff] %v17219_v53  ;;  %v17229_v40 = vpop.permute.xlu1 %9486 }
 0x719   : > { %9696 = vrot.lane.b32.xlu0 %v17217_v17, %s11302_s17  ;;  %19212 = vst [vmem:[#allocation91_spill] sm:$0xff] %v17229_v40  ;;  %v7672_v40 = vcombine.high %v17083_v20, %v18807_v58 }
 0x71a   : > { %9698 = vrot.lane.b32.xlu1 %v17227_v30, %s11302_s17 }
 0x71b   : > { %v17231_v13 = vpop.permute.xlu0 %9488 }
 0x71c   : > { %19213 = vst [vmem:[#allocation133_spill] sm:$0xff] %v17231_v13  ;;  %v17238_v53 = vpop.permute.xlu1 %9490  ;;  %v7770_v13 = vcombine.high %v17098_v39, %v18807_v58 }
 0x71d   : > { %9732 = vrot.lane.b32.xlu0 %v7476_v44, %s11307_s22  ;;  %19214 = vst [vmem:[#allocation20_spill] sm:$0xff] %v17238_v53  ;;  %v7868_v53 = vcombine.high %v17109_v54, %v18807_v58  ;;  %v8162_v54 = vcombine.high %v8152_v52, %v18807_v58  ;;  %v7459_v52 = vcombine.high %v17039_v49, %v18807_v58 }
 0x71e   : > { %9734 = vrot.lane.b32.xlu1 %v7574_v12, %s11307_s22  ;;  %v7966_v12 = vcombine.high %v17124_v36, %v18807_v58  ;;  %v7949_v49 = vcombine.high %v17101_v0, %v18807_v58 }
 0x71f   : > { %v17242_v56 = vpop.permute.xlu0 %9492  ;;  %v7473_v0 = vrot.slane %v7459_v52, %v14071_v50  ;;  %v8848_v52 = vcombine.high %v17217_v17, %v18807_v58 }
 0x720   : > { %19215 = vst [vmem:[#allocation166_spill] sm:$0xff] %v17242_v56  ;;  %v17248_v3 = vpop.permute.xlu1 %9494  ;;  %v19237_v56 = vld [vmem:[#allocation49_spill] sm:$0xff] }
 0x721   : > { %9736 = vrot.lane.b32.xlu0 %v7672_v40, %s11307_s22  ;;  %19216 = vst [vmem:[#allocation16_spill] sm:$0xff] %v17248_v3  ;;  %v8064_v40 = vcombine.high %v17135_v10, %v18807_v58  ;;  %v8358_v10 = vcombine.high %v8348_v23, %v18807_v58  ;;  %v7753_v23 = vcombine.high %v17075_v34, %v18807_v58  ;;  %v19232_v3 = vld [vmem:[#allocation68_spill] sm:$0xff] }
 0x722   : > { %9738 = vrot.lane.b32.xlu1 %v7770_v13, %s11307_s22  ;;  %v8145_v34 = vcombine.high %v17127_v33, %v18807_v58 }
 0x723   : > { %v17252_v44 = vpop.permute.xlu0 %9496 }
 0x724   : > { %19217 = vst [vmem:[#allocation171_spill] sm:$0xff] %v17252_v44  ;;  %v17258_v32 = vpop.permute.xlu1 %9498  ;;  %v19230_v44 = vld [vmem:[#allocation17_spill] sm:$0xff] }
 0x725   : > { %9740 = vrot.lane.b32.xlu0 %v7868_v53, %s11307_s22  ;;  %19218 = vst [vmem:[#allocation105_spill] sm:$0xff] %v17258_v32  ;;  %v8260_v53 = vcombine.high %v8250_v14, %v18807_v58  ;;  %v7557_v14 = vcombine.high %v17049_v9, %v18807_v58  ;;  %v8652_v9 = vcombine.high %v8642_v63, %v18807_v58 }
 0x726   : > { %9742 = vrot.lane.b32.xlu1 %v7966_v12, %s11307_s22  ;;  %v8456_v12 = vcombine.high %v8446_v8, %v18807_v58  ;;  %v8554_v8 = vcombine.high %v8544_v25, %v18807_v58  ;;  %v8341_v25 = vcombine.high %v17151_v29, %v18807_v58  ;;  %v17322_v29 = vrot.slane %v7753_v23, %v14071_v50 }
 0x727   : > { %v17262_v20 = vpop.permute.xlu0 %9500  ;;  %v17341_v23 = vrot.slane %v8145_v34, %v14071_v50  ;;  %v8635_v34 = vcombine.high %v17180_v46, %v18807_v58 }
 0x728   : > { %19219 = vst [vmem:[#allocation150_spill] sm:$0xff] %v17262_v20  ;;  %v17268_v39 = vpop.permute.xlu1 %9502  ;;  %v17381_v46 = vcombine.high %v17322_v29, %v18807_v58 }
 0x729   : > { %9744 = vrot.lane.b32.xlu0 %v8064_v40, %s11307_s22  ;;  %19220 = vst [vmem:[#allocation59_spill] sm:$0xff] %v17268_v39  ;;  %v7655_v40 = vcombine.high %v17061_v18, %v18807_v58  ;;  %v8047_v18 = vcombine.high %v17112_v38, %v18807_v58  ;;  %v7571_v38 = vrot.slane %v7557_v14, %v14071_v50 }
 0x72a   : > { %9746 = vrot.lane.b32.xlu1 %v8162_v54, %s11307_s22  ;;  %19227 = vst [vmem:[#allocation93_spill] sm:$0xff] %v17381_v46  ;;  %v9910_v46 = vsel %vm556_vm1, %v19232_v3, %v16258_v57  ;;  %v19239_v57 = vld [vmem:[#allocation138_spill] sm:$0xff] }
 0x72b   : > { %v17271_v13 = vpop.permute.xlu0 %9504  ;;  %v7669_v63 = vrot.slane %v7655_v40, %v14071_v50  ;;  %v17334_v40 = vrot.slane %v7949_v49, %v14071_v50  ;;  %v17357_v49 = vcombine.high %v7571_v38, %v18807_v58  ;;  %v19240_v3 = vld [vmem:[#allocation90_spill] sm:$0xff] }
 0x72c   : > { %v17276_v36 = vpop.permute.xlu1 %9506 }
 0x72d   : > { %9748 = vrot.lane.b32.xlu0 %v8260_v53, %s11307_s22  ;;  %v7851_v53 = vcombine.high %v17086_v24, %v18807_v58  ;;  %v8439_v24 = vcombine.high %v17160_v47, %v18807_v58  ;;  %19223 = vst [vmem:[#allocation27_spill] sm:$0xff] %v17357_v49  ;;  %v19235_v49 = vld [vmem:[#allocation87_spill] sm:$0xff] }
 0x72e   : > { %9750 = vrot.lane.b32.xlu1 %v8358_v10, %s11307_s22 }
 0x72f   : > { %v17279_v20 = vpop.permute.xlu0 %9540  ;;  %v17331_v14 = vrot.slane %v7851_v53, %v14071_v50  ;;  %v17351_v17 = vrot.slane %v8439_v24, %v14071_v50  ;;  %v17354_v53 = vcombine.high %v7473_v0, %v18807_v58 }
 0x730   : > { %v17292_v54 = vpop.permute.xlu1 %9542 }
 0x731   : > { %9752 = vrot.lane.b32.xlu0 %v8456_v12, %s11307_s22  ;;  %v8243_v12 = vcombine.high %v17138_v27, %v18807_v58  ;;  %v8750_v27 = vcombine.high %v17208_v28, %v18807_v58  ;;  %v17338_v28 = vrot.slane %v8047_v18, %v14071_v50  ;;  %19222 = vst [vmem:[#allocation84_spill] sm:$0xff] %v17354_v53 }
 0x732   : > { %9754 = vrot.lane.b32.xlu1 %v8554_v8, %s11307_s22  ;;  %v8537_v8 = vcombine.high %v17171_v2, %v18807_v58  ;;  %v17360_v18 = vcombine.high %v7669_v63, %v18807_v58 }
 0x733   : > { %v17299_v10 = vpop.permute.xlu0 %9544  ;;  %v17344_v2 = vrot.slane %v8243_v12, %v14071_v50  ;;  %v8733_v12 = vcombine.high %v17191_v48, %v18807_v58  ;;  %v19229_v48 = vld [vmem:[#allocation101_spill] sm:$0xff] }
 0x734   : > { %v17317_v33 = vpop.permute.xlu1 %9546  ;;  %19224 = vst [vmem:[#allocation100_spill] sm:$0xff] %v17360_v18  ;;  %v17377_v32 = vrot.slane %v8537_v8, %v14071_v50  ;;  %v19231_v18 = vld [vmem:[#allocation81_spill] sm:$0xff] }
 0x735   : > { %9756 = vrot.lane.b32.xlu0 %v8652_v9, %s11307_s22  ;;  %v17347_v9 = vrot.slane %v8341_v25, %v14071_v50  ;;  %v8831_v25 = vcombine.high %v17200_v43, %v18807_v58  ;;  %v17385_v43 = vcombine.high %v17331_v14, %v18807_v58  ;;  %v9911_v8 = vsel %vm556_vm1, %v19231_v18, %v16260_v51  ;;  %v19238_v51 = vld [vmem:[#allocation131_spill] sm:$0xff] }
 0x736   : > { %9758 = vrot.lane.b32.xlu1 %v8750_v27, %s11307_s22  ;;  %v8946_v27 = vcombine.high %v17227_v30, %v18807_v58  ;;  %v9909_v30 = vsel %vm556_vm1, %v19229_v48, %v16232_v26  ;;  %v19234_v26 = vld [vmem:[#allocation113_spill] sm:$0xff]  ;;  %v9914_v18 = vsel %vm556_vm1, %v19238_v51, %v19237_v56  ;;  %v19248_v51 = vld [vmem:[#allocation26_spill] sm:$0xff] }
 0x737   : > { %v17326_v47 = vpop.permute.xlu0 %9548  ;;  %19228 = vst [vmem:[#allocation102_spill] sm:$0xff] %v17385_v43  ;;  %v9912_v48 = vsel %vm556_vm1, %v19234_v26, %v16279_v41  ;;  %v17422_v41 = vrot.slane %v8733_v12, %v14071_v50  ;;  %v19245_v26 = vld [vmem:[#allocation82_spill] sm:$0xff]  ;;  %v19252_v12 = vld [vmem:[#allocation99_spill] sm:$0xff] }
 0x738   : > { %19221 = vst [vmem:[#allocation13_spill] sm:$0xff] %v17326_v47  ;;  %v17368_v24 = vpop.permute.xlu1 %9550  ;;  %v19280_v47 = vld [vmem:[#allocation30_spill] sm:$0xff] }
 0x739   : > { %9760 = vrot.lane.b32.xlu0 %v8848_v52, %s11307_s22  ;;  %19225 = vst [vmem:[#allocation57_spill] sm:$0xff] %v17368_v24  ;;  %v8929_v52 = vcombine.high %v17211_v11, %v18807_v58  ;;  %v9908_v11 = vsel %vm556_vm1, %v19230_v44, %v16219_v4  ;;  %v19233_v58 = vld [vmem:[#allocation73_spill] sm:$0xff]  ;;  %v19236_v4 = vld [vmem:[#allocation103_spill] sm:$0xff]  ;;  %19242 = vst [vmem:[#allocation108_spill] sm:$0xff] %v17422_v41 }
 0x73a   : > { %9762 = vrot.lane.b32.xlu1 %v8946_v27, %s11307_s22  ;;  %v9913_v43 = vsel %vm556_vm1, %v19233_v58, %v16289_v61  ;;  %v9915_v44 = vsel %vm556_vm1, %v19236_v4, %v19235_v49  ;;  %v9917_v27 = vsel %vm556_vm1, %v19240_v3, %v19239_v57  ;;  %v17419_v58 = vrot.slane %v8635_v34, %v14071_v50  ;;  %v19244_v49 = vld [vmem:[#allocation96_spill] sm:$0xff]  ;;  %v19249_v57 = vld [vmem:[#allocation75_spill] sm:$0xff]  ;;  %v19255_v24 = vld [vmem:[#allocation122_spill] sm:$0xff] }
 0x73b   : > { %v17374_v39 = vpop.permute.xlu0 %9552  ;;  %v17425_v61 = vrot.slane %v8831_v25, %v14071_v50  ;;  %v9916_v56 = vsel %vm556_vm1, %v19245_v26, %v19244_v49  ;;  %v9918_v3 = vsel %vm556_vm1, %v19249_v57, %v19248_v51  ;;  %v17438_v34 = vrot.slane %v8929_v52, %v14071_v50  ;;  %v19256_v49 = vld [vmem:[#allocation89_spill] sm:$0xff]  ;;  %v19260_v51 = vld [vmem:[#allocation156_spill] sm:$0xff]  ;;  %v19263_v57 = vld [vmem:[#allocation19_spill] sm:$0xff] }
 0x73c   : > { %19226 = vst [vmem:[#allocation60_spill] sm:$0xff] %v17374_v39  ;;  %v17416_v53 = vpop.permute.xlu1 %9554  ;;  %v9924_v25 = vsel %vm19253_vm9, %v9908_v11, %v19252_v12  ;;  %v19254_v39 = vld [vmem:[#allocation22_spill] sm:$0xff]  ;;  %v9927_v26 = vsel %vm19257_vm13, %v9911_v8, %v19256_v49  ;;  %v9926_v50 = vsel %vm19261_vm7, %v9910_v46, %v19260_v51  ;;  %v19262_v52 = vld [vmem:[#allocation33_spill] sm:$0xff]  ;;  %v19271_v51 = vld [vmem:[#allocation24_spill] sm:$0xff] }
 0x73d   : > { %9796 = vrot.lane.b32.xlu0 %v7473_v0, %s11308_s23  ;;  %19241 = vst [vmem:[#allocation128_spill] sm:$0xff] %v17416_v53  ;;  %19243 = vst [vmem:[#allocation71_spill] sm:$0xff] %v17425_v61  ;;  %v19246_v0 = vld [vmem:[#allocation23_spill] sm:$0xff]  ;;  %v9919_v61 = vsel %vm556_vm1, %v19255_v24, %v19254_v39  ;;  %v9921_v11 = vsel %vm556_vm1, %v19263_v57, %v19262_v52  ;;  %v19264_v12 = vld [vmem:[#allocation137_spill] sm:$0xff] }
 0x73e   : > { %v9925_v4 = vsel %vm19247_vm2, %v9909_v30, %v19246_v0  ;;  %19251 = vst [vmem:[#allocation65_spill] sm:$0xff] %v17438_v34  ;;  %v19258_v30 = vld [vmem:[#allocation39_spill] sm:$0xff]  ;;  %v19259_v0 = vld [vmem:[#allocation134_spill] sm:$0xff]  ;;  %9798 = vrot.lane.b32.xlu1 %v7571_v38, %s11308_s23  ;;  %v19266_v39 = vld [vmem:[#allocation32_spill] sm:$0xff] }
 0x73f   : > { %v17435_v53 = vpop.permute.xlu0 %9556  ;;  %v9920_v41 = vsel %vm556_vm1, %v19259_v0, %v19258_v30  ;;  %v19267_v24 = vld [vmem:[#allocation125_spill] sm:$0xff]  ;;  %v19268_v49 = vld [vmem:[#allocation50_spill] sm:$0xff]  ;;  %v19270_v0 = vld [vmem:[#allocation120_spill] sm:$0xff] }
 0x740   : > { %19250 = vst [vmem:[#allocation154_spill] sm:$0xff] %v17435_v53  ;;  %v9929_v53 = vsel %vm19265_vm8, %v9913_v43, %v19264_v12  ;;  %v9922_v8 = vsel %vm556_vm1, %v19267_v24, %v19266_v39  ;;  %v9928_v30 = vsel %vm19247_vm2, %v9912_v48, %v19268_v49  ;;  %v19269_v38 = vld [vmem:[#allocation117_spill] sm:$0xff]  ;;  %vm19272_vm9 = vmmov %vm19247_vm2  ;;  %v19273_v52 = vld [vmem:[#allocation31_spill] sm:$0xff]  ;;  %v17471_v43 = vpop.permute.xlu1 %9558  ;;  %v9934_v48 = vsel %vm19247_vm2, %v9918_v3, %v19280_v47 }
 0x741   : > { %9800 = vrot.lane.b32.xlu0 %v7669_v63, %s11308_s23  ;;  %v9923_v46 = vsel %vm556_vm1, %v19270_v0, %v19269_v38  ;;  %v9930_v34 = vsel %vm19272_vm9, %v9914_v18, %v19271_v51  ;;  %vm19274_vm13 = vmmov %vm19247_vm2  ;;  %19275 = vst [vmem:[#allocation25_spill] sm:$0xff] %v17471_v43  ;;  %v19276_v12 = vld [vmem:[#allocation107_spill] sm:$0xff]  ;;  %v19278_v24 = vld [vmem:[#allocation158_spill] sm:$0xff] }
 0x742   : > { %v9931_v57 = vsel %vm19274_vm13, %v9915_v44, %v19273_v52  ;;  %vm19277_vm7 = vmmov %vm19247_vm2  ;;  %v19281_v49 = vld [vmem:[#allocation140_spill] sm:$0xff]  ;;  %v19283_v18 = vld [vmem:[#allocation29_spill] sm:$0xff]  ;;  %9802 = vrot.lane.b32.xlu1 %v17322_v29, %s11308_s23 }
 0x743   : > { %v9932_v39 = vsel %vm19277_vm7, %v9916_v56, %v19276_v12  ;;  %vm19279_vm8 = vmmov %vm19247_vm2  ;;  %v9935_v38 = vsel %vm19282_vm0, %v9919_v61, %v19281_v49  ;;  %v17481_v0 = vpop.permute.xlu0 %9560  ;;  %v19285_v44 = vld [vmem:[#allocation119_spill] sm:$0xff]  ;;  %v19287_v43 = vld [vmem:[#allocation109_spill] sm:$0xff] }
 0x744   : > { %v9933_v63 = vsel %vm19279_vm8, %v9917_v27, %v19278_v24  ;;  %vm19284_vm1 = vmmov %vm19282_vm0  ;;  %v19289_v12 = vld [vmem:[#allocation42_spill] sm:$0xff]  ;;  %vm19292_vm8 = vcmask 97280   ;;  %v19293_v3 = vld [vmem:[#allocation56_spill] sm:$0xff] }
 0x745   : > { %v9936_v51 = vsel %vm19284_vm1, %v9920_v41, %v19283_v18  ;;  %vm19286_vm9 = vmmov %vm19282_vm0  ;;  %v19291_v47 = vld [vmem:[#allocation46_spill] sm:$0xff]  ;;  %v19295_v49 = vld [vmem:[#allocation161_spill] sm:$0xff]  ;;  %9804 = vrot.lane.b32.xlu0 %v17331_v14, %s11308_s23 }
 0x746   : > { %v9937_v52 = vsel %vm19286_vm9, %v9921_v11, %v19285_v44  ;;  %vm19288_vm13 = vmmov %vm19282_vm0  ;;  %v9940_v61 = vsel %vm19292_vm8, %v9924_v25, %v19291_v47  ;;  %v19297_v18 = vld [vmem:[#allocation167_spill] sm:$0xff]  ;;  %v19303_v44 = vld [vmem:[#allocation126_spill] sm:$0xff]  ;;  %9806 = vrot.lane.b32.xlu1 %v17334_v40, %s11308_s23 }
 0x747   : > { %v9938_v56 = vsel %vm19288_vm13, %v9922_v8, %v19287_v43  ;;  %vm19290_vm7 = vmmov %vm19282_vm0  ;;  %v19299_v8 = vld [vmem:[#allocation34_spill] sm:$0xff]  ;;  %v19301_v43 = vld [vmem:[#allocation136_spill] sm:$0xff] }
 0x748   : > { %v9939_v27 = vsel %vm19290_vm7, %v9923_v46, %v19289_v12  ;;  %vm19294_vm0 = vmmov %vm19292_vm8  ;;  %v19306_v47 = vld [vmem:[#allocation163_spill] sm:$0xff] }
 0x749   : > { %v9941_v24 = vsel %vm19294_vm0, %v9925_v4, %v19293_v3  ;;  %vm19296_vm2 = vmmov %vm19294_vm0  ;;  %v19305_v4 = vld [vmem:[#allocation118_spill] sm:$0xff]  ;;  %v19308_v14 = vld [vmem:[#allocation55_spill] sm:$0xff]  ;;  %9808 = vrot.lane.b32.xlu0 %v17338_v28, %s11308_s23 }
 0x74a   : > { %v9942_v41 = vsel %vm19296_vm2, %v9926_v50, %v19295_v49  ;;  %vm19298_vm1 = vmmov %vm19294_vm0  ;;  %v17513_v50 = vpop.permute.xlu1 %9562  ;;  %v17521_v3 = vsel %vm19294_vm0, %v9931_v57, %v19308_v14  ;;  %v17529_v49 = vpop.permute.xlu0 %9564  ;;  %v19323_v14 = vld [vmem:[#allocation149_spill] sm:$0xff]  ;;  %9810 = vrot.lane.b32.xlu1 %v17341_v23, %s11308_s23 }
 0x74b   : > { %v9954_v11 = vsel %vm19298_vm1, %v9938_v56, %v19297_v18  ;;  %vm19300_vm9 = vmmov %vm19294_vm0  ;;  %v19311_v18 = vld [vmem:[#allocation139_spill] sm:$0xff] }
 0x74c   : > { %v9943_v46 = vsel %vm19300_vm9, %v9927_v26, %v19299_v8  ;;  %vm19302_vm13 = vmmov %vm19294_vm0  ;;  %v9970_v12 = vsel %vm6749_vm10, %v9954_v11, %v19305_v4  ;;  %v19309_v26 = vld [vmem:[#allocation162_spill] sm:$0xff]  ;;  %v19313_v8 = vld [vmem:[#allocation129_spill] sm:$0xff] }
 0x74d   : > { %v9944_v29 = vsel %vm19302_vm13, %v9928_v30, %v19301_v43  ;;  %vm19304_vm7 = vmmov %vm19294_vm0  ;;  %v19315_v43 = vld [vmem:[#allocation48_spill] sm:$0xff]  ;;  %v19320_v4 = vld [vmem:[#allocation41_spill] sm:$0xff]  ;;  %9812 = vrot.lane.b32.xlu0 %v17344_v2, %s11308_s23 }
 0x74e   : > { %v17509_v25 = vsel %vm19304_vm7, %v9929_v53, %v19303_v44  ;;  %vm19307_vm8 = vmmov %vm19294_vm0  ;;  %v9986_v53 = vsel %vm6766_vm11, %v9970_v12, %v16847_v1  ;;  %vm19317_vm7 = vcmask 195584   ;;  %v19318_v1 = vld [vmem:[#allocation40_spill] sm:$0xff]  ;;  %v19321_v12 = vld [vmem:[#allocation69_spill] sm:$0xff]  ;;  %9814 = vrot.lane.b32.xlu1 %v17347_v9, %s11308_s23 }
 0x74f   : > { %v17517_v56 = vsel %vm19307_vm8, %v9930_v34, %v19306_v47  ;;  %vm19310_vm2 = vmmov %vm19294_vm0 }
 0x750   : > { %v17525_v30 = vsel %vm19310_vm2, %v9932_v39, %v19309_v26  ;;  %vm19312_vm1 = vmmov %vm19294_vm0  ;;  %v10002_v39 = vsel %vm19317_vm7, %v9986_v53, %v16936_v59  ;;  %v19322_v59 = vld [vmem:[#allocation169_spill] sm:$0xff]  ;;  %vm19324_vm2 = vcmask 261120   ;;  %v17567_v53 = vpop.permute.xlu1 %9566 }
 0x751   : > { %v17533_v11 = vsel %vm19312_vm1, %v9933_v63, %v19311_v18  ;;  %vm19314_vm9 = vmmov %vm19294_vm0  ;;  %v9956_v63 = vsel %vm6749_vm10, %v9940_v61, %v19320_v4  ;;  %v10018_v47 = vsel %vm6800_vm12, %v10002_v39, %v17010_v5  ;;  %v19325_v18 = vld [vmem:[#allocation72_spill] sm:$0xff]  ;;  %9816 = vrot.lane.b32.xlu0 %v17351_v17, %s11308_s23 }
 0x752   : > { %v17537_v34 = vsel %vm19314_vm9, %v9934_v48, %v19313_v8  ;;  %vm19316_vm13 = vmmov %vm19294_vm0  ;;  %v10034_v61 = vsel %vm19324_vm2, %v10018_v47, %v17164_v6  ;;  %9818 = vrot.lane.b32.xlu1 %v17377_v32, %s11308_s23 }
 0x753   : > { %v9955_v57 = vsel %vm19316_vm13, %v9939_v27, %v19315_v43  ;;  %vm19319_vm8 = vmmov %vm19294_vm0  ;;  %v17559_v27 = vsel %vm19294_vm0, %v9936_v51, %v19322_v59  ;;  %v10050_v43 = vsel %vm6834_vm14, %v10034_v61, %v17271_v13  ;;  %v19331_v13 = vld [vmem:[#allocation135_spill] sm:$0xff]  ;;  %v19340_v61 = vld [vmem:[#allocation61_spill] sm:$0xff] }
 0x754   : > { %v17547_v44 = vsel %vm19319_vm8, %v9935_v38, %v19318_v1  ;;  %v9971_v48 = vsel %vm6749_vm10, %v9955_v57, %v19321_v12  ;;  %v9972_v38 = vsel %vm6766_vm11, %v9956_v63, %v19323_v14  ;;  %vm19326_vm1 = vmmov %vm19294_vm0  ;;  %v9569_v57 = vpop.permute.xlu0 %9568  ;;  %v9571_v47 = vpop.permute.xlu1 %9570 }
 0x755   : > { %v9987_v26 = vsel %vm6766_vm11, %v9971_v48, %v16852_v22  ;;  %v17571_v5 = vsel %vm19326_vm1, %v9937_v52, %v19325_v18  ;;  %vm19327_vm9 = vmmov %vm19317_vm7  ;;  %v19329_v22 = vld [vmem:[#allocation145_spill] sm:$0xff]  ;;  %9820 = vrot.lane.b32.xlu0 %v17419_v58, %s11308_s23 }
 0x756   : > { %v9988_v8 = vsel %vm19327_vm9, %v9972_v38, %v16855_v19  ;;  %vm19328_vm13 = vmmov %vm19317_vm7  ;;  %v9957_v39 = vsel %vm6749_vm10, %v9941_v24, %v19329_v22  ;;  %v17588_v19 = vsel %vm6851_vm15, %v10050_v43, %v9569_v57  ;;  %v19337_v38 = vld [vmem:[#allocation141_spill] sm:$0xff]  ;;  %v19346_v22 = vld [vmem:[#allocation130_spill] sm:$0xff] }
 0x757   : > { %v10003_v51 = vsel %vm19328_vm13, %v9987_v26, %v16943_v45  ;;  %v10004_v6 = vsel %vm6800_vm12, %v9988_v8, %v16948_v7  ;;  %v19330_v45 = vld [vmem:[#allocation124_spill] sm:$0xff]  ;;  %v9973_v4 = vsel %vm6766_vm11, %v9957_v39, %v19331_v13  ;;  %vm19332_vm7 = vmmov %vm19324_vm2  ;;  %v19342_v8 = vld [vmem:[#allocation21_spill] sm:$0xff] }
 0x758   : > { %v10019_v52 = vsel %vm6800_vm12, %v10003_v51, %v17015_v42  ;;  %v9958_v1 = vsel %vm6749_vm10, %v9942_v41, %v19330_v45  ;;  %v10020_v24 = vsel %vm19332_vm7, %v10004_v6, %v17018_v35  ;;  %vm19333_vm8 = vmmov %vm19324_vm2  ;;  %v19334_v42 = vld [vmem:[#allocation172_spill] sm:$0xff]  ;;  %v19344_v43 = vld [vmem:[#allocation45_spill] sm:$0xff]  ;;  %v9607_v6 = vpop.permute.xlu1 %9606 }
 0x759   : > { %v10035_v7 = vsel %vm19333_vm8, %v10019_v52, %v17175_v60  ;;  %v9974_v63 = vsel %vm6766_vm11, %v9958_v1, %v19334_v42  ;;  %vm19335_vm0 = vmmov %vm19327_vm9  ;;  %v10036_v41 = vsel %vm6834_vm14, %v10020_v24, %v17184_v21  ;;  %v9959_v21 = vsel %vm6749_vm10, %v9943_v46, %v19337_v38  ;;  %v19349_v45 = vld [vmem:[#allocation110_spill] sm:$0xff] }
 0x75a   : > { %v9989_v12 = vsel %vm19335_vm0, %v9973_v4, %v16860_v37  ;;  %v10051_v48 = vsel %vm6834_vm14, %v10035_v7, %v17276_v36  ;;  %vm19336_vm2 = vmmov %vm19335_vm0  ;;  %v10052_v59 = vsel %vm6851_vm15, %v10036_v41, %v17279_v20  ;;  %v9605_v37 = vpop.permute.xlu0 %9604  ;;  %v9975_v18 = vsel %vm6766_vm11, %v9959_v21, %v19340_v61  ;;  %v19350_v7 = vld [vmem:[#allocation170_spill] sm:$0xff]  ;;  %v19359_v21 = vld [vmem:[#allocation153_spill] sm:$0xff] }
 0x75b   : > { %v9990_v35 = vsel %vm19336_vm2, %v9974_v63, %v16863_v16  ;;  %v10005_v60 = vsel %vm6800_vm12, %v9989_v12, %v16955_v31  ;;  %v17615_v14 = vsel %vm6851_vm15, %v10051_v48, %v9571_v47  ;;  %vm19338_vm1 = vmmov %vm19332_vm7  ;;  %v17626_v31 = vsel %vm6868_vm3, %v10052_v59, %v9605_v37  ;;  %v19339_v16 = vld [vmem:[#allocation64_spill] sm:$0xff]  ;;  %v19351_v63 = vld [vmem:[#allocation18_spill] sm:$0xff] }
 0x75c   : > { %v10006_v36 = vsel %vm6800_vm12, %v9990_v35, %v16960_v62  ;;  %v10021_v26 = vsel %vm19338_vm1, %v10005_v60, %v17023_v15  ;;  %v9960_v20 = vsel %vm6749_vm10, %v9944_v29, %v19339_v16  ;;  %vm19341_vm9 = vmmov %vm19338_vm1  ;;  %v19343_v15 = vld [vmem:[#allocation44_spill] sm:$0xff]  ;;  %v9961_v42 = vsel %vm6749_vm10, %v17509_v25, %v19350_v7  ;;  %v19352_v12 = vld [vmem:[#allocation114_spill] sm:$0xff] }
 0x75d   : > { %v10022_v46 = vsel %vm19341_vm9, %v10006_v36, %v17028_v55  ;;  %v10037_v62 = vsel %vm6834_vm14, %v10021_v26, %v19342_v8  ;;  %v9976_v51 = vsel %vm6766_vm11, %v9960_v20, %v19343_v15  ;;  %vm19345_vm13 = vmmov %vm19335_vm0  ;;  %v19347_v55 = vld [vmem:[#allocation6_spill] sm:$0xff]  ;;  %v19355_v35 = vld [vmem:[#allocation7_spill] sm:$0xff] }
 0x75e   : > { %v9991_v57 = vsel %vm19345_vm13, %v9975_v18, %v19344_v43  ;;  %v10038_v29 = vsel %vm6834_vm14, %v10022_v46, %v19346_v22  ;;  %v10053_v39 = vsel %vm6851_vm15, %v10037_v62, %v17292_v54  ;;  %vm19348_vm7 = vmmov %vm19335_vm0  ;;  %v9609_v24 = vpop.permute.xlu0 %9608  ;;  %v9977_v60 = vsel %vm6766_vm11, %v9961_v42, %v19355_v35  ;;  %v19356_v25 = vld [vmem:[#allocation123_spill] sm:$0xff]  ;;  %v19358_v37 = vld [vmem:[#allocation80_spill] sm:$0xff]  ;;  %v9611_v18 = vpop.permute.xlu1 %9610 }
 0x75f   : > { %v9992_v52 = vsel %vm19348_vm7, %v9976_v51, %v19347_v55  ;;  %v10007_v1 = vsel %vm6800_vm12, %v9991_v57, %v19349_v45  ;;  %v10054_v13 = vsel %vm6851_vm15, %v10038_v29, %v17299_v10  ;;  %v17653_v4 = vsel %vm6868_vm3, %v10053_v39, %v9607_v6  ;;  %vm19353_vm8 = vmmov %vm19338_vm1  ;;  %v19354_v10 = vld [vmem:[#allocation111_spill] sm:$0xff]  ;;  %v19361_v20 = vld [vmem:[#allocation157_spill] sm:$0xff] }
 0x760   : > { %v10008_v54 = vsel %vm6800_vm12, %v9992_v52, %v19351_v63  ;;  %v10023_v41 = vsel %vm19353_vm8, %v10007_v1, %v19352_v12  ;;  %v17665_v48 = vsel %vm6868_vm3, %v10054_v13, %v9609_v24  ;;  %v9962_v47 = vsel %vm6749_vm10, %v17517_v56, %v19354_v10  ;;  %vm19357_vm0 = vmmov %vm19338_vm1  ;;  %v19360_v26 = vld [vmem:[#allocation15_spill] sm:$0xff]  ;;  %v19362_v46 = vld [vmem:[#allocation52_spill] sm:$0xff] }
 0x761   : > { %v10024_v59 = vsel %vm19357_vm0, %v10008_v54, %v19356_v25  ;;  %v10039_v38 = vsel %vm6834_vm14, %v10023_v41, %v19358_v37  ;;  %v9978_v36 = vsel %vm6766_vm11, %v9962_v47, %v19359_v21  ;;  %v9993_v16 = vsel %vm19336_vm2, %v9977_v60, %v19360_v26  ;;  %vm19363_vm1 = vmmov %vm19336_vm2  ;;  %v19364_v62 = vld [vmem:[#allocation12_spill] sm:$0xff]  ;;  %v19365_v51 = vld [vmem:[#allocation13_spill] sm:$0xff] }
 0x762   : > { %v10040_v56 = vsel %vm6834_vm14, %v10024_v59, %v19361_v20  ;;  %v10055_v61 = vsel %vm6851_vm15, %v10039_v38, %v17317_v33  ;;  %v9994_v8 = vsel %vm19363_vm1, %v9978_v36, %v19362_v46  ;;  %v10009_v15 = vsel %vm6800_vm12, %v9993_v16, %v19364_v62  ;;  %v9613_v22 = vpop.permute.xlu0 %9612  ;;  %v19366_v29 = vld [vmem:[#allocation164_spill] sm:$0xff]  ;;  %v19367_v6 = vld [vmem:[#allocation121_spill] sm:$0xff]  ;;  %vm19369_vm9 = vmmov %vm19357_vm0  ;;  %v9615_v38 = vpop.permute.xlu1 %9614 }
 0x763   : > { %v10056_v43 = vsel %vm6851_vm15, %v10040_v56, %v19365_v51  ;;  %v17693_v57 = vsel %vm6868_vm3, %v10055_v61, %v9611_v18  ;;  %v9963_v39 = vsel %vm6749_vm10, %v17521_v3, %v19366_v29  ;;  %v10010_v33 = vsel %vm6800_vm12, %v9994_v8, %v19367_v6  ;;  %v19368_v55 = vld [vmem:[#allocation5_spill] sm:$0xff]  ;;  %v19370_v45 = vld [vmem:[#allocation108_spill] sm:$0xff]  ;;  %v19371_v13 = vld [vmem:[#allocation35_spill] sm:$0xff] }
 0x764   : > { %v10025_v52 = vsel %vm19369_vm9, %v10009_v15, %v19368_v55  ;;  %9822 = vrot.lane.b32.xlu1 %v19370_v45, %s11308_s23  ;;  %v17705_v1 = vsel %vm6868_vm3, %v10056_v43, %v9613_v22  ;;  %v9964_v24 = vsel %vm6749_vm10, %v17525_v30, %v19371_v13  ;;  %v19372_v7 = vld [vmem:[#allocation77_spill] sm:$0xff]  ;;  %v19373_v3 = vld [vmem:[#allocation98_spill] sm:$0xff]  ;;  %vm19374_vm13 = vmmov %vm19357_vm0 }
 0x765   : > { %v9979_v42 = vsel %vm6766_vm11, %v9963_v39, %v19372_v7  ;;  %v10026_v63 = vsel %vm19374_vm13, %v10010_v33, %v19373_v3  ;;  %v19375_v54 = vld [vmem:[#allocation91_spill] sm:$0xff]  ;;  %v19377_v10 = vld [vmem:[#allocation148_spill] sm:$0xff]  ;;  %v19378_v35 = vld [vmem:[#allocation62_spill] sm:$0xff] }
 0x766   : > { %v10041_v12 = vsel %vm6834_vm14, %v10025_v52, %v19375_v54  ;;  %v19376_v41 = vld [vmem:[#allocation71_spill] sm:$0xff]  ;;  %v9980_v47 = vsel %vm6766_vm11, %v9964_v24, %v19377_v10  ;;  %vm19379_vm7 = vmmov %vm19363_vm1  ;;  %v19380_v25 = vld [vmem:[#allocation133_spill] sm:$0xff]  ;;  %v9617_v18 = vpop.permute.xlu0 %9616 }
 0x767   : > { %9824 = vrot.lane.b32.xlu0 %v19376_v41, %s11308_s23  ;;  %v9995_v60 = vsel %vm19379_vm7, %v9979_v42, %v19378_v35  ;;  %v10042_v30 = vsel %vm6834_vm14, %v10026_v63, %v19380_v25  ;;  %v19381_v59 = vld [vmem:[#allocation57_spill] sm:$0xff]  ;;  %v19382_v21 = vld [vmem:[#allocation83_spill] sm:$0xff]  ;;  %vm19383_vm8 = vmmov %vm19363_vm1  ;;  %v9619_v35 = vpop.permute.xlu1 %9618 }
 0x768   : > { %v10057_v37 = vsel %vm6851_vm15, %v10041_v12, %v19381_v59  ;;  %v9996_v36 = vsel %vm19383_vm8, %v9980_v47, %v19382_v21  ;;  %v19384_v26 = vld [vmem:[#allocation97_spill] sm:$0xff]  ;;  %v19385_v20 = vld [vmem:[#allocation60_spill] sm:$0xff]  ;;  %v19387_v62 = vld [vmem:[#allocation11_spill] sm:$0xff] }
 0x769   : > { %v10011_v16 = vsel %vm6800_vm12, %v9995_v60, %v19384_v26  ;;  %v10058_v56 = vsel %vm6851_vm15, %v10042_v30, %v19385_v20  ;;  %v17733_v61 = vsel %vm6868_vm3, %v10057_v37, %v9615_v38  ;;  %v19386_v46 = vld [vmem:[#allocation168_spill] sm:$0xff]  ;;  %v10012_v15 = vsel %vm6800_vm12, %v9996_v36, %v19387_v62  ;;  %v19388_v51 = vld [vmem:[#allocation86_spill] sm:$0xff]  ;;  %v19389_v22 = vld [vmem:[#allocation65_spill] sm:$0xff] }
 0x76a   : > { %v9965_v8 = vsel %vm6749_vm10, %v17533_v11, %v19386_v46  ;;  %v10027_v43 = vsel %vm19357_vm0, %v10011_v16, %v19388_v51  ;;  %9826 = vrot.lane.b32.xlu1 %v19389_v22, %s11308_s23  ;;  %v17745_v29 = vsel %vm6868_vm3, %v10058_v56, %v9617_v18  ;;  %v19390_v39 = vld [vmem:[#allocation51_spill] sm:$0xff]  ;;  %vm19393_vm2 = vmmov %vm19357_vm0  ;;  %v19394_v13 = vld [vmem:[#allocation20_spill] sm:$0xff]  ;;  %v9621_v36 = vpop.permute.xlu0 %9620 }
 0x76b   : > { %v9966_v6 = vsel %vm6749_vm10, %v17537_v34, %v19390_v39  ;;  %v19391_v33 = vld [vmem:[#allocation151_spill] sm:$0xff]  ;;  %v10043_v24 = vsel %vm6834_vm14, %v10027_v43, %v19394_v13  ;;  %v19395_v7 = vld [vmem:[#allocation84_spill] sm:$0xff]  ;;  %v19396_v42 = vld [vmem:[#allocation14_spill] sm:$0xff] }
 0x76c   : > { %v9981_v55 = vsel %vm6766_vm11, %v9965_v8, %v19391_v33  ;;  %v19392_v11 = vld [vmem:[#allocation47_spill] sm:$0xff]  ;;  %9860 = vrot.lane.b32.xlu0 %v19395_v7, %s11312_s27  ;;  %v9982_v3 = vsel %vm6766_vm11, %v9966_v6, %v19396_v42  ;;  %v19397_v63 = vld [vmem:[#allocation85_spill] sm:$0xff]  ;;  %v19398_v12 = vld [vmem:[#allocation166_spill] sm:$0xff] }
 0x76d   : > { %v10028_v52 = vsel %vm19393_vm2, %v10012_v15, %v19392_v11  ;;  %v9997_v54 = vsel %vm19363_vm1, %v9981_v55, %v19397_v63  ;;  %v19399_v10 = vld [vmem:[#allocation128_spill] sm:$0xff]  ;;  %v19400_v60 = vld [vmem:[#allocation94_spill] sm:$0xff]  ;;  %vm19401_vm9 = vmmov %vm19363_vm1 }
 0x76e   : > { %v10044_v34 = vsel %vm6834_vm14, %v10028_v52, %v19398_v12  ;;  %v10059_v47 = vsel %vm6851_vm15, %v10043_v24, %v19399_v10  ;;  %v9998_v25 = vsel %vm19401_vm9, %v9982_v3, %v19400_v60  ;;  %v19402_v30 = vld [vmem:[#allocation115_spill] sm:$0xff]  ;;  %v19403_v37 = vld [vmem:[#allocation154_spill] sm:$0xff]  ;;  %v19405_v20 = vld [vmem:[#allocation152_spill] sm:$0xff] }
 0x76f   : > { %v10013_v59 = vsel %vm6800_vm12, %v9997_v54, %v19402_v30  ;;  %v10060_v38 = vsel %vm6851_vm15, %v10044_v34, %v19403_v37  ;;  %v17773_v21 = vsel %vm6868_vm3, %v10059_v47, %v9619_v35  ;;  %v19404_v26 = vld [vmem:[#allocation147_spill] sm:$0xff]  ;;  %v10014_v56 = vsel %vm6800_vm12, %v9998_v25, %v19405_v20  ;;  %v19406_v18 = vld [vmem:[#allocation10_spill] sm:$0xff]  ;;  %vm19407_vm13 = vmmov %vm19357_vm0  ;;  %v9623_v54 = vpop.permute.xlu1 %9622  ;;  %v9625_v25 = vpop.permute.xlu0 %9624 }
 0x770   : > { %v9967_v16 = vsel %vm6749_vm10, %v17547_v44, %v19404_v26  ;;  %v10029_v46 = vsel %vm19407_vm13, %v10013_v59, %v19406_v18  ;;  %v19408_v8 = vld [vmem:[#allocation27_spill] sm:$0xff]  ;;  %v17785_v62 = vsel %vm6868_vm3, %v10060_v38, %v9621_v36  ;;  %v19409_v15 = vld [vmem:[#allocation28_spill] sm:$0xff]  ;;  %vm19412_vm7 = vmmov %vm19357_vm0 }
 0x771   : > { %9862 = vrot.lane.b32.xlu1 %v19408_v8, %s11312_s27  ;;  %v9968_v51 = vsel %vm6749_vm10, %v17559_v27, %v19409_v15  ;;  %v19410_v43 = vld [vmem:[#allocation43_spill] sm:$0xff]  ;;  %v19411_v44 = vld [vmem:[#allocation144_spill] sm:$0xff]  ;;  %v19415_v52 = vld [vmem:[#allocation173_spill] sm:$0xff] }
 0x772   : > { %v9983_v39 = vsel %vm6766_vm11, %v9967_v16, %v19410_v43  ;;  %v10030_v6 = vsel %vm19412_vm7, %v10014_v56, %v19411_v44  ;;  %v19413_v33 = vld [vmem:[#allocation16_spill] sm:$0xff]  ;;  %v9984_v13 = vsel %vm6766_vm11, %v9968_v51, %v19415_v52  ;;  %v19416_v24 = vld [vmem:[#allocation63_spill] sm:$0xff]  ;;  %vm19417_vm8 = vmmov %vm19363_vm1 }
 0x773   : > { %v10045_v55 = vsel %vm6834_vm14, %v10029_v46, %v19413_v33  ;;  %v19414_v11 = vld [vmem:[#allocation100_spill] sm:$0xff]  ;;  %v9999_v7 = vsel %vm19417_vm8, %v9983_v39, %v19416_v24  ;;  %v19418_v42 = vld [vmem:[#allocation171_spill] sm:$0xff]  ;;  %v19419_v3 = vld [vmem:[#allocation25_spill] sm:$0xff]  ;;  %v9627_v33 = vpop.permute.xlu1 %9626 }
 0x774   : > { %9864 = vrot.lane.b32.xlu0 %v19414_v11, %s11312_s27  ;;  %v10046_v27 = vsel %vm6834_vm14, %v10030_v6, %v19418_v42  ;;  %v10061_v63 = vsel %vm6851_vm15, %v10045_v55, %v19419_v3  ;;  %v19420_v12 = vld [vmem:[#allocation36_spill] sm:$0xff]  ;;  %vm19421_vm0 = vmmov %vm19363_vm1  ;;  %v19422_v10 = vld [vmem:[#allocation54_spill] sm:$0xff]  ;;  %v19435_v55 = vmov 0.0   ;;  %v9629_v42 = vpop.permute.xlu0 %9628 }
 0x775   : > { %v10000_v34 = vsel %vm19421_vm0, %v9984_v13, %v19420_v12  ;;  %v10015_v47 = vsel %vm6800_vm12, %v9999_v7, %v19422_v10  ;;  %v10062_v35 = vsel %vm6851_vm15, %v10046_v27, %v17481_v0  ;;  %v17813_v60 = vsel %vm6868_vm3, %v10061_v63, %v9623_v54  ;;  %v19423_v30 = vld [vmem:[#allocation142_spill] sm:$0xff]  ;;  %v19424_v37 = vld [vmem:[#allocation9_spill] sm:$0xff]  ;;  %v19427_v0 = vld [vmem:[#allocation76_spill] sm:$0xff] }
 0x776   : > { %v9969_v59 = vsel %vm6749_vm10, %v17571_v5, %v19423_v30  ;;  %v10016_v38 = vsel %vm6800_vm12, %v10000_v34, %v19424_v37  ;;  %v19425_v36 = vld [vmem:[#allocation106_spill] sm:$0xff]  ;;  %v19426_v16 = vld [vmem:[#allocation93_spill] sm:$0xff]  ;;  %v17825_v20 = vsel %vm6868_vm3, %v10062_v35, %v9625_v25  ;;  %v19428_v18 = vld [vmem:[#allocation116_spill] sm:$0xff]  ;;  %v7967_v11 = vcombine.high %v17334_v40, %v19435_v55 }
 0x777   : > { %v10031_v26 = vsel %vm19393_vm2, %v10015_v47, %v19425_v36  ;;  %9866 = vrot.lane.b32.xlu1 %v19426_v16, %s11312_s27  ;;  %v9985_v56 = vsel %vm6766_vm11, %v9969_v59, %v19427_v0  ;;  %vm19429_vm1 = vmmov %vm19393_vm2  ;;  %v19430_v8 = vld [vmem:[#allocation105_spill] sm:$0xff]  ;;  %v19431_v15 = vld [vmem:[#allocation102_spill] sm:$0xff]  ;;  %v8065_v27 = vcombine.high %v17338_v28, %v19435_v55  ;;  %v9631_v12 = vpop.permute.xlu1 %9630  ;;  %v8163_v34 = vcombine.high %v17341_v23, %v19435_v55 }
 0x778   : > { %v10032_v46 = vsel %vm19429_vm1, %v10016_v38, %v19428_v18  ;;  %v10047_v5 = vsel %vm6834_vm14, %v10031_v26, %v19430_v8  ;;  %9868 = vrot.lane.b32.xlu0 %v19431_v15, %s11312_s27  ;;  %v19432_v51 = vld [vmem:[#allocation8_spill] sm:$0xff]  ;;  %vm19433_vm10 = vmmov %vm19421_vm0  ;;  %v19434_v39 = vld [vmem:[#allocation150_spill] sm:$0xff]  ;;  %v9633_v10 = vpop.permute.xlu0 %9632  ;;  %v8261_v47 = vcombine.high %v17344_v2, %v19435_v55  ;;  %v8457_v59 = vcombine.high %v17351_v17, %v19435_v55 }
 0x779   : > { %v10001_v43 = vsel %vm19433_vm10, %v9985_v56, %v19432_v51  ;;  %v10048_v44 = vsel %vm6834_vm14, %v10032_v46, %v19434_v39  ;;  %v10063_v6 = vsel %vm6851_vm15, %v10047_v5, %v17513_v50  ;;  %v19436_v52 = vld [vmem:[#allocation78_spill] sm:$0xff]  ;;  %v19437_v3 = vld [vmem:[#allocation160_spill] sm:$0xff]  ;;  %vm19438_vm11 = vmmov %vm19429_vm1  ;;  %v10082_v35 = vsel %vm6868_vm3, %v17588_v19, %v9633_v10 }
 0x77a   : > { %v10017_v13 = vsel %vm6800_vm12, %v10001_v43, %v19436_v52  ;;  %v10064_v24 = vsel %vm6851_vm15, %v10048_v44, %v17529_v49  ;;  %v10079_v7 = vsel %vm6868_vm3, %v10063_v6, %v9627_v33  ;;  %v19439_v40 = vld [vmem:[#allocation59_spill] sm:$0xff]  ;;  %v8555_v37 = vcombine.high %v17377_v32, %v19435_v55 }
 0x77b   : > { %v10033_v63 = vsel %vm19438_vm11, %v10017_v13, %v19437_v3  ;;  %9870 = vrot.lane.b32.xlu1 %v7967_v11, %s11312_s27  ;;  %v10080_v50 = vsel %vm6868_vm3, %v10064_v24, %v9629_v42  ;;  %v9635_v25 = vpop.permute.xlu1 %9634  ;;  %v8653_v17 = vcombine.high %v17419_v58, %v19435_v55  ;;  %v8751_v32 = vcombine.high %v19370_v45, %v19435_v55 }
 0x77c   : > { %v10049_v54 = vsel %vm6834_vm14, %v10033_v63, %v19439_v40  ;;  %9872 = vrot.lane.b32.xlu0 %v8065_v27, %s11312_s27  ;;  %v10083_v23 = vsel %vm6868_vm3, %v17615_v14, %v9635_v25  ;;  %v9669_v30 = vpop.permute.xlu0 %9668  ;;  %v8849_v58 = vcombine.high %v19376_v41, %v19435_v55  ;;  %v8947_v45 = vcombine.high %v19389_v22, %v19435_v55 }
 0x77d   : > { %v10065_v49 = vsel %vm6851_vm15, %v10049_v54, %v17567_v53  ;;  %v8359_v53 = vcombine.high %v17347_v9, %v19435_v55  ;;  %v17877_v2 = vsel %vm6885_vm4, %v17626_v31, %v9669_v30  ;;  %vm19440_vm12 = vcmask 490496  }
 0x77e   : > { %v10081_v28 = vsel %vm6868_vm3, %v10065_v49, %v9631_v12  ;;  %vm19441_vm14 = vcmask 516096   ;;  %vm19442_vm15 = vmmov %vm19440_vm12 }
 0x77f   : > { %9874 = vrot.lane.b32.xlu1 %v8163_v34, %s11312_s27  ;;  %v9671_v19 = vpop.permute.xlu1 %9670  ;;  %vm19443_vm3 = vmmov %vm19441_vm14 }
 0x780   : > { %9876 = vrot.lane.b32.xlu0 %v8261_v47, %s11312_s27  ;;  %v17884_v9 = vsel %vm6885_vm4, %v17653_v4, %v9671_v19  ;;  %v9673_v14 = vpop.permute.xlu0 %9672  ;;  %vm19445_vm9 = vmmov %vm19443_vm3 }
 0x781   : > { %v17891_v31 = vsel %vm6885_vm4, %v17665_v48, %v9673_v14  ;;  %vm19447_vm7 = vmmov %vm19443_vm3 }
 0x782   : > { %vm19449_vm0 = vmmov %vm19443_vm3 }
 0x783   : > { %9878 = vrot.lane.b32.xlu1 %v8359_v53, %s11312_s27  ;;  %v9675_v38 = vpop.permute.xlu1 %9674  ;;  %vm19451_vm1 = vmmov %vm19449_vm0 }
 0x784   : > { %9880 = vrot.lane.b32.xlu0 %v8457_v59, %s11312_s27  ;;  %v17898_v4 = vsel %vm6885_vm4, %v17693_v57, %v9675_v38  ;;  %v9677_v36 = vpop.permute.xlu0 %9676  ;;  %vm19453_vm11 = vmmov %vm19449_vm0 }
 0x785   : > { %v17905_v48 = vsel %vm6885_vm4, %v17705_v1, %v9677_v36 }
 0x787   : > { %9882 = vrot.lane.b32.xlu1 %v8555_v37, %s11312_s27  ;;  %v9679_v26 = vpop.permute.xlu1 %9678 }
 0x788   : > { %9884 = vrot.lane.b32.xlu0 %v8653_v17, %s11312_s27  ;;  %v17912_v57 = vsel %vm6885_vm4, %v17733_v61, %v9679_v26  ;;  %v9681_v16 = vpop.permute.xlu0 %9680 }
 0x789   : > { %v17917_v41 = vsel %vm6885_vm4, %v17745_v29, %v9681_v16 }
 0x78b   : > { %9886 = vrot.lane.b32.xlu1 %v8751_v32, %s11312_s27  ;;  %v9683_v0 = vpop.permute.xlu1 %9682 }
 0x78c   : > { %9888 = vrot.lane.b32.xlu0 %v8849_v58, %s11312_s27  ;;  %v17921_v1 = vsel %vm6885_vm4, %v17773_v21, %v9683_v0  ;;  %v9685_v56 = vpop.permute.xlu0 %9684 }
 0x78d   : > { %v17925_v22 = vsel %vm6885_vm4, %v17785_v62, %v9685_v56 }
 0x78f   : > { %9890 = vrot.lane.b32.xlu1 %v8947_v45, %s11312_s27  ;;  %v9687_v18 = vpop.permute.xlu1 %9686 }
 0x790   : > { %v17929_v61 = vsel %vm6885_vm4, %v17813_v60, %v9687_v18  ;;  %v9689_v46 = vpop.permute.xlu0 %9688 }
 0x791   : > { %v17933_v29 = vsel %vm6885_vm4, %v17825_v20, %v9689_v46 }
 0x793   : > { %v9691_v8 = vpop.permute.xlu1 %9690 }
 0x794   : > { %v17936_v5 = vsel %vm6885_vm4, %v10079_v7, %v9691_v8  ;;  %v9693_v21 = vpop.permute.xlu0 %9692 }
 0x795   : > { %v17939_v15 = vsel %vm6885_vm4, %v10080_v50, %v9693_v21 }
 0x797   : > { %v9695_v62 = vpop.permute.xlu1 %9694 }
 0x798   : > { %v17942_v51 = vsel %vm6885_vm4, %v10081_v28, %v9695_v62  ;;  %v9697_v43 = vpop.permute.xlu0 %9696 }
 0x799   : > { %v17945_v60 = vsel %vm6885_vm4, %v10082_v35, %v9697_v43 }
 0x79b   : > { %v9699_v39 = vpop.permute.xlu1 %9698 }
 0x79c   : > { %v17948_v20 = vsel %vm6885_vm4, %v10083_v23, %v9699_v39  ;;  %v9733_v44 = vpop.permute.xlu0 %9732  ;;  %vm19444_vm4 = vmmov %vm19440_vm12 }
 0x79d   : > { %v10100_v17 = vsel %vm6902_vm5, %v17877_v2, %v9733_v44  ;;  %vm19446_vm13 = vmmov %vm19444_vm4 }
 0x79e   : > { %vm19448_vm8 = vmmov %vm19444_vm4 }
 0x79f   : > { %v9735_v6 = vpop.permute.xlu1 %9734  ;;  %vm19450_vm2 = vmmov %vm19444_vm4 }
 0x7a0   : > { %v9737_v33 = vpop.permute.xlu0 %9736  ;;  %v10101_v26 = vsel %vm6902_vm5, %v17884_v9, %v9735_v6  ;;  %vm19452_vm10 = vmmov %vm19450_vm2 }
 0x7a1   : > { %v10102_v45 = vsel %vm6902_vm5, %v17891_v31, %v9737_v33 }
 0x7a3   : > { %v9739_v55 = vpop.permute.xlu1 %9738 }
 0x7a4   : > { %v9741_v11 = vpop.permute.xlu0 %9740  ;;  %v10103_v9 = vsel %vm6902_vm5, %v17898_v4, %v9739_v55 }
 0x7a5   : > { %v10104_v31 = vsel %vm6902_vm5, %v17905_v48, %v9741_v11 }
 0x7a7   : > { %v9743_v52 = vpop.permute.xlu1 %9742 }
 0x7a8   : > { %v9745_v13 = vpop.permute.xlu0 %9744  ;;  %v10105_v4 = vsel %vm6902_vm5, %v17912_v57, %v9743_v52 }
 0x7a9   : > { %v10106_v48 = vsel %vm6902_vm5, %v17917_v41, %v9745_v13 }
 0x7ab   : > { %v9747_v24 = vpop.permute.xlu1 %9746 }
 0x7ac   : > { %v9749_v7 = vpop.permute.xlu0 %9748  ;;  %v10107_v57 = vsel %vm6902_vm5, %v17921_v1, %v9747_v24 }
 0x7ad   : > { %v10108_v41 = vsel %vm6902_vm5, %v17925_v22, %v9749_v7 }
 0x7af   : > { %v17950_v42 = vpop.permute.xlu1 %9750 }
 0x7b0   : > { %v17952_v27 = vpop.permute.xlu0 %9752  ;;  %v10109_v1 = vsel %vm6902_vm5, %v17929_v61, %v17950_v42 }
 0x7b1   : > { %v10110_v22 = vsel %vm6902_vm5, %v17933_v29, %v17952_v27 }
 0x7b3   : > { %v17954_v3 = vpop.permute.xlu1 %9754 }
 0x7b4   : > { %v17956_v63 = vpop.permute.xlu0 %9756  ;;  %v10111_v42 = vsel %vm6902_vm5, %v17936_v5, %v17954_v3 }
 0x7b5   : > { %v10112_v29 = vsel %vm6902_vm5, %v17939_v15, %v17956_v63 }
 0x7b7   : > { %v17958_v50 = vpop.permute.xlu1 %9758 }
 0x7b8   : > { %v17960_v40 = vpop.permute.xlu0 %9760  ;;  %v10113_v15 = vsel %vm6902_vm5, %v17942_v51, %v17958_v50 }
 0x7b9   : > { %v10114_v3 = vsel %vm6902_vm5, %v17945_v60, %v17960_v40 }
 0x7bb   : > { %v17962_v54 = vpop.permute.xlu1 %9762 }
 0x7bc   : > { %v9797_v49 = vpop.permute.xlu0 %9796  ;;  %v10115_v50 = vsel %vm6902_vm5, %v17948_v20, %v17962_v54 }
 0x7bd   : > { %v10116_v32 = vsel %vm6919_vm6, %v10100_v17, %v9797_v49 }
 0x7bf   : > { %v9799_v12 = vpop.permute.xlu1 %9798 }
 0x7c0   : > { %v9801_v34 = vpop.permute.xlu0 %9800  ;;  %v10117_v16 = vsel %vm6919_vm6, %v10101_v26, %v9799_v12 }
 0x7c1   : > { %v10118_v0 = vsel %vm6919_vm6, %v10102_v45, %v9801_v34 }
 0x7c3   : > { %v9803_v28 = vpop.permute.xlu1 %9802 }
 0x7c4   : > { %v9805_v10 = vpop.permute.xlu0 %9804  ;;  %v10119_v8 = vsel %vm6919_vm6, %v10103_v9, %v9803_v28 }
 0x7c5   : > { %v10120_v62 = vsel %vm6919_vm6, %v10104_v31, %v9805_v10 }
 0x7c7   : > { %v9807_v47 = vpop.permute.xlu1 %9806 }
 0x7c8   : > { %v9809_v35 = vpop.permute.xlu0 %9808  ;;  %v10121_v6 = vsel %vm6919_vm6, %v10105_v4, %v9807_v47 }
 0x7c9   : > { %v10122_v55 = vsel %vm6919_vm6, %v10106_v48, %v9809_v35 }
 0x7cb   : > { %v9811_v25 = vpop.permute.xlu1 %9810 }
 0x7cc   : > { %v9813_v53 = vpop.permute.xlu0 %9812  ;;  %v10123_v52 = vsel %vm6919_vm6, %v10107_v57, %v9811_v25 }
 0x7cd   : > { %v10124_v34 = vsel %vm6919_vm6, %v10108_v41, %v9813_v53 }
 0x7cf   : > { %v9815_v23 = vpop.permute.xlu1 %9814 }
 0x7d0   : > { %v9817_v30 = vpop.permute.xlu0 %9816  ;;  %v10125_v24 = vsel %vm6919_vm6, %v10109_v1, %v9815_v23 }
 0x7d1   : > { %v10126_v35 = vsel %vm6919_vm6, %v10110_v22, %v9817_v30 }
 0x7d3   : > { %v17964_v59 = vpop.permute.xlu1 %9818 }
 0x7d4   : > { %v17966_v19 = vpop.permute.xlu0 %9820  ;;  %v10127_v27 = vsel %vm6919_vm6, %v10111_v42, %v17964_v59 }
 0x7d5   : > { %v10128_v30 = vsel %vm6919_vm6, %v10112_v29, %v17966_v19 }
 0x7d7   : > { %v17968_v37 = vpop.permute.xlu1 %9822 }
 0x7d8   : > { %v10129_v63 = vsel %vm6919_vm6, %v10113_v15, %v17968_v37 }
 0x7d9   : > { %v17970_v14 = vpop.permute.xlu0 %9824 }
 0x7da   : > { %v10130_v19 = vsel %vm6919_vm6, %v10114_v3, %v17970_v14 }
 0x7dc   : > { %v17974_v38 = vpop.permute.xlu1 %9826 }
 0x7dd   : > { %v10131_v60 = vsel %vm6919_vm6, %v10115_v50, %v17974_v38 }
 0x7de   : > { %v9861_v36 = vpop.permute.xlu0 %9860 }
 0x7df   : > { %v10132_v58 = vsel %vm19440_vm12, %v10116_v32, %v9861_v36  ;;  %vm19454_vm12 = vmmov %vm19450_vm2 }
 0x7e0   : > { %10148 = vst.msk [vmem:[%s14628_s26 + $0x1] sm:$0x1] %vm19441_vm14, %v10132_v58  ;;  %vm19455_vm14 = vmmov %vm19449_vm0 }
 0x7e3   : > { %v9863_v2 = vpop.permute.xlu1 %9862 }
 0x7e4   : > { %v10133_v56 = vsel %vm19442_vm15, %v10117_v16, %v9863_v2  ;;  %vm19456_vm15 = vmmov %vm19450_vm2 }
 0x7e5   : > { %10149 = vst.msk [vmem:[%s14628_s26 + $0x3] sm:$0x1] %vm19443_vm3, %v10133_v56  ;;  %vm19457_vm3 = vmmov %vm19449_vm0 }
 0x7e6   : > { %v9865_v18 = vpop.permute.xlu0 %9864 }
 0x7e7   : > { %v10134_v46 = vsel %vm19444_vm4, %v10118_v0, %v9865_v18  ;;  %vm19458_vm4 = vmmov %vm19450_vm2 }
 0x7e8   : > { %10150 = vst.msk [vmem:[%s14628_s26 + $0x5] sm:$0x1] %vm19445_vm9, %v10134_v46  ;;  %vm19459_vm9 = vmmov %vm19449_vm0 }
 0x7e9   : > { %v9867_v21 = vpop.permute.xlu1 %9866 }
 0x7ea   : > { %v10135_v43 = vsel %vm19446_vm13, %v10119_v8, %v9867_v21  ;;  %v9869_v39 = vpop.permute.xlu0 %9868  ;;  %vm19460_vm13 = vmmov %vm19450_vm2 }
 0x7eb   : > { %10151 = vst.msk [vmem:[%s14628_s26 + $0x7] sm:$0x1] %vm19447_vm7, %v10135_v43  ;;  %v10136_v44 = vsel %vm19448_vm8, %v10120_v62, %v9869_v39  ;;  %vm19461_vm7 = vmmov %vm19449_vm0 }
 0x7ec   : > { %10152 = vst.msk [vmem:[%s14628_s26 + $0x9] sm:$0x1] %vm19449_vm0, %v10136_v44  ;;  %vm19462_vm8 = vmmov %vm19450_vm2 }
 0x7ed   : > { %v9871_v33 = vpop.permute.xlu1 %9870 }
 0x7ee   : > { %v10137_v11 = vsel %vm19450_vm2, %v10121_v6, %v9871_v33  ;;  %v9873_v49 = vpop.permute.xlu0 %9872 }
 0x7ef   : > { %10153 = vst.msk [vmem:[%s14628_s26 + $0xb] sm:$0x1] %vm19451_vm1, %v10137_v11  ;;  %v10138_v12 = vsel %vm19452_vm10, %v10122_v55, %v9873_v49  ;;  %vm19463_vm1 = vmmov %vm19449_vm0 }
 0x7f0   : > { %10154 = vst.msk [vmem:[%s14628_s26 + $0xd] sm:$0x1] %vm19453_vm11, %v10138_v12  ;;  %vm19464_vm10 = vmmov %vm19450_vm2 }
 0x7f1   : > { %v9875_v13 = vpop.permute.xlu1 %9874  ;;  %vm19465_vm11 = vmmov %vm19449_vm0 }
 0x7f2   : > { %v10139_v28 = vsel %vm19454_vm12, %v10123_v52, %v9875_v13  ;;  %v9877_v10 = vpop.permute.xlu0 %9876  ;;  %vm19466_vm12 = vmmov %vm19450_vm2 }
 0x7f3   : > { %10155 = vst.msk [vmem:[%s14628_s26 + $0xf] sm:$0x1] %vm19455_vm14, %v10139_v28  ;;  %v10140_v47 = vsel %vm19456_vm15, %v10124_v34, %v9877_v10  ;;  %vm19467_vm14 = vmmov %vm19449_vm0 }
 0x7f4   : > { %10156 = vst.msk [vmem:[%s14628_s26 + $0x11] sm:$0x1] %vm19457_vm3, %v10140_v47  ;;  %vm19468_vm15 = vmmov %vm19450_vm2 }
 0x7f5   : > { %v9879_v7 = vpop.permute.xlu1 %9878  ;;  %vm19469_vm3 = vmmov %vm19449_vm0 }
 0x7f6   : > { %v10141_v25 = vsel %vm19458_vm4, %v10125_v24, %v9879_v7  ;;  %v9881_v53 = vpop.permute.xlu0 %9880 }
 0x7f7   : > { %10157 = vst.msk [vmem:[%s14628_s26 + $0x13] sm:$0x1] %vm19459_vm9, %v10141_v25  ;;  %v10142_v61 = vsel %vm19460_vm13, %v10126_v35, %v9881_v53 }
 0x7f8   : > { %10158 = vst.msk [vmem:[%s14628_s26 + $0x15] sm:$0x1] %vm19461_vm7, %v10142_v61 }
 0x7f9   : > { %v9883_v23 = vpop.permute.xlu1 %9882 }
 0x7fa   : > { %v10143_v17 = vsel %vm19462_vm8, %v10127_v27, %v9883_v23  ;;  %v9885_v32 = vpop.permute.xlu0 %9884 }
 0x7fb   : > { %10159 = vst.msk [vmem:[%s14628_s26 + $0x17] sm:$0x1] %vm19449_vm0, %v10143_v17  ;;  %v10144_v5 = vsel %vm19450_vm2, %v10128_v30, %v9885_v32 }
 0x7fc   : > { %10160 = vst.msk [vmem:[%s14628_s26 + $0x19] sm:$0x1] %vm19463_vm1, %v10144_v5 }
 0x7fd   : > { %v9887_v59 = vpop.permute.xlu1 %9886 }
 0x7fe   : > { %v10145_v36 = vsel %vm19464_vm10, %v10129_v63, %v9887_v59  ;;  %v9889_v58 = vpop.permute.xlu0 %9888 }
 0x7ff   : > { %10161 = vst.msk [vmem:[%s14628_s26 + $0x1b] sm:$0x1] %vm19465_vm11, %v10145_v36  ;;  %v10146_v51 = vsel %vm19466_vm12, %v10130_v19, %v9889_v58 }
 0x800   : > { %10162 = vst.msk [vmem:[%s14628_s26 + $0x1d] sm:$0x1] %vm19467_vm14, %v10146_v51 }
 0x801   : > { %v9891_v40 = vpop.permute.xlu1 %9890 }
 0x802   : > { %v10147_v37 = vsel %vm19468_vm15, %v10131_v60, %v9891_v40 }
 0x803   : > { %10163 = vst.msk [vmem:[%s14628_s26 + $0x1f] sm:$0x1] %vm19469_vm3, %v10147_v37 }
 0x804 PF: > { %s20_s11 = sadd.s32 1, %s11289_s11   ;;  %s19470_s30 = smov %s11285_s10 }
 0x805   : > { %p17_p2 = scmp.ge.s32.totalorder %s20_s11, 4   ;;  %s19471_s10 = smov %s19473_s13 }
 0x807   :  { %19 = sbr.rel (!%p17_p2) target bundleno = 2 (0x2), region = 97 }
 0x80e   :  { %10194 = vsyncpa [#allocation3], 1 }
 0x80f   :  { %10196 = vsyncpa [#allocation3 + $0x1], 1 }

</bundles_post_ra>
